<compile_context>
chip_gen: v7x
topology: tpu7x:2x2x1
jax: 0.10.0
libtpu: 0.0.40
codegen_flags: <defaults>
</compile_context>

<pallas_src>
import functools

import jax
import jax.numpy as jnp
from jax.experimental import pallas as pl
from jax.experimental.pallas import tpu as pltpu

LANE = 128          # lane width: channel padding multiple
SUB = 8             # sublane multiple for row padding
NEG_SLOPE = 0.01    # LeakyReLU default negative_slope
_POOL_PAD = -1e30   # finite "-inf" for max-pool padding


def _ceil_to(x, m):
    return ((x + m - 1) // m) * m


def _leaky_relu(x):
    return jnp.where(x > 0, x, x * NEG_SLOPE)


# ----------------------------------------------------------------------------
# Conv kernel: sum over taps of shifted-row-slab matmuls, fused epilogue.
# ----------------------------------------------------------------------------
def _make_conv_kernel(taps, mo, relu, has_res):
    def _body(x_ref, w_ref, b_ref, r_ref, o_ref):
        cout = o_ref.shape[-1]
        acc = jnp.zeros((mo, cout), jnp.float32)
        for t, (ph, off) in enumerate(taps):
            xs = x_ref[0, ph, pl.ds(off, mo), :]          # (mo, cin) bf16
            acc = acc + jnp.dot(xs, w_ref[t],
                                preferred_element_type=jnp.float32)
        acc = acc + b_ref[...]                            # (1, cout) f32 bcast
        if r_ref is not None:
            acc = acc + r_ref[0].astype(jnp.float32)      # fused residual add
        if relu:
            acc = _leaky_relu(acc)
        o_ref[0] = acc.astype(o_ref.dtype)

    if has_res:
        def kernel(x_ref, w_ref, b_ref, r_ref, o_ref):
            _body(x_ref, w_ref, b_ref, r_ref, o_ref)
    else:
        def kernel(x_ref, w_ref, b_ref, o_ref):
            _body(x_ref, w_ref, b_ref, None, o_ref)
    return kernel


def _to_out_flat(r, ws, mo_pad):
    """NHWC residual -> the conv output's flat (N, mo_pad, C) row layout."""
    n, ho, wo, c = r.shape
    r = jnp.pad(r, ((0, 0), (0, 0), (0, ws - wo), (0, 0)))
    r = r.reshape(n, ho * ws, c)
    return jnp.pad(r, ((0, 0), (0, mo_pad - ho * ws), (0, 0)))


def conv2d_pallas(x, w, b, *, stride, padding, relu, residual=None):
    """x: (N,H,W,Cin_p) bf16; w: (KH,KW,Cin_p,Cout_p) bf16; b: (Cout_p,) f32."""
    n, h, wdt, cin = x.shape
    kh, kw, _, cout = w.shape
    s, p = stride, padding
    ho = (h + 2 * p - kh) // s + 1
    wo = (wdt + 2 * p - kw) // s + 1

    # zero-pad spatially, round padded dims up to a multiple of the stride
    hp, wp = h + 2 * p, wdt + 2 * p
    hp2, wp2 = _ceil_to(hp, s), _ceil_to(wp, s)
    xp = jnp.pad(x, ((0, 0), (p, p + hp2 - hp), (p, p + wp2 - wp), (0, 0)))

    # stride^2 phase decomposition -> each tap becomes a stride-1 flat shift
    hs, ws = hp2 // s, wp2 // s
    phases = [xp[:, pp::s, qq::s, :] for pp in range(s) for qq in range(s)]
    xf = jnp.stack(phases, axis=1).reshape(n, s * s, hs * ws, cin)

    mo = ho * ws
    mo_pad = _ceil_to(mo, SUB)
    amax, bmax = (kh - 1) // s, (kw - 1) // s
    rows = _ceil_to(max(mo_pad + amax * ws + bmax, hs * ws), SUB)
    xf = jnp.pad(xf, ((0, 0), (0, 0), (0, rows - hs * ws), (0, 0)))

    taps = tuple(((ki % s) * s + (kj % s), (ki // s) * ws + (kj // s))
                 for ki in range(kh) for kj in range(kw))
    wf = w.reshape(kh * kw, cin, cout)
    bf = b.reshape(1, cout).astype(jnp.float32)

    in_arrays = [xf, wf, bf]
    in_specs = [
        pl.BlockSpec((1, s * s, rows, cin), lambda i: (i, 0, 0, 0)),
        pl.BlockSpec((kh * kw, cin, cout), lambda i: (0, 0, 0)),
        pl.BlockSpec((1, cout), lambda i: (0, 0)),
    ]
    has_res = residual is not None
    if has_res:
        assert residual.shape == (n, ho, wo, cout)
        in_arrays.append(_to_out_flat(residual, ws, mo_pad))
        in_specs.append(pl.BlockSpec((1, mo_pad, cout), lambda i: (i, 0, 0)))

    out_flat = pl.pallas_call(
        _make_conv_kernel(taps, mo_pad, relu, has_res),
        grid=(n,),
        in_specs=in_specs,
        out_specs=pl.BlockSpec((1, mo_pad, cout), lambda i: (i, 0, 0)),
        out_shape=jax.ShapeDtypeStruct((n, mo_pad, cout), x.dtype),
        compiler_params=pltpu.CompilerParams(
            dimension_semantics=("parallel",)),
    )(*in_arrays)

    return out_flat[:, :mo, :].reshape(n, ho, ws, cout)[:, :, :wo, :]


# ----------------------------------------------------------------------------
# Max-pool kernel (3x3, stride 2, pad 1): shifted-slab max, pure VPU.
# ----------------------------------------------------------------------------
def _make_pool_kernel(taps, mo):
    def kernel(x_ref, o_ref):
        c = o_ref.shape[-1]
        m = jnp.full((mo, c), _POOL_PAD, jnp.float32)
        for ph, off in taps:
            m = jnp.maximum(m, x_ref[0, ph, pl.ds(off, mo), :].astype(jnp.float32))
        o_ref[0] = m.astype(o_ref.dtype)
    return kernel


def maxpool2d_pallas(x, *, ksize=3, stride=2, padding=1):
    n, h, wdt, c = x.shape
    s, p, k = stride, padding, ksize
    ho = (h + 2 * p - k) // s + 1
    wo = (wdt + 2 * p - k) // s + 1
    hp, wp = h + 2 * p, wdt + 2 * p
    hp2, wp2 = _ceil_to(hp, s), _ceil_to(wp, s)
    xp = jnp.pad(x, ((0, 0), (p, p + hp2 - hp), (p, p + wp2 - wp), (0, 0)),
                 constant_values=_POOL_PAD)
    hs, ws = hp2 // s, wp2 // s
    phases = [xp[:, pp::s, qq::s, :] for pp in range(s) for qq in range(s)]
    xf = jnp.stack(phases, axis=1).reshape(n, s * s, hs * ws, c)
    mo = ho * ws
    mo_pad = _ceil_to(mo, SUB)
    amax = bmax = (k - 1) // s
    rows = _ceil_to(max(mo_pad + amax * ws + bmax, hs * ws), SUB)
    xf = jnp.pad(xf, ((0, 0), (0, 0), (0, rows - hs * ws), (0, 0)),
                 constant_values=_POOL_PAD)
    taps = tuple(((ki % s) * s + (kj % s), (ki // s) * ws + (kj // s))
                 for ki in range(k) for kj in range(k))
    out_flat = pl.pallas_call(
        _make_pool_kernel(taps, mo_pad),
        grid=(n,),
        in_specs=[pl.BlockSpec((1, s * s, rows, c), lambda i: (i, 0, 0, 0))],
        out_specs=pl.BlockSpec((1, mo_pad, c), lambda i: (i, 0, 0)),
        out_shape=jax.ShapeDtypeStruct((n, mo_pad, c), x.dtype),
        compiler_params=pltpu.CompilerParams(
            dimension_semantics=("parallel",)),
    )(xf)
    return out_flat[:, :mo, :].reshape(n, ho, ws, c)[:, :, :wo, :]


# ----------------------------------------------------------------------------
# Fused adaptive-avgpool(1,1) + Linear head; output padded to 128 lanes.
# ----------------------------------------------------------------------------
def _make_head_kernel(inv_hw):
    def kernel(x_ref, w_ref, b_ref, o_ref):
        s = jnp.sum(x_ref[...].astype(jnp.float32), axis=1)   # (N, Cpad)
        mean = s * inv_hw
        y = jnp.dot(mean, w_ref[...], preferred_element_type=jnp.float32)
        o_ref[...] = y + b_ref[...]
    return kernel


def avgpool_fc_pallas(x, w_fc, b_fc):
    """x: (N,H,W,Cpad) bf16; w_fc: (Cpad,Opad) f32; b_fc: (Opad,) f32."""
    n, h, wdt, c = x.shape
    opad = w_fc.shape[1]
    xf = x.reshape(n, h * wdt, c)
    return pl.pallas_call(
        _make_head_kernel(1.0 / float(h * wdt)),
        grid=(1,),
        in_specs=[
            pl.BlockSpec((n, h * wdt, c), lambda i: (0, 0, 0)),
            pl.BlockSpec((c, opad), lambda i: (0, 0)),
            pl.BlockSpec((1, opad), lambda i: (0, 0)),
        ],
        out_specs=pl.BlockSpec((n, opad), lambda i: (0, 0)),
        out_shape=jax.ShapeDtypeStruct((n, opad), jnp.float32),
        compiler_params=pltpu.CompilerParams(
            dimension_semantics=("arbitrary",)),
    )(xf, w_fc, b_fc.reshape(1, opad))


# ----------------------------------------------------------------------------
# Parameters + forward pass (ImageRegressor, defaults: no BN / no softmax).
# ----------------------------------------------------------------------------
def init_params(key, in_channels, num_classes, filters, blocks_per_layer=2):
    k = key

    def nxt():
        nonlocal k
        k, sub = jax.random.split(k)
        return sub

    def conv_param(cin, cout, ksize):
        w = jax.random.normal(nxt(), (ksize, ksize, cin, cout), jnp.float32)
        w = w * (1.0 / (ksize * (cin ** 0.5)))
        b = jax.random.normal(nxt(), (cout,), jnp.float32) * 0.01
        cin_p, cout_p = _ceil_to(cin, LANE), _ceil_to(cout, LANE)
        w = jnp.pad(w, ((0, 0), (0, 0), (0, cin_p - cin), (0, cout_p - cout)))
        b = jnp.pad(b, ((0, cout_p - cout),))
        return {"w": w.astype(jnp.bfloat16), "b": b}

    params = {"conv1": conv_param(in_channels, filters[0], 7)}
    in_planes = filters[0]
    layers = []
    for li, f in enumerate(filters):
        blocks = []
        for bi in range(blocks_per_layer):
            s = (2 if li > 0 else 1) if bi == 0 else 1
            blk = {"conv1": conv_param(in_planes, f, 3),
                   "conv2": conv_param(f, f, 3)}
            if s != 1 or in_planes != f:
                blk["down"] = conv_param(in_planes, f, 1)
            blocks.append(blk)
            in_planes = f
        layers.append(blocks)
    params["layers"] = layers

    c, cp = filters[-1], _ceil_to(filters[-1], LANE)
    op = _ceil_to(num_classes, LANE)
    wfc = jax.random.normal(nxt(), (c, num_classes), jnp.float32) * (1.0 / (c ** 0.5))
    bfc = jax.random.normal(nxt(), (num_classes,), jnp.float32) * 0.01
    params["fc"] = {"w": jnp.pad(wfc, ((0, cp - c), (0, op - num_classes))),
                    "b": jnp.pad(bfc, ((0, op - num_classes),))}
    return params


def forward(params, logits, image, *, num_classes):
    # use_probs=False -> logits passed through; use_image=True -> channel concat
    x = jnp.concatenate([logits, image], axis=1)           # NCHW
    x = jnp.transpose(x, (0, 2, 3, 1))                     # NHWC
    cin = x.shape[-1]
    x = jnp.pad(x, ((0, 0), (0, 0), (0, 0), (0, _ceil_to(cin, LANE) - cin)))
    x = x.astype(jnp.bfloat16)

    # stem: 7x7 s2 p3 conv + bias + LeakyReLU, then 3x3 s2 p1 max-pool
    x = conv2d_pallas(x, params["conv1"]["w"], params["conv1"]["b"],
                      stride=2, padding=3, relu=True)
    x = maxpool2d_pallas(x, ksize=3, stride=2, padding=1)

    # residual layers (BasicBlock x blocks_per_layer)
    for li, blocks in enumerate(params["layers"]):
        for bi, blk in enumerate(blocks):
            stride = 2 if (li > 0 and bi == 0) else 1
            residual = x
            y = conv2d_pallas(x, blk["conv1"]["w"], blk["conv1"]["b"],
                              stride=stride, padding=1, relu=True)
            if "down" in blk:
                residual = conv2d_pallas(x, blk["down"]["w"], blk["down"]["b"],
                                         stride=stride, padding=0, relu=False)
            # conv2 with fused bias + residual add + LeakyReLU epilogue
            x = conv2d_pallas(y, blk["conv2"]["w"], blk["conv2"]["b"],
                              stride=1, padding=1, relu=True, residual=residual)

    out = avgpool_fc_pallas(x, params["fc"]["w"], params["fc"]["b"])
    return out[:, :num_classes]


if __name__ == "__main__":
    key = jax.random.PRNGKey(0)
    k1, k2, k3 = jax.random.split(key, 3)

    N, C_LOGITS, C_IMG, H, W = 2, 4, 3, 16, 16
    FILTERS = [32, 64]
    NUM_CLASSES = 3

    logits = jax.random.normal(k1, (N, C_LOGITS, H, W), jnp.float32)
    image = jax.random.normal(k2, (N, C_IMG, H, W), jnp.float32)
    params = init_params(k3, C_LOGITS + C_IMG, NUM_CLASSES, FILTERS,
                         blocks_per_layer=2)

    fwd = jax.jit(functools.partial(forward, num_classes=NUM_CLASSES))
    out = jax.block_until_ready(fwd(params, logits, image))

    assert out.shape == (N, NUM_CLASSES), out.shape
    assert bool(jnp.all(jnp.isfinite(out)))
    print("KERNEL_OK")
</pallas_src>

<mosaic_0001>
module attributes {stable_mosaic.version = 11 : i64} {
  func.func @kernel(%arg0: i32, %arg1: memref<1x4x128x128xbf16, #tpu.memory_space<vmem>>, %arg2: memref<49x128x128xbf16, #tpu.memory_space<vmem>>, %arg3: memref<1x128xf32, #tpu.memory_space<vmem>>, %arg4: memref<1x88x128xbf16, #tpu.memory_space<vmem>>) attributes {dimension_semantics = [#tpu.dimension_semantics<parallel>], iteration_bounds = array<i64: 2>, scalar_prefetch = 0 : i64, scratch_operands = 0 : i64, tpu.core_type = #tpu.core_type<tc>, window_params = [{transform_indices = @transform_0, window_bounds = array<i64: 1, 4, 128, 128>}, {pipeline_mode = #tpu.pipeline_mode<synchronous>, transform_indices = @transform_1, window_bounds = array<i64: 49, 128, 128>}, {pipeline_mode = #tpu.pipeline_mode<synchronous>, transform_indices = @transform_2, window_bounds = array<i64: 1, 128>}, {transform_indices = @transform_3, window_bounds = array<i64: 1, 88, 128>}]} {
    %cst = arith.constant 0.000000e+00 : f32
    %0 = vector.broadcast %cst : f32 to vector<88x128xf32>
    %c0 = arith.constant 0 : index
    %c0_0 = arith.constant 0 : index
    %c0_1 = arith.constant 0 : index
    %c0_2 = arith.constant 0 : index
    %1 = vector.load %arg1[%c0, %c0_0, %c0_1, %c0_2] : memref<1x4x128x128xbf16, #tpu.memory_space<vmem>>, vector<1x1x88x128xbf16>
    %2 = vector.shape_cast %1 : vector<1x1x88x128xbf16> to vector<88x128xbf16>
    %c0_3 = arith.constant 0 : index
    %c0_4 = arith.constant 0 : index
    %c0_5 = arith.constant 0 : index
    %3 = vector.load %arg2[%c0_3, %c0_4, %c0_5] : memref<49x128x128xbf16, #tpu.memory_space<vmem>>, vector<1x128x128xbf16>
    %4 = vector.shape_cast %3 : vector<1x128x128xbf16> to vector<128x128xbf16>
    %cst_6 = arith.constant dense<0.000000e+00> : vector<88x128xf32>
    %5 = tpu.matmul %2, %4, %cst_6 {dimension_numbers = #tpu.dot_dimension_numbers<[1], [0], [0], [1], [0, 0, 1, 1], [], []>} : vector<88x128xbf16>, vector<128x128xbf16>, vector<88x128xf32> -> vector<88x128xf32>
    %6 = arith.addf %0, %5 : vector<88x128xf32>
    %c0_7 = arith.constant 0 : index
    %c1 = arith.constant 1 : index
    %c0_8 = arith.constant 0 : index
    %c0_9 = arith.constant 0 : index
    %7 = vector.load %arg1[%c0_7, %c1, %c0_8, %c0_9] : memref<1x4x128x128xbf16, #tpu.memory_space<vmem>>, vector<1x1x88x128xbf16>
    %8 = vector.shape_cast %7 : vector<1x1x88x128xbf16> to vector<88x128xbf16>
    %c1_10 = arith.constant 1 : index
    %c0_11 = arith.constant 0 : index
    %c0_12 = arith.constant 0 : index
    %9 = vector.load %arg2[%c1_10, %c0_11, %c0_12] : memref<49x128x128xbf16, #tpu.memory_space<vmem>>, vector<1x128x128xbf16>
    %10 = vector.shape_cast %9 : vector<1x128x128xbf16> to vector<128x128xbf16>
    %cst_13 = arith.constant dense<0.000000e+00> : vector<88x128xf32>
    %11 = tpu.matmul %8, %10, %cst_13 {dimension_numbers = #tpu.dot_dimension_numbers<[1], [0], [0], [1], [0, 0, 1, 1], [], []>} : vector<88x128xbf16>, vector<128x128xbf16>, vector<88x128xf32> -> vector<88x128xf32>
    %12 = arith.addf %6, %11 : vector<88x128xf32>
    %c0_14 = arith.constant 0 : index
    %c0_15 = arith.constant 0 : index
    %c1_16 = arith.constant 1 : index
    %c0_17 = arith.constant 0 : index
    %13 = vector.load %arg1[%c0_14, %c0_15, %c1_16, %c0_17] : memref<1x4x128x128xbf16, #tpu.memory_space<vmem>>, vector<1x1x88x128xbf16>
    %14 = vector.shape_cast %13 : vector<1x1x88x128xbf16> to vector<88x128xbf16>
    %c2 = arith.constant 2 : index
    %c0_18 = arith.constant 0 : index
    %c0_19 = arith.constant 0 : index
    %15 = vector.load %arg2[%c2, %c0_18, %c0_19] : memref<49x128x128xbf16, #tpu.memory_space<vmem>>, vector<1x128x128xbf16>
    %16 = vector.shape_cast %15 : vector<1x128x128xbf16> to vector<128x128xbf16>
    %cst_20 = arith.constant dense<0.000000e+00> : vector<88x128xf32>
    %17 = tpu.matmul %14, %16, %cst_20 {dimension_numbers = #tpu.dot_dimension_numbers<[1], [0], [0], [1], [0, 0, 1, 1], [], []>} : vector<88x128xbf16>, vector<128x128xbf16>, vector<88x128xf32> -> vector<88x128xf32>
    %18 = arith.addf %12, %17 : vector<88x128xf32>
    %c0_21 = arith.constant 0 : index
    %c1_22 = arith.constant 1 : index
    %c1_23 = arith.constant 1 : index
    %c0_24 = arith.constant 0 : index
    %19 = vector.load %arg1[%c0_21, %c1_22, %c1_23, %c0_24] : memref<1x4x128x128xbf16, #tpu.memory_space<vmem>>, vector<1x1x88x128xbf16>
    %20 = vector.shape_cast %19 : vector<1x1x88x128xbf16> to vector<88x128xbf16>
    %c3 = arith.constant 3 : index
    %c0_25 = arith.constant 0 : index
    %c0_26 = arith.constant 0 : index
    %21 = vector.load %arg2[%c3, %c0_25, %c0_26] : memref<49x128x128xbf16, #tpu.memory_space<vmem>>, vector<1x128x128xbf16>
    %22 = vector.shape_cast %21 : vector<1x128x128xbf16> to vector<128x128xbf16>
    %cst_27 = arith.constant dense<0.000000e+00> : vector<88x128xf32>
    %23 = tpu.matmul %20, %22, %cst_27 {dimension_numbers = #tpu.dot_dimension_numbers<[1], [0], [0], [1], [0, 0, 1, 1], [], []>} : vector<88x128xbf16>, vector<128x128xbf16>, vector<88x128xf32> -> vector<88x128xf32>
    %24 = arith.addf %18, %23 : vector<88x128xf32>
    %c0_28 = arith.constant 0 : index
    %c0_29 = arith.constant 0 : index
    %c2_30 = arith.constant 2 : index
    %c0_31 = arith.constant 0 : index
    %25 = vector.load %arg1[%c0_28, %c0_29, %c2_30, %c0_31] : memref<1x4x128x128xbf16, #tpu.memory_space<vmem>>, vector<1x1x88x128xbf16>
    %26 = vector.shape_cast %25 : vector<1x1x88x128xbf16> to vector<88x128xbf16>
    %c4 = arith.constant 4 : index
    %c0_32 = arith.constant 0 : index
    %c0_33 = arith.constant 0 : index
    %27 = vector.load %arg2[%c4, %c0_32, %c0_33] : memref<49x128x128xbf16, #tpu.memory_space<vmem>>, vector<1x128x128xbf16>
    %28 = vector.shape_cast %27 : vector<1x128x128xbf16> to vector<128x128xbf16>
    %cst_34 = arith.constant dense<0.000000e+00> : vector<88x128xf32>
    %29 = tpu.matmul %26, %28, %cst_34 {dimension_numbers = #tpu.dot_dimension_numbers<[1], [0], [0], [1], [0, 0, 1, 1], [], []>} : vector<88x128xbf16>, vector<128x128xbf16>, vector<88x128xf32> -> vector<88x128xf32>
    %30 = arith.addf %24, %29 : vector<88x128xf32>
    %c0_35 = arith.constant 0 : index
    %c1_36 = arith.constant 1 : index
    %c2_37 = arith.constant 2 : index
    %c0_38 = arith.constant 0 : index
    %31 = vector.load %arg1[%c0_35, %c1_36, %c2_37, %c0_38] : memref<1x4x128x128xbf16, #tpu.memory_space<vmem>>, vector<1x1x88x128xbf16>
    %32 = vector.shape_cast %31 : vector<1x1x88x128xbf16> to vector<88x128xbf16>
    %c5 = arith.constant 5 : index
    %c0_39 = arith.constant 0 : index
    %c0_40 = arith.constant 0 : index
    %33 = vector.load %arg2[%c5, %c0_39, %c0_40] : memref<49x128x128xbf16, #tpu.memory_space<vmem>>, vector<1x128x128xbf16>
    %34 = vector.shape_cast %33 : vector<1x128x128xbf16> to vector<128x128xbf16>
    %cst_41 = arith.constant dense<0.000000e+00> : vector<88x128xf32>
    %35 = tpu.matmul %32, %34, %cst_41 {dimension_numbers = #tpu.dot_dimension_numbers<[1], [0], [0], [1], [0, 0, 1, 1], [], []>} : vector<88x128xbf16>, vector<128x128xbf16>, vector<88x128xf32> -> vector<88x128xf32>
    %36 = arith.addf %30, %35 : vector<88x128xf32>
    %c0_42 = arith.constant 0 : index
    %c0_43 = arith.constant 0 : index
    %c3_44 = arith.constant 3 : index
    %c0_45 = arith.constant 0 : index
    %37 = vector.load %arg1[%c0_42, %c0_43, %c3_44, %c0_45] : memref<1x4x128x128xbf16, #tpu.memory_space<vmem>>, vector<1x1x88x128xbf16>
    %38 = vector.shape_cast %37 : vector<1x1x88x128xbf16> to vector<88x128xbf16>
    %c6 = arith.constant 6 : index
    %c0_46 = arith.constant 0 : index
    %c0_47 = arith.constant 0 : index
    %39 = vector.load %arg2[%c6, %c0_46, %c0_47] : memref<49x128x128xbf16, #tpu.memory_space<vmem>>, vector<1x128x128xbf16>
    %40 = vector.shape_cast %39 : vector<1x128x128xbf16> to vector<128x128xbf16>
    %cst_48 = arith.constant dense<0.000000e+00> : vector<88x128xf32>
    %41 = tpu.matmul %38, %40, %cst_48 {dimension_numbers = #tpu.dot_dimension_numbers<[1], [0], [0], [1], [0, 0, 1, 1], [], []>} : vector<88x128xbf16>, vector<128x128xbf16>, vector<88x128xf32> -> vector<88x128xf32>
    %42 = arith.addf %36, %41 : vector<88x128xf32>
    %c0_49 = arith.constant 0 : index
    %c2_50 = arith.constant 2 : index
    %c0_51 = arith.constant 0 : index
    %c0_52 = arith.constant 0 : index
    %43 = vector.load %arg1[%c0_49, %c2_50, %c0_51, %c0_52] : memref<1x4x128x128xbf16, #tpu.memory_space<vmem>>, vector<1x1x88x128xbf16>
    %44 = vector.shape_cast %43 : vector<1x1x88x128xbf16> to vector<88x128xbf16>
    %c7 = arith.constant 7 : index
    %c0_53 = arith.constant 0 : index
    %c0_54 = arith.constant 0 : index
    %45 = vector.load %arg2[%c7, %c0_53, %c0_54] : memref<49x128x128xbf16, #tpu.memory_space<vmem>>, vector<1x128x128xbf16>
    %46 = vector.shape_cast %45 : vector<1x128x128xbf16> to vector<128x128xbf16>
    %cst_55 = arith.constant dense<0.000000e+00> : vector<88x128xf32>
    %47 = tpu.matmul %44, %46, %cst_55 {dimension_numbers = #tpu.dot_dimension_numbers<[1], [0], [0], [1], [0, 0, 1, 1], [], []>} : vector<88x128xbf16>, vector<128x128xbf16>, vector<88x128xf32> -> vector<88x128xf32>
    %48 = arith.addf %42, %47 : vector<88x128xf32>
    %c0_56 = arith.constant 0 : index
    %c3_57 = arith.constant 3 : index
    %c0_58 = arith.constant 0 : index
    %c0_59 = arith.constant 0 : index
    %49 = vector.load %arg1[%c0_56, %c3_57, %c0_58, %c0_59] : memref<1x4x128x128xbf16, #tpu.memory_space<vmem>>, vector<1x1x88x128xbf16>
    %50 = vector.shape_cast %49 : vector<1x1x88x128xbf16> to vector<88x128xbf16>
    %c8 = arith.constant 8 : index
    %c0_60 = arith.constant 0 : index
    %c0_61 = arith.constant 0 : index
    %51 = vector.load %arg2[%c8, %c0_60, %c0_61] : memref<49x128x128xbf16, #tpu.memory_space<vmem>>, vector<1x128x128xbf16>
    %52 = vector.shape_cast %51 : vector<1x128x128xbf16> to vector<128x128xbf16>
    %cst_62 = arith.constant dense<0.000000e+00> : vector<88x128xf32>
    %53 = tpu.matmul %50, %52, %cst_62 {dimension_numbers = #tpu.dot_dimension_numbers<[1], [0], [0], [1], [0, 0, 1, 1], [], []>} : vector<88x128xbf16>, vector<128x128xbf16>, vector<88x128xf32> -> vector<88x128xf32>
    %54 = arith.addf %48, %53 : vector<88x128xf32>
    %c0_63 = arith.constant 0 : index
    %c2_64 = arith.constant 2 : index
    %c1_65 = arith.constant 1 : index
    %c0_66 = arith.constant 0 : index
    %55 = vector.load %arg1[%c0_63, %c2_64, %c1_65, %c0_66] : memref<1x4x128x128xbf16, #tpu.memory_space<vmem>>, vector<1x1x88x128xbf16>
    %56 = vector.shape_cast %55 : vector<1x1x88x128xbf16> to vector<88x128xbf16>
    %c9 = arith.constant 9 : index
    %c0_67 = arith.constant 0 : index
    %c0_68 = arith.constant 0 : index
    %57 = vector.load %arg2[%c9, %c0_67, %c0_68] : memref<49x128x128xbf16, #tpu.memory_space<vmem>>, vector<1x128x128xbf16>
    %58 = vector.shape_cast %57 : vector<1x128x128xbf16> to vector<128x128xbf16>
    %cst_69 = arith.constant dense<0.000000e+00> : vector<88x128xf32>
    %59 = tpu.matmul %56, %58, %cst_69 {dimension_numbers = #tpu.dot_dimension_numbers<[1], [0], [0], [1], [0, 0, 1, 1], [], []>} : vector<88x128xbf16>, vector<128x128xbf16>, vector<88x128xf32> -> vector<88x128xf32>
    %60 = arith.addf %54, %59 : vector<88x128xf32>
    %c0_70 = arith.constant 0 : index
    %c3_71 = arith.constant 3 : index
    %c1_72 = arith.constant 1 : index
    %c0_73 = arith.constant 0 : index
    %61 = vector.load %arg1[%c0_70, %c3_71, %c1_72, %c0_73] : memref<1x4x128x128xbf16, #tpu.memory_space<vmem>>, vector<1x1x88x128xbf16>
    %62 = vector.shape_cast %61 : vector<1x1x88x128xbf16> to vector<88x128xbf16>
    %c10 = arith.constant 10 : index
    %c0_74 = arith.constant 0 : index
    %c0_75 = arith.constant 0 : index
    %63 = vector.load %arg2[%c10, %c0_74, %c0_75] : memref<49x128x128xbf16, #tpu.memory_space<vmem>>, vector<1x128x128xbf16>
    %64 = vector.shape_cast %63 : vector<1x128x128xbf16> to vector<128x128xbf16>
    %cst_76 = arith.constant dense<0.000000e+00> : vector<88x128xf32>
    %65 = tpu.matmul %62, %64, %cst_76 {dimension_numbers = #tpu.dot_dimension_numbers<[1], [0], [0], [1], [0, 0, 1, 1], [], []>} : vector<88x128xbf16>, vector<128x128xbf16>, vector<88x128xf32> -> vector<88x128xf32>
    %66 = arith.addf %60, %65 : vector<88x128xf32>
    %c0_77 = arith.constant 0 : index
    %c2_78 = arith.constant 2 : index
    %c2_79 = arith.constant 2 : index
    %c0_80 = arith.constant 0 : index
    %67 = vector.load %arg1[%c0_77, %c2_78, %c2_79, %c0_80] : memref<1x4x128x128xbf16, #tpu.memory_space<vmem>>, vector<1x1x88x128xbf16>
    %68 = vector.shape_cast %67 : vector<1x1x88x128xbf16> to vector<88x128xbf16>
    %c11 = arith.constant 11 : index
    %c0_81 = arith.constant 0 : index
    %c0_82 = arith.constant 0 : index
    %69 = vector.load %arg2[%c11, %c0_81, %c0_82] : memref<49x128x128xbf16, #tpu.memory_space<vmem>>, vector<1x128x128xbf16>
    %70 = vector.shape_cast %69 : vector<1x128x128xbf16> to vector<128x128xbf16>
    %cst_83 = arith.constant dense<0.000000e+00> : vector<88x128xf32>
    %71 = tpu.matmul %68, %70, %cst_83 {dimension_numbers = #tpu.dot_dimension_numbers<[1], [0], [0], [1], [0, 0, 1, 1], [], []>} : vector<88x128xbf16>, vector<128x128xbf16>, vector<88x128xf32> -> vector<88x128xf32>
    %72 = arith.addf %66, %71 : vector<88x128xf32>
    %c0_84 = arith.constant 0 : index
    %c3_85 = arith.constant 3 : index
    %c2_86 = arith.constant 2 : index
    %c0_87 = arith.constant 0 : index
    %73 = vector.load %arg1[%c0_84, %c3_85, %c2_86, %c0_87] : memref<1x4x128x128xbf16, #tpu.memory_space<vmem>>, vector<1x1x88x128xbf16>
    %74 = vector.shape_cast %73 : vector<1x1x88x128xbf16> to vector<88x128xbf16>
    %c12 = arith.constant 12 : index
    %c0_88 = arith.constant 0 : index
    %c0_89 = arith.constant 0 : index
    %75 = vector.load %arg2[%c12, %c0_88, %c0_89] : memref<49x128x128xbf16, #tpu.memory_space<vmem>>, vector<1x128x128xbf16>
    %76 = vector.shape_cast %75 : vector<1x128x128xbf16> to vector<128x128xbf16>
    %cst_90 = arith.constant dense<0.000000e+00> : vector<88x128xf32>
    %77 = tpu.matmul %74, %76, %cst_90 {dimension_numbers = #tpu.dot_dimension_numbers<[1], [0], [0], [1], [0, 0, 1, 1], [], []>} : vector<88x128xbf16>, vector<128x128xbf16>, vector<88x128xf32> -> vector<88x128xf32>
    %78 = arith.addf %72, %77 : vector<88x128xf32>
    %c0_91 = arith.constant 0 : index
    %c2_92 = arith.constant 2 : index
    %c3_93 = arith.constant 3 : index
    %c0_94 = arith.constant 0 : index
    %79 = vector.load %arg1[%c0_91, %c2_92, %c3_93, %c0_94] : memref<1x4x128x128xbf16, #tpu.memory_space<vmem>>, vector<1x1x88x128xbf16>
    %80 = vector.shape_cast %79 : vector<1x1x88x128xbf16> to vector<88x128xbf16>
    %c13 = arith.constant 13 : index
    %c0_95 = arith.constant 0 : index
    %c0_96 = arith.constant 0 : index
    %81 = vector.load %arg2[%c13, %c0_95, %c0_96] : memref<49x128x128xbf16, #tpu.memory_space<vmem>>, vector<1x128x128xbf16>
    %82 = vector.shape_cast %81 : vector<1x128x128xbf16> to vector<128x128xbf16>
    %cst_97 = arith.constant dense<0.000000e+00> : vector<88x128xf32>
    %83 = tpu.matmul %80, %82, %cst_97 {dimension_numbers = #tpu.dot_dimension_numbers<[1], [0], [0], [1], [0, 0, 1, 1], [], []>} : vector<88x128xbf16>, vector<128x128xbf16>, vector<88x128xf32> -> vector<88x128xf32>
    %84 = arith.addf %78, %83 : vector<88x128xf32>
    %c0_98 = arith.constant 0 : index
    %c0_99 = arith.constant 0 : index
    %c11_100 = arith.constant 11 : index
    %c0_101 = arith.constant 0 : index
    %85 = vector.load %arg1[%c0_98, %c0_99, %c11_100, %c0_101] : memref<1x4x128x128xbf16, #tpu.memory_space<vmem>>, vector<1x1x88x128xbf16>
    %86 = vector.shape_cast %85 : vector<1x1x88x128xbf16> to vector<88x128xbf16>
    %c14 = arith.constant 14 : index
    %c0_102 = arith.constant 0 : index
    %c0_103 = arith.constant 0 : index
    %87 = vector.load %arg2[%c14, %c0_102, %c0_103] : memref<49x128x128xbf16, #tpu.memory_space<vmem>>, vector<1x128x128xbf16>
    %88 = vector.shape_cast %87 : vector<1x128x128xbf16> to vector<128x128xbf16>
    %cst_104 = arith.constant dense<0.000000e+00> : vector<88x128xf32>
    %89 = tpu.matmul %86, %88, %cst_104 {dimension_numbers = #tpu.dot_dimension_numbers<[1], [0], [0], [1], [0, 0, 1, 1], [], []>} : vector<88x128xbf16>, vector<128x128xbf16>, vector<88x128xf32> -> vector<88x128xf32>
    %90 = arith.addf %84, %89 : vector<88x128xf32>
    %c0_105 = arith.constant 0 : index
    %c1_106 = arith.constant 1 : index
    %c11_107 = arith.constant 11 : index
    %c0_108 = arith.constant 0 : index
    %91 = vector.load %arg1[%c0_105, %c1_106, %c11_107, %c0_108] : memref<1x4x128x128xbf16, #tpu.memory_space<vmem>>, vector<1x1x88x128xbf16>
    %92 = vector.shape_cast %91 : vector<1x1x88x128xbf16> to vector<88x128xbf16>
    %c15 = arith.constant 15 : index
    %c0_109 = arith.constant 0 : index
    %c0_110 = arith.constant 0 : index
    %93 = vector.load %arg2[%c15, %c0_109, %c0_110] : memref<49x128x128xbf16, #tpu.memory_space<vmem>>, vector<1x128x128xbf16>
    %94 = vector.shape_cast %93 : vector<1x128x128xbf16> to vector<128x128xbf16>
    %cst_111 = arith.constant dense<0.000000e+00> : vector<88x128xf32>
    %95 = tpu.matmul %92, %94, %cst_111 {dimension_numbers = #tpu.dot_dimension_numbers<[1], [0], [0], [1], [0, 0, 1, 1], [], []>} : vector<88x128xbf16>, vector<128x128xbf16>, vector<88x128xf32> -> vector<88x128xf32>
    %96 = arith.addf %90, %95 : vector<88x128xf32>
    %c0_112 = arith.constant 0 : index
    %c0_113 = arith.constant 0 : index
    %c12_114 = arith.constant 12 : index
    %c0_115 = arith.constant 0 : index
    %97 = vector.load %arg1[%c0_112, %c0_113, %c12_114, %c0_115] : memref<1x4x128x128xbf16, #tpu.memory_space<vmem>>, vector<1x1x88x128xbf16>
    %98 = vector.shape_cast %97 : vector<1x1x88x128xbf16> to vector<88x128xbf16>
    %c16 = arith.constant 16 : index
    %c0_116 = arith.constant 0 : index
    %c0_117 = arith.constant 0 : index
    %99 = vector.load %arg2[%c16, %c0_116, %c0_117] : memref<49x128x128xbf16, #tpu.memory_space<vmem>>, vector<1x128x128xbf16>
    %100 = vector.shape_cast %99 : vector<1x128x128xbf16> to vector<128x128xbf16>
    %cst_118 = arith.constant dense<0.000000e+00> : vector<88x128xf32>
    %101 = tpu.matmul %98, %100, %cst_118 {dimension_numbers = #tpu.dot_dimension_numbers<[1], [0], [0], [1], [0, 0, 1, 1], [], []>} : vector<88x128xbf16>, vector<128x128xbf16>, vector<88x128xf32> -> vector<88x128xf32>
    %102 = arith.addf %96, %101 : vector<88x128xf32>
    %c0_119 = arith.constant 0 : index
    %c1_120 = arith.constant 1 : index
    %c12_121 = arith.constant 12 : index
    %c0_122 = arith.constant 0 : index
    %103 = vector.load %arg1[%c0_119, %c1_120, %c12_121, %c0_122] : memref<1x4x128x128xbf16, #tpu.memory_space<vmem>>, vector<1x1x88x128xbf16>
    %104 = vector.shape_cast %103 : vector<1x1x88x128xbf16> to vector<88x128xbf16>
    %c17 = arith.constant 17 : index
    %c0_123 = arith.constant 0 : index
    %c0_124 = arith.constant 0 : index
    %105 = vector.load %arg2[%c17, %c0_123, %c0_124] : memref<49x128x128xbf16, #tpu.memory_space<vmem>>, vector<1x128x128xbf16>
    %106 = vector.shape_cast %105 : vector<1x128x128xbf16> to vector<128x128xbf16>
    %cst_125 = arith.constant dense<0.000000e+00> : vector<88x128xf32>
    %107 = tpu.matmul %104, %106, %cst_125 {dimension_numbers = #tpu.dot_dimension_numbers<[1], [0], [0], [1], [0, 0, 1, 1], [], []>} : vector<88x128xbf16>, vector<128x128xbf16>, vector<88x128xf32> -> vector<88x128xf32>
    %108 = arith.addf %102, %107 : vector<88x128xf32>
    %c0_126 = arith.constant 0 : index
    %c0_127 = arith.constant 0 : index
    %c13_128 = arith.constant 13 : index
    %c0_129 = arith.constant 0 : index
    %109 = vector.load %arg1[%c0_126, %c0_127, %c13_128, %c0_129] : memref<1x4x128x128xbf16, #tpu.memory_space<vmem>>, vector<1x1x88x128xbf16>
    %110 = vector.shape_cast %109 : vector<1x1x88x128xbf16> to vector<88x128xbf16>
    %c18 = arith.constant 18 : index
    %c0_130 = arith.constant 0 : index
    %c0_131 = arith.constant 0 : index
    %111 = vector.load %arg2[%c18, %c0_130, %c0_131] : memref<49x128x128xbf16, #tpu.memory_space<vmem>>, vector<1x128x128xbf16>
    %112 = vector.shape_cast %111 : vector<1x128x128xbf16> to vector<128x128xbf16>
    %cst_132 = arith.constant dense<0.000000e+00> : vector<88x128xf32>
    %113 = tpu.matmul %110, %112, %cst_132 {dimension_numbers = #tpu.dot_dimension_numbers<[1], [0], [0], [1], [0, 0, 1, 1], [], []>} : vector<88x128xbf16>, vector<128x128xbf16>, vector<88x128xf32> -> vector<88x128xf32>
    %114 = arith.addf %108, %113 : vector<88x128xf32>
    %c0_133 = arith.constant 0 : index
    %c1_134 = arith.constant 1 : index
    %c13_135 = arith.constant 13 : index
    %c0_136 = arith.constant 0 : index
    %115 = vector.load %arg1[%c0_133, %c1_134, %c13_135, %c0_136] : memref<1x4x128x128xbf16, #tpu.memory_space<vmem>>, vector<1x1x88x128xbf16>
    %116 = vector.shape_cast %115 : vector<1x1x88x128xbf16> to vector<88x128xbf16>
    %c19 = arith.constant 19 : index
    %c0_137 = arith.constant 0 : index
    %c0_138 = arith.constant 0 : index
    %117 = vector.load %arg2[%c19, %c0_137, %c0_138] : memref<49x128x128xbf16, #tpu.memory_space<vmem>>, vector<1x128x128xbf16>
    %118 = vector.shape_cast %117 : vector<1x128x128xbf16> to vector<128x128xbf16>
    %cst_139 = arith.constant dense<0.000000e+00> : vector<88x128xf32>
    %119 = tpu.matmul %116, %118, %cst_139 {dimension_numbers = #tpu.dot_dimension_numbers<[1], [0], [0], [1], [0, 0, 1, 1], [], []>} : vector<88x128xbf16>, vector<128x128xbf16>, vector<88x128xf32> -> vector<88x128xf32>
    %120 = arith.addf %114, %119 : vector<88x128xf32>
    %c0_140 = arith.constant 0 : index
    %c0_141 = arith.constant 0 : index
    %c14_142 = arith.constant 14 : index
    %c0_143 = arith.constant 0 : index
    %121 = vector.load %arg1[%c0_140, %c0_141, %c14_142, %c0_143] : memref<1x4x128x128xbf16, #tpu.memory_space<vmem>>, vector<1x1x88x128xbf16>
    %122 = vector.shape_cast %121 : vector<1x1x88x128xbf16> to vector<88x128xbf16>
    %c20 = arith.constant 20 : index
    %c0_144 = arith.constant 0 : index
    %c0_145 = arith.constant 0 : index
    %123 = vector.load %arg2[%c20, %c0_144, %c0_145] : memref<49x128x128xbf16, #tpu.memory_space<vmem>>, vector<1x128x128xbf16>
    %124 = vector.shape_cast %123 : vector<1x128x128xbf16> to vector<128x128xbf16>
    %cst_146 = arith.constant dense<0.000000e+00> : vector<88x128xf32>
    %125 = tpu.matmul %122, %124, %cst_146 {dimension_numbers = #tpu.dot_dimension_numbers<[1], [0], [0], [1], [0, 0, 1, 1], [], []>} : vector<88x128xbf16>, vector<128x128xbf16>, vector<88x128xf32> -> vector<88x128xf32>
    %126 = arith.addf %120, %125 : vector<88x128xf32>
    %c0_147 = arith.constant 0 : index
    %c2_148 = arith.constant 2 : index
    %c11_149 = arith.constant 11 : index
    %c0_150 = arith.constant 0 : index
    %127 = vector.load %arg1[%c0_147, %c2_148, %c11_149, %c0_150] : memref<1x4x128x128xbf16, #tpu.memory_space<vmem>>, vector<1x1x88x128xbf16>
    %128 = vector.shape_cast %127 : vector<1x1x88x128xbf16> to vector<88x128xbf16>
    %c21 = arith.constant 21 : index
    %c0_151 = arith.constant 0 : index
    %c0_152 = arith.constant 0 : index
    %129 = vector.load %arg2[%c21, %c0_151, %c0_152] : memref<49x128x128xbf16, #tpu.memory_space<vmem>>, vector<1x128x128xbf16>
    %130 = vector.shape_cast %129 : vector<1x128x128xbf16> to vector<128x128xbf16>
    %cst_153 = arith.constant dense<0.000000e+00> : vector<88x128xf32>
    %131 = tpu.matmul %128, %130, %cst_153 {dimension_numbers = #tpu.dot_dimension_numbers<[1], [0], [0], [1], [0, 0, 1, 1], [], []>} : vector<88x128xbf16>, vector<128x128xbf16>, vector<88x128xf32> -> vector<88x128xf32>
    %132 = arith.addf %126, %131 : vector<88x128xf32>
    %c0_154 = arith.constant 0 : index
    %c3_155 = arith.constant 3 : index
    %c11_156 = arith.constant 11 : index
    %c0_157 = arith.constant 0 : index
    %133 = vector.load %arg1[%c0_154, %c3_155, %c11_156, %c0_157] : memref<1x4x128x128xbf16, #tpu.memory_space<vmem>>, vector<1x1x88x128xbf16>
    %134 = vector.shape_cast %133 : vector<1x1x88x128xbf16> to vector<88x128xbf16>
    %c22 = arith.constant 22 : index
    %c0_158 = arith.constant 0 : index
    %c0_159 = arith.constant 0 : index
    %135 = vector.load %arg2[%c22, %c0_158, %c0_159] : memref<49x128x128xbf16, #tpu.memory_space<vmem>>, vector<1x128x128xbf16>
    %136 = vector.shape_cast %135 : vector<1x128x128xbf16> to vector<128x128xbf16>
    %cst_160 = arith.constant dense<0.000000e+00> : vector<88x128xf32>
    %137 = tpu.matmul %134, %136, %cst_160 {dimension_numbers = #tpu.dot_dimension_numbers<[1], [0], [0], [1], [0, 0, 1, 1], [], []>} : vector<88x128xbf16>, vector<128x128xbf16>, vector<88x128xf32> -> vector<88x128xf32>
    %138 = arith.addf %132, %137 : vector<88x128xf32>
    %c0_161 = arith.constant 0 : index
    %c2_162 = arith.constant 2 : index
    %c12_163 = arith.constant 12 : index
    %c0_164 = arith.constant 0 : index
    %139 = vector.load %arg1[%c0_161, %c2_162, %c12_163, %c0_164] : memref<1x4x128x128xbf16, #tpu.memory_space<vmem>>, vector<1x1x88x128xbf16>
    %140 = vector.shape_cast %139 : vector<1x1x88x128xbf16> to vector<88x128xbf16>
    %c23 = arith.constant 23 : index
    %c0_165 = arith.constant 0 : index
    %c0_166 = arith.constant 0 : index
    %141 = vector.load %arg2[%c23, %c0_165, %c0_166] : memref<49x128x128xbf16, #tpu.memory_space<vmem>>, vector<1x128x128xbf16>
    %142 = vector.shape_cast %141 : vector<1x128x128xbf16> to vector<128x128xbf16>
    %cst_167 = arith.constant dense<0.000000e+00> : vector<88x128xf32>
    %143 = tpu.matmul %140, %142, %cst_167 {dimension_numbers = #tpu.dot_dimension_numbers<[1], [0], [0], [1], [0, 0, 1, 1], [], []>} : vector<88x128xbf16>, vector<128x128xbf16>, vector<88x128xf32> -> vector<88x128xf32>
    %144 = arith.addf %138, %143 : vector<88x128xf32>
    %c0_168 = arith.constant 0 : index
    %c3_169 = arith.constant 3 : index
    %c12_170 = arith.constant 12 : index
    %c0_171 = arith.constant 0 : index
    %145 = vector.load %arg1[%c0_168, %c3_169, %c12_170, %c0_171] : memref<1x4x128x128xbf16, #tpu.memory_space<vmem>>, vector<1x1x88x128xbf16>
    %146 = vector.shape_cast %145 : vector<1x1x88x128xbf16> to vector<88x128xbf16>
    %c24 = arith.constant 24 : index
    %c0_172 = arith.constant 0 : index
    %c0_173 = arith.constant 0 : index
    %147 = vector.load %arg2[%c24, %c0_172, %c0_173] : memref<49x128x128xbf16, #tpu.memory_space<vmem>>, vector<1x128x128xbf16>
    %148 = vector.shape_cast %147 : vector<1x128x128xbf16> to vector<128x128xbf16>
    %cst_174 = arith.constant dense<0.000000e+00> : vector<88x128xf32>
    %149 = tpu.matmul %146, %148, %cst_174 {dimension_numbers = #tpu.dot_dimension_numbers<[1], [0], [0], [1], [0, 0, 1, 1], [], []>} : vector<88x128xbf16>, vector<128x128xbf16>, vector<88x128xf32> -> vector<88x128xf32>
    %150 = arith.addf %144, %149 : vector<88x128xf32>
    %c0_175 = arith.constant 0 : index
    %c2_176 = arith.constant 2 : index
    %c13_177 = arith.constant 13 : index
    %c0_178 = arith.constant 0 : index
    %151 = vector.load %arg1[%c0_175, %c2_176, %c13_177, %c0_178] : memref<1x4x128x128xbf16, #tpu.memory_space<vmem>>, vector<1x1x88x128xbf16>
    %152 = vector.shape_cast %151 : vector<1x1x88x128xbf16> to vector<88x128xbf16>
    %c25 = arith.constant 25 : index
    %c0_179 = arith.constant 0 : index
    %c0_180 = arith.constant 0 : index
    %153 = vector.load %arg2[%c25, %c0_179, %c0_180] : memref<49x128x128xbf16, #tpu.memory_space<vmem>>, vector<1x128x128xbf16>
    %154 = vector.shape_cast %153 : vector<1x128x128xbf16> to vector<128x128xbf16>
    %cst_181 = arith.constant dense<0.000000e+00> : vector<88x128xf32>
    %155 = tpu.matmul %152, %154, %cst_181 {dimension_numbers = #tpu.dot_dimension_numbers<[1], [0], [0], [1], [0, 0, 1, 1], [], []>} : vector<88x128xbf16>, vector<128x128xbf16>, vector<88x128xf32> -> vector<88x128xf32>
    %156 = arith.addf %150, %155 : vector<88x128xf32>
    %c0_182 = arith.constant 0 : index
    %c3_183 = arith.constant 3 : index
    %c13_184 = arith.constant 13 : index
    %c0_185 = arith.constant 0 : index
    %157 = vector.load %arg1[%c0_182, %c3_183, %c13_184, %c0_185] : memref<1x4x128x128xbf16, #tpu.memory_space<vmem>>, vector<1x1x88x128xbf16>
    %158 = vector.shape_cast %157 : vector<1x1x88x128xbf16> to vector<88x128xbf16>
    %c26 = arith.constant 26 : index
    %c0_186 = arith.constant 0 : index
    %c0_187 = arith.constant 0 : index
    %159 = vector.load %arg2[%c26, %c0_186, %c0_187] : memref<49x128x128xbf16, #tpu.memory_space<vmem>>, vector<1x128x128xbf16>
    %160 = vector.shape_cast %159 : vector<1x128x128xbf16> to vector<128x128xbf16>
    %cst_188 = arith.constant dense<0.000000e+00> : vector<88x128xf32>
    %161 = tpu.matmul %158, %160, %cst_188 {dimension_numbers = #tpu.dot_dimension_numbers<[1], [0], [0], [1], [0, 0, 1, 1], [], []>} : vector<88x128xbf16>, vector<128x128xbf16>, vector<88x128xf32> -> vector<88x128xf32>
    %162 = arith.addf %156, %161 : vector<88x128xf32>
    %c0_189 = arith.constant 0 : index
    %c2_190 = arith.constant 2 : index
    %c14_191 = arith.constant 14 : index
    %c0_192 = arith.constant 0 : index
    %163 = vector.load %arg1[%c0_189, %c2_190, %c14_191, %c0_192] : memref<1x4x128x128xbf16, #tpu.memory_space<vmem>>, vector<1x1x88x128xbf16>
    %164 = vector.shape_cast %163 : vector<1x1x88x128xbf16> to vector<88x128xbf16>
    %c27 = arith.constant 27 : index
    %c0_193 = arith.constant 0 : index
    %c0_194 = arith.constant 0 : index
    %165 = vector.load %arg2[%c27, %c0_193, %c0_194] : memref<49x128x128xbf16, #tpu.memory_space<vmem>>, vector<1x128x128xbf16>
    %166 = vector.shape_cast %165 : vector<1x128x128xbf16> to vector<128x128xbf16>
    %cst_195 = arith.constant dense<0.000000e+00> : vector<88x128xf32>
    %167 = tpu.matmul %164, %166, %cst_195 {dimension_numbers = #tpu.dot_dimension_numbers<[1], [0], [0], [1], [0, 0, 1, 1], [], []>} : vector<88x128xbf16>, vector<128x128xbf16>, vector<88x128xf32> -> vector<88x128xf32>
    %168 = arith.addf %162, %167 : vector<88x128xf32>
    %c0_196 = arith.constant 0 : index
    %c0_197 = arith.constant 0 : index
    %c22_198 = arith.constant 22 : index
    %c0_199 = arith.constant 0 : index
    %169 = vector.load %arg1[%c0_196, %c0_197, %c22_198, %c0_199] : memref<1x4x128x128xbf16, #tpu.memory_space<vmem>>, vector<1x1x88x128xbf16>
    %170 = vector.shape_cast %169 : vector<1x1x88x128xbf16> to vector<88x128xbf16>
    %c28 = arith.constant 28 : index
    %c0_200 = arith.constant 0 : index
    %c0_201 = arith.constant 0 : index
    %171 = vector.load %arg2[%c28, %c0_200, %c0_201] : memref<49x128x128xbf16, #tpu.memory_space<vmem>>, vector<1x128x128xbf16>
    %172 = vector.shape_cast %171 : vector<1x128x128xbf16> to vector<128x128xbf16>
    %cst_202 = arith.constant dense<0.000000e+00> : vector<88x128xf32>
    %173 = tpu.matmul %170, %172, %cst_202 {dimension_numbers = #tpu.dot_dimension_numbers<[1], [0], [0], [1], [0, 0, 1, 1], [], []>} : vector<88x128xbf16>, vector<128x128xbf16>, vector<88x128xf32> -> vector<88x128xf32>
    %174 = arith.addf %168, %173 : vector<88x128xf32>
    %c0_203 = arith.constant 0 : index
    %c1_204 = arith.constant 1 : index
    %c22_205 = arith.constant 22 : index
    %c0_206 = arith.constant 0 : index
    %175 = vector.load %arg1[%c0_203, %c1_204, %c22_205, %c0_206] : memref<1x4x128x128xbf16, #tpu.memory_space<vmem>>, vector<1x1x88x128xbf16>
    %176 = vector.shape_cast %175 : vector<1x1x88x128xbf16> to vector<88x128xbf16>
    %c29 = arith.constant 29 : index
    %c0_207 = arith.constant 0 : index
    %c0_208 = arith.constant 0 : index
    %177 = vector.load %arg2[%c29, %c0_207, %c0_208] : memref<49x128x128xbf16, #tpu.memory_space<vmem>>, vector<1x128x128xbf16>
    %178 = vector.shape_cast %177 : vector<1x128x128xbf16> to vector<128x128xbf16>
    %cst_209 = arith.constant dense<0.000000e+00> : vector<88x128xf32>
    %179 = tpu.matmul %176, %178, %cst_209 {dimension_numbers = #tpu.dot_dimension_numbers<[1], [0], [0], [1], [0, 0, 1, 1], [], []>} : vector<88x128xbf16>, vector<128x128xbf16>, vector<88x128xf32> -> vector<88x128xf32>
    %180 = arith.addf %174, %179 : vector<88x128xf32>
    %c0_210 = arith.constant 0 : index
    %c0_211 = arith.constant 0 : index
    %c23_212 = arith.constant 23 : index
    %c0_213 = arith.constant 0 : index
    %181 = vector.load %arg1[%c0_210, %c0_211, %c23_212, %c0_213] : memref<1x4x128x128xbf16, #tpu.memory_space<vmem>>, vector<1x1x88x128xbf16>
    %182 = vector.shape_cast %181 : vector<1x1x88x128xbf16> to vector<88x128xbf16>
    %c30 = arith.constant 30 : index
    %c0_214 = arith.constant 0 : index
    %c0_215 = arith.constant 0 : index
    %183 = vector.load %arg2[%c30, %c0_214, %c0_215] : memref<49x128x128xbf16, #tpu.memory_space<vmem>>, vector<1x128x128xbf16>
    %184 = vector.shape_cast %183 : vector<1x128x128xbf16> to vector<128x128xbf16>
    %cst_216 = arith.constant dense<0.000000e+00> : vector<88x128xf32>
    %185 = tpu.matmul %182, %184, %cst_216 {dimension_numbers = #tpu.dot_dimension_numbers<[1], [0], [0], [1], [0, 0, 1, 1], [], []>} : vector<88x128xbf16>, vector<128x128xbf16>, vector<88x128xf32> -> vector<88x128xf32>
    %186 = arith.addf %180, %185 : vector<88x128xf32>
    %c0_217 = arith.constant 0 : index
    %c1_218 = arith.constant 1 : index
    %c23_219 = arith.constant 23 : index
    %c0_220 = arith.constant 0 : index
    %187 = vector.load %arg1[%c0_217, %c1_218, %c23_219, %c0_220] : memref<1x4x128x128xbf16, #tpu.memory_space<vmem>>, vector<1x1x88x128xbf16>
    %188 = vector.shape_cast %187 : vector<1x1x88x128xbf16> to vector<88x128xbf16>
    %c31 = arith.constant 31 : index
    %c0_221 = arith.constant 0 : index
    %c0_222 = arith.constant 0 : index
    %189 = vector.load %arg2[%c31, %c0_221, %c0_222] : memref<49x128x128xbf16, #tpu.memory_space<vmem>>, vector<1x128x128xbf16>
    %190 = vector.shape_cast %189 : vector<1x128x128xbf16> to vector<128x128xbf16>
    %cst_223 = arith.constant dense<0.000000e+00> : vector<88x128xf32>
    %191 = tpu.matmul %188, %190, %cst_223 {dimension_numbers = #tpu.dot_dimension_numbers<[1], [0], [0], [1], [0, 0, 1, 1], [], []>} : vector<88x128xbf16>, vector<128x128xbf16>, vector<88x128xf32> -> vector<88x128xf32>
    %192 = arith.addf %186, %191 : vector<88x128xf32>
    %c0_224 = arith.constant 0 : index
    %c0_225 = arith.constant 0 : index
    %c24_226 = arith.constant 24 : index
    %c0_227 = arith.constant 0 : index
    %193 = vector.load %arg1[%c0_224, %c0_225, %c24_226, %c0_227] : memref<1x4x128x128xbf16, #tpu.memory_space<vmem>>, vector<1x1x88x128xbf16>
    %194 = vector.shape_cast %193 : vector<1x1x88x128xbf16> to vector<88x128xbf16>
    %c32 = arith.constant 32 : index
    %c0_228 = arith.constant 0 : index
    %c0_229 = arith.constant 0 : index
    %195 = vector.load %arg2[%c32, %c0_228, %c0_229] : memref<49x128x128xbf16, #tpu.memory_space<vmem>>, vector<1x128x128xbf16>
    %196 = vector.shape_cast %195 : vector<1x128x128xbf16> to vector<128x128xbf16>
    %cst_230 = arith.constant dense<0.000000e+00> : vector<88x128xf32>
    %197 = tpu.matmul %194, %196, %cst_230 {dimension_numbers = #tpu.dot_dimension_numbers<[1], [0], [0], [1], [0, 0, 1, 1], [], []>} : vector<88x128xbf16>, vector<128x128xbf16>, vector<88x128xf32> -> vector<88x128xf32>
    %198 = arith.addf %192, %197 : vector<88x128xf32>
    %c0_231 = arith.constant 0 : index
    %c1_232 = arith.constant 1 : index
    %c24_233 = arith.constant 24 : index
    %c0_234 = arith.constant 0 : index
    %199 = vector.load %arg1[%c0_231, %c1_232, %c24_233, %c0_234] : memref<1x4x128x128xbf16, #tpu.memory_space<vmem>>, vector<1x1x88x128xbf16>
    %200 = vector.shape_cast %199 : vector<1x1x88x128xbf16> to vector<88x128xbf16>
    %c33 = arith.constant 33 : index
    %c0_235 = arith.constant 0 : index
    %c0_236 = arith.constant 0 : index
    %201 = vector.load %arg2[%c33, %c0_235, %c0_236] : memref<49x128x128xbf16, #tpu.memory_space<vmem>>, vector<1x128x128xbf16>
    %202 = vector.shape_cast %201 : vector<1x128x128xbf16> to vector<128x128xbf16>
    %cst_237 = arith.constant dense<0.000000e+00> : vector<88x128xf32>
    %203 = tpu.matmul %200, %202, %cst_237 {dimension_numbers = #tpu.dot_dimension_numbers<[1], [0], [0], [1], [0, 0, 1, 1], [], []>} : vector<88x128xbf16>, vector<128x128xbf16>, vector<88x128xf32> -> vector<88x128xf32>
    %204 = arith.addf %198, %203 : vector<88x128xf32>
    %c0_238 = arith.constant 0 : index
    %c0_239 = arith.constant 0 : index
    %c25_240 = arith.constant 25 : index
    %c0_241 = arith.constant 0 : index
    %205 = vector.load %arg1[%c0_238, %c0_239, %c25_240, %c0_241] : memref<1x4x128x128xbf16, #tpu.memory_space<vmem>>, vector<1x1x88x128xbf16>
    %206 = vector.shape_cast %205 : vector<1x1x88x128xbf16> to vector<88x128xbf16>
    %c34 = arith.constant 34 : index
    %c0_242 = arith.constant 0 : index
    %c0_243 = arith.constant 0 : index
    %207 = vector.load %arg2[%c34, %c0_242, %c0_243] : memref<49x128x128xbf16, #tpu.memory_space<vmem>>, vector<1x128x128xbf16>
    %208 = vector.shape_cast %207 : vector<1x128x128xbf16> to vector<128x128xbf16>
    %cst_244 = arith.constant dense<0.000000e+00> : vector<88x128xf32>
    %209 = tpu.matmul %206, %208, %cst_244 {dimension_numbers = #tpu.dot_dimension_numbers<[1], [0], [0], [1], [0, 0, 1, 1], [], []>} : vector<88x128xbf16>, vector<128x128xbf16>, vector<88x128xf32> -> vector<88x128xf32>
    %210 = arith.addf %204, %209 : vector<88x128xf32>
    %c0_245 = arith.constant 0 : index
    %c2_246 = arith.constant 2 : index
    %c22_247 = arith.constant 22 : index
    %c0_248 = arith.constant 0 : index
    %211 = vector.load %arg1[%c0_245, %c2_246, %c22_247, %c0_248] : memref<1x4x128x128xbf16, #tpu.memory_space<vmem>>, vector<1x1x88x128xbf16>
    %212 = vector.shape_cast %211 : vector<1x1x88x128xbf16> to vector<88x128xbf16>
    %c35 = arith.constant 35 : index
    %c0_249 = arith.constant 0 : index
    %c0_250 = arith.constant 0 : index
    %213 = vector.load %arg2[%c35, %c0_249, %c0_250] : memref<49x128x128xbf16, #tpu.memory_space<vmem>>, vector<1x128x128xbf16>
    %214 = vector.shape_cast %213 : vector<1x128x128xbf16> to vector<128x128xbf16>
    %cst_251 = arith.constant dense<0.000000e+00> : vector<88x128xf32>
    %215 = tpu.matmul %212, %214, %cst_251 {dimension_numbers = #tpu.dot_dimension_numbers<[1], [0], [0], [1], [0, 0, 1, 1], [], []>} : vector<88x128xbf16>, vector<128x128xbf16>, vector<88x128xf32> -> vector<88x128xf32>
    %216 = arith.addf %210, %215 : vector<88x128xf32>
    %c0_252 = arith.constant 0 : index
    %c3_253 = arith.constant 3 : index
    %c22_254 = arith.constant 22 : index
    %c0_255 = arith.constant 0 : index
    %217 = vector.load %arg1[%c0_252, %c3_253, %c22_254, %c0_255] : memref<1x4x128x128xbf16, #tpu.memory_space<vmem>>, vector<1x1x88x128xbf16>
    %218 = vector.shape_cast %217 : vector<1x1x88x128xbf16> to vector<88x128xbf16>
    %c36 = arith.constant 36 : index
    %c0_256 = arith.constant 0 : index
    %c0_257 = arith.constant 0 : index
    %219 = vector.load %arg2[%c36, %c0_256, %c0_257] : memref<49x128x128xbf16, #tpu.memory_space<vmem>>, vector<1x128x128xbf16>
    %220 = vector.shape_cast %219 : vector<1x128x128xbf16> to vector<128x128xbf16>
    %cst_258 = arith.constant dense<0.000000e+00> : vector<88x128xf32>
    %221 = tpu.matmul %218, %220, %cst_258 {dimension_numbers = #tpu.dot_dimension_numbers<[1], [0], [0], [1], [0, 0, 1, 1], [], []>} : vector<88x128xbf16>, vector<128x128xbf16>, vector<88x128xf32> -> vector<88x128xf32>
    %222 = arith.addf %216, %221 : vector<88x128xf32>
    %c0_259 = arith.constant 0 : index
    %c2_260 = arith.constant 2 : index
    %c23_261 = arith.constant 23 : index
    %c0_262 = arith.constant 0 : index
    %223 = vector.load %arg1[%c0_259, %c2_260, %c23_261, %c0_262] : memref<1x4x128x128xbf16, #tpu.memory_space<vmem>>, vector<1x1x88x128xbf16>
    %224 = vector.shape_cast %223 : vector<1x1x88x128xbf16> to vector<88x128xbf16>
    %c37 = arith.constant 37 : index
    %c0_263 = arith.constant 0 : index
    %c0_264 = arith.constant 0 : index
    %225 = vector.load %arg2[%c37, %c0_263, %c0_264] : memref<49x128x128xbf16, #tpu.memory_space<vmem>>, vector<1x128x128xbf16>
    %226 = vector.shape_cast %225 : vector<1x128x128xbf16> to vector<128x128xbf16>
    %cst_265 = arith.constant dense<0.000000e+00> : vector<88x128xf32>
    %227 = tpu.matmul %224, %226, %cst_265 {dimension_numbers = #tpu.dot_dimension_numbers<[1], [0], [0], [1], [0, 0, 1, 1], [], []>} : vector<88x128xbf16>, vector<128x128xbf16>, vector<88x128xf32> -> vector<88x128xf32>
    %228 = arith.addf %222, %227 : vector<88x128xf32>
    %c0_266 = arith.constant 0 : index
    %c3_267 = arith.constant 3 : index
    %c23_268 = arith.constant 23 : index
    %c0_269 = arith.constant 0 : index
    %229 = vector.load %arg1[%c0_266, %c3_267, %c23_268, %c0_269] : memref<1x4x128x128xbf16, #tpu.memory_space<vmem>>, vector<1x1x88x128xbf16>
    %230 = vector.shape_cast %229 : vector<1x1x88x128xbf16> to vector<88x128xbf16>
    %c38 = arith.constant 38 : index
    %c0_270 = arith.constant 0 : index
    %c0_271 = arith.constant 0 : index
    %231 = vector.load %arg2[%c38, %c0_270, %c0_271] : memref<49x128x128xbf16, #tpu.memory_space<vmem>>, vector<1x128x128xbf16>
    %232 = vector.shape_cast %231 : vector<1x128x128xbf16> to vector<128x128xbf16>
    %cst_272 = arith.constant dense<0.000000e+00> : vector<88x128xf32>
    %233 = tpu.matmul %230, %232, %cst_272 {dimension_numbers = #tpu.dot_dimension_numbers<[1], [0], [0], [1], [0, 0, 1, 1], [], []>} : vector<88x128xbf16>, vector<128x128xbf16>, vector<88x128xf32> -> vector<88x128xf32>
    %234 = arith.addf %228, %233 : vector<88x128xf32>
    %c0_273 = arith.constant 0 : index
    %c2_274 = arith.constant 2 : index
    %c24_275 = arith.constant 24 : index
    %c0_276 = arith.constant 0 : index
    %235 = vector.load %arg1[%c0_273, %c2_274, %c24_275, %c0_276] : memref<1x4x128x128xbf16, #tpu.memory_space<vmem>>, vector<1x1x88x128xbf16>
    %236 = vector.shape_cast %235 : vector<1x1x88x128xbf16> to vector<88x128xbf16>
    %c39 = arith.constant 39 : index
    %c0_277 = arith.constant 0 : index
    %c0_278 = arith.constant 0 : index
    %237 = vector.load %arg2[%c39, %c0_277, %c0_278] : memref<49x128x128xbf16, #tpu.memory_space<vmem>>, vector<1x128x128xbf16>
    %238 = vector.shape_cast %237 : vector<1x128x128xbf16> to vector<128x128xbf16>
    %cst_279 = arith.constant dense<0.000000e+00> : vector<88x128xf32>
    %239 = tpu.matmul %236, %238, %cst_279 {dimension_numbers = #tpu.dot_dimension_numbers<[1], [0], [0], [1], [0, 0, 1, 1], [], []>} : vector<88x128xbf16>, vector<128x128xbf16>, vector<88x128xf32> -> vector<88x128xf32>
    %240 = arith.addf %234, %239 : vector<88x128xf32>
    %c0_280 = arith.constant 0 : index
    %c3_281 = arith.constant 3 : index
    %c24_282 = arith.constant 24 : index
    %c0_283 = arith.constant 0 : index
    %241 = vector.load %arg1[%c0_280, %c3_281, %c24_282, %c0_283] : memref<1x4x128x128xbf16, #tpu.memory_space<vmem>>, vector<1x1x88x128xbf16>
    %242 = vector.shape_cast %241 : vector<1x1x88x128xbf16> to vector<88x128xbf16>
    %c40 = arith.constant 40 : index
    %c0_284 = arith.constant 0 : index
    %c0_285 = arith.constant 0 : index
    %243 = vector.load %arg2[%c40, %c0_284, %c0_285] : memref<49x128x128xbf16, #tpu.memory_space<vmem>>, vector<1x128x128xbf16>
    %244 = vector.shape_cast %243 : vector<1x128x128xbf16> to vector<128x128xbf16>
    %cst_286 = arith.constant dense<0.000000e+00> : vector<88x128xf32>
    %245 = tpu.matmul %242, %244, %cst_286 {dimension_numbers = #tpu.dot_dimension_numbers<[1], [0], [0], [1], [0, 0, 1, 1], [], []>} : vector<88x128xbf16>, vector<128x128xbf16>, vector<88x128xf32> -> vector<88x128xf32>
    %246 = arith.addf %240, %245 : vector<88x128xf32>
    %c0_287 = arith.constant 0 : index
    %c2_288 = arith.constant 2 : index
    %c25_289 = arith.constant 25 : index
    %c0_290 = arith.constant 0 : index
    %247 = vector.load %arg1[%c0_287, %c2_288, %c25_289, %c0_290] : memref<1x4x128x128xbf16, #tpu.memory_space<vmem>>, vector<1x1x88x128xbf16>
    %248 = vector.shape_cast %247 : vector<1x1x88x128xbf16> to vector<88x128xbf16>
    %c41 = arith.constant 41 : index
    %c0_291 = arith.constant 0 : index
    %c0_292 = arith.constant 0 : index
    %249 = vector.load %arg2[%c41, %c0_291, %c0_292] : memref<49x128x128xbf16, #tpu.memory_space<vmem>>, vector<1x128x128xbf16>
    %250 = vector.shape_cast %249 : vector<1x128x128xbf16> to vector<128x128xbf16>
    %cst_293 = arith.constant dense<0.000000e+00> : vector<88x128xf32>
    %251 = tpu.matmul %248, %250, %cst_293 {dimension_numbers = #tpu.dot_dimension_numbers<[1], [0], [0], [1], [0, 0, 1, 1], [], []>} : vector<88x128xbf16>, vector<128x128xbf16>, vector<88x128xf32> -> vector<88x128xf32>
    %252 = arith.addf %246, %251 : vector<88x128xf32>
    %c0_294 = arith.constant 0 : index
    %c0_295 = arith.constant 0 : index
    %c33_296 = arith.constant 33 : index
    %c0_297 = arith.constant 0 : index
    %253 = vector.load %arg1[%c0_294, %c0_295, %c33_296, %c0_297] : memref<1x4x128x128xbf16, #tpu.memory_space<vmem>>, vector<1x1x88x128xbf16>
    %254 = vector.shape_cast %253 : vector<1x1x88x128xbf16> to vector<88x128xbf16>
    %c42 = arith.constant 42 : index
    %c0_298 = arith.constant 0 : index
    %c0_299 = arith.constant 0 : index
    %255 = vector.load %arg2[%c42, %c0_298, %c0_299] : memref<49x128x128xbf16, #tpu.memory_space<vmem>>, vector<1x128x128xbf16>
    %256 = vector.shape_cast %255 : vector<1x128x128xbf16> to vector<128x128xbf16>
    %cst_300 = arith.constant dense<0.000000e+00> : vector<88x128xf32>
    %257 = tpu.matmul %254, %256, %cst_300 {dimension_numbers = #tpu.dot_dimension_numbers<[1], [0], [0], [1], [0, 0, 1, 1], [], []>} : vector<88x128xbf16>, vector<128x128xbf16>, vector<88x128xf32> -> vector<88x128xf32>
    %258 = arith.addf %252, %257 : vector<88x128xf32>
    %c0_301 = arith.constant 0 : index
    %c1_302 = arith.constant 1 : index
    %c33_303 = arith.constant 33 : index
    %c0_304 = arith.constant 0 : index
    %259 = vector.load %arg1[%c0_301, %c1_302, %c33_303, %c0_304] : memref<1x4x128x128xbf16, #tpu.memory_space<vmem>>, vector<1x1x88x128xbf16>
    %260 = vector.shape_cast %259 : vector<1x1x88x128xbf16> to vector<88x128xbf16>
    %c43 = arith.constant 43 : index
    %c0_305 = arith.constant 0 : index
    %c0_306 = arith.constant 0 : index
    %261 = vector.load %arg2[%c43, %c0_305, %c0_306] : memref<49x128x128xbf16, #tpu.memory_space<vmem>>, vector<1x128x128xbf16>
    %262 = vector.shape_cast %261 : vector<1x128x128xbf16> to vector<128x128xbf16>
    %cst_307 = arith.constant dense<0.000000e+00> : vector<88x128xf32>
    %263 = tpu.matmul %260, %262, %cst_307 {dimension_numbers = #tpu.dot_dimension_numbers<[1], [0], [0], [1], [0, 0, 1, 1], [], []>} : vector<88x128xbf16>, vector<128x128xbf16>, vector<88x128xf32> -> vector<88x128xf32>
    %264 = arith.addf %258, %263 : vector<88x128xf32>
    %c0_308 = arith.constant 0 : index
    %c0_309 = arith.constant 0 : index
    %c34_310 = arith.constant 34 : index
    %c0_311 = arith.constant 0 : index
    %265 = vector.load %arg1[%c0_308, %c0_309, %c34_310, %c0_311] : memref<1x4x128x128xbf16, #tpu.memory_space<vmem>>, vector<1x1x88x128xbf16>
    %266 = vector.shape_cast %265 : vector<1x1x88x128xbf16> to vector<88x128xbf16>
    %c44 = arith.constant 44 : index
    %c0_312 = arith.constant 0 : index
    %c0_313 = arith.constant 0 : index
    %267 = vector.load %arg2[%c44, %c0_312, %c0_313] : memref<49x128x128xbf16, #tpu.memory_space<vmem>>, vector<1x128x128xbf16>
    %268 = vector.shape_cast %267 : vector<1x128x128xbf16> to vector<128x128xbf16>
    %cst_314 = arith.constant dense<0.000000e+00> : vector<88x128xf32>
    %269 = tpu.matmul %266, %268, %cst_314 {dimension_numbers = #tpu.dot_dimension_numbers<[1], [0], [0], [1], [0, 0, 1, 1], [], []>} : vector<88x128xbf16>, vector<128x128xbf16>, vector<88x128xf32> -> vector<88x128xf32>
    %270 = arith.addf %264, %269 : vector<88x128xf32>
    %c0_315 = arith.constant 0 : index
    %c1_316 = arith.constant 1 : index
    %c34_317 = arith.constant 34 : index
    %c0_318 = arith.constant 0 : index
    %271 = vector.load %arg1[%c0_315, %c1_316, %c34_317, %c0_318] : memref<1x4x128x128xbf16, #tpu.memory_space<vmem>>, vector<1x1x88x128xbf16>
    %272 = vector.shape_cast %271 : vector<1x1x88x128xbf16> to vector<88x128xbf16>
    %c45 = arith.constant 45 : index
    %c0_319 = arith.constant 0 : index
    %c0_320 = arith.constant 0 : index
    %273 = vector.load %arg2[%c45, %c0_319, %c0_320] : memref<49x128x128xbf16, #tpu.memory_space<vmem>>, vector<1x128x128xbf16>
    %274 = vector.shape_cast %273 : vector<1x128x128xbf16> to vector<128x128xbf16>
    %cst_321 = arith.constant dense<0.000000e+00> : vector<88x128xf32>
    %275 = tpu.matmul %272, %274, %cst_321 {dimension_numbers = #tpu.dot_dimension_numbers<[1], [0], [0], [1], [0, 0, 1, 1], [], []>} : vector<88x128xbf16>, vector<128x128xbf16>, vector<88x128xf32> -> vector<88x128xf32>
    %276 = arith.addf %270, %275 : vector<88x128xf32>
    %c0_322 = arith.constant 0 : index
    %c0_323 = arith.constant 0 : index
    %c35_324 = arith.constant 35 : index
    %c0_325 = arith.constant 0 : index
    %277 = vector.load %arg1[%c0_322, %c0_323, %c35_324, %c0_325] : memref<1x4x128x128xbf16, #tpu.memory_space<vmem>>, vector<1x1x88x128xbf16>
    %278 = vector.shape_cast %277 : vector<1x1x88x128xbf16> to vector<88x128xbf16>
    %c46 = arith.constant 46 : index
    %c0_326 = arith.constant 0 : index
    %c0_327 = arith.constant 0 : index
    %279 = vector.load %arg2[%c46, %c0_326, %c0_327] : memref<49x128x128xbf16, #tpu.memory_space<vmem>>, vector<1x128x128xbf16>
    %280 = vector.shape_cast %279 : vector<1x128x128xbf16> to vector<128x128xbf16>
    %cst_328 = arith.constant dense<0.000000e+00> : vector<88x128xf32>
    %281 = tpu.matmul %278, %280, %cst_328 {dimension_numbers = #tpu.dot_dimension_numbers<[1], [0], [0], [1], [0, 0, 1, 1], [], []>} : vector<88x128xbf16>, vector<128x128xbf16>, vector<88x128xf32> -> vector<88x128xf32>
    %282 = arith.addf %276, %281 : vector<88x128xf32>
    %c0_329 = arith.constant 0 : index
    %c1_330 = arith.constant 1 : index
    %c35_331 = arith.constant 35 : index
    %c0_332 = arith.constant 0 : index
    %283 = vector.load %arg1[%c0_329, %c1_330, %c35_331, %c0_332] : memref<1x4x128x128xbf16, #tpu.memory_space<vmem>>, vector<1x1x88x128xbf16>
    %284 = vector.shape_cast %283 : vector<1x1x88x128xbf16> to vector<88x128xbf16>
    %c47 = arith.constant 47 : index
    %c0_333 = arith.constant 0 : index
    %c0_334 = arith.constant 0 : index
    %285 = vector.load %arg2[%c47, %c0_333, %c0_334] : memref<49x128x128xbf16, #tpu.memory_space<vmem>>, vector<1x128x128xbf16>
    %286 = vector.shape_cast %285 : vector<1x128x128xbf16> to vector<128x128xbf16>
    %cst_335 = arith.constant dense<0.000000e+00> : vector<88x128xf32>
    %287 = tpu.matmul %284, %286, %cst_335 {dimension_numbers = #tpu.dot_dimension_numbers<[1], [0], [0], [1], [0, 0, 1, 1], [], []>} : vector<88x128xbf16>, vector<128x128xbf16>, vector<88x128xf32> -> vector<88x128xf32>
    %288 = arith.addf %282, %287 : vector<88x128xf32>
    %c0_336 = arith.constant 0 : index
    %c0_337 = arith.constant 0 : index
    %c36_338 = arith.constant 36 : index
    %c0_339 = arith.constant 0 : index
    %289 = vector.load %arg1[%c0_336, %c0_337, %c36_338, %c0_339] : memref<1x4x128x128xbf16, #tpu.memory_space<vmem>>, vector<1x1x88x128xbf16>
    %290 = vector.shape_cast %289 : vector<1x1x88x128xbf16> to vector<88x128xbf16>
    %c48 = arith.constant 48 : index
    %c0_340 = arith.constant 0 : index
    %c0_341 = arith.constant 0 : index
    %291 = vector.load %arg2[%c48, %c0_340, %c0_341] : memref<49x128x128xbf16, #tpu.memory_space<vmem>>, vector<1x128x128xbf16>
    %292 = vector.shape_cast %291 : vector<1x128x128xbf16> to vector<128x128xbf16>
    %cst_342 = arith.constant dense<0.000000e+00> : vector<88x128xf32>
    %293 = tpu.matmul %290, %292, %cst_342 {dimension_numbers = #tpu.dot_dimension_numbers<[1], [0], [0], [1], [0, 0, 1, 1], [], []>} : vector<88x128xbf16>, vector<128x128xbf16>, vector<88x128xf32> -> vector<88x128xf32>
    %294 = arith.addf %288, %293 : vector<88x128xf32>
    %c0_343 = arith.constant 0 : index
    %c0_344 = arith.constant 0 : index
    %295 = vector.load %arg3[%c0_343, %c0_344] : memref<1x128xf32, #tpu.memory_space<vmem>>, vector<1x128xf32>
    %296 = vector.broadcast %295 : vector<1x128xf32> to vector<88x128xf32>
    %297 = arith.addf %294, %296 : vector<88x128xf32>
    %cst_345 = arith.constant 0.000000e+00 : f32
    %298 = vector.broadcast %cst_345 : f32 to vector<88x128xf32>
    %299 = arith.cmpf ogt, %297, %298 : vector<88x128xf32>
    %cst_346 = arith.constant 0.00999999977 : f32
    %300 = vector.broadcast %cst_346 : f32 to vector<88x128xf32>
    %301 = arith.mulf %297, %300 : vector<88x128xf32>
    %302 = arith.select %299, %297, %301 : vector<88x128xi1>, vector<88x128xf32>
    %303 = arith.truncf %302 : vector<88x128xf32> to vector<88x128xbf16>
    %c0_347 = arith.constant 0 : index
    %c0_348 = arith.constant 0 : index
    %c0_349 = arith.constant 0 : index
    %304 = vector.load %arg4[%c0_347, %c0_348, %c0_349] : memref<1x88x128xbf16, #tpu.memory_space<vmem>>, vector<1x88x128xbf16>
    %305 = vector.shape_cast %304 : vector<1x88x128xbf16> to vector<88x128xbf16>
    %306 = vector.shape_cast %303 : vector<88x128xbf16> to vector<1x88x128xbf16>
    tpu.vector_store %arg4[%c0_347, %c0_348, %c0_349], %306 {strides = array<i32>} : memref<1x88x128xbf16, #tpu.memory_space<vmem>>, vector<1x88x128xbf16>,
    return
  }
  func.func @transform_0(%arg0: i32) -> (i32, i32, i32, i32) {
    %c0_i32 = arith.constant 0 : i32
    %c0_i32_0 = arith.constant 0 : i32
    %c0_i32_1 = arith.constant 0 : i32
    %c0_i32_2 = arith.constant 0 : i32
    return %arg0, %c0_i32, %c0_i32_0, %c0_i32_1 : i32, i32, i32, i32
  }
  func.func @transform_1(%arg0: i32) -> (i32, i32, i32) {
    %c0_i32 = arith.constant 0 : i32
    %c0_i32_0 = arith.constant 0 : i32
    %c0_i32_1 = arith.constant 0 : i32
    %c0_i32_2 = arith.constant 0 : i32
    return %c0_i32, %c0_i32_0, %c0_i32_1 : i32, i32, i32
  }
  func.func @transform_2(%arg0: i32) -> (i32, i32) {
    %c0_i32 = arith.constant 0 : i32
    %c0_i32_0 = arith.constant 0 : i32
    %c0_i32_1 = arith.constant 0 : i32
    return %c0_i32, %c0_i32_0 : i32, i32
  }
  func.func @transform_3(%arg0: i32) -> (i32, i32, i32) {
    %c0_i32 = arith.constant 0 : i32
    %c0_i32_0 = arith.constant 0 : i32
    %c0_i32_1 = arith.constant 0 : i32
    return %arg0, %c0_i32, %c0_i32_0 : i32, i32, i32
  }
}

module attributes {stable_mosaic.version = 11 : i64} {
  func.func @kernel(%arg0: i32, %arg1: memref<1x4x32x128xbf16, #tpu.memory_space<vmem>>, %arg2: memref<1x24x128xbf16, #tpu.memory_space<vmem>>) attributes {dimension_semantics = [#tpu.dimension_semantics<parallel>], iteration_bounds = array<i64: 2>, scalar_prefetch = 0 : i64, scratch_operands = 0 : i64, tpu.core_type = #tpu.core_type<tc>, window_params = [{transform_indices = @transform_0, window_bounds = array<i64: 1, 4, 32, 128>}, {transform_indices = @transform_1, window_bounds = array<i64: 1, 24, 128>}]} {
    %cst = arith.constant -1.000000e+30 : f32
    %0 = vector.broadcast %cst : f32 to vector<24x128xf32>
    %c0 = arith.constant 0 : index
    %c0_0 = arith.constant 0 : index
    %c0_1 = arith.constant 0 : index
    %c0_2 = arith.constant 0 : index
    %1 = vector.load %arg1[%c0, %c0_0, %c0_1, %c0_2] : memref<1x4x32x128xbf16, #tpu.memory_space<vmem>>, vector<1x1x24x128xbf16>
    %2 = vector.shape_cast %1 : vector<1x1x24x128xbf16> to vector<24x128xbf16>
    %3 = arith.extf %2 : vector<24x128xbf16> to vector<24x128xf32>
    %4 = arith.maximumf %0, %3 : vector<24x128xf32>
    %c0_3 = arith.constant 0 : index
    %c1 = arith.constant 1 : index
    %c0_4 = arith.constant 0 : index
    %c0_5 = arith.constant 0 : index
    %5 = vector.load %arg1[%c0_3, %c1, %c0_4, %c0_5] : memref<1x4x32x128xbf16, #tpu.memory_space<vmem>>, vector<1x1x24x128xbf16>
    %6 = vector.shape_cast %5 : vector<1x1x24x128xbf16> to vector<24x128xbf16>
    %7 = arith.extf %6 : vector<24x128xbf16> to vector<24x128xf32>
    %8 = arith.maximumf %4, %7 : vector<24x128xf32>
    %c0_6 = arith.constant 0 : index
    %c0_7 = arith.constant 0 : index
    %c1_8 = arith.constant 1 : index
    %c0_9 = arith.constant 0 : index
    %9 = vector.load %arg1[%c0_6, %c0_7, %c1_8, %c0_9] : memref<1x4x32x128xbf16, #tpu.memory_space<vmem>>, vector<1x1x24x128xbf16>
    %10 = vector.shape_cast %9 : vector<1x1x24x128xbf16> to vector<24x128xbf16>
    %11 = arith.extf %10 : vector<24x128xbf16> to vector<24x128xf32>
    %12 = arith.maximumf %8, %11 : vector<24x128xf32>
    %c0_10 = arith.constant 0 : index
    %c2 = arith.constant 2 : index
    %c0_11 = arith.constant 0 : index
    %c0_12 = arith.constant 0 : index
    %13 = vector.load %arg1[%c0_10, %c2, %c0_11, %c0_12] : memref<1x4x32x128xbf16, #tpu.memory_space<vmem>>, vector<1x1x24x128xbf16>
    %14 = vector.shape_cast %13 : vector<1x1x24x128xbf16> to vector<24x128xbf16>
    %15 = arith.extf %14 : vector<24x128xbf16> to vector<24x128xf32>
    %16 = arith.maximumf %12, %15 : vector<24x128xf32>
    %c0_13 = arith.constant 0 : index
    %c3 = arith.constant 3 : index
    %c0_14 = arith.constant 0 : index
    %c0_15 = arith.constant 0 : index
    %17 = vector.load %arg1[%c0_13, %c3, %c0_14, %c0_15] : memref<1x4x32x128xbf16, #tpu.memory_space<vmem>>, vector<1x1x24x128xbf16>
    %18 = vector.shape_cast %17 : vector<1x1x24x128xbf16> to vector<24x128xbf16>
    %19 = arith.extf %18 : vector<24x128xbf16> to vector<24x128xf32>
    %20 = arith.maximumf %16, %19 : vector<24x128xf32>
    %c0_16 = arith.constant 0 : index
    %c2_17 = arith.constant 2 : index
    %c1_18 = arith.constant 1 : index
    %c0_19 = arith.constant 0 : index
    %21 = vector.load %arg1[%c0_16, %c2_17, %c1_18, %c0_19] : memref<1x4x32x128xbf16, #tpu.memory_space<vmem>>, vector<1x1x24x128xbf16>
    %22 = vector.shape_cast %21 : vector<1x1x24x128xbf16> to vector<24x128xbf16>
    %23 = arith.extf %22 : vector<24x128xbf16> to vector<24x128xf32>
    %24 = arith.maximumf %20, %23 : vector<24x128xf32>
    %c0_20 = arith.constant 0 : index
    %c0_21 = arith.constant 0 : index
    %c5 = arith.constant 5 : index
    %c0_22 = arith.constant 0 : index
    %25 = vector.load %arg1[%c0_20, %c0_21, %c5, %c0_22] : memref<1x4x32x128xbf16, #tpu.memory_space<vmem>>, vector<1x1x24x128xbf16>
    %26 = vector.shape_cast %25 : vector<1x1x24x128xbf16> to vector<24x128xbf16>
    %27 = arith.extf %26 : vector<24x128xbf16> to vector<24x128xf32>
    %28 = arith.maximumf %24, %27 : vector<24x128xf32>
    %c0_23 = arith.constant 0 : index
    %c1_24 = arith.constant 1 : index
    %c5_25 = arith.constant 5 : index
    %c0_26 = arith.constant 0 : index
    %29 = vector.load %arg1[%c0_23, %c1_24, %c5_25, %c0_26] : memref<1x4x32x128xbf16, #tpu.memory_space<vmem>>, vector<1x1x24x128xbf16>
    %30 = vector.shape_cast %29 : vector<1x1x24x128xbf16> to vector<24x128xbf16>
    %31 = arith.extf %30 : vector<24x128xbf16> to vector<24x128xf32>
    %32 = arith.maximumf %28, %31 : vector<24x128xf32>
    %c0_27 = arith.constant 0 : index
    %c0_28 = arith.constant 0 : index
    %c6 = arith.constant 6 : index
    %c0_29 = arith.constant 0 : index
    %33 = vector.load %arg1[%c0_27, %c0_28, %c6, %c0_29] : memref<1x4x32x128xbf16, #tpu.memory_space<vmem>>, vector<1x1x24x128xbf16>
    %34 = vector.shape_cast %33 : vector<1x1x24x128xbf16> to vector<24x128xbf16>
    %35 = arith.extf %34 : vector<24x128xbf16> to vector<24x128xf32>
    %36 = arith.maximumf %32, %35 : vector<24x128xf32>
    %37 = arith.truncf %36 : vector<24x128xf32> to vector<24x128xbf16>
    %c0_30 = arith.constant 0 : index
    %c0_31 = arith.constant 0 : index
    %c0_32 = arith.constant 0 : index
    %38 = vector.load %arg2[%c0_30, %c0_31, %c0_32] : memref<1x24x128xbf16, #tpu.memory_space<vmem>>, vector<1x24x128xbf16>
    %39 = vector.shape_cast %38 : vector<1x24x128xbf16> to vector<24x128xbf16>
    %40 = vector.shape_cast %37 : vector<24x128xbf16> to vector<1x24x128xbf16>
    tpu.vector_store %arg2[%c0_30, %c0_31, %c0_32], %40 {strides = array<i32>} : memref<1x24x128xbf16, #tpu.memory_space<vmem>>, vector<1x24x128xbf16>,
    return
  }
  func.func @transform_0(%arg0: i32) -> (i32, i32, i32, i32) {
    %c0_i32 = arith.constant 0 : i32
    %c0_i32_0 = arith.constant 0 : i32
    %c0_i32_1 = arith.constant 0 : i32
    %c0_i32_2 = arith.constant 0 : i32
    return %arg0, %c0_i32, %c0_i32_0, %c0_i32_1 : i32, i32, i32, i32
  }
  func.func @transform_1(%arg0: i32) -> (i32, i32, i32) {
    %c0_i32 = arith.constant 0 : i32
    %c0_i32_0 = arith.constant 0 : i32
    %c0_i32_1 = arith.constant 0 : i32
    return %arg0, %c0_i32, %c0_i32_0 : i32, i32, i32
  }
}

module attributes {stable_mosaic.version = 11 : i64} {
  func.func @kernel(%arg0: i32, %arg1: memref<1x1x40x128xbf16, #tpu.memory_space<vmem>>, %arg2: memref<9x128x128xbf16, #tpu.memory_space<vmem>>, %arg3: memref<1x128xf32, #tpu.memory_space<vmem>>, %arg4: memref<1x24x128xbf16, #tpu.memory_space<vmem>>) attributes {dimension_semantics = [#tpu.dimension_semantics<parallel>], iteration_bounds = array<i64: 2>, scalar_prefetch = 0 : i64, scratch_operands = 0 : i64, tpu.core_type = #tpu.core_type<tc>, window_params = [{transform_indices = @transform_0, window_bounds = array<i64: 1, 1, 40, 128>}, {pipeline_mode = #tpu.pipeline_mode<synchronous>, transform_indices = @transform_1, window_bounds = array<i64: 9, 128, 128>}, {pipeline_mode = #tpu.pipeline_mode<synchronous>, transform_indices = @transform_2, window_bounds = array<i64: 1, 128>}, {transform_indices = @transform_3, window_bounds = array<i64: 1, 24, 128>}]} {
    %cst = arith.constant 0.000000e+00 : f32
    %0 = vector.broadcast %cst : f32 to vector<24x128xf32>
    %c0 = arith.constant 0 : index
    %c0_0 = arith.constant 0 : index
    %c0_1 = arith.constant 0 : index
    %c0_2 = arith.constant 0 : index
    %1 = vector.load %arg1[%c0, %c0_0, %c0_1, %c0_2] : memref<1x1x40x128xbf16, #tpu.memory_space<vmem>>, vector<1x1x24x128xbf16>
    %2 = vector.shape_cast %1 : vector<1x1x24x128xbf16> to vector<24x128xbf16>
    %c0_3 = arith.constant 0 : index
    %c0_4 = arith.constant 0 : index
    %c0_5 = arith.constant 0 : index
    %3 = vector.load %arg2[%c0_3, %c0_4, %c0_5] : memref<9x128x128xbf16, #tpu.memory_space<vmem>>, vector<1x128x128xbf16>
    %4 = vector.shape_cast %3 : vector<1x128x128xbf16> to vector<128x128xbf16>
    %cst_6 = arith.constant dense<0.000000e+00> : vector<24x128xf32>
    %5 = tpu.matmul %2, %4, %cst_6 {dimension_numbers = #tpu.dot_dimension_numbers<[1], [0], [0], [1], [0, 0, 1, 1], [], []>} : vector<24x128xbf16>, vector<128x128xbf16>, vector<24x128xf32> -> vector<24x128xf32>
    %6 = arith.addf %0, %5 : vector<24x128xf32>
    %c0_7 = arith.constant 0 : index
    %c0_8 = arith.constant 0 : index
    %c1 = arith.constant 1 : index
    %c0_9 = arith.constant 0 : index
    %7 = vector.load %arg1[%c0_7, %c0_8, %c1, %c0_9] : memref<1x1x40x128xbf16, #tpu.memory_space<vmem>>, vector<1x1x24x128xbf16>
    %8 = vector.shape_cast %7 : vector<1x1x24x128xbf16> to vector<24x128xbf16>
    %c1_10 = arith.constant 1 : index
    %c0_11 = arith.constant 0 : index
    %c0_12 = arith.constant 0 : index
    %9 = vector.load %arg2[%c1_10, %c0_11, %c0_12] : memref<9x128x128xbf16, #tpu.memory_space<vmem>>, vector<1x128x128xbf16>
    %10 = vector.shape_cast %9 : vector<1x128x128xbf16> to vector<128x128xbf16>
    %cst_13 = arith.constant dense<0.000000e+00> : vector<24x128xf32>
    %11 = tpu.matmul %8, %10, %cst_13 {dimension_numbers = #tpu.dot_dimension_numbers<[1], [0], [0], [1], [0, 0, 1, 1], [], []>} : vector<24x128xbf16>, vector<128x128xbf16>, vector<24x128xf32> -> vector<24x128xf32>
    %12 = arith.addf %6, %11 : vector<24x128xf32>
    %c0_14 = arith.constant 0 : index
    %c0_15 = arith.constant 0 : index
    %c2 = arith.constant 2 : index
    %c0_16 = arith.constant 0 : index
    %13 = vector.load %arg1[%c0_14, %c0_15, %c2, %c0_16] : memref<1x1x40x128xbf16, #tpu.memory_space<vmem>>, vector<1x1x24x128xbf16>
    %14 = vector.shape_cast %13 : vector<1x1x24x128xbf16> to vector<24x128xbf16>
    %c2_17 = arith.constant 2 : index
    %c0_18 = arith.constant 0 : index
    %c0_19 = arith.constant 0 : index
    %15 = vector.load %arg2[%c2_17, %c0_18, %c0_19] : memref<9x128x128xbf16, #tpu.memory_space<vmem>>, vector<1x128x128xbf16>
    %16 = vector.shape_cast %15 : vector<1x128x128xbf16> to vector<128x128xbf16>
    %cst_20 = arith.constant dense<0.000000e+00> : vector<24x128xf32>
    %17 = tpu.matmul %14, %16, %cst_20 {dimension_numbers = #tpu.dot_dimension_numbers<[1], [0], [0], [1], [0, 0, 1, 1], [], []>} : vector<24x128xbf16>, vector<128x128xbf16>, vector<24x128xf32> -> vector<24x128xf32>
    %18 = arith.addf %12, %17 : vector<24x128xf32>
    %c0_21 = arith.constant 0 : index
    %c0_22 = arith.constant 0 : index
    %c6 = arith.constant 6 : index
    %c0_23 = arith.constant 0 : index
    %19 = vector.load %arg1[%c0_21, %c0_22, %c6, %c0_23] : memref<1x1x40x128xbf16, #tpu.memory_space<vmem>>, vector<1x1x24x128xbf16>
    %20 = vector.shape_cast %19 : vector<1x1x24x128xbf16> to vector<24x128xbf16>
    %c3 = arith.constant 3 : index
    %c0_24 = arith.constant 0 : index
    %c0_25 = arith.constant 0 : index
    %21 = vector.load %arg2[%c3, %c0_24, %c0_25] : memref<9x128x128xbf16, #tpu.memory_space<vmem>>, vector<1x128x128xbf16>
    %22 = vector.shape_cast %21 : vector<1x128x128xbf16> to vector<128x128xbf16>
    %cst_26 = arith.constant dense<0.000000e+00> : vector<24x128xf32>
    %23 = tpu.matmul %20, %22, %cst_26 {dimension_numbers = #tpu.dot_dimension_numbers<[1], [0], [0], [1], [0, 0, 1, 1], [], []>} : vector<24x128xbf16>, vector<128x128xbf16>, vector<24x128xf32> -> vector<24x128xf32>
    %24 = arith.addf %18, %23 : vector<24x128xf32>
    %c0_27 = arith.constant 0 : index
    %c0_28 = arith.constant 0 : index
    %c7 = arith.constant 7 : index
    %c0_29 = arith.constant 0 : index
    %25 = vector.load %arg1[%c0_27, %c0_28, %c7, %c0_29] : memref<1x1x40x128xbf16, #tpu.memory_space<vmem>>, vector<1x1x24x128xbf16>
    %26 = vector.shape_cast %25 : vector<1x1x24x128xbf16> to vector<24x128xbf16>
    %c4 = arith.constant 4 : index
    %c0_30 = arith.constant 0 : index
    %c0_31 = arith.constant 0 : index
    %27 = vector.load %arg2[%c4, %c0_30, %c0_31] : memref<9x128x128xbf16, #tpu.memory_space<vmem>>, vector<1x128x128xbf16>
    %28 = vector.shape_cast %27 : vector<1x128x128xbf16> to vector<128x128xbf16>
    %cst_32 = arith.constant dense<0.000000e+00> : vector<24x128xf32>
    %29 = tpu.matmul %26, %28, %cst_32 {dimension_numbers = #tpu.dot_dimension_numbers<[1], [0], [0], [1], [0, 0, 1, 1], [], []>} : vector<24x128xbf16>, vector<128x128xbf16>, vector<24x128xf32> -> vector<24x128xf32>
    %30 = arith.addf %24, %29 : vector<24x128xf32>
    %c0_33 = arith.constant 0 : index
    %c0_34 = arith.constant 0 : index
    %c8 = arith.constant 8 : index
    %c0_35 = arith.constant 0 : index
    %31 = vector.load %arg1[%c0_33, %c0_34, %c8, %c0_35] : memref<1x1x40x128xbf16, #tpu.memory_space<vmem>>, vector<1x1x24x128xbf16>
    %32 = vector.shape_cast %31 : vector<1x1x24x128xbf16> to vector<24x128xbf16>
    %c5 = arith.constant 5 : index
    %c0_36 = arith.constant 0 : index
    %c0_37 = arith.constant 0 : index
    %33 = vector.load %arg2[%c5, %c0_36, %c0_37] : memref<9x128x128xbf16, #tpu.memory_space<vmem>>, vector<1x128x128xbf16>
    %34 = vector.shape_cast %33 : vector<1x128x128xbf16> to vector<128x128xbf16>
    %cst_38 = arith.constant dense<0.000000e+00> : vector<24x128xf32>
    %35 = tpu.matmul %32, %34, %cst_38 {dimension_numbers = #tpu.dot_dimension_numbers<[1], [0], [0], [1], [0, 0, 1, 1], [], []>} : vector<24x128xbf16>, vector<128x128xbf16>, vector<24x128xf32> -> vector<24x128xf32>
    %36 = arith.addf %30, %35 : vector<24x128xf32>
    %c0_39 = arith.constant 0 : index
    %c0_40 = arith.constant 0 : index
    %c12 = arith.constant 12 : index
    %c0_41 = arith.constant 0 : index
    %37 = vector.load %arg1[%c0_39, %c0_40, %c12, %c0_41] : memref<1x1x40x128xbf16, #tpu.memory_space<vmem>>, vector<1x1x24x128xbf16>
    %38 = vector.shape_cast %37 : vector<1x1x24x128xbf16> to vector<24x128xbf16>
    %c6_42 = arith.constant 6 : index
    %c0_43 = arith.constant 0 : index
    %c0_44 = arith.constant 0 : index
    %39 = vector.load %arg2[%c6_42, %c0_43, %c0_44] : memref<9x128x128xbf16, #tpu.memory_space<vmem>>, vector<1x128x128xbf16>
    %40 = vector.shape_cast %39 : vector<1x128x128xbf16> to vector<128x128xbf16>
    %cst_45 = arith.constant dense<0.000000e+00> : vector<24x128xf32>
    %41 = tpu.matmul %38, %40, %cst_45 {dimension_numbers = #tpu.dot_dimension_numbers<[1], [0], [0], [1], [0, 0, 1, 1], [], []>} : vector<24x128xbf16>, vector<128x128xbf16>, vector<24x128xf32> -> vector<24x128xf32>
    %42 = arith.addf %36, %41 : vector<24x128xf32>
    %c0_46 = arith.constant 0 : index
    %c0_47 = arith.constant 0 : index
    %c13 = arith.constant 13 : index
    %c0_48 = arith.constant 0 : index
    %43 = vector.load %arg1[%c0_46, %c0_47, %c13, %c0_48] : memref<1x1x40x128xbf16, #tpu.memory_space<vmem>>, vector<1x1x24x128xbf16>
    %44 = vector.shape_cast %43 : vector<1x1x24x128xbf16> to vector<24x128xbf16>
    %c7_49 = arith.constant 7 : index
    %c0_50 = arith.constant 0 : index
    %c0_51 = arith.constant 0 : index
    %45 = vector.load %arg2[%c7_49, %c0_50, %c0_51] : memref<9x128x128xbf16, #tpu.memory_space<vmem>>, vector<1x128x128xbf16>
    %46 = vector.shape_cast %45 : vector<1x128x128xbf16> to vector<128x128xbf16>
    %cst_52 = arith.constant dense<0.000000e+00> : vector<24x128xf32>
    %47 = tpu.matmul %44, %46, %cst_52 {dimension_numbers = #tpu.dot_dimension_numbers<[1], [0], [0], [1], [0, 0, 1, 1], [], []>} : vector<24x128xbf16>, vector<128x128xbf16>, vector<24x128xf32> -> vector<24x128xf32>
    %48 = arith.addf %42, %47 : vector<24x128xf32>
    %c0_53 = arith.constant 0 : index
    %c0_54 = arith.constant 0 : index
    %c14 = arith.constant 14 : index
    %c0_55 = arith.constant 0 : index
    %49 = vector.load %arg1[%c0_53, %c0_54, %c14, %c0_55] : memref<1x1x40x128xbf16, #tpu.memory_space<vmem>>, vector<1x1x24x128xbf16>
    %50 = vector.shape_cast %49 : vector<1x1x24x128xbf16> to vector<24x128xbf16>
    %c8_56 = arith.constant 8 : index
    %c0_57 = arith.constant 0 : index
    %c0_58 = arith.constant 0 : index
    %51 = vector.load %arg2[%c8_56, %c0_57, %c0_58] : memref<9x128x128xbf16, #tpu.memory_space<vmem>>, vector<1x128x128xbf16>
    %52 = vector.shape_cast %51 : vector<1x128x128xbf16> to vector<128x128xbf16>
    %cst_59 = arith.constant dense<0.000000e+00> : vector<24x128xf32>
    %53 = tpu.matmul %50, %52, %cst_59 {dimension_numbers = #tpu.dot_dimension_numbers<[1], [0], [0], [1], [0, 0, 1, 1], [], []>} : vector<24x128xbf16>, vector<128x128xbf16>, vector<24x128xf32> -> vector<24x128xf32>
    %54 = arith.addf %48, %53 : vector<24x128xf32>
    %c0_60 = arith.constant 0 : index
    %c0_61 = arith.constant 0 : index
    %55 = vector.load %arg3[%c0_60, %c0_61] : memref<1x128xf32, #tpu.memory_space<vmem>>, vector<1x128xf32>
    %56 = vector.broadcast %55 : vector<1x128xf32> to vector<24x128xf32>
    %57 = arith.addf %54, %56 : vector<24x128xf32>
    %cst_62 = arith.constant 0.000000e+00 : f32
    %58 = vector.broadcast %cst_62 : f32 to vector<24x128xf32>
    %59 = arith.cmpf ogt, %57, %58 : vector<24x128xf32>
    %cst_63 = arith.constant 0.00999999977 : f32
    %60 = vector.broadcast %cst_63 : f32 to vector<24x128xf32>
    %61 = arith.mulf %57, %60 : vector<24x128xf32>
    %62 = arith.select %59, %57, %61 : vector<24x128xi1>, vector<24x128xf32>
    %63 = arith.truncf %62 : vector<24x128xf32> to vector<24x128xbf16>
    %c0_64 = arith.constant 0 : index
    %c0_65 = arith.constant 0 : index
    %c0_66 = arith.constant 0 : index
    %64 = vector.load %arg4[%c0_64, %c0_65, %c0_66] : memref<1x24x128xbf16, #tpu.memory_space<vmem>>, vector<1x24x128xbf16>
    %65 = vector.shape_cast %64 : vector<1x24x128xbf16> to vector<24x128xbf16>
    %66 = vector.shape_cast %63 : vector<24x128xbf16> to vector<1x24x128xbf16>
    tpu.vector_store %arg4[%c0_64, %c0_65, %c0_66], %66 {strides = array<i32>} : memref<1x24x128xbf16, #tpu.memory_space<vmem>>, vector<1x24x128xbf16>,
    return
  }
  func.func @transform_0(%arg0: i32) -> (i32, i32, i32, i32) {
    %c0_i32 = arith.constant 0 : i32
    %c0_i32_0 = arith.constant 0 : i32
    %c0_i32_1 = arith.constant 0 : i32
    %c0_i32_2 = arith.constant 0 : i32
    return %arg0, %c0_i32, %c0_i32_0, %c0_i32_1 : i32, i32, i32, i32
  }
  func.func @transform_1(%arg0: i32) -> (i32, i32, i32) {
    %c0_i32 = arith.constant 0 : i32
    %c0_i32_0 = arith.constant 0 : i32
    %c0_i32_1 = arith.constant 0 : i32
    %c0_i32_2 = arith.constant 0 : i32
    return %c0_i32, %c0_i32_0, %c0_i32_1 : i32, i32, i32
  }
  func.func @transform_2(%arg0: i32) -> (i32, i32) {
    %c0_i32 = arith.constant 0 : i32
    %c0_i32_0 = arith.constant 0 : i32
    %c0_i32_1 = arith.constant 0 : i32
    return %c0_i32, %c0_i32_0 : i32, i32
  }
  func.func @transform_3(%arg0: i32) -> (i32, i32, i32) {
    %c0_i32 = arith.constant 0 : i32
    %c0_i32_0 = arith.constant 0 : i32
    %c0_i32_1 = arith.constant 0 : i32
    return %arg0, %c0_i32, %c0_i32_0 : i32, i32, i32
  }
}

module attributes {stable_mosaic.version = 11 : i64} {
  func.func @kernel(%arg0: i32, %arg1: memref<1x1x40x128xbf16, #tpu.memory_space<vmem>>, %arg2: memref<9x128x128xbf16, #tpu.memory_space<vmem>>, %arg3: memref<1x128xf32, #tpu.memory_space<vmem>>, %arg4: memref<1x24x128xbf16, #tpu.memory_space<vmem>>, %arg5: memref<1x24x128xbf16, #tpu.memory_space<vmem>>) attributes {dimension_semantics = [#tpu.dimension_semantics<parallel>], iteration_bounds = array<i64: 2>, scalar_prefetch = 0 : i64, scratch_operands = 0 : i64, tpu.core_type = #tpu.core_type<tc>, window_params = [{transform_indices = @transform_0, window_bounds = array<i64: 1, 1, 40, 128>}, {pipeline_mode = #tpu.pipeline_mode<synchronous>, transform_indices = @transform_1, window_bounds = array<i64: 9, 128, 128>}, {pipeline_mode = #tpu.pipeline_mode<synchronous>, transform_indices = @transform_2, window_bounds = array<i64: 1, 128>}, {transform_indices = @transform_3, window_bounds = array<i64: 1, 24, 128>}, {transform_indices = @transform_4, window_bounds = array<i64: 1, 24, 128>}]} {
    %cst = arith.constant 0.000000e+00 : f32
    %0 = vector.broadcast %cst : f32 to vector<24x128xf32>
    %c0 = arith.constant 0 : index
    %c0_0 = arith.constant 0 : index
    %c0_1 = arith.constant 0 : index
    %c0_2 = arith.constant 0 : index
    %1 = vector.load %arg1[%c0, %c0_0, %c0_1, %c0_2] : memref<1x1x40x128xbf16, #tpu.memory_space<vmem>>, vector<1x1x24x128xbf16>
    %2 = vector.shape_cast %1 : vector<1x1x24x128xbf16> to vector<24x128xbf16>
    %c0_3 = arith.constant 0 : index
    %c0_4 = arith.constant 0 : index
    %c0_5 = arith.constant 0 : index
    %3 = vector.load %arg2[%c0_3, %c0_4, %c0_5] : memref<9x128x128xbf16, #tpu.memory_space<vmem>>, vector<1x128x128xbf16>
    %4 = vector.shape_cast %3 : vector<1x128x128xbf16> to vector<128x128xbf16>
    %cst_6 = arith.constant dense<0.000000e+00> : vector<24x128xf32>
    %5 = tpu.matmul %2, %4, %cst_6 {dimension_numbers = #tpu.dot_dimension_numbers<[1], [0], [0], [1], [0, 0, 1, 1], [], []>} : vector<24x128xbf16>, vector<128x128xbf16>, vector<24x128xf32> -> vector<24x128xf32>
    %6 = arith.addf %0, %5 : vector<24x128xf32>
    %c0_7 = arith.constant 0 : index
    %c0_8 = arith.constant 0 : index
    %c1 = arith.constant 1 : index
    %c0_9 = arith.constant 0 : index
    %7 = vector.load %arg1[%c0_7, %c0_8, %c1, %c0_9] : memref<1x1x40x128xbf16, #tpu.memory_space<vmem>>, vector<1x1x24x128xbf16>
    %8 = vector.shape_cast %7 : vector<1x1x24x128xbf16> to vector<24x128xbf16>
    %c1_10 = arith.constant 1 : index
    %c0_11 = arith.constant 0 : index
    %c0_12 = arith.constant 0 : index
    %9 = vector.load %arg2[%c1_10, %c0_11, %c0_12] : memref<9x128x128xbf16, #tpu.memory_space<vmem>>, vector<1x128x128xbf16>
    %10 = vector.shape_cast %9 : vector<1x128x128xbf16> to vector<128x128xbf16>
    %cst_13 = arith.constant dense<0.000000e+00> : vector<24x128xf32>
    %11 = tpu.matmul %8, %10, %cst_13 {dimension_numbers = #tpu.dot_dimension_numbers<[1], [0], [0], [1], [0, 0, 1, 1], [], []>} : vector<24x128xbf16>, vector<128x128xbf16>, vector<24x128xf32> -> vector<24x128xf32>
    %12 = arith.addf %6, %11 : vector<24x128xf32>
    %c0_14 = arith.constant 0 : index
    %c0_15 = arith.constant 0 : index
    %c2 = arith.constant 2 : index
    %c0_16 = arith.constant 0 : index
    %13 = vector.load %arg1[%c0_14, %c0_15, %c2, %c0_16] : memref<1x1x40x128xbf16, #tpu.memory_space<vmem>>, vector<1x1x24x128xbf16>
    %14 = vector.shape_cast %13 : vector<1x1x24x128xbf16> to vector<24x128xbf16>
    %c2_17 = arith.constant 2 : index
    %c0_18 = arith.constant 0 : index
    %c0_19 = arith.constant 0 : index
    %15 = vector.load %arg2[%c2_17, %c0_18, %c0_19] : memref<9x128x128xbf16, #tpu.memory_space<vmem>>, vector<1x128x128xbf16>
    %16 = vector.shape_cast %15 : vector<1x128x128xbf16> to vector<128x128xbf16>
    %cst_20 = arith.constant dense<0.000000e+00> : vector<24x128xf32>
    %17 = tpu.matmul %14, %16, %cst_20 {dimension_numbers = #tpu.dot_dimension_numbers<[1], [0], [0], [1], [0, 0, 1, 1], [], []>} : vector<24x128xbf16>, vector<128x128xbf16>, vector<24x128xf32> -> vector<24x128xf32>
    %18 = arith.addf %12, %17 : vector<24x128xf32>
    %c0_21 = arith.constant 0 : index
    %c0_22 = arith.constant 0 : index
    %c6 = arith.constant 6 : index
    %c0_23 = arith.constant 0 : index
    %19 = vector.load %arg1[%c0_21, %c0_22, %c6, %c0_23] : memref<1x1x40x128xbf16, #tpu.memory_space<vmem>>, vector<1x1x24x128xbf16>
    %20 = vector.shape_cast %19 : vector<1x1x24x128xbf16> to vector<24x128xbf16>
    %c3 = arith.constant 3 : index
    %c0_24 = arith.constant 0 : index
    %c0_25 = arith.constant 0 : index
    %21 = vector.load %arg2[%c3, %c0_24, %c0_25] : memref<9x128x128xbf16, #tpu.memory_space<vmem>>, vector<1x128x128xbf16>
    %22 = vector.shape_cast %21 : vector<1x128x128xbf16> to vector<128x128xbf16>
    %cst_26 = arith.constant dense<0.000000e+00> : vector<24x128xf32>
    %23 = tpu.matmul %20, %22, %cst_26 {dimension_numbers = #tpu.dot_dimension_numbers<[1], [0], [0], [1], [0, 0, 1, 1], [], []>} : vector<24x128xbf16>, vector<128x128xbf16>, vector<24x128xf32> -> vector<24x128xf32>
    %24 = arith.addf %18, %23 : vector<24x128xf32>
    %c0_27 = arith.constant 0 : index
    %c0_28 = arith.constant 0 : index
    %c7 = arith.constant 7 : index
    %c0_29 = arith.constant 0 : index
    %25 = vector.load %arg1[%c0_27, %c0_28, %c7, %c0_29] : memref<1x1x40x128xbf16, #tpu.memory_space<vmem>>, vector<1x1x24x128xbf16>
    %26 = vector.shape_cast %25 : vector<1x1x24x128xbf16> to vector<24x128xbf16>
    %c4 = arith.constant 4 : index
    %c0_30 = arith.constant 0 : index
    %c0_31 = arith.constant 0 : index
    %27 = vector.load %arg2[%c4, %c0_30, %c0_31] : memref<9x128x128xbf16, #tpu.memory_space<vmem>>, vector<1x128x128xbf16>
    %28 = vector.shape_cast %27 : vector<1x128x128xbf16> to vector<128x128xbf16>
    %cst_32 = arith.constant dense<0.000000e+00> : vector<24x128xf32>
    %29 = tpu.matmul %26, %28, %cst_32 {dimension_numbers = #tpu.dot_dimension_numbers<[1], [0], [0], [1], [0, 0, 1, 1], [], []>} : vector<24x128xbf16>, vector<128x128xbf16>, vector<24x128xf32> -> vector<24x128xf32>
    %30 = arith.addf %24, %29 : vector<24x128xf32>
    %c0_33 = arith.constant 0 : index
    %c0_34 = arith.constant 0 : index
    %c8 = arith.constant 8 : index
    %c0_35 = arith.constant 0 : index
    %31 = vector.load %arg1[%c0_33, %c0_34, %c8, %c0_35] : memref<1x1x40x128xbf16, #tpu.memory_space<vmem>>, vector<1x1x24x128xbf16>
    %32 = vector.shape_cast %31 : vector<1x1x24x128xbf16> to vector<24x128xbf16>
    %c5 = arith.constant 5 : index
    %c0_36 = arith.constant 0 : index
    %c0_37 = arith.constant 0 : index
    %33 = vector.load %arg2[%c5, %c0_36, %c0_37] : memref<9x128x128xbf16, #tpu.memory_space<vmem>>, vector<1x128x128xbf16>
    %34 = vector.shape_cast %33 : vector<1x128x128xbf16> to vector<128x128xbf16>
    %cst_38 = arith.constant dense<0.000000e+00> : vector<24x128xf32>
    %35 = tpu.matmul %32, %34, %cst_38 {dimension_numbers = #tpu.dot_dimension_numbers<[1], [0], [0], [1], [0, 0, 1, 1], [], []>} : vector<24x128xbf16>, vector<128x128xbf16>, vector<24x128xf32> -> vector<24x128xf32>
    %36 = arith.addf %30, %35 : vector<24x128xf32>
    %c0_39 = arith.constant 0 : index
    %c0_40 = arith.constant 0 : index
    %c12 = arith.constant 12 : index
    %c0_41 = arith.constant 0 : index
    %37 = vector.load %arg1[%c0_39, %c0_40, %c12, %c0_41] : memref<1x1x40x128xbf16, #tpu.memory_space<vmem>>, vector<1x1x24x128xbf16>
    %38 = vector.shape_cast %37 : vector<1x1x24x128xbf16> to vector<24x128xbf16>
    %c6_42 = arith.constant 6 : index
    %c0_43 = arith.constant 0 : index
    %c0_44 = arith.constant 0 : index
    %39 = vector.load %arg2[%c6_42, %c0_43, %c0_44] : memref<9x128x128xbf16, #tpu.memory_space<vmem>>, vector<1x128x128xbf16>
    %40 = vector.shape_cast %39 : vector<1x128x128xbf16> to vector<128x128xbf16>
    %cst_45 = arith.constant dense<0.000000e+00> : vector<24x128xf32>
    %41 = tpu.matmul %38, %40, %cst_45 {dimension_numbers = #tpu.dot_dimension_numbers<[1], [0], [0], [1], [0, 0, 1, 1], [], []>} : vector<24x128xbf16>, vector<128x128xbf16>, vector<24x128xf32> -> vector<24x128xf32>
    %42 = arith.addf %36, %41 : vector<24x128xf32>
    %c0_46 = arith.constant 0 : index
    %c0_47 = arith.constant 0 : index
    %c13 = arith.constant 13 : index
    %c0_48 = arith.constant 0 : index
    %43 = vector.load %arg1[%c0_46, %c0_47, %c13, %c0_48] : memref<1x1x40x128xbf16, #tpu.memory_space<vmem>>, vector<1x1x24x128xbf16>
    %44 = vector.shape_cast %43 : vector<1x1x24x128xbf16> to vector<24x128xbf16>
    %c7_49 = arith.constant 7 : index
    %c0_50 = arith.constant 0 : index
    %c0_51 = arith.constant 0 : index
    %45 = vector.load %arg2[%c7_49, %c0_50, %c0_51] : memref<9x128x128xbf16, #tpu.memory_space<vmem>>, vector<1x128x128xbf16>
    %46 = vector.shape_cast %45 : vector<1x128x128xbf16> to vector<128x128xbf16>
    %cst_52 = arith.constant dense<0.000000e+00> : vector<24x128xf32>
    %47 = tpu.matmul %44, %46, %cst_52 {dimension_numbers = #tpu.dot_dimension_numbers<[1], [0], [0], [1], [0, 0, 1, 1], [], []>} : vector<24x128xbf16>, vector<128x128xbf16>, vector<24x128xf32> -> vector<24x128xf32>
    %48 = arith.addf %42, %47 : vector<24x128xf32>
    %c0_53 = arith.constant 0 : index
    %c0_54 = arith.constant 0 : index
    %c14 = arith.constant 14 : index
    %c0_55 = arith.constant 0 : index
    %49 = vector.load %arg1[%c0_53, %c0_54, %c14, %c0_55] : memref<1x1x40x128xbf16, #tpu.memory_space<vmem>>, vector<1x1x24x128xbf16>
    %50 = vector.shape_cast %49 : vector<1x1x24x128xbf16> to vector<24x128xbf16>
    %c8_56 = arith.constant 8 : index
    %c0_57 = arith.constant 0 : index
    %c0_58 = arith.constant 0 : index
    %51 = vector.load %arg2[%c8_56, %c0_57, %c0_58] : memref<9x128x128xbf16, #tpu.memory_space<vmem>>, vector<1x128x128xbf16>
    %52 = vector.shape_cast %51 : vector<1x128x128xbf16> to vector<128x128xbf16>
    %cst_59 = arith.constant dense<0.000000e+00> : vector<24x128xf32>
    %53 = tpu.matmul %50, %52, %cst_59 {dimension_numbers = #tpu.dot_dimension_numbers<[1], [0], [0], [1], [0, 0, 1, 1], [], []>} : vector<24x128xbf16>, vector<128x128xbf16>, vector<24x128xf32> -> vector<24x128xf32>
    %54 = arith.addf %48, %53 : vector<24x128xf32>
    %c0_60 = arith.constant 0 : index
    %c0_61 = arith.constant 0 : index
    %55 = vector.load %arg3[%c0_60, %c0_61] : memref<1x128xf32, #tpu.memory_space<vmem>>, vector<1x128xf32>
    %56 = vector.broadcast %55 : vector<1x128xf32> to vector<24x128xf32>
    %57 = arith.addf %54, %56 : vector<24x128xf32>
    %c0_62 = arith.constant 0 : index
    %c0_63 = arith.constant 0 : index
    %c0_64 = arith.constant 0 : index
    %58 = vector.load %arg4[%c0_62, %c0_63, %c0_64] : memref<1x24x128xbf16, #tpu.memory_space<vmem>>, vector<1x24x128xbf16>
    %59 = vector.shape_cast %58 : vector<1x24x128xbf16> to vector<24x128xbf16>
    %60 = arith.extf %59 : vector<24x128xbf16> to vector<24x128xf32>
    %61 = arith.addf %57, %60 : vector<24x128xf32>
    %cst_65 = arith.constant 0.000000e+00 : f32
    %62 = vector.broadcast %cst_65 : f32 to vector<24x128xf32>
    %63 = arith.cmpf ogt, %61, %62 : vector<24x128xf32>
    %cst_66 = arith.constant 0.00999999977 : f32
    %64 = vector.broadcast %cst_66 : f32 to vector<24x128xf32>
    %65 = arith.mulf %61, %64 : vector<24x128xf32>
    %66 = arith.select %63, %61, %65 : vector<24x128xi1>, vector<24x128xf32>
    %67 = arith.truncf %66 : vector<24x128xf32> to vector<24x128xbf16>
    %c0_67 = arith.constant 0 : index
    %c0_68 = arith.constant 0 : index
    %c0_69 = arith.constant 0 : index
    %68 = vector.load %arg5[%c0_67, %c0_68, %c0_69] : memref<1x24x128xbf16, #tpu.memory_space<vmem>>, vector<1x24x128xbf16>
    %69 = vector.shape_cast %68 : vector<1x24x128xbf16> to vector<24x128xbf16>
    %70 = vector.shape_cast %67 : vector<24x128xbf16> to vector<1x24x128xbf16>
    tpu.vector_store %arg5[%c0_67, %c0_68, %c0_69], %70 {strides = array<i32>} : memref<1x24x128xbf16, #tpu.memory_space<vmem>>, vector<1x24x128xbf16>,
    return
  }
  func.func @transform_0(%arg0: i32) -> (i32, i32, i32, i32) {
    %c0_i32 = arith.constant 0 : i32
    %c0_i32_0 = arith.constant 0 : i32
    %c0_i32_1 = arith.constant 0 : i32
    %c0_i32_2 = arith.constant 0 : i32
    return %arg0, %c0_i32, %c0_i32_0, %c0_i32_1 : i32, i32, i32, i32
  }
  func.func @transform_1(%arg0: i32) -> (i32, i32, i32) {
    %c0_i32 = arith.constant 0 : i32
    %c0_i32_0 = arith.constant 0 : i32
    %c0_i32_1 = arith.constant 0 : i32
    %c0_i32_2 = arith.constant 0 : i32
    return %c0_i32, %c0_i32_0, %c0_i32_1 : i32, i32, i32
  }
  func.func @transform_2(%arg0: i32) -> (i32, i32) {
    %c0_i32 = arith.constant 0 : i32
    %c0_i32_0 = arith.constant 0 : i32
    %c0_i32_1 = arith.constant 0 : i32
    return %c0_i32, %c0_i32_0 : i32, i32
  }
  func.func @transform_3(%arg0: i32) -> (i32, i32, i32) {
    %c0_i32 = arith.constant 0 : i32
    %c0_i32_0 = arith.constant 0 : i32
    %c0_i32_1 = arith.constant 0 : i32
    return %arg0, %c0_i32, %c0_i32_0 : i32, i32, i32
  }
  func.func @transform_4(%arg0: i32) -> (i32, i32, i32) {
    %c0_i32 = arith.constant 0 : i32
    %c0_i32_0 = arith.constant 0 : i32
    %c0_i32_1 = arith.constant 0 : i32
    return %arg0, %c0_i32, %c0_i32_0 : i32, i32, i32
  }
}

module attributes {stable_mosaic.version = 11 : i64} {
  func.func @kernel(%arg0: i32, %arg1: memref<1x4x8x128xbf16, #tpu.memory_space<vmem>>, %arg2: memref<1x128x128xbf16, #tpu.memory_space<vmem>>, %arg3: memref<1x128xf32, #tpu.memory_space<vmem>>, %arg4: memref<1x8x128xbf16, #tpu.memory_space<vmem>>) attributes {dimension_semantics = [#tpu.dimension_semantics<parallel>], iteration_bounds = array<i64: 2>, scalar_prefetch = 0 : i64, scratch_operands = 0 : i64, tpu.core_type = #tpu.core_type<tc>, window_params = [{transform_indices = @transform_0, window_bounds = array<i64: 1, 4, 8, 128>}, {pipeline_mode = #tpu.pipeline_mode<synchronous>, transform_indices = @transform_1, window_bounds = array<i64: 1, 128, 128>}, {pipeline_mode = #tpu.pipeline_mode<synchronous>, transform_indices = @transform_2, window_bounds = array<i64: 1, 128>}, {transform_indices = @transform_3, window_bounds = array<i64: 1, 8, 128>}]} {
    %cst = arith.constant 0.000000e+00 : f32
    %0 = vector.broadcast %cst : f32 to vector<8x128xf32>
    %c0 = arith.constant 0 : index
    %c0_0 = arith.constant 0 : index
    %c0_1 = arith.constant 0 : index
    %c0_2 = arith.constant 0 : index
    %1 = vector.load %arg1[%c0, %c0_0, %c0_1, %c0_2] : memref<1x4x8x128xbf16, #tpu.memory_space<vmem>>, vector<1x1x8x128xbf16>
    %2 = vector.shape_cast %1 : vector<1x1x8x128xbf16> to vector<8x128xbf16>
    %c0_3 = arith.constant 0 : index
    %c0_4 = arith.constant 0 : index
    %c0_5 = arith.constant 0 : index
    %3 = vector.load %arg2[%c0_3, %c0_4, %c0_5] : memref<1x128x128xbf16, #tpu.memory_space<vmem>>, vector<1x128x128xbf16>
    %4 = vector.shape_cast %3 : vector<1x128x128xbf16> to vector<128x128xbf16>
    %cst_6 = arith.constant dense<0.000000e+00> : vector<8x128xf32>
    %5 = tpu.matmul %2, %4, %cst_6 {dimension_numbers = #tpu.dot_dimension_numbers<[1], [0], [0], [1], [0, 0, 1, 1], [], []>} : vector<8x128xbf16>, vector<128x128xbf16>, vector<8x128xf32> -> vector<8x128xf32>
    %6 = arith.addf %0, %5 : vector<8x128xf32>
    %c0_7 = arith.constant 0 : index
    %c0_8 = arith.constant 0 : index
    %7 = vector.load %arg3[%c0_7, %c0_8] : memref<1x128xf32, #tpu.memory_space<vmem>>, vector<1x128xf32>
    %8 = vector.broadcast %7 : vector<1x128xf32> to vector<8x128xf32>
    %9 = arith.addf %6, %8 : vector<8x128xf32>
    %10 = arith.truncf %9 : vector<8x128xf32> to vector<8x128xbf16>
    %c0_9 = arith.constant 0 : index
    %c0_10 = arith.constant 0 : index
    %c0_11 = arith.constant 0 : index
    %11 = vector.load %arg4[%c0_9, %c0_10, %c0_11] : memref<1x8x128xbf16, #tpu.memory_space<vmem>>, vector<1x8x128xbf16>
    %12 = vector.shape_cast %11 : vector<1x8x128xbf16> to vector<8x128xbf16>
    %13 = vector.shape_cast %10 : vector<8x128xbf16> to vector<1x8x128xbf16>
    tpu.vector_store %arg4[%c0_9, %c0_10, %c0_11], %13 {strides = array<i32>} : memref<1x8x128xbf16, #tpu.memory_space<vmem>>, vector<1x8x128xbf16>,
    return
  }
  func.func @transform_0(%arg0: i32) -> (i32, i32, i32, i32) {
    %c0_i32 = arith.constant 0 : i32
    %c0_i32_0 = arith.constant 0 : i32
    %c0_i32_1 = arith.constant 0 : i32
    %c0_i32_2 = arith.constant 0 : i32
    return %arg0, %c0_i32, %c0_i32_0, %c0_i32_1 : i32, i32, i32, i32
  }
  func.func @transform_1(%arg0: i32) -> (i32, i32, i32) {
    %c0_i32 = arith.constant 0 : i32
    %c0_i32_0 = arith.constant 0 : i32
    %c0_i32_1 = arith.constant 0 : i32
    %c0_i32_2 = arith.constant 0 : i32
    return %c0_i32, %c0_i32_0, %c0_i32_1 : i32, i32, i32
  }
  func.func @transform_2(%arg0: i32) -> (i32, i32) {
    %c0_i32 = arith.constant 0 : i32
    %c0_i32_0 = arith.constant 0 : i32
    %c0_i32_1 = arith.constant 0 : i32
    return %c0_i32, %c0_i32_0 : i32, i32
  }
  func.func @transform_3(%arg0: i32) -> (i32, i32, i32) {
    %c0_i32 = arith.constant 0 : i32
    %c0_i32_0 = arith.constant 0 : i32
    %c0_i32_1 = arith.constant 0 : i32
    return %arg0, %c0_i32, %c0_i32_0 : i32, i32, i32
  }
}

module attributes {stable_mosaic.version = 11 : i64} {
  func.func @kernel(%arg0: i32, %arg1: memref<1x4x16x128xbf16, #tpu.memory_space<vmem>>, %arg2: memref<9x128x128xbf16, #tpu.memory_space<vmem>>, %arg3: memref<1x128xf32, #tpu.memory_space<vmem>>, %arg4: memref<1x8x128xbf16, #tpu.memory_space<vmem>>) attributes {dimension_semantics = [#tpu.dimension_semantics<parallel>], iteration_bounds = array<i64: 2>, scalar_prefetch = 0 : i64, scratch_operands = 0 : i64, tpu.core_type = #tpu.core_type<tc>, window_params = [{transform_indices = @transform_0, window_bounds = array<i64: 1, 4, 16, 128>}, {pipeline_mode = #tpu.pipeline_mode<synchronous>, transform_indices = @transform_1, window_bounds = array<i64: 9, 128, 128>}, {pipeline_mode = #tpu.pipeline_mode<synchronous>, transform_indices = @transform_2, window_bounds = array<i64: 1, 128>}, {transform_indices = @transform_3, window_bounds = array<i64: 1, 8, 128>}]} {
    %cst = arith.constant 0.000000e+00 : f32
    %0 = vector.broadcast %cst : f32 to vector<8x128xf32>
    %c0 = arith.constant 0 : index
    %c0_0 = arith.constant 0 : index
    %c0_1 = arith.constant 0 : index
    %c0_2 = arith.constant 0 : index
    %1 = vector.load %arg1[%c0, %c0_0, %c0_1, %c0_2] : memref<1x4x16x128xbf16, #tpu.memory_space<vmem>>, vector<1x1x8x128xbf16>
    %2 = vector.shape_cast %1 : vector<1x1x8x128xbf16> to vector<8x128xbf16>
    %c0_3 = arith.constant 0 : index
    %c0_4 = arith.constant 0 : index
    %c0_5 = arith.constant 0 : index
    %3 = vector.load %arg2[%c0_3, %c0_4, %c0_5] : memref<9x128x128xbf16, #tpu.memory_space<vmem>>, vector<1x128x128xbf16>
    %4 = vector.shape_cast %3 : vector<1x128x128xbf16> to vector<128x128xbf16>
    %cst_6 = arith.constant dense<0.000000e+00> : vector<8x128xf32>
    %5 = tpu.matmul %2, %4, %cst_6 {dimension_numbers = #tpu.dot_dimension_numbers<[1], [0], [0], [1], [0, 0, 1, 1], [], []>} : vector<8x128xbf16>, vector<128x128xbf16>, vector<8x128xf32> -> vector<8x128xf32>
    %6 = arith.addf %0, %5 : vector<8x128xf32>
    %c0_7 = arith.constant 0 : index
    %c1 = arith.constant 1 : index
    %c0_8 = arith.constant 0 : index
    %c0_9 = arith.constant 0 : index
    %7 = vector.load %arg1[%c0_7, %c1, %c0_8, %c0_9] : memref<1x4x16x128xbf16, #tpu.memory_space<vmem>>, vector<1x1x8x128xbf16>
    %8 = vector.shape_cast %7 : vector<1x1x8x128xbf16> to vector<8x128xbf16>
    %c1_10 = arith.constant 1 : index
    %c0_11 = arith.constant 0 : index
    %c0_12 = arith.constant 0 : index
    %9 = vector.load %arg2[%c1_10, %c0_11, %c0_12] : memref<9x128x128xbf16, #tpu.memory_space<vmem>>, vector<1x128x128xbf16>
    %10 = vector.shape_cast %9 : vector<1x128x128xbf16> to vector<128x128xbf16>
    %cst_13 = arith.constant dense<0.000000e+00> : vector<8x128xf32>
    %11 = tpu.matmul %8, %10, %cst_13 {dimension_numbers = #tpu.dot_dimension_numbers<[1], [0], [0], [1], [0, 0, 1, 1], [], []>} : vector<8x128xbf16>, vector<128x128xbf16>, vector<8x128xf32> -> vector<8x128xf32>
    %12 = arith.addf %6, %11 : vector<8x128xf32>
    %c0_14 = arith.constant 0 : index
    %c0_15 = arith.constant 0 : index
    %c1_16 = arith.constant 1 : index
    %c0_17 = arith.constant 0 : index
    %13 = vector.load %arg1[%c0_14, %c0_15, %c1_16, %c0_17] : memref<1x4x16x128xbf16, #tpu.memory_space<vmem>>, vector<1x1x8x128xbf16>
    %14 = vector.shape_cast %13 : vector<1x1x8x128xbf16> to vector<8x128xbf16>
    %c2 = arith.constant 2 : index
    %c0_18 = arith.constant 0 : index
    %c0_19 = arith.constant 0 : index
    %15 = vector.load %arg2[%c2, %c0_18, %c0_19] : memref<9x128x128xbf16, #tpu.memory_space<vmem>>, vector<1x128x128xbf16>
    %16 = vector.shape_cast %15 : vector<1x128x128xbf16> to vector<128x128xbf16>
    %cst_20 = arith.constant dense<0.000000e+00> : vector<8x128xf32>
    %17 = tpu.matmul %14, %16, %cst_20 {dimension_numbers = #tpu.dot_dimension_numbers<[1], [0], [0], [1], [0, 0, 1, 1], [], []>} : vector<8x128xbf16>, vector<128x128xbf16>, vector<8x128xf32> -> vector<8x128xf32>
    %18 = arith.addf %12, %17 : vector<8x128xf32>
    %c0_21 = arith.constant 0 : index
    %c2_22 = arith.constant 2 : index
    %c0_23 = arith.constant 0 : index
    %c0_24 = arith.constant 0 : index
    %19 = vector.load %arg1[%c0_21, %c2_22, %c0_23, %c0_24] : memref<1x4x16x128xbf16, #tpu.memory_space<vmem>>, vector<1x1x8x128xbf16>
    %20 = vector.shape_cast %19 : vector<1x1x8x128xbf16> to vector<8x128xbf16>
    %c3 = arith.constant 3 : index
    %c0_25 = arith.constant 0 : index
    %c0_26 = arith.constant 0 : index
    %21 = vector.load %arg2[%c3, %c0_25, %c0_26] : memref<9x128x128xbf16, #tpu.memory_space<vmem>>, vector<1x128x128xbf16>
    %22 = vector.shape_cast %21 : vector<1x128x128xbf16> to vector<128x128xbf16>
    %cst_27 = arith.constant dense<0.000000e+00> : vector<8x128xf32>
    %23 = tpu.matmul %20, %22, %cst_27 {dimension_numbers = #tpu.dot_dimension_numbers<[1], [0], [0], [1], [0, 0, 1, 1], [], []>} : vector<8x128xbf16>, vector<128x128xbf16>, vector<8x128xf32> -> vector<8x128xf32>
    %24 = arith.addf %18, %23 : vector<8x128xf32>
    %c0_28 = arith.constant 0 : index
    %c3_29 = arith.constant 3 : index
    %c0_30 = arith.constant 0 : index
    %c0_31 = arith.constant 0 : index
    %25 = vector.load %arg1[%c0_28, %c3_29, %c0_30, %c0_31] : memref<1x4x16x128xbf16, #tpu.memory_space<vmem>>, vector<1x1x8x128xbf16>
    %26 = vector.shape_cast %25 : vector<1x1x8x128xbf16> to vector<8x128xbf16>
    %c4 = arith.constant 4 : index
    %c0_32 = arith.constant 0 : index
    %c0_33 = arith.constant 0 : index
    %27 = vector.load %arg2[%c4, %c0_32, %c0_33] : memref<9x128x128xbf16, #tpu.memory_space<vmem>>, vector<1x128x128xbf16>
    %28 = vector.shape_cast %27 : vector<1x128x128xbf16> to vector<128x128xbf16>
    %cst_34 = arith.constant dense<0.000000e+00> : vector<8x128xf32>
    %29 = tpu.matmul %26, %28, %cst_34 {dimension_numbers = #tpu.dot_dimension_numbers<[1], [0], [0], [1], [0, 0, 1, 1], [], []>} : vector<8x128xbf16>, vector<128x128xbf16>, vector<8x128xf32> -> vector<8x128xf32>
    %30 = arith.addf %24, %29 : vector<8x128xf32>
    %c0_35 = arith.constant 0 : index
    %c2_36 = arith.constant 2 : index
    %c1_37 = arith.constant 1 : index
    %c0_38 = arith.constant 0 : index
    %31 = vector.load %arg1[%c0_35, %c2_36, %c1_37, %c0_38] : memref<1x4x16x128xbf16, #tpu.memory_space<vmem>>, vector<1x1x8x128xbf16>
    %32 = vector.shape_cast %31 : vector<1x1x8x128xbf16> to vector<8x128xbf16>
    %c5 = arith.constant 5 : index
    %c0_39 = arith.constant 0 : index
    %c0_40 = arith.constant 0 : index
    %33 = vector.load %arg2[%c5, %c0_39, %c0_40] : memref<9x128x128xbf16, #tpu.memory_space<vmem>>, vector<1x128x128xbf16>
    %34 = vector.shape_cast %33 : vector<1x128x128xbf16> to vector<128x128xbf16>
    %cst_41 = arith.constant dense<0.000000e+00> : vector<8x128xf32>
    %35 = tpu.matmul %32, %34, %cst_41 {dimension_numbers = #tpu.dot_dimension_numbers<[1], [0], [0], [1], [0, 0, 1, 1], [], []>} : vector<8x128xbf16>, vector<128x128xbf16>, vector<8x128xf32> -> vector<8x128xf32>
    %36 = arith.addf %30, %35 : vector<8x128xf32>
    %c0_42 = arith.constant 0 : index
    %c0_43 = arith.constant 0 : index
    %c3_44 = arith.constant 3 : index
    %c0_45 = arith.constant 0 : index
    %37 = vector.load %arg1[%c0_42, %c0_43, %c3_44, %c0_45] : memref<1x4x16x128xbf16, #tpu.memory_space<vmem>>, vector<1x1x8x128xbf16>
    %38 = vector.shape_cast %37 : vector<1x1x8x128xbf16> to vector<8x128xbf16>
    %c6 = arith.constant 6 : index
    %c0_46 = arith.constant 0 : index
    %c0_47 = arith.constant 0 : index
    %39 = vector.load %arg2[%c6, %c0_46, %c0_47] : memref<9x128x128xbf16, #tpu.memory_space<vmem>>, vector<1x128x128xbf16>
    %40 = vector.shape_cast %39 : vector<1x128x128xbf16> to vector<128x128xbf16>
    %cst_48 = arith.constant dense<0.000000e+00> : vector<8x128xf32>
    %41 = tpu.matmul %38, %40, %cst_48 {dimension_numbers = #tpu.dot_dimension_numbers<[1], [0], [0], [1], [0, 0, 1, 1], [], []>} : vector<8x128xbf16>, vector<128x128xbf16>, vector<8x128xf32> -> vector<8x128xf32>
    %42 = arith.addf %36, %41 : vector<8x128xf32>
    %c0_49 = arith.constant 0 : index
    %c1_50 = arith.constant 1 : index
    %c3_51 = arith.constant 3 : index
    %c0_52 = arith.constant 0 : index
    %43 = vector.load %arg1[%c0_49, %c1_50, %c3_51, %c0_52] : memref<1x4x16x128xbf16, #tpu.memory_space<vmem>>, vector<1x1x8x128xbf16>
    %44 = vector.shape_cast %43 : vector<1x1x8x128xbf16> to vector<8x128xbf16>
    %c7 = arith.constant 7 : index
    %c0_53 = arith.constant 0 : index
    %c0_54 = arith.constant 0 : index
    %45 = vector.load %arg2[%c7, %c0_53, %c0_54] : memref<9x128x128xbf16, #tpu.memory_space<vmem>>, vector<1x128x128xbf16>
    %46 = vector.shape_cast %45 : vector<1x128x128xbf16> to vector<128x128xbf16>
    %cst_55 = arith.constant dense<0.000000e+00> : vector<8x128xf32>
    %47 = tpu.matmul %44, %46, %cst_55 {dimension_numbers = #tpu.dot_dimension_numbers<[1], [0], [0], [1], [0, 0, 1, 1], [], []>} : vector<8x128xbf16>, vector<128x128xbf16>, vector<8x128xf32> -> vector<8x128xf32>
    %48 = arith.addf %42, %47 : vector<8x128xf32>
    %c0_56 = arith.constant 0 : index
    %c0_57 = arith.constant 0 : index
    %c4_58 = arith.constant 4 : index
    %c0_59 = arith.constant 0 : index
    %49 = vector.load %arg1[%c0_56, %c0_57, %c4_58, %c0_59] : memref<1x4x16x128xbf16, #tpu.memory_space<vmem>>, vector<1x1x8x128xbf16>
    %50 = vector.shape_cast %49 : vector<1x1x8x128xbf16> to vector<8x128xbf16>
    %c8 = arith.constant 8 : index
    %c0_60 = arith.constant 0 : index
    %c0_61 = arith.constant 0 : index
    %51 = vector.load %arg2[%c8, %c0_60, %c0_61] : memref<9x128x128xbf16, #tpu.memory_space<vmem>>, vector<1x128x128xbf16>
    %52 = vector.shape_cast %51 : vector<1x128x128xbf16> to vector<128x128xbf16>
    %cst_62 = arith.constant dense<0.000000e+00> : vector<8x128xf32>
    %53 = tpu.matmul %50, %52, %cst_62 {dimension_numbers = #tpu.dot_dimension_numbers<[1], [0], [0], [1], [0, 0, 1, 1], [], []>} : vector<8x128xbf16>, vector<128x128xbf16>, vector<8x128xf32> -> vector<8x128xf32>
    %54 = arith.addf %48, %53 : vector<8x128xf32>
    %c0_63 = arith.constant 0 : index
    %c0_64 = arith.constant 0 : index
    %55 = vector.load %arg3[%c0_63, %c0_64] : memref<1x128xf32, #tpu.memory_space<vmem>>, vector<1x128xf32>
    %56 = vector.broadcast %55 : vector<1x128xf32> to vector<8x128xf32>
    %57 = arith.addf %54, %56 : vector<8x128xf32>
    %cst_65 = arith.constant 0.000000e+00 : f32
    %58 = vector.broadcast %cst_65 : f32 to vector<8x128xf32>
    %59 = arith.cmpf ogt, %57, %58 : vector<8x128xf32>
    %cst_66 = arith.constant 0.00999999977 : f32
    %60 = vector.broadcast %cst_66 : f32 to vector<8x128xf32>
    %61 = arith.mulf %57, %60 : vector<8x128xf32>
    %62 = arith.select %59, %57, %61 : vector<8x128xi1>, vector<8x128xf32>
    %63 = arith.truncf %62 : vector<8x128xf32> to vector<8x128xbf16>
    %c0_67 = arith.constant 0 : index
    %c0_68 = arith.constant 0 : index
    %c0_69 = arith.constant 0 : index
    %64 = vector.load %arg4[%c0_67, %c0_68, %c0_69] : memref<1x8x128xbf16, #tpu.memory_space<vmem>>, vector<1x8x128xbf16>
    %65 = vector.shape_cast %64 : vector<1x8x128xbf16> to vector<8x128xbf16>
    %66 = vector.shape_cast %63 : vector<8x128xbf16> to vector<1x8x128xbf16>
    tpu.vector_store %arg4[%c0_67, %c0_68, %c0_69], %66 {strides = array<i32>} : memref<1x8x128xbf16, #tpu.memory_space<vmem>>, vector<1x8x128xbf16>,
    return
  }
  func.func @transform_0(%arg0: i32) -> (i32, i32, i32, i32) {
    %c0_i32 = arith.constant 0 : i32
    %c0_i32_0 = arith.constant 0 : i32
    %c0_i32_1 = arith.constant 0 : i32
    %c0_i32_2 = arith.constant 0 : i32
    return %arg0, %c0_i32, %c0_i32_0, %c0_i32_1 : i32, i32, i32, i32
  }
  func.func @transform_1(%arg0: i32) -> (i32, i32, i32) {
    %c0_i32 = arith.constant 0 : i32
    %c0_i32_0 = arith.constant 0 : i32
    %c0_i32_1 = arith.constant 0 : i32
    %c0_i32_2 = arith.constant 0 : i32
    return %c0_i32, %c0_i32_0, %c0_i32_1 : i32, i32, i32
  }
  func.func @transform_2(%arg0: i32) -> (i32, i32) {
    %c0_i32 = arith.constant 0 : i32
    %c0_i32_0 = arith.constant 0 : i32
    %c0_i32_1 = arith.constant 0 : i32
    return %c0_i32, %c0_i32_0 : i32, i32
  }
  func.func @transform_3(%arg0: i32) -> (i32, i32, i32) {
    %c0_i32 = arith.constant 0 : i32
    %c0_i32_0 = arith.constant 0 : i32
    %c0_i32_1 = arith.constant 0 : i32
    return %arg0, %c0_i32, %c0_i32_0 : i32, i32, i32
  }
}

module attributes {stable_mosaic.version = 11 : i64} {
  func.func @kernel(%arg0: i32, %arg1: memref<1x1x24x128xbf16, #tpu.memory_space<vmem>>, %arg2: memref<9x128x128xbf16, #tpu.memory_space<vmem>>, %arg3: memref<1x128xf32, #tpu.memory_space<vmem>>, %arg4: memref<1x8x128xbf16, #tpu.memory_space<vmem>>, %arg5: memref<1x8x128xbf16, #tpu.memory_space<vmem>>) attributes {dimension_semantics = [#tpu.dimension_semantics<parallel>], iteration_bounds = array<i64: 2>, scalar_prefetch = 0 : i64, scratch_operands = 0 : i64, tpu.core_type = #tpu.core_type<tc>, window_params = [{transform_indices = @transform_0, window_bounds = array<i64: 1, 1, 24, 128>}, {pipeline_mode = #tpu.pipeline_mode<synchronous>, transform_indices = @transform_1, window_bounds = array<i64: 9, 128, 128>}, {pipeline_mode = #tpu.pipeline_mode<synchronous>, transform_indices = @transform_2, window_bounds = array<i64: 1, 128>}, {transform_indices = @transform_3, window_bounds = array<i64: 1, 8, 128>}, {transform_indices = @transform_4, window_bounds = array<i64: 1, 8, 128>}]} {
    %cst = arith.constant 0.000000e+00 : f32
    %0 = vector.broadcast %cst : f32 to vector<8x128xf32>
    %c0 = arith.constant 0 : index
    %c0_0 = arith.constant 0 : index
    %c0_1 = arith.constant 0 : index
    %c0_2 = arith.constant 0 : index
    %1 = vector.load %arg1[%c0, %c0_0, %c0_1, %c0_2] : memref<1x1x24x128xbf16, #tpu.memory_space<vmem>>, vector<1x1x8x128xbf16>
    %2 = vector.shape_cast %1 : vector<1x1x8x128xbf16> to vector<8x128xbf16>
    %c0_3 = arith.constant 0 : index
    %c0_4 = arith.constant 0 : index
    %c0_5 = arith.constant 0 : index
    %3 = vector.load %arg2[%c0_3, %c0_4, %c0_5] : memref<9x128x128xbf16, #tpu.memory_space<vmem>>, vector<1x128x128xbf16>
    %4 = vector.shape_cast %3 : vector<1x128x128xbf16> to vector<128x128xbf16>
    %cst_6 = arith.constant dense<0.000000e+00> : vector<8x128xf32>
    %5 = tpu.matmul %2, %4, %cst_6 {dimension_numbers = #tpu.dot_dimension_numbers<[1], [0], [0], [1], [0, 0, 1, 1], [], []>} : vector<8x128xbf16>, vector<128x128xbf16>, vector<8x128xf32> -> vector<8x128xf32>
    %6 = arith.addf %0, %5 : vector<8x128xf32>
    %c0_7 = arith.constant 0 : index
    %c0_8 = arith.constant 0 : index
    %c1 = arith.constant 1 : index
    %c0_9 = arith.constant 0 : index
    %7 = vector.load %arg1[%c0_7, %c0_8, %c1, %c0_9] : memref<1x1x24x128xbf16, #tpu.memory_space<vmem>>, vector<1x1x8x128xbf16>
    %8 = vector.shape_cast %7 : vector<1x1x8x128xbf16> to vector<8x128xbf16>
    %c1_10 = arith.constant 1 : index
    %c0_11 = arith.constant 0 : index
    %c0_12 = arith.constant 0 : index
    %9 = vector.load %arg2[%c1_10, %c0_11, %c0_12] : memref<9x128x128xbf16, #tpu.memory_space<vmem>>, vector<1x128x128xbf16>
    %10 = vector.shape_cast %9 : vector<1x128x128xbf16> to vector<128x128xbf16>
    %cst_13 = arith.constant dense<0.000000e+00> : vector<8x128xf32>
    %11 = tpu.matmul %8, %10, %cst_13 {dimension_numbers = #tpu.dot_dimension_numbers<[1], [0], [0], [1], [0, 0, 1, 1], [], []>} : vector<8x128xbf16>, vector<128x128xbf16>, vector<8x128xf32> -> vector<8x128xf32>
    %12 = arith.addf %6, %11 : vector<8x128xf32>
    %c0_14 = arith.constant 0 : index
    %c0_15 = arith.constant 0 : index
    %c2 = arith.constant 2 : index
    %c0_16 = arith.constant 0 : index
    %13 = vector.load %arg1[%c0_14, %c0_15, %c2, %c0_16] : memref<1x1x24x128xbf16, #tpu.memory_space<vmem>>, vector<1x1x8x128xbf16>
    %14 = vector.shape_cast %13 : vector<1x1x8x128xbf16> to vector<8x128xbf16>
    %c2_17 = arith.constant 2 : index
    %c0_18 = arith.constant 0 : index
    %c0_19 = arith.constant 0 : index
    %15 = vector.load %arg2[%c2_17, %c0_18, %c0_19] : memref<9x128x128xbf16, #tpu.memory_space<vmem>>, vector<1x128x128xbf16>
    %16 = vector.shape_cast %15 : vector<1x128x128xbf16> to vector<128x128xbf16>
    %cst_20 = arith.constant dense<0.000000e+00> : vector<8x128xf32>
    %17 = tpu.matmul %14, %16, %cst_20 {dimension_numbers = #tpu.dot_dimension_numbers<[1], [0], [0], [1], [0, 0, 1, 1], [], []>} : vector<8x128xbf16>, vector<128x128xbf16>, vector<8x128xf32> -> vector<8x128xf32>
    %18 = arith.addf %12, %17 : vector<8x128xf32>
    %c0_21 = arith.constant 0 : index
    %c0_22 = arith.constant 0 : index
    %c4 = arith.constant 4 : index
    %c0_23 = arith.constant 0 : index
    %19 = vector.load %arg1[%c0_21, %c0_22, %c4, %c0_23] : memref<1x1x24x128xbf16, #tpu.memory_space<vmem>>, vector<1x1x8x128xbf16>
    %20 = vector.shape_cast %19 : vector<1x1x8x128xbf16> to vector<8x128xbf16>
    %c3 = arith.constant 3 : index
    %c0_24 = arith.constant 0 : index
    %c0_25 = arith.constant 0 : index
    %21 = vector.load %arg2[%c3, %c0_24, %c0_25] : memref<9x128x128xbf16, #tpu.memory_space<vmem>>, vector<1x128x128xbf16>
    %22 = vector.shape_cast %21 : vector<1x128x128xbf16> to vector<128x128xbf16>
    %cst_26 = arith.constant dense<0.000000e+00> : vector<8x128xf32>
    %23 = tpu.matmul %20, %22, %cst_26 {dimension_numbers = #tpu.dot_dimension_numbers<[1], [0], [0], [1], [0, 0, 1, 1], [], []>} : vector<8x128xbf16>, vector<128x128xbf16>, vector<8x128xf32> -> vector<8x128xf32>
    %24 = arith.addf %18, %23 : vector<8x128xf32>
    %c0_27 = arith.constant 0 : index
    %c0_28 = arith.constant 0 : index
    %c5 = arith.constant 5 : index
    %c0_29 = arith.constant 0 : index
    %25 = vector.load %arg1[%c0_27, %c0_28, %c5, %c0_29] : memref<1x1x24x128xbf16, #tpu.memory_space<vmem>>, vector<1x1x8x128xbf16>
    %26 = vector.shape_cast %25 : vector<1x1x8x128xbf16> to vector<8x128xbf16>
    %c4_30 = arith.constant 4 : index
    %c0_31 = arith.constant 0 : index
    %c0_32 = arith.constant 0 : index
    %27 = vector.load %arg2[%c4_30, %c0_31, %c0_32] : memref<9x128x128xbf16, #tpu.memory_space<vmem>>, vector<1x128x128xbf16>
    %28 = vector.shape_cast %27 : vector<1x128x128xbf16> to vector<128x128xbf16>
    %cst_33 = arith.constant dense<0.000000e+00> : vector<8x128xf32>
    %29 = tpu.matmul %26, %28, %cst_33 {dimension_numbers = #tpu.dot_dimension_numbers<[1], [0], [0], [1], [0, 0, 1, 1], [], []>} : vector<8x128xbf16>, vector<128x128xbf16>, vector<8x128xf32> -> vector<8x128xf32>
    %30 = arith.addf %24, %29 : vector<8x128xf32>
    %c0_34 = arith.constant 0 : index
    %c0_35 = arith.constant 0 : index
    %c6 = arith.constant 6 : index
    %c0_36 = arith.constant 0 : index
    %31 = vector.load %arg1[%c0_34, %c0_35, %c6, %c0_36] : memref<1x1x24x128xbf16, #tpu.memory_space<vmem>>, vector<1x1x8x128xbf16>
    %32 = vector.shape_cast %31 : vector<1x1x8x128xbf16> to vector<8x128xbf16>
    %c5_37 = arith.constant 5 : index
    %c0_38 = arith.constant 0 : index
    %c0_39 = arith.constant 0 : index
    %33 = vector.load %arg2[%c5_37, %c0_38, %c0_39] : memref<9x128x128xbf16, #tpu.memory_space<vmem>>, vector<1x128x128xbf16>
    %34 = vector.shape_cast %33 : vector<1x128x128xbf16> to vector<128x128xbf16>
    %cst_40 = arith.constant dense<0.000000e+00> : vector<8x128xf32>
    %35 = tpu.matmul %32, %34, %cst_40 {dimension_numbers = #tpu.dot_dimension_numbers<[1], [0], [0], [1], [0, 0, 1, 1], [], []>} : vector<8x128xbf16>, vector<128x128xbf16>, vector<8x128xf32> -> vector<8x128xf32>
    %36 = arith.addf %30, %35 : vector<8x128xf32>
    %c0_41 = arith.constant 0 : index
    %c0_42 = arith.constant 0 : index
    %c8 = arith.constant 8 : index
    %c0_43 = arith.constant 0 : index
    %37 = vector.load %arg1[%c0_41, %c0_42, %c8, %c0_43] : memref<1x1x24x128xbf16, #tpu.memory_space<vmem>>, vector<1x1x8x128xbf16>
    %38 = vector.shape_cast %37 : vector<1x1x8x128xbf16> to vector<8x128xbf16>
    %c6_44 = arith.constant 6 : index
    %c0_45 = arith.constant 0 : index
    %c0_46 = arith.constant 0 : index
    %39 = vector.load %arg2[%c6_44, %c0_45, %c0_46] : memref<9x128x128xbf16, #tpu.memory_space<vmem>>, vector<1x128x128xbf16>
    %40 = vector.shape_cast %39 : vector<1x128x128xbf16> to vector<128x128xbf16>
    %cst_47 = arith.constant dense<0.000000e+00> : vector<8x128xf32>
    %41 = tpu.matmul %38, %40, %cst_47 {dimension_numbers = #tpu.dot_dimension_numbers<[1], [0], [0], [1], [0, 0, 1, 1], [], []>} : vector<8x128xbf16>, vector<128x128xbf16>, vector<8x128xf32> -> vector<8x128xf32>
    %42 = arith.addf %36, %41 : vector<8x128xf32>
    %c0_48 = arith.constant 0 : index
    %c0_49 = arith.constant 0 : index
    %c9 = arith.constant 9 : index
    %c0_50 = arith.constant 0 : index
    %43 = vector.load %arg1[%c0_48, %c0_49, %c9, %c0_50] : memref<1x1x24x128xbf16, #tpu.memory_space<vmem>>, vector<1x1x8x128xbf16>
    %44 = vector.shape_cast %43 : vector<1x1x8x128xbf16> to vector<8x128xbf16>
    %c7 = arith.constant 7 : index
    %c0_51 = arith.constant 0 : index
    %c0_52 = arith.constant 0 : index
    %45 = vector.load %arg2[%c7, %c0_51, %c0_52] : memref<9x128x128xbf16, #tpu.memory_space<vmem>>, vector<1x128x128xbf16>
    %46 = vector.shape_cast %45 : vector<1x128x128xbf16> to vector<128x128xbf16>
    %cst_53 = arith.constant dense<0.000000e+00> : vector<8x128xf32>
    %47 = tpu.matmul %44, %46, %cst_53 {dimension_numbers = #tpu.dot_dimension_numbers<[1], [0], [0], [1], [0, 0, 1, 1], [], []>} : vector<8x128xbf16>, vector<128x128xbf16>, vector<8x128xf32> -> vector<8x128xf32>
    %48 = arith.addf %42, %47 : vector<8x128xf32>
    %c0_54 = arith.constant 0 : index
    %c0_55 = arith.constant 0 : index
    %c10 = arith.constant 10 : index
    %c0_56 = arith.constant 0 : index
    %49 = vector.load %arg1[%c0_54, %c0_55, %c10, %c0_56] : memref<1x1x24x128xbf16, #tpu.memory_space<vmem>>, vector<1x1x8x128xbf16>
    %50 = vector.shape_cast %49 : vector<1x1x8x128xbf16> to vector<8x128xbf16>
    %c8_57 = arith.constant 8 : index
    %c0_58 = arith.constant 0 : index
    %c0_59 = arith.constant 0 : index
    %51 = vector.load %arg2[%c8_57, %c0_58, %c0_59] : memref<9x128x128xbf16, #tpu.memory_space<vmem>>, vector<1x128x128xbf16>
    %52 = vector.shape_cast %51 : vector<1x128x128xbf16> to vector<128x128xbf16>
    %cst_60 = arith.constant dense<0.000000e+00> : vector<8x128xf32>
    %53 = tpu.matmul %50, %52, %cst_60 {dimension_numbers = #tpu.dot_dimension_numbers<[1], [0], [0], [1], [0, 0, 1, 1], [], []>} : vector<8x128xbf16>, vector<128x128xbf16>, vector<8x128xf32> -> vector<8x128xf32>
    %54 = arith.addf %48, %53 : vector<8x128xf32>
    %c0_61 = arith.constant 0 : index
    %c0_62 = arith.constant 0 : index
    %55 = vector.load %arg3[%c0_61, %c0_62] : memref<1x128xf32, #tpu.memory_space<vmem>>, vector<1x128xf32>
    %56 = vector.broadcast %55 : vector<1x128xf32> to vector<8x128xf32>
    %57 = arith.addf %54, %56 : vector<8x128xf32>
    %c0_63 = arith.constant 0 : index
    %c0_64 = arith.constant 0 : index
    %c0_65 = arith.constant 0 : index
    %58 = vector.load %arg4[%c0_63, %c0_64, %c0_65] : memref<1x8x128xbf16, #tpu.memory_space<vmem>>, vector<1x8x128xbf16>
    %59 = vector.shape_cast %58 : vector<1x8x128xbf16> to vector<8x128xbf16>
    %60 = arith.extf %59 : vector<8x128xbf16> to vector<8x128xf32>
    %61 = arith.addf %57, %60 : vector<8x128xf32>
    %cst_66 = arith.constant 0.000000e+00 : f32
    %62 = vector.broadcast %cst_66 : f32 to vector<8x128xf32>
    %63 = arith.cmpf ogt, %61, %62 : vector<8x128xf32>
    %cst_67 = arith.constant 0.00999999977 : f32
    %64 = vector.broadcast %cst_67 : f32 to vector<8x128xf32>
    %65 = arith.mulf %61, %64 : vector<8x128xf32>
    %66 = arith.select %63, %61, %65 : vector<8x128xi1>, vector<8x128xf32>
    %67 = arith.truncf %66 : vector<8x128xf32> to vector<8x128xbf16>
    %c0_68 = arith.constant 0 : index
    %c0_69 = arith.constant 0 : index
    %c0_70 = arith.constant 0 : index
    %68 = vector.load %arg5[%c0_68, %c0_69, %c0_70] : memref<1x8x128xbf16, #tpu.memory_space<vmem>>, vector<1x8x128xbf16>
    %69 = vector.shape_cast %68 : vector<1x8x128xbf16> to vector<8x128xbf16>
    %70 = vector.shape_cast %67 : vector<8x128xbf16> to vector<1x8x128xbf16>
    tpu.vector_store %arg5[%c0_68, %c0_69, %c0_70], %70 {strides = array<i32>} : memref<1x8x128xbf16, #tpu.memory_space<vmem>>, vector<1x8x128xbf16>,
    return
  }
  func.func @transform_0(%arg0: i32) -> (i32, i32, i32, i32) {
    %c0_i32 = arith.constant 0 : i32
    %c0_i32_0 = arith.constant 0 : i32
    %c0_i32_1 = arith.constant 0 : i32
    %c0_i32_2 = arith.constant 0 : i32
    return %arg0, %c0_i32, %c0_i32_0, %c0_i32_1 : i32, i32, i32, i32
  }
  func.func @transform_1(%arg0: i32) -> (i32, i32, i32) {
    %c0_i32 = arith.constant 0 : i32
    %c0_i32_0 = arith.constant 0 : i32
    %c0_i32_1 = arith.constant 0 : i32
    %c0_i32_2 = arith.constant 0 : i32
    return %c0_i32, %c0_i32_0, %c0_i32_1 : i32, i32, i32
  }
  func.func @transform_2(%arg0: i32) -> (i32, i32) {
    %c0_i32 = arith.constant 0 : i32
    %c0_i32_0 = arith.constant 0 : i32
    %c0_i32_1 = arith.constant 0 : i32
    return %c0_i32, %c0_i32_0 : i32, i32
  }
  func.func @transform_3(%arg0: i32) -> (i32, i32, i32) {
    %c0_i32 = arith.constant 0 : i32
    %c0_i32_0 = arith.constant 0 : i32
    %c0_i32_1 = arith.constant 0 : i32
    return %arg0, %c0_i32, %c0_i32_0 : i32, i32, i32
  }
  func.func @transform_4(%arg0: i32) -> (i32, i32, i32) {
    %c0_i32 = arith.constant 0 : i32
    %c0_i32_0 = arith.constant 0 : i32
    %c0_i32_1 = arith.constant 0 : i32
    return %arg0, %c0_i32, %c0_i32_0 : i32, i32, i32
  }
}

module attributes {stable_mosaic.version = 11 : i64} {
  func.func @kernel(%arg0: i32, %arg1: memref<1x1x24x128xbf16, #tpu.memory_space<vmem>>, %arg2: memref<9x128x128xbf16, #tpu.memory_space<vmem>>, %arg3: memref<1x128xf32, #tpu.memory_space<vmem>>, %arg4: memref<1x8x128xbf16, #tpu.memory_space<vmem>>) attributes {dimension_semantics = [#tpu.dimension_semantics<parallel>], iteration_bounds = array<i64: 2>, scalar_prefetch = 0 : i64, scratch_operands = 0 : i64, tpu.core_type = #tpu.core_type<tc>, window_params = [{transform_indices = @transform_0, window_bounds = array<i64: 1, 1, 24, 128>}, {pipeline_mode = #tpu.pipeline_mode<synchronous>, transform_indices = @transform_1, window_bounds = array<i64: 9, 128, 128>}, {pipeline_mode = #tpu.pipeline_mode<synchronous>, transform_indices = @transform_2, window_bounds = array<i64: 1, 128>}, {transform_indices = @transform_3, window_bounds = array<i64: 1, 8, 128>}]} {
    %cst = arith.constant 0.000000e+00 : f32
    %0 = vector.broadcast %cst : f32 to vector<8x128xf32>
    %c0 = arith.constant 0 : index
    %c0_0 = arith.constant 0 : index
    %c0_1 = arith.constant 0 : index
    %c0_2 = arith.constant 0 : index
    %1 = vector.load %arg1[%c0, %c0_0, %c0_1, %c0_2] : memref<1x1x24x128xbf16, #tpu.memory_space<vmem>>, vector<1x1x8x128xbf16>
    %2 = vector.shape_cast %1 : vector<1x1x8x128xbf16> to vector<8x128xbf16>
    %c0_3 = arith.constant 0 : index
    %c0_4 = arith.constant 0 : index
    %c0_5 = arith.constant 0 : index
    %3 = vector.load %arg2[%c0_3, %c0_4, %c0_5] : memref<9x128x128xbf16, #tpu.memory_space<vmem>>, vector<1x128x128xbf16>
    %4 = vector.shape_cast %3 : vector<1x128x128xbf16> to vector<128x128xbf16>
    %cst_6 = arith.constant dense<0.000000e+00> : vector<8x128xf32>
    %5 = tpu.matmul %2, %4, %cst_6 {dimension_numbers = #tpu.dot_dimension_numbers<[1], [0], [0], [1], [0, 0, 1, 1], [], []>} : vector<8x128xbf16>, vector<128x128xbf16>, vector<8x128xf32> -> vector<8x128xf32>
    %6 = arith.addf %0, %5 : vector<8x128xf32>
    %c0_7 = arith.constant 0 : index
    %c0_8 = arith.constant 0 : index
    %c1 = arith.constant 1 : index
    %c0_9 = arith.constant 0 : index
    %7 = vector.load %arg1[%c0_7, %c0_8, %c1, %c0_9] : memref<1x1x24x128xbf16, #tpu.memory_space<vmem>>, vector<1x1x8x128xbf16>
    %8 = vector.shape_cast %7 : vector<1x1x8x128xbf16> to vector<8x128xbf16>
    %c1_10 = arith.constant 1 : index
    %c0_11 = arith.constant 0 : index
    %c0_12 = arith.constant 0 : index
    %9 = vector.load %arg2[%c1_10, %c0_11, %c0_12] : memref<9x128x128xbf16, #tpu.memory_space<vmem>>, vector<1x128x128xbf16>
    %10 = vector.shape_cast %9 : vector<1x128x128xbf16> to vector<128x128xbf16>
    %cst_13 = arith.constant dense<0.000000e+00> : vector<8x128xf32>
    %11 = tpu.matmul %8, %10, %cst_13 {dimension_numbers = #tpu.dot_dimension_numbers<[1], [0], [0], [1], [0, 0, 1, 1], [], []>} : vector<8x128xbf16>, vector<128x128xbf16>, vector<8x128xf32> -> vector<8x128xf32>
    %12 = arith.addf %6, %11 : vector<8x128xf32>
    %c0_14 = arith.constant 0 : index
    %c0_15 = arith.constant 0 : index
    %c2 = arith.constant 2 : index
    %c0_16 = arith.constant 0 : index
    %13 = vector.load %arg1[%c0_14, %c0_15, %c2, %c0_16] : memref<1x1x24x128xbf16, #tpu.memory_space<vmem>>, vector<1x1x8x128xbf16>
    %14 = vector.shape_cast %13 : vector<1x1x8x128xbf16> to vector<8x128xbf16>
    %c2_17 = arith.constant 2 : index
    %c0_18 = arith.constant 0 : index
    %c0_19 = arith.constant 0 : index
    %15 = vector.load %arg2[%c2_17, %c0_18, %c0_19] : memref<9x128x128xbf16, #tpu.memory_space<vmem>>, vector<1x128x128xbf16>
    %16 = vector.shape_cast %15 : vector<1x128x128xbf16> to vector<128x128xbf16>
    %cst_20 = arith.constant dense<0.000000e+00> : vector<8x128xf32>
    %17 = tpu.matmul %14, %16, %cst_20 {dimension_numbers = #tpu.dot_dimension_numbers<[1], [0], [0], [1], [0, 0, 1, 1], [], []>} : vector<8x128xbf16>, vector<128x128xbf16>, vector<8x128xf32> -> vector<8x128xf32>
    %18 = arith.addf %12, %17 : vector<8x128xf32>
    %c0_21 = arith.constant 0 : index
    %c0_22 = arith.constant 0 : index
    %c4 = arith.constant 4 : index
    %c0_23 = arith.constant 0 : index
    %19 = vector.load %arg1[%c0_21, %c0_22, %c4, %c0_23] : memref<1x1x24x128xbf16, #tpu.memory_space<vmem>>, vector<1x1x8x128xbf16>
    %20 = vector.shape_cast %19 : vector<1x1x8x128xbf16> to vector<8x128xbf16>
    %c3 = arith.constant 3 : index
    %c0_24 = arith.constant 0 : index
    %c0_25 = arith.constant 0 : index
    %21 = vector.load %arg2[%c3, %c0_24, %c0_25] : memref<9x128x128xbf16, #tpu.memory_space<vmem>>, vector<1x128x128xbf16>
    %22 = vector.shape_cast %21 : vector<1x128x128xbf16> to vector<128x128xbf16>
    %cst_26 = arith.constant dense<0.000000e+00> : vector<8x128xf32>
    %23 = tpu.matmul %20, %22, %cst_26 {dimension_numbers = #tpu.dot_dimension_numbers<[1], [0], [0], [1], [0, 0, 1, 1], [], []>} : vector<8x128xbf16>, vector<128x128xbf16>, vector<8x128xf32> -> vector<8x128xf32>
    %24 = arith.addf %18, %23 : vector<8x128xf32>
    %c0_27 = arith.constant 0 : index
    %c0_28 = arith.constant 0 : index
    %c5 = arith.constant 5 : index
    %c0_29 = arith.constant 0 : index
    %25 = vector.load %arg1[%c0_27, %c0_28, %c5, %c0_29] : memref<1x1x24x128xbf16, #tpu.memory_space<vmem>>, vector<1x1x8x128xbf16>
    %26 = vector.shape_cast %25 : vector<1x1x8x128xbf16> to vector<8x128xbf16>
    %c4_30 = arith.constant 4 : index
    %c0_31 = arith.constant 0 : index
    %c0_32 = arith.constant 0 : index
    %27 = vector.load %arg2[%c4_30, %c0_31, %c0_32] : memref<9x128x128xbf16, #tpu.memory_space<vmem>>, vector<1x128x128xbf16>
    %28 = vector.shape_cast %27 : vector<1x128x128xbf16> to vector<128x128xbf16>
    %cst_33 = arith.constant dense<0.000000e+00> : vector<8x128xf32>
    %29 = tpu.matmul %26, %28, %cst_33 {dimension_numbers = #tpu.dot_dimension_numbers<[1], [0], [0], [1], [0, 0, 1, 1], [], []>} : vector<8x128xbf16>, vector<128x128xbf16>, vector<8x128xf32> -> vector<8x128xf32>
    %30 = arith.addf %24, %29 : vector<8x128xf32>
    %c0_34 = arith.constant 0 : index
    %c0_35 = arith.constant 0 : index
    %c6 = arith.constant 6 : index
    %c0_36 = arith.constant 0 : index
    %31 = vector.load %arg1[%c0_34, %c0_35, %c6, %c0_36] : memref<1x1x24x128xbf16, #tpu.memory_space<vmem>>, vector<1x1x8x128xbf16>
    %32 = vector.shape_cast %31 : vector<1x1x8x128xbf16> to vector<8x128xbf16>
    %c5_37 = arith.constant 5 : index
    %c0_38 = arith.constant 0 : index
    %c0_39 = arith.constant 0 : index
    %33 = vector.load %arg2[%c5_37, %c0_38, %c0_39] : memref<9x128x128xbf16, #tpu.memory_space<vmem>>, vector<1x128x128xbf16>
    %34 = vector.shape_cast %33 : vector<1x128x128xbf16> to vector<128x128xbf16>
    %cst_40 = arith.constant dense<0.000000e+00> : vector<8x128xf32>
    %35 = tpu.matmul %32, %34, %cst_40 {dimension_numbers = #tpu.dot_dimension_numbers<[1], [0], [0], [1], [0, 0, 1, 1], [], []>} : vector<8x128xbf16>, vector<128x128xbf16>, vector<8x128xf32> -> vector<8x128xf32>
    %36 = arith.addf %30, %35 : vector<8x128xf32>
    %c0_41 = arith.constant 0 : index
    %c0_42 = arith.constant 0 : index
    %c8 = arith.constant 8 : index
    %c0_43 = arith.constant 0 : index
    %37 = vector.load %arg1[%c0_41, %c0_42, %c8, %c0_43] : memref<1x1x24x128xbf16, #tpu.memory_space<vmem>>, vector<1x1x8x128xbf16>
    %38 = vector.shape_cast %37 : vector<1x1x8x128xbf16> to vector<8x128xbf16>
    %c6_44 = arith.constant 6 : index
    %c0_45 = arith.constant 0 : index
    %c0_46 = arith.constant 0 : index
    %39 = vector.load %arg2[%c6_44, %c0_45, %c0_46] : memref<9x128x128xbf16, #tpu.memory_space<vmem>>, vector<1x128x128xbf16>
    %40 = vector.shape_cast %39 : vector<1x128x128xbf16> to vector<128x128xbf16>
    %cst_47 = arith.constant dense<0.000000e+00> : vector<8x128xf32>
    %41 = tpu.matmul %38, %40, %cst_47 {dimension_numbers = #tpu.dot_dimension_numbers<[1], [0], [0], [1], [0, 0, 1, 1], [], []>} : vector<8x128xbf16>, vector<128x128xbf16>, vector<8x128xf32> -> vector<8x128xf32>
    %42 = arith.addf %36, %41 : vector<8x128xf32>
    %c0_48 = arith.constant 0 : index
    %c0_49 = arith.constant 0 : index
    %c9 = arith.constant 9 : index
    %c0_50 = arith.constant 0 : index
    %43 = vector.load %arg1[%c0_48, %c0_49, %c9, %c0_50] : memref<1x1x24x128xbf16, #tpu.memory_space<vmem>>, vector<1x1x8x128xbf16>
    %44 = vector.shape_cast %43 : vector<1x1x8x128xbf16> to vector<8x128xbf16>
    %c7 = arith.constant 7 : index
    %c0_51 = arith.constant 0 : index
    %c0_52 = arith.constant 0 : index
    %45 = vector.load %arg2[%c7, %c0_51, %c0_52] : memref<9x128x128xbf16, #tpu.memory_space<vmem>>, vector<1x128x128xbf16>
    %46 = vector.shape_cast %45 : vector<1x128x128xbf16> to vector<128x128xbf16>
    %cst_53 = arith.constant dense<0.000000e+00> : vector<8x128xf32>
    %47 = tpu.matmul %44, %46, %cst_53 {dimension_numbers = #tpu.dot_dimension_numbers<[1], [0], [0], [1], [0, 0, 1, 1], [], []>} : vector<8x128xbf16>, vector<128x128xbf16>, vector<8x128xf32> -> vector<8x128xf32>
    %48 = arith.addf %42, %47 : vector<8x128xf32>
    %c0_54 = arith.constant 0 : index
    %c0_55 = arith.constant 0 : index
    %c10 = arith.constant 10 : index
    %c0_56 = arith.constant 0 : index
    %49 = vector.load %arg1[%c0_54, %c0_55, %c10, %c0_56] : memref<1x1x24x128xbf16, #tpu.memory_space<vmem>>, vector<1x1x8x128xbf16>
    %50 = vector.shape_cast %49 : vector<1x1x8x128xbf16> to vector<8x128xbf16>
    %c8_57 = arith.constant 8 : index
    %c0_58 = arith.constant 0 : index
    %c0_59 = arith.constant 0 : index
    %51 = vector.load %arg2[%c8_57, %c0_58, %c0_59] : memref<9x128x128xbf16, #tpu.memory_space<vmem>>, vector<1x128x128xbf16>
    %52 = vector.shape_cast %51 : vector<1x128x128xbf16> to vector<128x128xbf16>
    %cst_60 = arith.constant dense<0.000000e+00> : vector<8x128xf32>
    %53 = tpu.matmul %50, %52, %cst_60 {dimension_numbers = #tpu.dot_dimension_numbers<[1], [0], [0], [1], [0, 0, 1, 1], [], []>} : vector<8x128xbf16>, vector<128x128xbf16>, vector<8x128xf32> -> vector<8x128xf32>
    %54 = arith.addf %48, %53 : vector<8x128xf32>
    %c0_61 = arith.constant 0 : index
    %c0_62 = arith.constant 0 : index
    %55 = vector.load %arg3[%c0_61, %c0_62] : memref<1x128xf32, #tpu.memory_space<vmem>>, vector<1x128xf32>
    %56 = vector.broadcast %55 : vector<1x128xf32> to vector<8x128xf32>
    %57 = arith.addf %54, %56 : vector<8x128xf32>
    %cst_63 = arith.constant 0.000000e+00 : f32
    %58 = vector.broadcast %cst_63 : f32 to vector<8x128xf32>
    %59 = arith.cmpf ogt, %57, %58 : vector<8x128xf32>
    %cst_64 = arith.constant 0.00999999977 : f32
    %60 = vector.broadcast %cst_64 : f32 to vector<8x128xf32>
    %61 = arith.mulf %57, %60 : vector<8x128xf32>
    %62 = arith.select %59, %57, %61 : vector<8x128xi1>, vector<8x128xf32>
    %63 = arith.truncf %62 : vector<8x128xf32> to vector<8x128xbf16>
    %c0_65 = arith.constant 0 : index
    %c0_66 = arith.constant 0 : index
    %c0_67 = arith.constant 0 : index
    %64 = vector.load %arg4[%c0_65, %c0_66, %c0_67] : memref<1x8x128xbf16, #tpu.memory_space<vmem>>, vector<1x8x128xbf16>
    %65 = vector.shape_cast %64 : vector<1x8x128xbf16> to vector<8x128xbf16>
    %66 = vector.shape_cast %63 : vector<8x128xbf16> to vector<1x8x128xbf16>
    tpu.vector_store %arg4[%c0_65, %c0_66, %c0_67], %66 {strides = array<i32>} : memref<1x8x128xbf16, #tpu.memory_space<vmem>>, vector<1x8x128xbf16>,
    return
  }
  func.func @transform_0(%arg0: i32) -> (i32, i32, i32, i32) {
    %c0_i32 = arith.constant 0 : i32
    %c0_i32_0 = arith.constant 0 : i32
    %c0_i32_1 = arith.constant 0 : i32
    %c0_i32_2 = arith.constant 0 : i32
    return %arg0, %c0_i32, %c0_i32_0, %c0_i32_1 : i32, i32, i32, i32
  }
  func.func @transform_1(%arg0: i32) -> (i32, i32, i32) {
    %c0_i32 = arith.constant 0 : i32
    %c0_i32_0 = arith.constant 0 : i32
    %c0_i32_1 = arith.constant 0 : i32
    %c0_i32_2 = arith.constant 0 : i32
    return %c0_i32, %c0_i32_0, %c0_i32_1 : i32, i32, i32
  }
  func.func @transform_2(%arg0: i32) -> (i32, i32) {
    %c0_i32 = arith.constant 0 : i32
    %c0_i32_0 = arith.constant 0 : i32
    %c0_i32_1 = arith.constant 0 : i32
    return %c0_i32, %c0_i32_0 : i32, i32
  }
  func.func @transform_3(%arg0: i32) -> (i32, i32, i32) {
    %c0_i32 = arith.constant 0 : i32
    %c0_i32_0 = arith.constant 0 : i32
    %c0_i32_1 = arith.constant 0 : i32
    return %arg0, %c0_i32, %c0_i32_0 : i32, i32, i32
  }
}

module attributes {stable_mosaic.version = 11 : i64} {
  func.func @kernel(%arg0: i32, %arg1: memref<2x4x128xbf16, #tpu.memory_space<vmem>>, %arg2: memref<128x128xf32, #tpu.memory_space<vmem>>, %arg3: memref<1x128xf32, #tpu.memory_space<vmem>>, %arg4: memref<2x128xf32, #tpu.memory_space<vmem>>) attributes {dimension_semantics = [#tpu.dimension_semantics<arbitrary>], iteration_bounds = array<i64: 1>, scalar_prefetch = 0 : i64, scratch_operands = 0 : i64, tpu.core_type = #tpu.core_type<tc>, window_params = [{pipeline_mode = #tpu.pipeline_mode<synchronous>, transform_indices = @transform_0, window_bounds = array<i64: 2, 4, 128>}, {pipeline_mode = #tpu.pipeline_mode<synchronous>, transform_indices = @transform_1, window_bounds = array<i64: 128, 128>}, {pipeline_mode = #tpu.pipeline_mode<synchronous>, transform_indices = @transform_2, window_bounds = array<i64: 1, 128>}, {pipeline_mode = #tpu.pipeline_mode<synchronous>, transform_indices = @transform_3, window_bounds = array<i64: 2, 128>}]} {
    %c0 = arith.constant 0 : index
    %c0_0 = arith.constant 0 : index
    %c0_1 = arith.constant 0 : index
    %0 = vector.load %arg1[%c0, %c0_0, %c0_1] : memref<2x4x128xbf16, #tpu.memory_space<vmem>>, vector<2x4x128xbf16>
    %1 = arith.extf %0 : vector<2x4x128xbf16> to vector<2x4x128xf32>
    %cst = arith.constant dense<0.000000e+00> : vector<2x128xf32>
    %2 = vector.multi_reduction <add>, %1, %cst [1] : vector<2x4x128xf32> to vector<2x128xf32>
    %cst_2 = arith.constant 2.500000e-01 : f32
    %3 = vector.broadcast %cst_2 : f32 to vector<2x128xf32>
    %4 = arith.mulf %2, %3 : vector<2x128xf32>
    %c0_3 = arith.constant 0 : index
    %c0_4 = arith.constant 0 : index
    %5 = vector.load %arg2[%c0_3, %c0_4] : memref<128x128xf32, #tpu.memory_space<vmem>>, vector<128x128xf32>
    %cst_5 = arith.constant dense<0.000000e+00> : vector<2x128xf32>
    %6 = tpu.matmul %4, %5, %cst_5 {dimension_numbers = #tpu.dot_dimension_numbers<[1], [0], [0], [1], [0, 0, 1, 1], [], []>} : vector<2x128xf32>, vector<128x128xf32>, vector<2x128xf32> -> vector<2x128xf32>
    %c0_6 = arith.constant 0 : index
    %c0_7 = arith.constant 0 : index
    %7 = vector.load %arg3[%c0_6, %c0_7] : memref<1x128xf32, #tpu.memory_space<vmem>>, vector<1x128xf32>
    %8 = vector.broadcast %7 : vector<1x128xf32> to vector<2x128xf32>
    %9 = arith.addf %6, %8 : vector<2x128xf32>
    %c0_8 = arith.constant 0 : index
    %c0_9 = arith.constant 0 : index
    %10 = vector.load %arg4[%c0_8, %c0_9] : memref<2x128xf32, #tpu.memory_space<vmem>>, vector<2x128xf32>
    tpu.vector_store %arg4[%c0_8, %c0_9], %9 {strides = array<i32>} : memref<2x128xf32, #tpu.memory_space<vmem>>, vector<2x128xf32>,
    return
  }
  func.func @transform_0(%arg0: i32) -> (i32, i32, i32) {
    %c0_i32 = arith.constant 0 : i32
    %c0_i32_0 = arith.constant 0 : i32
    %c0_i32_1 = arith.constant 0 : i32
    %c0_i32_2 = arith.constant 0 : i32
    return %c0_i32, %c0_i32_0, %c0_i32_1 : i32, i32, i32
  }
  func.func @transform_1(%arg0: i32) -> (i32, i32) {
    %c0_i32 = arith.constant 0 : i32
    %c0_i32_0 = arith.constant 0 : i32
    %c0_i32_1 = arith.constant 0 : i32
    return %c0_i32, %c0_i32_0 : i32, i32
  }
  func.func @transform_2(%arg0: i32) -> (i32, i32) {
    %c0_i32 = arith.constant 0 : i32
    %c0_i32_0 = arith.constant 0 : i32
    %c0_i32_1 = arith.constant 0 : i32
    return %c0_i32, %c0_i32_0 : i32, i32
  }
  func.func @transform_3(%arg0: i32) -> (i32, i32) {
    %c0_i32 = arith.constant 0 : i32
    %c0_i32_0 = arith.constant 0 : i32
    %c0_i32_1 = arith.constant 0 : i32
    return %c0_i32, %c0_i32_0 : i32, i32
  }
}

</mosaic_0001>

<bundles_post_ra>
// kernel: forward.13
= control target key start
LH: loop header
LB: loop body
LE: loop exit
PB: predicated region body
PF: predicated region fallthrough
CT: control target
= control target key end

     0   :  { %s404_s6 = smov 0   ;;  %s479_s0 = inlined_call_operand.vmem [shape: bf16[2,4,32,128], index: 0, kind: input, shape index: {}]   ;;  %s480_s1 = inlined_call_operand.vmem [shape: bf16[2,24,128], index: 1, kind: output, shape index: {}]  }
   0x1 LB: > { %s324_s7 = sadd.s32 4294967295, %s392_s6   ;;  %p328_p0 = scmp.ge.s32.totalorder %s392_s6, 1  ;;  %s392_s6 = sphi %s404_s6, %s11_s6  }
   0x2   : > { %p87_p1 = scmp.lt.s32.totalorder %s392_s6, 3 }
   0x4   : > { %p88_p2 = pnand %p328_p0, %p87_p1 }
   0x5   : > { %p107_p3 = scmp.lt.s32.totalorder (!%p88_p2), %s324_s7, 1  ;;  %vm142_vm0 = vcmask (!%p88_p2), 1046528   ;;  %vm201_vm1 = vcmask (!%p88_p2), 1042432   ;;  %vm239_vm2 = vcmask (!%p88_p2), 1041408  }
   0x6   : > { %91 = sbr.rel (%p88_p2) target bundleno = 50 (0x32), region = 24 }
   0xd   : > { %s482_s7 = smov (!%p107_p3, %s324_s7), 1 }
   0xe   : > { %s349_s8 = sshll.u32 %s482_s7, 6  ;;  %s377_s12 = smul.u32 12, %s482_s7 }
   0xf   : > { %s418_s11 = scalar_lea.vmem %s479_s0, %s349_s8 }
  0x10   : > { %v354_v0 = vld [vmem:[%s418_s11] sm:$0xff]   ;;  %v422_v1 = vld [vmem:[%s418_s11 + $0x8] ss:$16 sps:$4 sm:$0xff]   ;;  %v374_v2 = vld [vmem:[%s418_s11 + $0x10] sm:$0xff]   ;;  %s116_s15 = scalar_lea.vmem %s480_s1, %s377_s12 }
  0x11   : > { %v355_v3 = vunpack.c.l.bf16 %v354_v0  ;;  %v425_v4 = vunpack.c.h.bf16 %v354_v0  ;;  %v428_v5 = vunpack.c.l.bf16 %v422_v1  ;;  %v359_v6 = vunpack.c.l.bf16 %v374_v2  ;;  %v375_v7 = vld [vmem:[%s418_s11 + $0x20] sm:$0xff]   ;;  %v432_v8 = vld [vmem:[%s418_s11 + $0x28] ss:$16 sps:$4 sm:$0xff]   ;;  %v376_v12 = vld [vmem:[%s418_s11 + $0x30] sm:$0xff]  }
  0x12   : > { %v360_v9 = vunpack.c.h.bf16 %v374_v2  ;;  %v363_v10 = vunpack.c.l.bf16 %v375_v7  ;;  %v364_v11 = vunpack.c.h.bf16 %v375_v7  ;;  %v162_v15 = vunpack.c.l.bf16 %v432_v8  ;;  %v195_v20 = vld [vmem:[%s418_s11] sm:$0xc]  ;;  %v342_v25 = vld [vmem:[%s418_s11 + $0x10] sm:$0xc]  ;;  %v136_v47 = vld [vmem:[%s418_s11 + $0xc] sm:$0x1] }
  0x13   : > { %v123_v13 = vmax.f32 %v355_v3, -1e+30  ;;  %v124_v14 = vmax.f32 %v425_v4, -1e+30  ;;  %v132_v16 = vunpack.c.h.bf16 %v422_v1  ;;  %v143_v17 = vrot.slane %v355_v3, 1 }
  0x14   : > { %v144_v18 = vrot.slane %v425_v4, 1  ;;  %v146_v19 = vrot.slane %v428_v5, 1  ;;  %v367_v23 = vunpack.c.l.bf16 %v376_v12  ;;  %v368_v24 = vunpack.c.h.bf16 %v376_v12  ;;  %v236_v38 = vld [vmem:[%s418_s11] sm:$0x8]  ;;  %v341_v51 = vld [vmem:[%s418_s11 + $0x2c] sm:$0x1] }
  0x15   : > { %v133_v21 = vmax.f32 %v123_v13, %v359_v6  ;;  %v134_v22 = vmax.f32 %v124_v14, %v360_v9  ;;  %v182_v28 = vrot.slane %v363_v10, 1  ;;  %v183_v29 = vrot.slane %v364_v11, 1  ;;  %v196_v56 = vld [vmem:[%s418_s11 + $0xc] sm:$0x7]  ;;  %v343_v1 = vld [vmem:[%s418_s11 + $0x1c] sm:$0x7] }
  0x16   : > { %v145_v26 = vsel %vm142_vm0, %v143_v17, %v144_v18  ;;  %v147_v27 = vsel %vm142_vm0, %v144_v18, %v146_v19  ;;  %v185_v32 = vrot.slane %v162_v15, 1  ;;  %v197_v33 = vunpack.c.l.bf16 %v195_v20 }
  0x17   : > { %v153_v30 = vmax.f32 %v133_v21, %v145_v26  ;;  %v154_v31 = vmax.f32 %v134_v22, %v147_v27  ;;  %v125_v34 = vmax.f32 %v428_v5, -1e+30  ;;  %v203_v35 = vrot.slane %v425_v4, 5 }
  0x18   : > { %v205_v36 = vrot.slane %v428_v5, 5  ;;  %v217_v37 = vunpack.c.l.bf16 %v342_v25  ;;  %v184_v41 = vsel %vm142_vm0, %v182_v28, %v183_v29  ;;  %v202_v42 = vrot.slane %v197_v33, 5 }
  0x19   : > { %v163_v39 = vmax.f32 %v153_v30, %v363_v10  ;;  %v164_v40 = vmax.f32 %v154_v31, %v364_v11  ;;  %v186_v43 = vsel %vm142_vm0, %v183_v29, %v185_v32  ;;  %v224_v45 = vrot.slane %v360_v9, 5 }
  0x1a   : > { %v223_v44 = vrot.slane %v217_v37, 5  ;;  %v226_v46 = vrot.slane %v132_v16, 5  ;;  %v237_v50 = vunpack.c.l.bf16 %v236_v38  ;;  %v204_v52 = vsel %vm201_vm1, %v202_v42, %v203_v35 }
  0x1b   : > { %v173_v48 = vmax.f32 %v163_v39, %v367_v23  ;;  %v174_v49 = vmax.f32 %v164_v40, %v368_v24  ;;  %v206_v53 = vsel %vm201_vm1, %v203_v35, %v205_v36  ;;  %v241_v54 = vrot.slane %v425_v4, 6 }
  0x1c   : > { %v243_v55 = vrot.slane %v428_v5, 6  ;;  %v240_v59 = vrot.slane %v237_v50, 6  ;;  %v137_v60 = vunpack.c.l.bf16 %v136_v47  ;;  %v135_v61 = vmax.f32 %v125_v34, %v132_v16 }
  0x1d   : > { %v192_v57 = vmax.f32 %v173_v48, %v184_v41  ;;  %v193_v58 = vmax.f32 %v174_v49, %v186_v43  ;;  %v225_v62 = vsel %vm201_vm1, %v223_v44, %v224_v45  ;;  %v227_v63 = vsel %vm201_vm1, %v224_v45, %v226_v46 }
  0x1e   : > { %v177_v0 = vunpack.c.l.bf16 %v341_v51  ;;  %v148_v6 = vrot.slane %v137_v60, 1  ;;  %v198_v7 = vunpack.c.l.bf16 %v196_v56  ;;  %v242_v4 = vsel %vm239_vm2, %v240_v59, %v241_v54 }
  0x1f   : > { %v212_v2 = vmax.f32 %v192_v57, %v204_v52  ;;  %v213_v3 = vmax.f32 %v193_v58, %v206_v53  ;;  %v244_v5 = vsel %vm239_vm2, %v241_v54, %v243_v55  ;;  %v218_v13 = vunpack.c.l.bf16 %v343_v1 }
  0x20   : > { %v187_v9 = vrot.slane %v177_v0, 1  ;;  %v149_v12 = vsel %vm142_vm0, %v146_v19, %v148_v6  ;;  %v172_v16 = vunpack.c.h.bf16 %v432_v8  ;;  %v207_v20 = vrot.slane %v198_v7, 5 }
  0x21   : > { %v233_v10 = vmax.f32 %v212_v2, %v225_v62  ;;  %v234_v11 = vmax.f32 %v213_v3, %v227_v63  ;;  %v155_v14 = vmax.f32 %v135_v61, %v149_v12  ;;  %v228_v24 = vrot.slane %v218_v13, 5 }
  0x22   : > { %v188_v23 = vsel %vm142_vm0, %v185_v32, %v187_v9  ;;  %v208_v19 = vsel %vm201_vm1, %v205_v36, %v207_v20  ;;  %v245_v26 = vrot.slane %v198_v7, 6 }
  0x23   : > { %v250_v17 = vmax.f32 %v233_v10, %v242_v4  ;;  %v251_v18 = vmax.f32 %v234_v11, %v244_v5  ;;  %v165_v21 = vmax.f32 %v155_v14, %v162_v15  ;;  %v229_v28 = vsel %vm201_vm1, %v226_v46, %v228_v24 }
  0x24   : > { %v246_v30 = vsel %vm239_vm2, %v243_v55, %v245_v26 }
  0x25   : > { %v372_v22 = vpack.c.bf16 %v251_v18, %v250_v17  ;;  %v175_v25 = vmax.f32 %v165_v21, %v172_v16 }
  0x27   : > { %373 = vst [vmem:[%s116_s15] sm:$0xff] %v372_v22   ;;  %v194_v27 = vmax.f32 %v175_v25, %v188_v23 }
  0x29   : > { %v214_v29 = vmax.f32 %v194_v27, %v208_v19 }
  0x2b   : > { %v235_v31 = vmax.f32 %v214_v29, %v229_v28 }
  0x2d   : > { %v252_v33 = vmax.f32 %v235_v31, %v246_v30 }
  0x2f   : > { %v352_v34 = vpack.c.bf16 %v252_v33, %v252_v33 }
  0x31   : > { %268 = vst [vmem:[%s116_s15 + $0x8] sm:$0xf] %v352_v34 }
  0x32 PF: > { %s11_s6 = sadd.s32 1, %s392_s6  }
  0x33   : > { %p8_p4 = scmp.ge.s32.totalorder %s11_s6, 4  }
  0x35   :  { %10 = sbr.rel (!%p8_p4) target bundleno = 1 (0x1), region = 57 }

// kernel: forward.14
= control target key start
LH: loop header
LB: loop body
LE: loop exit
PB: predicated region body
PF: predicated region fallthrough
CT: control target
= control target key end

     0   :  { %s2066_s12 = smov 0   ;;  %s2374_s0 = inlined_call_operand.vmem [shape: bf16[2,1,40,128], index: 0, kind: input, shape index: {}]   ;;  %s2375_s1 = inlined_call_operand.vmem [shape: bf16[9,128,128], index: 1, kind: input, shape index: {}]   ;;  %s2376_s2 = inlined_call_operand.vmem [shape: f32[1,128], index: 2, kind: input, shape index: {}]   ;;  %s2377_s3 = inlined_call_operand.vmem [shape: bf16[2,24,128], index: 3, kind: output, shape index: {}]  }
   0x1 LB: > { %s1439_s13 = sadd.s32 4294967295, %s2044_s12   ;;  %p1443_p0 = scmp.ge.s32.totalorder %s2044_s12, 1  ;;  %s2044_s12 = sphi %s2066_s12, %s13_s12  }
   0x2   : > { %p137_p1 = scmp.lt.s32.totalorder %s2044_s12, 3 }
   0x4   : > { %p138_p2 = pnand %p1443_p0, %p137_p1 }
   0x5   : > { %v1953_v0 = vld [vmem:[%s2375_s1 + $0x40] sm:$0xff] (!%p138_p2)   ;;  %p161_p3 = scmp.lt.s32.totalorder (!%p138_p2), %s1439_s13, 1  ;;  %v1955_v2 = vld [vmem:[%s2375_s1 + $0x48] sm:$0xff] (!%p138_p2)   ;;  %v1957_v4 = vld [vmem:[%s2375_s1 + $0x50] sm:$0xff] (!%p138_p2)   ;;  %vm219_vm0 = vsmask.f32 (!%p138_p2), 7424 }
   0x6   : > { %141 = sbr.rel (%p138_p2) target bundleno = 391 (0x187), region = 32  ;;  %v1954_v1 = vld [vmem:[%s2375_s1] sm:$0xff] (!%p138_p2)   ;;  %1763 = vmatprep.subr.bf16.mxu0 (!%p138_p2), %v1953_v0  ;;  %v1956_v3 = vld [vmem:[%s2375_s1 + $0x8] sm:$0xff] (!%p138_p2)   ;;  %v1958_v5 = vld [vmem:[%s2375_s1 + $0x10] sm:$0xff] (!%p138_p2)   ;;  %vm453_vm1 = vcmask (!%p138_p2), 1046528   ;;  %vm583_vm2 = vcmask (!%p138_p2), 1044480  }
   0x7   : > { %1783 = vmatprep.subr.bf16.mxu1 (!%p138_p2), %v1954_v1  ;;  %1764 = vmatpush3.bf16.msra.mxu0 (!%p138_p2), %v1953_v0  ;;  %v1959_v6 = vld [vmem:[%s2375_s1 + $0x58] sm:$0xff] (!%p138_p2)   ;;  %v1961_v8 = vld [vmem:[%s2375_s1 + $0x60] sm:$0xff] (!%p138_p2)   ;;  %v1963_v10 = vld [vmem:[%s2375_s1 + $0x68] sm:$0xff] (!%p138_p2)   ;;  %vm709_vm3 = vsmask.f32 (!%p138_p2), 4352  ;;  %vm979_vm4 = vcmask (!%p138_p2), 1045504  }
   0x8   : > { %1784 = vmatpush3.bf16.msra.mxu1 (!%p138_p2), %v1954_v1  ;;  %1765 = vmatprep.subr.bf16.mxu0 (!%p138_p2), %v1955_v2  ;;  %v1960_v7 = vld [vmem:[%s2375_s1 + $0x18] sm:$0xff] (!%p138_p2)   ;;  %v1962_v9 = vld [vmem:[%s2375_s1 + $0x20] sm:$0xff] (!%p138_p2)   ;;  %v1964_v14 = vld [vmem:[%s2375_s1 + $0x28] sm:$0xff] (!%p138_p2)   ;;  %vm1105_vm5 = vsmask.f32 (!%p138_p2), 5376 }
   0x9   : > { %1785 = vmatprep.subr.bf16.mxu1 (!%p138_p2), %v1956_v3  ;;  %v1965_v20 = vld [vmem:[%s2375_s1 + $0x70] sm:$0xff] (!%p138_p2)   ;;  %v1967_v26 = vld [vmem:[%s2375_s1 + $0x78] sm:$0xff] (!%p138_p2)   ;;  %v1972_v30 = vld [vmem:[%s2375_s1 + $0x80] sm:$0xff] (!%p138_p2)  }
   0xa   : > { %v1966_v22 = vld [vmem:[%s2375_s1 + $0x30] sm:$0xff] (!%p138_p2)   ;;  %v1968_v27 = vld [vmem:[%s2375_s1 + $0x38] sm:$0xff] (!%p138_p2)   ;;  %v1973_v31 = vld [vmem:[%s2375_s1 + $0xc0] sm:$0xff] (!%p138_p2)  }
   0xb   : > { %1766 = vmatpush3.bf16.msra.mxu0 (!%p138_p2), %v1955_v2  ;;  %v1974_v34 = vld [vmem:[%s2375_s1 + $0x88] sm:$0xff] (!%p138_p2)   ;;  %v1976_v41 = vld [vmem:[%s2375_s1 + $0x90] sm:$0xff] (!%p138_p2)   ;;  %v1978_v49 = vld [vmem:[%s2375_s1 + $0x98] sm:$0xff] (!%p138_p2)  }
   0xc   : > { %1786 = vmatpush3.bf16.msra.mxu1 (!%p138_p2), %v1956_v3  ;;  %1767 = vmatprep.subr.bf16.mxu0 (!%p138_p2), %v1957_v4  ;;  %v1975_v35 = vld [vmem:[%s2375_s1 + $0xc8] sm:$0xff] (!%p138_p2)   ;;  %v1977_v44 = vld [vmem:[%s2375_s1 + $0xd0] sm:$0xff] (!%p138_p2)   ;;  %v1979_v51 = vld [vmem:[%s2375_s1 + $0xd8] sm:$0xff] (!%p138_p2)  }
   0xd   : > { %s2379_s13 = smov (!%p161_p3, %s1439_s13), 1  ;;  %1787 = vmatprep.subr.bf16.mxu1 %v1958_v5  ;;  %v1980_v52 = vld [vmem:[%s2375_s1 + $0xa0] sm:$0xff]   ;;  %v1982_v54 = vld [vmem:[%s2375_s1 + $0xa8] sm:$0xff]   ;;  %v1984_v56 = vld [vmem:[%s2375_s1 + $0xb0] sm:$0xff]  }
   0xe   : > { %s1943_s30 = smul.u32 20, %s2379_s13  ;;  %v1981_v53 = vld [vmem:[%s2375_s1 + $0xe0] sm:$0xff]   ;;  %v1983_v55 = vld [vmem:[%s2375_s1 + $0xe8] sm:$0xff]   ;;  %v1985_v61 = vld [vmem:[%s2375_s1 + $0xf0] sm:$0xff]  }
   0xf   : > { %1768 = vmatpush3.bf16.msra.mxu0 %v1957_v4  ;;  %v1986_v0 = vld [vmem:[%s2375_s1 + $0xb8] sm:$0xff]  }
  0x10   : > { %1788 = vmatpush3.bf16.msra.mxu1 %v1958_v5  ;;  %1769 = vmatprep.subr.bf16.mxu0 %v1959_v6  ;;  %s2110_s10 = scalar_lea.vmem %s2374_s0, %s1943_s30  ;;  %v1987_v1 = vld [vmem:[%s2375_s1 + $0xf8] sm:$0xff]  }
  0x11   : > { %1789 = vmatprep.subr.bf16.mxu1 %v1960_v7  ;;  %v172_v11 = vld [vmem:[%s2110_s10] sm:$0xf]  ;;  %v2117_v12 = vld [vmem:[%s2110_s10 + $0x4] sm:$0xf]  ;;  %v2120_v13 = vld [vmem:[%s2110_s10 + $0x8] sm:$0xf] }
  0x12   : > { %v191_v15 = vld [vmem:[%s2110_s10 + $0xc] sm:$0x1]  ;;  %v1462_v16 = vcombine.low %v172_v11, %v2117_v12  ;;  %v1472_v33 = vcombine.low %v2120_v13, %v2120_v13  ;;  %v432_v36 = vld [vmem:[%s2110_s10] sm:$0xe] }
  0x13   : > { %1770 = vmatpush3.bf16.msra.mxu0 %v1959_v6  ;;  %v2128_v17 = vcombine.low %v2120_v13, %v191_v15  ;;  %v1497_v37 = vcombine.low %v432_v36, %v2117_v12  ;;  %v558_v39 = vld [vmem:[%s2110_s10] sm:$0x8]  ;;  %v559_v40 = vld [vmem:[%s2110_s10 + $0xc] sm:$0x7]  ;;  %v1573_v15 = vcombine.low %v2117_v12, %v2120_v13 }
  0x14   : > { %1790 = vmatpush3.bf16.msra.mxu1 %v1960_v7  ;;  %1771 = vmatprep.subr.bf16.mxu0 %v1961_v8  ;;  %v221_v18 = vshrl.u32 %v1462_v16, 16  ;;  %v223_v19 = vshll.u32 %v1462_v16, 16  ;;  %v1522_v42 = vcombine.low %v558_v39, %v2117_v12  ;;  %v1523_v43 = vcombine.low %v2120_v13, %v559_v40  ;;  %v2201_v57 = vld [vmem:[%s2110_s10 + $0xc] sm:$0xf]  ;;  %v1989_v6 = vld [vmem:[%s2375_s1 + $0x100] sm:$0xff]   ;;  %v1997_v12 = vld [vmem:[%s2375_s1 + $0x118] sm:$0xff]  }
  0x15   : > { %1791 = vmatprep.subr.bf16.mxu1 %v1962_v9  ;;  %1799 = vmatprep.mubr.bf16.mxu1 %v1462_v16  ;;  %v228_v21 = vshll.u32 %v2128_v17, 16  ;;  %v232_v29 = vshrl.u32 %v2128_v17, 16  ;;  %v455_v38 = vrot.slane %v2128_v17, 1  ;;  %v454_v45 = vrot.slane %v1497_v37, 1  ;;  %v1992_v7 = vld [vmem:[%s2375_s1 + $0x140] sm:$0xff]   ;;  %v1994_v11 = vld [vmem:[%s2375_s1 + $0x148] sm:$0xff]  }
  0x16   : > { %v225_v23 = vrot.slane %v223_v19, 1  ;;  %v584_v46 = vrot.slane %v1522_v42, 3  ;;  %v2172_v47 = vrot.slane %v1523_v43, 3  ;;  %v711_v58 = vshrl.u32 %v1522_v42, 16  ;;  %v1995_v16 = vld [vmem:[%s2375_s1 + $0x110] sm:$0xff]   ;;  %v2005_v40 = vld [vmem:[%s2375_s1 + $0x138] sm:$0xff]  }
  0x17   : > { %1772 = vmatpush3.bf16.msra.mxu0 %v1961_v8  ;;  %v230_v24 = vrot.slane %v228_v21, 1  ;;  %v456_v48 = vsel %vm453_vm1, %v454_v45, %v455_v38  ;;  %v714_v59 = vshll.u32 %v1522_v42, 16  ;;  %v1548_v60 = vcombine.low %v2120_v13, %v2201_v57  ;;  %v1996_v17 = vld [vmem:[%s2375_s1 + $0x150] sm:$0xff]   ;;  %v1998_v13 = vld [vmem:[%s2375_s1 + $0x158] sm:$0xff]   ;;  %v2000_v21 = vld [vmem:[%s2375_s1 + $0x160] sm:$0xff]  }
  0x18   : > { %1792 = vmatpush3.bf16.msra.mxu1 %v1962_v9  ;;  %1773 = vmatprep.subr.bf16.mxu0 %v1963_v10  ;;  %v226_v25 = vor.u32 %v225_v23, %v221_v18  ;;  %v586_v50 = vsel %vm583_vm2, %v584_v46, %v2172_v47  ;;  %v713_v2 = vrot.slane %v711_v58, 3  ;;  %v950_v18 = vld [vmem:[%s2110_s10 + $0xc] sm:$0xf]  ;;  %v1084_v19 = vld [vmem:[%s2110_s10 + $0x10] sm:$0x7] }
  0x19   : > { %1793 = vmatprep.subr.bf16.mxu1 %v1964_v14  ;;  %v234_v32 = vor.u32 %v232_v29, %v230_v24  ;;  %v719_v62 = vshrl.u32 %v1548_v60, 16  ;;  %v722_v63 = vshll.u32 %v1548_v60, 16  ;;  %v716_v3 = vrot.slane %v714_v59, 4  ;;  %v949_v23 = vld [vmem:[%s2110_s10 + $0x8] sm:$0xf]  ;;  %v2014_v58 = vld [vmem:[%s2375_s1 + $0x190] sm:$0xff]  }
  0x1a   : > { %v231_v28 = vsel %vm219_vm0, %v226_v25, %v230_v24  ;;  %v1224_v24 = vld [vmem:[%s2110_s10 + $0x4] sm:$0x8]  ;;  %v2002_v29 = vld [vmem:[%s2375_s1 + $0x168] sm:$0xff]   ;;  %v2015_v59 = vld [vmem:[%s2375_s1 + $0x1d0] sm:$0xff]  }
  0x1b   : > { %1774 = vmatpush3.bf16.msra.mxu0 %v1963_v10  ;;  %1779 = vmatprep.mubr.bf16.mxu0 %v231_v28  ;;  %v721_v4 = vrot.slane %v719_v62, 3  ;;  %v724_v5 = vrot.slane %v722_v63, 4  ;;  %v717_v8 = vor.u32 %v716_v3, %v713_v2  ;;  %v1993_v10 = vld [vmem:[%s2375_s1 + $0x108] sm:$0xff]   ;;  %v1650_v25 = vcombine.low %v1224_v24, %v949_v23  ;;  %v948_v28 = vld [vmem:[%s2110_s10 + $0x4] sm:$0xc]  ;;  %v2016_v60 = vld [vmem:[%s2375_s1 + $0x198] sm:$0xff]  }
  0x1c   : > { %1794 = vmatpush3.bf16.msra.mxu1 %v1964_v14  ;;  %1775 = vmatprep.subr.bf16.mxu0 %v1965_v20  ;;  %v2018_v62 = vld [vmem:[%s2375_s1 + $0x1a0] sm:$0xff]   ;;  %v2022_v2 = vld [vmem:[%s2375_s1 + $0x1b0] sm:$0xff]  }
  0x1d   : > { %1795 = vmatprep.subr.bf16.mxu1 %v1966_v22  ;;  %v2220_v9 = vor.u32 %v724_v5, %v721_v4  ;;  %v2019_v63 = vld [vmem:[%s2375_s1 + $0x1e0] sm:$0xff]   ;;  %v2023_v3 = vld [vmem:[%s2375_s1 + $0x1f0] sm:$0xff]   ;;  %v2024_v4 = vld [vmem:[%s2375_s1 + $0x1b8] sm:$0xff]  }
  0x1e   : > { %v2025_v5 = vld [vmem:[%s2375_s1 + $0x1f8] sm:$0xff]  }
  0x1f   : > { %1776 = vmatpush3.bf16.msra.mxu0 %v1965_v20  ;;  %v726_v14 = vsel %vm709_vm3, %v717_v8, %v2220_v9  ;;  %v1999_v20 = vld [vmem:[%s2375_s1 + $0x120] sm:$0xff]   ;;  %v2031_v8 = vld [vmem:[%s2375_s1 + $0x210] sm:$0xff]  }
  0x20   : > { %1796 = vmatpush3.bf16.msra.mxu1 %v1966_v22  ;;  %1777 = vmatprep.subr.bf16.mxu0 %v1967_v26  ;;  %v2254_v22 = vcombine.low %v950_v18, %v1084_v19 }
  0x21   : > { %1797 = vmatprep.subr.bf16.mxu1 %v1968_v27 }
  0x22   : > { %v1118_v39 = vshll.u32 %v2254_v22, 16 }
  0x23   : > { %1778 = vmatpush3.bf16.msra.mxu0 %v1967_v26  ;;  %v1246_v26 = vrot.slane %v2254_v22, 3 }
  0x24   : > { %1798 = vmatpush3.bf16.msra.mxu1 %v1968_v27  ;;  %1803 = vmatprep.subr.bf16.mxu0 %v1972_v30  ;;  %v2001_v27 = vld [vmem:[%s2375_s1 + $0x128] sm:$0xff]   ;;  %v1120_v46 = vrot.slane %v1118_v39, 3 }
  0x25   : > { %1823 = vmatprep.subr.bf16.mxu1 %v1973_v31 }
  0x26   : > { %1780 = vmatmul.mubr.bf16.vlgmr.msra.gmra.mrb[0].mxu0 %v234_v32 }
  0x27   : > { %1800 = vmatmul.mubr.bf16.vlgmr.msra.gmra.mrb[0].mxu1 %v1472_v33  ;;  %1804 = vmatpush3.bf16.msra.mxu0 %v1972_v30  ;;  %v1245_v30 = vrot.slane %v1650_v25, 3  ;;  %v2003_v33 = vld [vmem:[%s2375_s1 + $0x130] sm:$0xff]  }
  0x28   : > { %1824 = vmatpush3.bf16.msra.mxu1 %v1973_v31  ;;  %1805 = vmatprep.subr.bf16.mxu0 %v1974_v34  ;;  %v1599_v31 = vcombine.low %v948_v28, %v949_v23 }
  0x29   : > { %1825 = vmatprep.subr.bf16.mxu1 %v1975_v35  ;;  %1819 = vmatprep.mubr.bf16.mxu0 %v456_v48  ;;  %v2269_v32 = vsel %vm583_vm2, %v1245_v30, %v1246_v26  ;;  %v2011_v48 = vld [vmem:[%s2375_s1 + $0x1c0] sm:$0xff]  }
  0x2a   : > { %1839 = vmatprep.mubr.bf16.mxu1 %v586_v50  ;;  %v1107_v36 = vshrl.u32 %v1599_v31, 16  ;;  %v1110_v37 = vshll.u32 %v1599_v31, 16 }
  0x2b   : > { %1806 = vmatpush3.bf16.msra.mxu0 %v1974_v34  ;;  %v2004_v34 = vld [vmem:[%s2375_s1 + $0x170] sm:$0xff]  }
  0x2c   : > { %1826 = vmatpush3.bf16.msra.mxu1 %v1975_v35  ;;  %1807 = vmatprep.subr.bf16.mxu0 %v1976_v41  ;;  %v951_v35 = vld [vmem:[%s2110_s10 + $0x10] sm:$0x3]  ;;  %v1109_v43 = vrot.slane %v1107_v36, 2  ;;  %s1944_s10 = smul.u32 12, %s2379_s13 }
  0x2d   : > { %1827 = vmatprep.subr.bf16.mxu1 %v1977_v44  ;;  %v1600_v42 = vcombine.low %v950_v18, %v951_v35 }
  0x2e   : > { %s170_s19 = scalar_lea.vmem %s2377_s3, %s1944_s10 }
  0x2f   : > { %1808 = vmatpush3.bf16.msra.mxu0 %v1976_v41  ;;  %v2006_v41 = vld [vmem:[%s2375_s1 + $0x178] sm:$0xff]   ;;  %v981_v50 = vrot.slane %v1600_v42, 2 }
  0x30   : > { %1828 = vmatpush3.bf16.msra.mxu1 %v1977_v44  ;;  %1809 = vmatprep.subr.bf16.mxu0 %v1978_v49  ;;  %v1112_v44 = vrot.slane %v1110_v37, 3 }
  0x31   : > { %1829 = vmatprep.subr.bf16.mxu1 %v1979_v51 }
  0x33   : > { %1810 = vmatpush3.bf16.msra.mxu0 %v1978_v49  ;;  %v980_v49 = vrot.slane %v1599_v31, 2 }
  0x34   : > { %1830 = vmatpush3.bf16.msra.mxu1 %v1979_v51  ;;  %1811 = vmatprep.subr.bf16.mxu0 %v1980_v52  ;;  %v1574_v51 = vcombine.low %v2201_v57, %v2201_v57 }
  0x35   : > { %1831 = vmatprep.subr.bf16.mxu1 %v1981_v53 }
  0x37   : > { %1812 = vmatpush3.bf16.msra.mxu0 %v1980_v52  ;;  %v1113_v52 = vor.u32 %v1112_v44, %v1109_v43 }
  0x38   : > { %1832 = vmatpush3.bf16.msra.mxu1 %v1981_v53  ;;  %1813 = vmatprep.subr.bf16.mxu0 %v1982_v54 }
  0x39   : > { %1833 = vmatprep.subr.bf16.mxu1 %v1983_v55 }
  0x3b   : > { %1814 = vmatpush3.bf16.msra.mxu0 %v1982_v54  ;;  %v2012_v54 = vld [vmem:[%s2375_s1 + $0x188] sm:$0xff]  }
  0x3c   : > { %1834 = vmatpush3.bf16.msra.mxu1 %v1983_v55  ;;  %1815 = vmatprep.subr.bf16.mxu0 %v1984_v56  ;;  %v2013_v55 = vld [vmem:[%s2375_s1 + $0x1c8] sm:$0xff]  }
  0x3d   : > { %1835 = vmatprep.subr.bf16.mxu1 %v1985_v61 }
  0x3f   : > { %1816 = vmatpush3.bf16.msra.mxu0 %v1984_v56  ;;  %v982_v56 = vsel %vm979_vm4, %v980_v49, %v981_v50 }
  0x40   : > { %1836 = vmatpush3.bf16.msra.mxu1 %v1985_v61  ;;  %1817 = vmatprep.subr.bf16.mxu0 %v1986_v0  ;;  %v2017_v61 = vld [vmem:[%s2375_s1 + $0x1d8] sm:$0xff]  }
  0x41   : > { %1837 = vmatprep.subr.bf16.mxu1 %v1987_v1 }
  0x43   : > { %1818 = vmatpush3.bf16.msra.mxu0 %v1986_v0  ;;  %v2020_v0 = vld [vmem:[%s2375_s1 + $0x1a8] sm:$0xff]  }
  0x44   : > { %1838 = vmatpush3.bf16.msra.mxu1 %v1987_v1  ;;  %1843 = vmatprep.subr.bf16.mxu0 %v1989_v6  ;;  %v2021_v1 = vld [vmem:[%s2375_s1 + $0x1e8] sm:$0xff]  }
  0x45   : > { %1863 = vmatprep.subr.bf16.mxu1 %v1992_v7 }
  0x46   : > { %1820 = vmatmul.mubr.bf16.vlgmr.msra.gmra.mrb[4].mxu0 %v455_v38  ;;  %v1115_v38 = vshrl.u32 %v2254_v22, 16 }
  0x47   : > { %1844 = vmatpush3.bf16.msra.mxu0 %v1989_v6  ;;  %1840 = vmatmul.mubr.bf16.vlgmr.msra.gmra.mrb[4].mxu1 %v2172_v47  ;;  %v2008_v47 = vld [vmem:[%s2375_s1 + $0x180] sm:$0xff]  }
  0x48   : > { %1864 = vmatpush3.bf16.msra.mxu1 %v1992_v7  ;;  %1845 = vmatprep.subr.bf16.mxu0 %v1993_v10  ;;  %v1117_v45 = vrot.slane %v1115_v38, 2  ;;  %v2029_v6 = vld [vmem:[%s2375_s1 + $0x200] sm:$0xff]   ;;  %v2030_v7 = vld [vmem:[%s2375_s1 + $0x208] sm:$0xff]  }
  0x49   : > { %1865 = vmatprep.subr.bf16.mxu1 %v1994_v11  ;;  %1859 = vmatprep.mubr.bf16.mxu0 %v726_v14  ;;  %v2035_v14 = vld [vmem:[%s2375_s1 + $0x230] sm:$0xff]  }
  0x4a   : > { %1879 = vmatprep.mubr.bf16.mxu1 %v1573_v15  ;;  %v1121_v53 = vor.u32 %v1120_v46, %v1117_v45  ;;  %v2036_v15 = vld [vmem:[%s2375_s1 + $0x238] sm:$0xff]  }
  0x4b   : > { %1846 = vmatpush3.bf16.msra.mxu0 %v1993_v10  ;;  %v2033_v10 = vld [vmem:[%s2375_s1 + $0x220] sm:$0xff]  }
  0x4c   : > { %1866 = vmatpush3.bf16.msra.mxu1 %v1994_v11  ;;  %1847 = vmatprep.subr.bf16.mxu0 %v1995_v16  ;;  %v1122_v57 = vsel %vm1105_vm5, %v1113_v52, %v1121_v53  ;;  %v2034_v11 = vld [vmem:[%s2375_s1 + $0x228] sm:$0xff]  }
  0x4d   : > { %1867 = vmatprep.subr.bf16.mxu1 %v1996_v17 }
  0x4f   : > { %1848 = vmatpush3.bf16.msra.mxu0 %v1995_v16 }
  0x50   : > { %1868 = vmatpush3.bf16.msra.mxu1 %v1996_v17  ;;  %1849 = vmatprep.subr.bf16.mxu0 %v1997_v12 }
  0x51   : > { %1869 = vmatprep.subr.bf16.mxu1 %v1998_v13 }
  0x53   : > { %1850 = vmatpush3.bf16.msra.mxu0 %v1997_v12 }
  0x54   : > { %1870 = vmatpush3.bf16.msra.mxu1 %v1998_v13  ;;  %1851 = vmatprep.subr.bf16.mxu0 %v1999_v20 }
  0x55   : > { %1871 = vmatprep.subr.bf16.mxu1 %v2000_v21 }
  0x57   : > { %1852 = vmatpush3.bf16.msra.mxu0 %v1999_v20 }
  0x58   : > { %1872 = vmatpush3.bf16.msra.mxu1 %v2000_v21  ;;  %1853 = vmatprep.subr.bf16.mxu0 %v2001_v27 }
  0x59   : > { %1873 = vmatprep.subr.bf16.mxu1 %v2002_v29 }
  0x5b   : > { %1854 = vmatpush3.bf16.msra.mxu0 %v2001_v27 }
  0x5c   : > { %1874 = vmatpush3.bf16.msra.mxu1 %v2002_v29  ;;  %1855 = vmatprep.subr.bf16.mxu0 %v2003_v33 }
  0x5d   : > { %1875 = vmatprep.subr.bf16.mxu1 %v2004_v34 }
  0x5f   : > { %1856 = vmatpush3.bf16.msra.mxu0 %v2003_v33 }
  0x60   : > { %1876 = vmatpush3.bf16.msra.mxu1 %v2004_v34  ;;  %1857 = vmatprep.subr.bf16.mxu0 %v2005_v40 }
  0x61   : > { %1877 = vmatprep.subr.bf16.mxu1 %v2006_v41 }
  0x63   : > { %1858 = vmatpush3.bf16.msra.mxu0 %v2005_v40 }
  0x64   : > { %1878 = vmatpush3.bf16.msra.mxu1 %v2006_v41  ;;  %1883 = vmatprep.subr.bf16.mxu0 %v2008_v47 }
  0x65   : > { %1903 = vmatprep.subr.bf16.mxu1 %v2011_v48 }
  0x66   : > { %1860 = vmatmul.mubr.bf16.vlgmr.msra.gmra.mrb[8].mxu0 %v2220_v9  ;;  %v2032_v9 = vld [vmem:[%s2375_s1 + $0x218] sm:$0xff]  }
  0x67   : > { %1884 = vmatpush3.bf16.msra.mxu0 %v2008_v47  ;;  %1880 = vmatmul.mubr.bf16.vlgmr.msra.gmra.mrb[8].mxu1 %v1574_v51 }
  0x68   : > { %1904 = vmatpush3.bf16.msra.mxu1 %v2011_v48  ;;  %1885 = vmatprep.subr.bf16.mxu0 %v2012_v54 }
  0x69   : > { %1905 = vmatprep.subr.bf16.mxu1 %v2013_v55  ;;  %1899 = vmatprep.mubr.bf16.mxu0 %v982_v56 }
  0x6a   : > { %1919 = vmatprep.mubr.bf16.mxu1 %v1122_v57 }
  0x6b   : > { %1886 = vmatpush3.bf16.msra.mxu0 %v2012_v54 }
  0x6c   : > { %1906 = vmatpush3.bf16.msra.mxu1 %v2013_v55  ;;  %1887 = vmatprep.subr.bf16.mxu0 %v2014_v58 }
  0x6d   : > { %1907 = vmatprep.subr.bf16.mxu1 %v2015_v59 }
  0x6f   : > { %1888 = vmatpush3.bf16.msra.mxu0 %v2014_v58 }
  0x70   : > { %1908 = vmatpush3.bf16.msra.mxu1 %v2015_v59  ;;  %1889 = vmatprep.subr.bf16.mxu0 %v2016_v60 }
  0x71   : > { %1909 = vmatprep.subr.bf16.mxu1 %v2017_v61 }
  0x73   : > { %1890 = vmatpush3.bf16.msra.mxu0 %v2016_v60 }
  0x74   : > { %1910 = vmatpush3.bf16.msra.mxu1 %v2017_v61  ;;  %1891 = vmatprep.subr.bf16.mxu0 %v2018_v62 }
  0x75   : > { %1911 = vmatprep.subr.bf16.mxu1 %v2019_v63 }
  0x77   : > { %1892 = vmatpush3.bf16.msra.mxu0 %v2018_v62 }
  0x78   : > { %1912 = vmatpush3.bf16.msra.mxu1 %v2019_v63  ;;  %1893 = vmatprep.subr.bf16.mxu0 %v2020_v0 }
  0x79   : > { %1913 = vmatprep.subr.bf16.mxu1 %v2021_v1 }
  0x7b   : > { %1894 = vmatpush3.bf16.msra.mxu0 %v2020_v0 }
  0x7c   : > { %1914 = vmatpush3.bf16.msra.mxu1 %v2021_v1  ;;  %1895 = vmatprep.subr.bf16.mxu0 %v2022_v2 }
  0x7d   : > { %1915 = vmatprep.subr.bf16.mxu1 %v2023_v3 }
  0x7f   : > { %1896 = vmatpush3.bf16.msra.mxu0 %v2022_v2 }
  0x80   : > { %1916 = vmatpush3.bf16.msra.mxu1 %v2023_v3  ;;  %1897 = vmatprep.subr.bf16.mxu0 %v2024_v4 }
  0x81   : > { %1917 = vmatprep.subr.bf16.mxu1 %v2025_v5 }
  0x83   : > { %1898 = vmatpush3.bf16.msra.mxu0 %v2024_v4  ;;  %v1659_v4 = vld [vmem:[%s2376_s2] ss:$0 sm:$0xff] }
  0x84   : > { %1918 = vmatpush3.bf16.msra.mxu1 %v2025_v5  ;;  %1923 = vmatprep.subr.bf16.mxu0 %v2029_v6 }
  0x86   : > { %1900 = vmatmul.mubr.bf16.vlgmr.msra.gmra.mrb[12].mxu0 %v981_v50 }
  0x87   : > { %1924 = vmatpush3.bf16.msra.mxu0 %v2029_v6  ;;  %1920 = vmatmul.mubr.bf16.vlgmr.msra.gmra.mrb[12].mxu1 %v1121_v53 }
  0x88   : > { %1925 = vmatprep.subr.bf16.mxu0 %v2030_v7  ;;  %1939 = vmatprep.mubr.bf16.mxu0 %v2269_v32 }
  0x8b   : > { %1926 = vmatpush3.bf16.msra.mxu0 %v2030_v7 }
  0x8c   : > { %1927 = vmatprep.subr.bf16.mxu0 %v2031_v8 }
  0x8f   : > { %1928 = vmatpush3.bf16.msra.mxu0 %v2031_v8 }
  0x90   : > { %1929 = vmatprep.subr.bf16.mxu0 %v2032_v9 }
  0x93   : > { %1930 = vmatpush3.bf16.msra.mxu0 %v2032_v9 }
  0x94   : > { %1931 = vmatprep.subr.bf16.mxu0 %v2033_v10 }
  0x97   : > { %1932 = vmatpush3.bf16.msra.mxu0 %v2033_v10 }
  0x98   : > { %1933 = vmatprep.subr.bf16.mxu0 %v2034_v11 }
  0x9b   : > { %1934 = vmatpush3.bf16.msra.mxu0 %v2034_v11 }
  0x9c   : > { %1935 = vmatprep.subr.bf16.mxu0 %v2035_v14 }
  0x9f   : > { %1936 = vmatpush3.bf16.msra.mxu0 %v2035_v14 }
  0xa0   : > { %1937 = vmatprep.subr.bf16.mxu0 %v2036_v15 }
  0xa3   : > { %1938 = vmatpush3.bf16.msra.mxu0 %v2036_v15 }
  0xa6   : > { %1940 = vmatmul.mubr.bf16.vlgmr.msra.gmra.mrb[16].mxu0 %v1246_v26 }
  0xf9   : > { %v1781_v16 = vpop.f32.mrb[0].mxu0 }
  0xfa   : > { %v1801_v17 = vpop.f32.mrb[0].mxu1  ;;  %v319_v12 = vpop.f32.mrb[1].mxu0 }
  0xfb   : > { %v427_v13 = vadd.f32 %v1801_v17, %v1781_v16  ;;  %v418_v18 = vpop.f32.mrb[1].mxu1  ;;  %v1782_v19 = vpop.f32.mrb[2].mxu0 }
  0xfc   : > { %v419_v20 = vadd.f32 %v418_v18, %v319_v12  ;;  %v1802_v21 = vpop.f32.mrb[2].mxu1  ;;  %v322_v23 = vpop.f32.mrb[3].mxu0 }
  0xfd   : > { %v421_v24 = vpop.f32.mrb[3].mxu1 }
  0xfe   : > { %v422_v25 = vadd.f32 %v421_v24, %v322_v23 }
 0x119   : > { %v1821_v27 = vpop.f32.mrb[4].mxu0 }
 0x11a   : > { %v557_v28 = vadd.f32 %v1821_v27, %v427_v13  ;;  %v541_v29 = vpop.f32.mrb[5].mxu0  ;;  %v1841_v30 = vpop.f32.mrb[4].mxu1 }
 0x11b   : > { %v555_v31 = vadd.f32 %v541_v29, %v419_v20  ;;  %v1822_v32 = vpop.f32.mrb[6].mxu0  ;;  %v671_v33 = vpop.f32.mrb[5].mxu1 }
 0x11c   : > { %v687_v22 = vadd.f32 %v1841_v30, %v557_v28  ;;  %v544_v26 = vpop.f32.mrb[7].mxu0  ;;  %v1842_v34 = vpop.f32.mrb[6].mxu1 }
 0x11d   : > { %v556_v35 = vadd.f32 %v544_v26, %v422_v25  ;;  %v685_v36 = vadd.f32 %v671_v33, %v555_v31  ;;  %v674_v37 = vpop.f32.mrb[7].mxu1 }
 0x11f   : > { %v686_v38 = vadd.f32 %v674_v37, %v556_v35 }
 0x139   : > { %v1861_v39 = vpop.f32.mrb[8].mxu0 }
 0x13a   : > { %v827_v40 = vadd.f32 %v1861_v39, %v687_v22  ;;  %v811_v41 = vpop.f32.mrb[9].mxu0  ;;  %v1881_v42 = vpop.f32.mrb[8].mxu1 }
 0x13b   : > { %v825_v43 = vadd.f32 %v811_v41, %v685_v36  ;;  %v1862_v44 = vpop.f32.mrb[10].mxu0  ;;  %v931_v45 = vpop.f32.mrb[9].mxu1 }
 0x13c   : > { %v947_v46 = vadd.f32 %v1881_v42, %v827_v40  ;;  %v814_v47 = vpop.f32.mrb[11].mxu0  ;;  %v1882_v48 = vpop.f32.mrb[10].mxu1 }
 0x13d   : > { %v826_v49 = vadd.f32 %v814_v47, %v686_v38  ;;  %v945_v50 = vadd.f32 %v931_v45, %v825_v43  ;;  %v934_v51 = vpop.f32.mrb[11].mxu1 }
 0x13f   : > { %v946_v52 = vadd.f32 %v934_v51, %v826_v49 }
 0x159   : > { %v1901_v53 = vpop.f32.mrb[12].mxu0 }
 0x15a   : > { %v1083_v54 = vadd.f32 %v1901_v53, %v947_v46  ;;  %v1067_v55 = vpop.f32.mrb[13].mxu0  ;;  %v1921_v56 = vpop.f32.mrb[12].mxu1 }
 0x15b   : > { %v1081_v57 = vadd.f32 %v1067_v55, %v945_v50  ;;  %v1902_v58 = vpop.f32.mrb[14].mxu0  ;;  %v1207_v59 = vpop.f32.mrb[13].mxu1 }
 0x15c   : > { %v1223_v60 = vadd.f32 %v1921_v56, %v1083_v54  ;;  %v1070_v61 = vpop.f32.mrb[15].mxu0  ;;  %v1922_v62 = vpop.f32.mrb[14].mxu1 }
 0x15d   : > { %v1082_v63 = vadd.f32 %v1070_v61, %v946_v52  ;;  %v1221_v0 = vadd.f32 %v1207_v59, %v1081_v57  ;;  %v1210_v1 = vpop.f32.mrb[15].mxu1 }
 0x15f   : > { %v1222_v2 = vadd.f32 %v1210_v1, %v1082_v63 }
 0x179   : > { %v1941_v3 = vpop.f32.mrb[16].mxu0 }
 0x17a   : > { %v1348_v5 = vadd.f32 %v1941_v3, %v1223_v60  ;;  %v1332_v6 = vpop.f32.mrb[17].mxu0 }
 0x17b   : > { %v1346_v7 = vadd.f32 %v1332_v6, %v1221_v0  ;;  %v1942_v8 = vpop.f32.mrb[18].mxu0 }
 0x17c   : > { %v1358_v9 = vadd.f32 %v1659_v4, %v1348_v5  ;;  %v1335_v10 = vpop.f32.mrb[19].mxu0 }
 0x17d   : > { %v1356_v11 = vadd.f32 %v1659_v4, %v1346_v7  ;;  %v1347_v14 = vadd.f32 %v1335_v10, %v1222_v2 }
 0x17e   : > { %vm1361_vm6 = vcmp.gt.f32.partialorder %v1358_v9, 0.0  ;;  %v1364_v15 = vmul.f32 0.01, %v1358_v9 }
 0x17f   : > { %v1362_v16 = vmul.f32 0.01, %v1356_v11  ;;  %v1357_v17 = vadd.f32 %v1659_v4, %v1347_v14  ;;  %vm1359_vm7 = vcmp.gt.f32.partialorder %v1356_v11, 0.0 }
 0x180   : > { %v1367_v12 = vsel %vm1361_vm6, %v1358_v9, %v1364_v15 }
 0x181   : > { %v1667_v13 = vpack.c.bf16 %v1367_v12, %v1367_v12  ;;  %vm1360_vm8 = vcmp.gt.f32.partialorder %v1357_v17, 0.0  ;;  %v1363_v18 = vmul.f32 0.01, %v1357_v17  ;;  %v1365_v19 = vsel %vm1359_vm7, %v1356_v11, %v1362_v16 }
 0x183   : > { %1383 = vst [vmem:[%s170_s19 + $0x8] sm:$0xf] %v1667_v13  ;;  %v1366_v20 = vsel %vm1360_vm8, %v1357_v17, %v1363_v18 }
 0x184   : > { %v1671_v21 = vpack.c.bf16 %v1366_v20, %v1365_v19 }
 0x186   : > { %1672 = vst [vmem:[%s170_s19] sm:$0xff] %v1671_v21  }
 0x187 PF: > { %s13_s12 = sadd.s32 1, %s2044_s12  }
 0x188   : > { %p10_p4 = scmp.ge.s32.totalorder %s13_s12, 4  }
 0x18a   :  { %12 = sbr.rel (!%p10_p4) target bundleno = 1 (0x1), region = 70 }

// kernel: forward.15
= control target key start
LH: loop header
LB: loop body
LE: loop exit
PB: predicated region body
PF: predicated region fallthrough
CT: control target
= control target key end

     0   :  { %s2144_s15 = smov 0   ;;  %s2455_s0 = inlined_call_operand.vmem [shape: bf16[2,1,40,128], index: 0, kind: input, shape index: {}]   ;;  %s2456_s1 = inlined_call_operand.vmem [shape: bf16[9,128,128], index: 1, kind: input, shape index: {}]   ;;  %s2457_s2 = inlined_call_operand.vmem [shape: f32[1,128], index: 2, kind: input, shape index: {}]   ;;  %s2458_s3 = inlined_call_operand.vmem [shape: bf16[2,24,128], index: 3, kind: input, shape index: {}]   ;;  %s2459_s4 = inlined_call_operand.vmem [shape: bf16[2,24,128], index: 4, kind: output, shape index: {}]  }
   0x1 LB: > { %s1507_s16 = sadd.s32 4294967295, %s2117_s15   ;;  %p1511_p0 = scmp.ge.s32.totalorder %s2117_s15, 1  ;;  %s2117_s15 = sphi %s2144_s15, %s14_s15  }
   0x2   : > { %p172_p1 = scmp.lt.s32.totalorder %s2117_s15, 3 }
   0x4   : > { %p173_p2 = pnand %p1511_p0, %p172_p1 }
   0x5   : > { %v2026_v0 = vld [vmem:[%s2456_s1 + $0x40] sm:$0xff] (!%p173_p2)   ;;  %p203_p3 = scmp.lt.s32.totalorder (!%p173_p2), %s1507_s16, 1  ;;  %v2028_v2 = vld [vmem:[%s2456_s1 + $0x48] sm:$0xff] (!%p173_p2)   ;;  %v2030_v4 = vld [vmem:[%s2456_s1 + $0x50] sm:$0xff] (!%p173_p2)   ;;  %vm266_vm0 = vsmask.f32 (!%p173_p2), 7424 }
   0x6   : > { %176 = sbr.rel (%p173_p2) target bundleno = 393 (0x189), region = 36  ;;  %v2027_v1 = vld [vmem:[%s2456_s1] sm:$0xff] (!%p173_p2)   ;;  %1836 = vmatprep.subr.bf16.mxu0 (!%p173_p2), %v2026_v0  ;;  %v2029_v3 = vld [vmem:[%s2456_s1 + $0x8] sm:$0xff] (!%p173_p2)   ;;  %v2031_v5 = vld [vmem:[%s2456_s1 + $0x10] sm:$0xff] (!%p173_p2)   ;;  %vm500_vm1 = vcmask (!%p173_p2), 1046528   ;;  %vm630_vm2 = vcmask (!%p173_p2), 1044480  }
   0x7   : > { %1856 = vmatprep.subr.bf16.mxu1 (!%p173_p2), %v2027_v1  ;;  %1837 = vmatpush3.bf16.msra.mxu0 (!%p173_p2), %v2026_v0  ;;  %v2032_v6 = vld [vmem:[%s2456_s1 + $0x58] sm:$0xff] (!%p173_p2)   ;;  %v2034_v8 = vld [vmem:[%s2456_s1 + $0x60] sm:$0xff] (!%p173_p2)   ;;  %v2036_v10 = vld [vmem:[%s2456_s1 + $0x68] sm:$0xff] (!%p173_p2)   ;;  %vm756_vm3 = vsmask.f32 (!%p173_p2), 4352  ;;  %vm1026_vm4 = vcmask (!%p173_p2), 1045504  }
   0x8   : > { %1857 = vmatpush3.bf16.msra.mxu1 (!%p173_p2), %v2027_v1  ;;  %1838 = vmatprep.subr.bf16.mxu0 (!%p173_p2), %v2028_v2  ;;  %v2033_v7 = vld [vmem:[%s2456_s1 + $0x18] sm:$0xff] (!%p173_p2)   ;;  %v2035_v9 = vld [vmem:[%s2456_s1 + $0x20] sm:$0xff] (!%p173_p2)   ;;  %v2037_v14 = vld [vmem:[%s2456_s1 + $0x28] sm:$0xff] (!%p173_p2)   ;;  %vm1152_vm5 = vsmask.f32 (!%p173_p2), 5376 }
   0x9   : > { %1858 = vmatprep.subr.bf16.mxu1 (!%p173_p2), %v2029_v3  ;;  %v2038_v20 = vld [vmem:[%s2456_s1 + $0x70] sm:$0xff] (!%p173_p2)   ;;  %v2040_v26 = vld [vmem:[%s2456_s1 + $0x78] sm:$0xff] (!%p173_p2)   ;;  %v2045_v30 = vld [vmem:[%s2456_s1 + $0x80] sm:$0xff] (!%p173_p2)  }
   0xa   : > { %v2039_v22 = vld [vmem:[%s2456_s1 + $0x30] sm:$0xff] (!%p173_p2)   ;;  %v2041_v27 = vld [vmem:[%s2456_s1 + $0x38] sm:$0xff] (!%p173_p2)   ;;  %v2046_v31 = vld [vmem:[%s2456_s1 + $0xc0] sm:$0xff] (!%p173_p2)  }
   0xb   : > { %1839 = vmatpush3.bf16.msra.mxu0 (!%p173_p2), %v2028_v2  ;;  %v2047_v34 = vld [vmem:[%s2456_s1 + $0x88] sm:$0xff] (!%p173_p2)   ;;  %v2049_v41 = vld [vmem:[%s2456_s1 + $0x90] sm:$0xff] (!%p173_p2)   ;;  %v2051_v49 = vld [vmem:[%s2456_s1 + $0x98] sm:$0xff] (!%p173_p2)  }
   0xc   : > { %1859 = vmatpush3.bf16.msra.mxu1 (!%p173_p2), %v2029_v3  ;;  %1840 = vmatprep.subr.bf16.mxu0 (!%p173_p2), %v2030_v4  ;;  %v2048_v35 = vld [vmem:[%s2456_s1 + $0xc8] sm:$0xff] (!%p173_p2)   ;;  %v2050_v44 = vld [vmem:[%s2456_s1 + $0xd0] sm:$0xff] (!%p173_p2)   ;;  %v2052_v51 = vld [vmem:[%s2456_s1 + $0xd8] sm:$0xff] (!%p173_p2)  }
   0xd   : > { %s2461_s16 = smov (!%p203_p3, %s1507_s16), 1  ;;  %1860 = vmatprep.subr.bf16.mxu1 %v2031_v5  ;;  %v2053_v52 = vld [vmem:[%s2456_s1 + $0xa0] sm:$0xff]   ;;  %v2055_v54 = vld [vmem:[%s2456_s1 + $0xa8] sm:$0xff]   ;;  %v2057_v56 = vld [vmem:[%s2456_s1 + $0xb0] sm:$0xff]  }
   0xe   : > { %s2016_s7 = smul.u32 20, %s2461_s16  ;;  %v2054_v53 = vld [vmem:[%s2456_s1 + $0xe0] sm:$0xff]   ;;  %v2056_v55 = vld [vmem:[%s2456_s1 + $0xe8] sm:$0xff]   ;;  %v2058_v61 = vld [vmem:[%s2456_s1 + $0xf0] sm:$0xff]  }
   0xf   : > { %1841 = vmatpush3.bf16.msra.mxu0 %v2030_v4  ;;  %v2059_v0 = vld [vmem:[%s2456_s1 + $0xb8] sm:$0xff]  }
  0x10   : > { %1861 = vmatpush3.bf16.msra.mxu1 %v2031_v5  ;;  %1842 = vmatprep.subr.bf16.mxu0 %v2032_v6  ;;  %s2188_s14 = scalar_lea.vmem %s2455_s0, %s2016_s7  ;;  %v2060_v1 = vld [vmem:[%s2456_s1 + $0xf8] sm:$0xff]  }
  0x11   : > { %1862 = vmatprep.subr.bf16.mxu1 %v2033_v7  ;;  %v219_v11 = vld [vmem:[%s2188_s14] sm:$0xf]  ;;  %v2195_v12 = vld [vmem:[%s2188_s14 + $0x4] sm:$0xf]  ;;  %v2198_v13 = vld [vmem:[%s2188_s14 + $0x8] sm:$0xf] }
  0x12   : > { %v238_v15 = vld [vmem:[%s2188_s14 + $0xc] sm:$0x1]  ;;  %v1531_v16 = vcombine.low %v219_v11, %v2195_v12  ;;  %v1541_v33 = vcombine.low %v2198_v13, %v2198_v13  ;;  %v479_v36 = vld [vmem:[%s2188_s14] sm:$0xe] }
  0x13   : > { %1843 = vmatpush3.bf16.msra.mxu0 %v2032_v6  ;;  %v2206_v17 = vcombine.low %v2198_v13, %v238_v15  ;;  %v1566_v37 = vcombine.low %v479_v36, %v2195_v12  ;;  %v605_v39 = vld [vmem:[%s2188_s14] sm:$0x8]  ;;  %v606_v40 = vld [vmem:[%s2188_s14 + $0xc] sm:$0x7]  ;;  %v1642_v15 = vcombine.low %v2195_v12, %v2198_v13 }
  0x14   : > { %1863 = vmatpush3.bf16.msra.mxu1 %v2033_v7  ;;  %1844 = vmatprep.subr.bf16.mxu0 %v2034_v8  ;;  %v268_v18 = vshrl.u32 %v1531_v16, 16  ;;  %v270_v19 = vshll.u32 %v1531_v16, 16  ;;  %v1591_v42 = vcombine.low %v605_v39, %v2195_v12  ;;  %v1592_v43 = vcombine.low %v2198_v13, %v606_v40  ;;  %v2279_v57 = vld [vmem:[%s2188_s14 + $0xc] sm:$0xf]  ;;  %v2062_v6 = vld [vmem:[%s2456_s1 + $0x100] sm:$0xff]   ;;  %v2070_v12 = vld [vmem:[%s2456_s1 + $0x118] sm:$0xff]  }
  0x15   : > { %1864 = vmatprep.subr.bf16.mxu1 %v2035_v9  ;;  %1872 = vmatprep.mubr.bf16.mxu1 %v1531_v16  ;;  %v275_v21 = vshll.u32 %v2206_v17, 16  ;;  %v279_v29 = vshrl.u32 %v2206_v17, 16  ;;  %v502_v38 = vrot.slane %v2206_v17, 1  ;;  %v501_v45 = vrot.slane %v1566_v37, 1  ;;  %v2065_v7 = vld [vmem:[%s2456_s1 + $0x140] sm:$0xff]   ;;  %v2067_v11 = vld [vmem:[%s2456_s1 + $0x148] sm:$0xff]  }
  0x16   : > { %v272_v23 = vrot.slane %v270_v19, 1  ;;  %v631_v46 = vrot.slane %v1591_v42, 3  ;;  %v2250_v47 = vrot.slane %v1592_v43, 3  ;;  %v758_v58 = vshrl.u32 %v1591_v42, 16  ;;  %v2068_v16 = vld [vmem:[%s2456_s1 + $0x110] sm:$0xff]   ;;  %v2078_v40 = vld [vmem:[%s2456_s1 + $0x138] sm:$0xff]  }
  0x17   : > { %1845 = vmatpush3.bf16.msra.mxu0 %v2034_v8  ;;  %v277_v24 = vrot.slane %v275_v21, 1  ;;  %v503_v48 = vsel %vm500_vm1, %v501_v45, %v502_v38  ;;  %v761_v59 = vshll.u32 %v1591_v42, 16  ;;  %v1617_v60 = vcombine.low %v2198_v13, %v2279_v57  ;;  %v2069_v17 = vld [vmem:[%s2456_s1 + $0x150] sm:$0xff]   ;;  %v2071_v13 = vld [vmem:[%s2456_s1 + $0x158] sm:$0xff]   ;;  %v2073_v21 = vld [vmem:[%s2456_s1 + $0x160] sm:$0xff]  }
  0x18   : > { %1865 = vmatpush3.bf16.msra.mxu1 %v2035_v9  ;;  %1846 = vmatprep.subr.bf16.mxu0 %v2036_v10  ;;  %v273_v25 = vor.u32 %v272_v23, %v268_v18  ;;  %v633_v50 = vsel %vm630_vm2, %v631_v46, %v2250_v47  ;;  %v760_v2 = vrot.slane %v758_v58, 3  ;;  %v997_v18 = vld [vmem:[%s2188_s14 + $0xc] sm:$0xf]  ;;  %v1131_v19 = vld [vmem:[%s2188_s14 + $0x10] sm:$0x7] }
  0x19   : > { %1866 = vmatprep.subr.bf16.mxu1 %v2037_v14  ;;  %v281_v32 = vor.u32 %v279_v29, %v277_v24  ;;  %v766_v62 = vshrl.u32 %v1617_v60, 16  ;;  %v769_v63 = vshll.u32 %v1617_v60, 16  ;;  %v763_v3 = vrot.slane %v761_v59, 4  ;;  %v996_v23 = vld [vmem:[%s2188_s14 + $0x8] sm:$0xf]  ;;  %v2087_v58 = vld [vmem:[%s2456_s1 + $0x190] sm:$0xff]  }
  0x1a   : > { %v278_v28 = vsel %vm266_vm0, %v273_v25, %v277_v24  ;;  %v1271_v24 = vld [vmem:[%s2188_s14 + $0x4] sm:$0x8]  ;;  %v2075_v29 = vld [vmem:[%s2456_s1 + $0x168] sm:$0xff]   ;;  %v2088_v59 = vld [vmem:[%s2456_s1 + $0x1d0] sm:$0xff]  }
  0x1b   : > { %1847 = vmatpush3.bf16.msra.mxu0 %v2036_v10  ;;  %1852 = vmatprep.mubr.bf16.mxu0 %v278_v28  ;;  %v768_v4 = vrot.slane %v766_v62, 3  ;;  %v771_v5 = vrot.slane %v769_v63, 4  ;;  %v764_v8 = vor.u32 %v763_v3, %v760_v2  ;;  %v2066_v10 = vld [vmem:[%s2456_s1 + $0x108] sm:$0xff]   ;;  %v1719_v25 = vcombine.low %v1271_v24, %v996_v23  ;;  %v995_v28 = vld [vmem:[%s2188_s14 + $0x4] sm:$0xc]  ;;  %v2089_v60 = vld [vmem:[%s2456_s1 + $0x198] sm:$0xff]  }
  0x1c   : > { %1867 = vmatpush3.bf16.msra.mxu1 %v2037_v14  ;;  %1848 = vmatprep.subr.bf16.mxu0 %v2038_v20  ;;  %v2091_v62 = vld [vmem:[%s2456_s1 + $0x1a0] sm:$0xff]   ;;  %v2095_v2 = vld [vmem:[%s2456_s1 + $0x1b0] sm:$0xff]  }
  0x1d   : > { %1868 = vmatprep.subr.bf16.mxu1 %v2039_v22  ;;  %v2298_v9 = vor.u32 %v771_v5, %v768_v4  ;;  %v2092_v63 = vld [vmem:[%s2456_s1 + $0x1e0] sm:$0xff]   ;;  %v2096_v3 = vld [vmem:[%s2456_s1 + $0x1f0] sm:$0xff]   ;;  %v2097_v4 = vld [vmem:[%s2456_s1 + $0x1b8] sm:$0xff]  }
  0x1e   : > { %v2098_v5 = vld [vmem:[%s2456_s1 + $0x1f8] sm:$0xff]  }
  0x1f   : > { %1849 = vmatpush3.bf16.msra.mxu0 %v2038_v20  ;;  %v773_v14 = vsel %vm756_vm3, %v764_v8, %v2298_v9  ;;  %v2072_v20 = vld [vmem:[%s2456_s1 + $0x120] sm:$0xff]   ;;  %v2104_v8 = vld [vmem:[%s2456_s1 + $0x210] sm:$0xff]  }
  0x20   : > { %1869 = vmatpush3.bf16.msra.mxu1 %v2039_v22  ;;  %1850 = vmatprep.subr.bf16.mxu0 %v2040_v26  ;;  %v2332_v22 = vcombine.low %v997_v18, %v1131_v19 }
  0x21   : > { %1870 = vmatprep.subr.bf16.mxu1 %v2041_v27 }
  0x22   : > { %v1165_v39 = vshll.u32 %v2332_v22, 16 }
  0x23   : > { %1851 = vmatpush3.bf16.msra.mxu0 %v2040_v26  ;;  %v1293_v26 = vrot.slane %v2332_v22, 3 }
  0x24   : > { %1871 = vmatpush3.bf16.msra.mxu1 %v2041_v27  ;;  %1876 = vmatprep.subr.bf16.mxu0 %v2045_v30  ;;  %v2074_v27 = vld [vmem:[%s2456_s1 + $0x128] sm:$0xff]   ;;  %v1167_v46 = vrot.slane %v1165_v39, 3 }
  0x25   : > { %1896 = vmatprep.subr.bf16.mxu1 %v2046_v31 }
  0x26   : > { %1853 = vmatmul.mubr.bf16.vlgmr.msra.gmra.mrb[0].mxu0 %v281_v32 }
  0x27   : > { %1873 = vmatmul.mubr.bf16.vlgmr.msra.gmra.mrb[0].mxu1 %v1541_v33  ;;  %1877 = vmatpush3.bf16.msra.mxu0 %v2045_v30  ;;  %v1292_v30 = vrot.slane %v1719_v25, 3  ;;  %v2076_v33 = vld [vmem:[%s2456_s1 + $0x130] sm:$0xff]  }
  0x28   : > { %1897 = vmatpush3.bf16.msra.mxu1 %v2046_v31  ;;  %1878 = vmatprep.subr.bf16.mxu0 %v2047_v34  ;;  %v1668_v31 = vcombine.low %v995_v28, %v996_v23 }
  0x29   : > { %1898 = vmatprep.subr.bf16.mxu1 %v2048_v35  ;;  %1892 = vmatprep.mubr.bf16.mxu0 %v503_v48  ;;  %v2347_v32 = vsel %vm630_vm2, %v1292_v30, %v1293_v26  ;;  %v2084_v48 = vld [vmem:[%s2456_s1 + $0x1c0] sm:$0xff]  }
  0x2a   : > { %1912 = vmatprep.mubr.bf16.mxu1 %v633_v50  ;;  %v1154_v36 = vshrl.u32 %v1668_v31, 16  ;;  %v1157_v37 = vshll.u32 %v1668_v31, 16 }
  0x2b   : > { %1879 = vmatpush3.bf16.msra.mxu0 %v2047_v34  ;;  %v2077_v34 = vld [vmem:[%s2456_s1 + $0x170] sm:$0xff]  }
  0x2c   : > { %1899 = vmatpush3.bf16.msra.mxu1 %v2048_v35  ;;  %1880 = vmatprep.subr.bf16.mxu0 %v2049_v41  ;;  %v998_v35 = vld [vmem:[%s2188_s14 + $0x10] sm:$0x3]  ;;  %v1156_v43 = vrot.slane %v1154_v36, 2  ;;  %s2017_s14 = smul.u32 12, %s2461_s16 }
  0x2d   : > { %1900 = vmatprep.subr.bf16.mxu1 %v2050_v44  ;;  %v1669_v42 = vcombine.low %v997_v18, %v998_v35 }
  0x2e   : > { %s212_s26 = scalar_lea.vmem %s2458_s3, %s2017_s14  ;;  %s217_s30 = scalar_lea.vmem %s2459_s4, %s2017_s14 }
  0x2f   : > { %1881 = vmatpush3.bf16.msra.mxu0 %v2049_v41  ;;  %v2079_v41 = vld [vmem:[%s2456_s1 + $0x178] sm:$0xff]   ;;  %v1028_v50 = vrot.slane %v1669_v42, 2 }
  0x30   : > { %1901 = vmatpush3.bf16.msra.mxu1 %v2050_v44  ;;  %1882 = vmatprep.subr.bf16.mxu0 %v2051_v49  ;;  %v1159_v44 = vrot.slane %v1157_v37, 3 }
  0x31   : > { %1902 = vmatprep.subr.bf16.mxu1 %v2052_v51 }
  0x33   : > { %1883 = vmatpush3.bf16.msra.mxu0 %v2051_v49  ;;  %v1027_v49 = vrot.slane %v1668_v31, 2 }
  0x34   : > { %1903 = vmatpush3.bf16.msra.mxu1 %v2052_v51  ;;  %1884 = vmatprep.subr.bf16.mxu0 %v2053_v52  ;;  %v1643_v51 = vcombine.low %v2279_v57, %v2279_v57 }
  0x35   : > { %1904 = vmatprep.subr.bf16.mxu1 %v2054_v53 }
  0x37   : > { %1885 = vmatpush3.bf16.msra.mxu0 %v2053_v52  ;;  %v1160_v52 = vor.u32 %v1159_v44, %v1156_v43 }
  0x38   : > { %1905 = vmatpush3.bf16.msra.mxu1 %v2054_v53  ;;  %1886 = vmatprep.subr.bf16.mxu0 %v2055_v54 }
  0x39   : > { %1906 = vmatprep.subr.bf16.mxu1 %v2056_v55 }
  0x3b   : > { %1887 = vmatpush3.bf16.msra.mxu0 %v2055_v54  ;;  %v2085_v54 = vld [vmem:[%s2456_s1 + $0x188] sm:$0xff]  }
  0x3c   : > { %1907 = vmatpush3.bf16.msra.mxu1 %v2056_v55  ;;  %1888 = vmatprep.subr.bf16.mxu0 %v2057_v56  ;;  %v2086_v55 = vld [vmem:[%s2456_s1 + $0x1c8] sm:$0xff]  }
  0x3d   : > { %1908 = vmatprep.subr.bf16.mxu1 %v2058_v61 }
  0x3f   : > { %1889 = vmatpush3.bf16.msra.mxu0 %v2057_v56  ;;  %v1029_v56 = vsel %vm1026_vm4, %v1027_v49, %v1028_v50 }
  0x40   : > { %1909 = vmatpush3.bf16.msra.mxu1 %v2058_v61  ;;  %1890 = vmatprep.subr.bf16.mxu0 %v2059_v0  ;;  %v2090_v61 = vld [vmem:[%s2456_s1 + $0x1d8] sm:$0xff]  }
  0x41   : > { %1910 = vmatprep.subr.bf16.mxu1 %v2060_v1 }
  0x43   : > { %1891 = vmatpush3.bf16.msra.mxu0 %v2059_v0  ;;  %v2093_v0 = vld [vmem:[%s2456_s1 + $0x1a8] sm:$0xff]  }
  0x44   : > { %1911 = vmatpush3.bf16.msra.mxu1 %v2060_v1  ;;  %1916 = vmatprep.subr.bf16.mxu0 %v2062_v6  ;;  %v2094_v1 = vld [vmem:[%s2456_s1 + $0x1e8] sm:$0xff]  }
  0x45   : > { %1936 = vmatprep.subr.bf16.mxu1 %v2065_v7 }
  0x46   : > { %1893 = vmatmul.mubr.bf16.vlgmr.msra.gmra.mrb[4].mxu0 %v502_v38  ;;  %v1162_v38 = vshrl.u32 %v2332_v22, 16 }
  0x47   : > { %1917 = vmatpush3.bf16.msra.mxu0 %v2062_v6  ;;  %1913 = vmatmul.mubr.bf16.vlgmr.msra.gmra.mrb[4].mxu1 %v2250_v47  ;;  %v2081_v47 = vld [vmem:[%s2456_s1 + $0x180] sm:$0xff]  }
  0x48   : > { %1937 = vmatpush3.bf16.msra.mxu1 %v2065_v7  ;;  %1918 = vmatprep.subr.bf16.mxu0 %v2066_v10  ;;  %v1164_v45 = vrot.slane %v1162_v38, 2  ;;  %v2102_v6 = vld [vmem:[%s2456_s1 + $0x200] sm:$0xff]   ;;  %v2103_v7 = vld [vmem:[%s2456_s1 + $0x208] sm:$0xff]  }
  0x49   : > { %1938 = vmatprep.subr.bf16.mxu1 %v2067_v11  ;;  %1932 = vmatprep.mubr.bf16.mxu0 %v773_v14  ;;  %v2108_v14 = vld [vmem:[%s2456_s1 + $0x230] sm:$0xff]  }
  0x4a   : > { %1952 = vmatprep.mubr.bf16.mxu1 %v1642_v15  ;;  %v1168_v53 = vor.u32 %v1167_v46, %v1164_v45  ;;  %v2109_v15 = vld [vmem:[%s2456_s1 + $0x238] sm:$0xff]  }
  0x4b   : > { %1919 = vmatpush3.bf16.msra.mxu0 %v2066_v10  ;;  %v2106_v10 = vld [vmem:[%s2456_s1 + $0x220] sm:$0xff]  }
  0x4c   : > { %1939 = vmatpush3.bf16.msra.mxu1 %v2067_v11  ;;  %1920 = vmatprep.subr.bf16.mxu0 %v2068_v16  ;;  %v1169_v57 = vsel %vm1152_vm5, %v1160_v52, %v1168_v53  ;;  %v2107_v11 = vld [vmem:[%s2456_s1 + $0x228] sm:$0xff]  }
  0x4d   : > { %1940 = vmatprep.subr.bf16.mxu1 %v2069_v17 }
  0x4f   : > { %1921 = vmatpush3.bf16.msra.mxu0 %v2068_v16 }
  0x50   : > { %1941 = vmatpush3.bf16.msra.mxu1 %v2069_v17  ;;  %1922 = vmatprep.subr.bf16.mxu0 %v2070_v12 }
  0x51   : > { %1942 = vmatprep.subr.bf16.mxu1 %v2071_v13 }
  0x53   : > { %1923 = vmatpush3.bf16.msra.mxu0 %v2070_v12 }
  0x54   : > { %1943 = vmatpush3.bf16.msra.mxu1 %v2071_v13  ;;  %1924 = vmatprep.subr.bf16.mxu0 %v2072_v20 }
  0x55   : > { %1944 = vmatprep.subr.bf16.mxu1 %v2073_v21 }
  0x57   : > { %1925 = vmatpush3.bf16.msra.mxu0 %v2072_v20 }
  0x58   : > { %1945 = vmatpush3.bf16.msra.mxu1 %v2073_v21  ;;  %1926 = vmatprep.subr.bf16.mxu0 %v2074_v27 }
  0x59   : > { %1946 = vmatprep.subr.bf16.mxu1 %v2075_v29 }
  0x5b   : > { %1927 = vmatpush3.bf16.msra.mxu0 %v2074_v27 }
  0x5c   : > { %1947 = vmatpush3.bf16.msra.mxu1 %v2075_v29  ;;  %1928 = vmatprep.subr.bf16.mxu0 %v2076_v33 }
  0x5d   : > { %1948 = vmatprep.subr.bf16.mxu1 %v2077_v34 }
  0x5f   : > { %1929 = vmatpush3.bf16.msra.mxu0 %v2076_v33 }
  0x60   : > { %1949 = vmatpush3.bf16.msra.mxu1 %v2077_v34  ;;  %1930 = vmatprep.subr.bf16.mxu0 %v2078_v40 }
  0x61   : > { %1950 = vmatprep.subr.bf16.mxu1 %v2079_v41 }
  0x63   : > { %1931 = vmatpush3.bf16.msra.mxu0 %v2078_v40 }
  0x64   : > { %1951 = vmatpush3.bf16.msra.mxu1 %v2079_v41  ;;  %1956 = vmatprep.subr.bf16.mxu0 %v2081_v47 }
  0x65   : > { %1976 = vmatprep.subr.bf16.mxu1 %v2084_v48 }
  0x66   : > { %1933 = vmatmul.mubr.bf16.vlgmr.msra.gmra.mrb[8].mxu0 %v2298_v9  ;;  %v2105_v9 = vld [vmem:[%s2456_s1 + $0x218] sm:$0xff]  }
  0x67   : > { %1957 = vmatpush3.bf16.msra.mxu0 %v2081_v47  ;;  %1953 = vmatmul.mubr.bf16.vlgmr.msra.gmra.mrb[8].mxu1 %v1643_v51 }
  0x68   : > { %1977 = vmatpush3.bf16.msra.mxu1 %v2084_v48  ;;  %1958 = vmatprep.subr.bf16.mxu0 %v2085_v54 }
  0x69   : > { %1978 = vmatprep.subr.bf16.mxu1 %v2086_v55  ;;  %1972 = vmatprep.mubr.bf16.mxu0 %v1029_v56 }
  0x6a   : > { %1992 = vmatprep.mubr.bf16.mxu1 %v1169_v57 }
  0x6b   : > { %1959 = vmatpush3.bf16.msra.mxu0 %v2085_v54 }
  0x6c   : > { %1979 = vmatpush3.bf16.msra.mxu1 %v2086_v55  ;;  %1960 = vmatprep.subr.bf16.mxu0 %v2087_v58 }
  0x6d   : > { %1980 = vmatprep.subr.bf16.mxu1 %v2088_v59 }
  0x6f   : > { %1961 = vmatpush3.bf16.msra.mxu0 %v2087_v58 }
  0x70   : > { %1981 = vmatpush3.bf16.msra.mxu1 %v2088_v59  ;;  %1962 = vmatprep.subr.bf16.mxu0 %v2089_v60 }
  0x71   : > { %1982 = vmatprep.subr.bf16.mxu1 %v2090_v61 }
  0x73   : > { %1963 = vmatpush3.bf16.msra.mxu0 %v2089_v60 }
  0x74   : > { %1983 = vmatpush3.bf16.msra.mxu1 %v2090_v61  ;;  %1964 = vmatprep.subr.bf16.mxu0 %v2091_v62 }
  0x75   : > { %1984 = vmatprep.subr.bf16.mxu1 %v2092_v63 }
  0x77   : > { %1965 = vmatpush3.bf16.msra.mxu0 %v2091_v62 }
  0x78   : > { %1985 = vmatpush3.bf16.msra.mxu1 %v2092_v63  ;;  %1966 = vmatprep.subr.bf16.mxu0 %v2093_v0 }
  0x79   : > { %1986 = vmatprep.subr.bf16.mxu1 %v2094_v1 }
  0x7b   : > { %1967 = vmatpush3.bf16.msra.mxu0 %v2093_v0 }
  0x7c   : > { %1987 = vmatpush3.bf16.msra.mxu1 %v2094_v1  ;;  %1968 = vmatprep.subr.bf16.mxu0 %v2095_v2 }
  0x7d   : > { %1988 = vmatprep.subr.bf16.mxu1 %v2096_v3 }
  0x7f   : > { %1969 = vmatpush3.bf16.msra.mxu0 %v2095_v2 }
  0x80   : > { %1989 = vmatpush3.bf16.msra.mxu1 %v2096_v3  ;;  %1970 = vmatprep.subr.bf16.mxu0 %v2097_v4  ;;  %v1408_v3 = vld [vmem:[%s212_s26 + $0x8] sm:$0xf] }
  0x81   : > { %1990 = vmatprep.subr.bf16.mxu1 %v2098_v5 }
  0x83   : > { %1971 = vmatpush3.bf16.msra.mxu0 %v2097_v4  ;;  %v1738_v4 = vld [vmem:[%s212_s26] sm:$0xff]  }
  0x84   : > { %1991 = vmatpush3.bf16.msra.mxu1 %v2098_v5  ;;  %1996 = vmatprep.subr.bf16.mxu0 %v2102_v6 }
  0x86   : > { %1973 = vmatmul.mubr.bf16.vlgmr.msra.gmra.mrb[12].mxu0 %v1028_v50 }
  0x87   : > { %1997 = vmatpush3.bf16.msra.mxu0 %v2102_v6  ;;  %1993 = vmatmul.mubr.bf16.vlgmr.msra.gmra.mrb[12].mxu1 %v1168_v53  ;;  %v1728_v6 = vld [vmem:[%s2457_s2] ss:$0 sm:$0xff] }
  0x88   : > { %1998 = vmatprep.subr.bf16.mxu0 %v2103_v7  ;;  %2012 = vmatprep.mubr.bf16.mxu0 %v2347_v32 }
  0x8b   : > { %1999 = vmatpush3.bf16.msra.mxu0 %v2103_v7 }
  0x8c   : > { %2000 = vmatprep.subr.bf16.mxu0 %v2104_v8 }
  0x8f   : > { %2001 = vmatpush3.bf16.msra.mxu0 %v2104_v8  ;;  %v1411_v8 = vunpack.c.l.bf16 %v1408_v3 }
  0x90   : > { %2002 = vmatprep.subr.bf16.mxu0 %v2105_v9 }
  0x93   : > { %2003 = vmatpush3.bf16.msra.mxu0 %v2105_v9 }
  0x94   : > { %2004 = vmatprep.subr.bf16.mxu0 %v2106_v10 }
  0x97   : > { %2005 = vmatpush3.bf16.msra.mxu0 %v2106_v10 }
  0x98   : > { %2006 = vmatprep.subr.bf16.mxu0 %v2107_v11 }
  0x9b   : > { %2007 = vmatpush3.bf16.msra.mxu0 %v2107_v11  ;;  %v1739_v11 = vunpack.c.l.bf16 %v1738_v4 }
  0x9c   : > { %2008 = vmatprep.subr.bf16.mxu0 %v2108_v14 }
  0x9f   : > { %2009 = vmatpush3.bf16.msra.mxu0 %v2108_v14 }
  0xa0   : > { %2010 = vmatprep.subr.bf16.mxu0 %v2109_v15 }
  0xa3   : > { %2011 = vmatpush3.bf16.msra.mxu0 %v2109_v15 }
  0xa6   : > { %2013 = vmatmul.mubr.bf16.vlgmr.msra.gmra.mrb[16].mxu0 %v1293_v26 }
  0xf9   : > { %v1854_v16 = vpop.f32.mrb[0].mxu0 }
  0xfa   : > { %v1874_v17 = vpop.f32.mrb[0].mxu1  ;;  %v366_v12 = vpop.f32.mrb[1].mxu0 }
  0xfb   : > { %v474_v13 = vadd.f32 %v1874_v17, %v1854_v16  ;;  %v465_v18 = vpop.f32.mrb[1].mxu1  ;;  %v1855_v19 = vpop.f32.mrb[2].mxu0 }
  0xfc   : > { %v466_v20 = vadd.f32 %v465_v18, %v366_v12  ;;  %v1875_v21 = vpop.f32.mrb[2].mxu1  ;;  %v369_v23 = vpop.f32.mrb[3].mxu0 }
  0xfd   : > { %v468_v24 = vpop.f32.mrb[3].mxu1 }
  0xfe   : > { %v469_v25 = vadd.f32 %v468_v24, %v369_v23 }
 0x119   : > { %v1894_v27 = vpop.f32.mrb[4].mxu0 }
 0x11a   : > { %v604_v28 = vadd.f32 %v1894_v27, %v474_v13  ;;  %v588_v29 = vpop.f32.mrb[5].mxu0  ;;  %v1914_v30 = vpop.f32.mrb[4].mxu1  ;;  %v1740_v13 = vunpack.c.h.bf16 %v1738_v4 }
 0x11b   : > { %v602_v31 = vadd.f32 %v588_v29, %v466_v20  ;;  %v1895_v32 = vpop.f32.mrb[6].mxu0  ;;  %v718_v33 = vpop.f32.mrb[5].mxu1 }
 0x11c   : > { %v734_v22 = vadd.f32 %v1914_v30, %v604_v28  ;;  %v591_v26 = vpop.f32.mrb[7].mxu0  ;;  %v1915_v34 = vpop.f32.mrb[6].mxu1 }
 0x11d   : > { %v603_v35 = vadd.f32 %v591_v26, %v469_v25  ;;  %v732_v36 = vadd.f32 %v718_v33, %v602_v31  ;;  %v721_v37 = vpop.f32.mrb[7].mxu1 }
 0x11f   : > { %v733_v38 = vadd.f32 %v721_v37, %v603_v35 }
 0x139   : > { %v1934_v39 = vpop.f32.mrb[8].mxu0 }
 0x13a   : > { %v874_v40 = vadd.f32 %v1934_v39, %v734_v22  ;;  %v858_v41 = vpop.f32.mrb[9].mxu0  ;;  %v1954_v42 = vpop.f32.mrb[8].mxu1 }
 0x13b   : > { %v872_v43 = vadd.f32 %v858_v41, %v732_v36  ;;  %v1935_v44 = vpop.f32.mrb[10].mxu0  ;;  %v978_v45 = vpop.f32.mrb[9].mxu1 }
 0x13c   : > { %v994_v46 = vadd.f32 %v1954_v42, %v874_v40  ;;  %v861_v47 = vpop.f32.mrb[11].mxu0  ;;  %v1955_v48 = vpop.f32.mrb[10].mxu1 }
 0x13d   : > { %v873_v49 = vadd.f32 %v861_v47, %v733_v38  ;;  %v992_v50 = vadd.f32 %v978_v45, %v872_v43  ;;  %v981_v51 = vpop.f32.mrb[11].mxu1 }
 0x13f   : > { %v993_v52 = vadd.f32 %v981_v51, %v873_v49 }
 0x159   : > { %v1974_v53 = vpop.f32.mrb[12].mxu0 }
 0x15a   : > { %v1130_v54 = vadd.f32 %v1974_v53, %v994_v46  ;;  %v1114_v55 = vpop.f32.mrb[13].mxu0  ;;  %v1994_v56 = vpop.f32.mrb[12].mxu1 }
 0x15b   : > { %v1128_v57 = vadd.f32 %v1114_v55, %v992_v50  ;;  %v1975_v58 = vpop.f32.mrb[14].mxu0  ;;  %v1254_v59 = vpop.f32.mrb[13].mxu1 }
 0x15c   : > { %v1270_v60 = vadd.f32 %v1994_v56, %v1130_v54  ;;  %v1117_v61 = vpop.f32.mrb[15].mxu0  ;;  %v1995_v62 = vpop.f32.mrb[14].mxu1 }
 0x15d   : > { %v1129_v63 = vadd.f32 %v1117_v61, %v993_v52  ;;  %v1268_v0 = vadd.f32 %v1254_v59, %v1128_v57  ;;  %v1257_v1 = vpop.f32.mrb[15].mxu1 }
 0x15f   : > { %v1269_v2 = vadd.f32 %v1257_v1, %v1129_v63 }
 0x179   : > { %v2014_v5 = vpop.f32.mrb[16].mxu0 }
 0x17a   : > { %v1395_v7 = vadd.f32 %v2014_v5, %v1270_v60  ;;  %v1379_v9 = vpop.f32.mrb[17].mxu0 }
 0x17b   : > { %v1393_v10 = vadd.f32 %v1379_v9, %v1268_v0  ;;  %v2015_v14 = vpop.f32.mrb[18].mxu0 }
 0x17c   : > { %v1405_v15 = vadd.f32 %v1728_v6, %v1395_v7  ;;  %v1382_v16 = vpop.f32.mrb[19].mxu0 }
 0x17d   : > { %v1403_v17 = vadd.f32 %v1728_v6, %v1393_v10  ;;  %v1394_v12 = vadd.f32 %v1382_v16, %v1269_v2 }
 0x17e   : > { %v1414_v18 = vadd.f32 %v1411_v8, %v1405_v15 }
 0x17f   : > { %v1412_v19 = vadd.f32 %v1739_v11, %v1403_v17  ;;  %v1404_v20 = vadd.f32 %v1728_v6, %v1394_v12 }
 0x180   : > { %vm1417_vm6 = vcmp.gt.f32.partialorder %v1414_v18, 0.0  ;;  %v1420_v21 = vmul.f32 0.01, %v1414_v18 }
 0x181   : > { %v1418_v23 = vmul.f32 0.01, %v1412_v19  ;;  %v1413_v24 = vadd.f32 %v1740_v13, %v1404_v20  ;;  %vm1415_vm7 = vcmp.gt.f32.partialorder %v1412_v19, 0.0 }
 0x182   : > { %v1423_v25 = vsel %vm1417_vm6, %v1414_v18, %v1420_v21 }
 0x183   : > { %v1736_v27 = vpack.c.bf16 %v1423_v25, %v1423_v25  ;;  %vm1416_vm8 = vcmp.gt.f32.partialorder %v1413_v24, 0.0  ;;  %v1419_v28 = vmul.f32 0.01, %v1413_v24  ;;  %v1421_v29 = vsel %vm1415_vm7, %v1412_v19, %v1418_v23 }
 0x185   : > { %1439 = vst [vmem:[%s217_s30 + $0x8] sm:$0xf] %v1736_v27  ;;  %v1422_v30 = vsel %vm1416_vm8, %v1413_v24, %v1419_v28 }
 0x186   : > { %v1744_v31 = vpack.c.bf16 %v1422_v30, %v1421_v29 }
 0x188   : > { %1745 = vst [vmem:[%s217_s30] sm:$0xff] %v1744_v31  }
 0x189 PF: > { %s14_s15 = sadd.s32 1, %s2117_s15  }
 0x18a   : > { %p11_p4 = scmp.ge.s32.totalorder %s14_s15, 4  }
 0x18c   :  { %13 = sbr.rel (!%p11_p4) target bundleno = 1 (0x1), region = 77 }

// kernel: forward.19
= control target key start
LH: loop header
LB: loop body
LE: loop exit
PB: predicated region body
PF: predicated region fallthrough
CT: control target
= control target key end

     0   :  { %s434_s12 = smov 0   ;;  %s478_s0 = inlined_call_operand.vmem [shape: bf16[2,4,8,128], index: 0, kind: input, shape index: {}]   ;;  %s479_s1 = inlined_call_operand.vmem [shape: bf16[1,128,128], index: 1, kind: input, shape index: {}]   ;;  %s480_s2 = inlined_call_operand.vmem [shape: f32[1,128], index: 2, kind: input, shape index: {}]   ;;  %s481_s3 = inlined_call_operand.vmem [shape: bf16[2,8,128], index: 3, kind: output, shape index: {}]  }
   0x1 LB: > { %s337_s13 = sadd.s32 4294967295, %s410_s12   ;;  %p341_p0 = scmp.ge.s32.totalorder %s410_s12, 1  ;;  %s410_s12 = sphi %s434_s12, %s13_s12  }
   0x2   : > { %p137_p1 = scmp.lt.s32.totalorder %s410_s12, 3 }
   0x4   : > { %p138_p2 = pnand %p341_p0, %p137_p1 }
   0x5   : > { %v396_v0 = vld [vmem:[%s479_s1] sm:$0xff] (!%p138_p2)   ;;  %v412_v1 = vmov (!%p138_p2), 0.0   ;;  %v397_v2 = vld [vmem:[%s479_s1 + $0x8] sm:$0xff] (!%p138_p2)   ;;  %vm413_vm0 = vmmov (!%p138_p2), 0   ;;  %v398_v3 = vld [vmem:[%s479_s1 + $0x10] sm:$0xff] (!%p138_p2)   ;;  %p160_p3 = scmp.lt.s32.totalorder (!%p138_p2), %s337_s13, 1 }
   0x6   : > { %141 = sbr.rel (%p138_p2) target bundleno = 255 (0xff), region = 32  ;;  %366 = vmatprep.subr.bf16.mxu0 (!%p138_p2), %v412_v1  ;;  %382 = vmatprep.mubr.msk.bf16.mxu0 (!%p138_p2), %vm413_vm0, %v412_v1  ;;  %v399_v4 = vld [vmem:[%s479_s1 + $0x18] sm:$0xff] (!%p138_p2)   ;;  %v400_v5 = vld [vmem:[%s479_s1 + $0x20] sm:$0xff] (!%p138_p2)   ;;  %v401_v6 = vld [vmem:[%s479_s1 + $0x28] sm:$0xff] (!%p138_p2)  }
   0x7   : > { %367 = vmatpush3.bf16.msra.mxu0 (!%p138_p2), %v396_v0  ;;  %v402_v7 = vld [vmem:[%s479_s1 + $0x30] sm:$0xff] (!%p138_p2)   ;;  %v403_v8 = vld [vmem:[%s479_s1 + $0x38] sm:$0xff] (!%p138_p2)   ;;  %v345_v10 = vld [vmem:[%s480_s2] ss:$0 sm:$0xff] (!%p138_p2) }
   0x8   : > { %368 = vmatprep.subr.bf16.mxu0 (!%p138_p2), %v412_v1 }
   0xb   : > { %369 = vmatpush3.bf16.msra.mxu0 (!%p138_p2), %v397_v2 }
   0xc   : > { %370 = vmatprep.subr.bf16.mxu0 (!%p138_p2), %v412_v1 }
   0xd   : > { %s483_s13 = smov (!%p160_p3, %s337_s13), 1 }
   0xe   : > { %s356_s28 = sshll.u32 %s483_s13, 4  ;;  %s344_s9 = sshll.u32 %s483_s13, 2 }
   0xf   : > { %371 = vmatpush3.bf16.msra.mxu0 %v398_v3  ;;  %s164_s6 = scalar_lea.vmem %s478_s0, %s356_s28  ;;  %s168_s14 = scalar_lea.vmem %s481_s3, %s344_s9 }
  0x10   : > { %372 = vmatprep.subr.bf16.mxu0 %v412_v1  ;;  %v170_v9 = vld [vmem:[%s164_s6] sm:$0xf] }
  0x13   : > { %373 = vmatpush3.bf16.msra.mxu0 %v399_v4 }
  0x14   : > { %374 = vmatprep.subr.bf16.mxu0 %v412_v1 }
  0x17   : > { %375 = vmatpush3.bf16.msra.mxu0 %v400_v5 }
  0x18   : > { %376 = vmatprep.subr.bf16.mxu0 %v412_v1 }
  0x1b   : > { %377 = vmatpush3.bf16.msra.mxu0 %v401_v6 }
  0x1c   : > { %378 = vmatprep.subr.bf16.mxu0 %v412_v1 }
  0x1f   : > { %379 = vmatpush3.bf16.msra.mxu0 %v402_v7 }
  0x20   : > { %380 = vmatprep.subr.bf16.mxu0 %v412_v1 }
  0x23   : > { %381 = vmatpush3.bf16.msra.mxu0 %v403_v8 }
  0x26   : > { %383 = vmatmul.mubr.bf16.vlgmr.msra.gmra.mrb[0].mxu0 %v170_v9 }
  0xf9   : > { %v276_v11 = vpop.f32.mrb[0].mxu0 }
  0xfa   : > { %v277_v12 = vadd.f32 %v345_v10, %v276_v11  ;;  %v384_v13 = vpop.f32.mrb[1].mxu0 }
  0xfb   : > { %v279_v14 = vpop.f32.mrb[2].mxu0 }
  0xfc   : > { %v282_v15 = vpack.c.bf16 %v277_v12, %v277_v12  ;;  %v385_v16 = vpop.f32.mrb[3].mxu0 }
  0xfe   : > { %283 = vst [vmem:[%s168_s14] sm:$0xf] %v282_v15 }
  0xff PF: > { %s13_s12 = sadd.s32 1, %s410_s12  }
 0x100   : > { %p10_p4 = scmp.ge.s32.totalorder %s13_s12, 4  }
 0x102   :  { %12 = sbr.rel (!%p10_p4) target bundleno = 1 (0x1), region = 62 }

// kernel: forward.18
= control target key start
LH: loop header
LB: loop body
LE: loop exit
PB: predicated region body
PF: predicated region fallthrough
CT: control target
= control target key end

     0   :  { %s1864_s12 = smov 0   ;;  %s2214_s0 = inlined_call_operand.vmem [shape: bf16[2,4,16,128], index: 0, kind: input, shape index: {}]   ;;  %s2215_s1 = inlined_call_operand.vmem [shape: bf16[9,128,128], index: 1, kind: input, shape index: {}]   ;;  %s2216_s2 = inlined_call_operand.vmem [shape: f32[1,128], index: 2, kind: input, shape index: {}]   ;;  %s2217_s3 = inlined_call_operand.vmem [shape: bf16[2,8,128], index: 3, kind: output, shape index: {}]  }
   0x1 LB: > { %s1262_s13 = sadd.s32 4294967295, %s1840_s12   ;;  %p1266_p0 = scmp.ge.s32.totalorder %s1840_s12, 1  ;;  %s1840_s12 = sphi %s1864_s12, %s13_s12  }
   0x2   : > { %p137_p1 = scmp.lt.s32.totalorder %s1840_s12, 3 }
   0x4   : > { %p138_p2 = pnand %p1266_p0, %p137_p1 }
   0x5   : > { %v1757_v0 = vld [vmem:[%s2215_s1 + $0x40] sm:$0xff] (!%p138_p2)   ;;  %v1842_v1 = vmov (!%p138_p2), 0.0   ;;  %v1759_v3 = vld [vmem:[%s2215_s1 + $0x48] sm:$0xff] (!%p138_p2)   ;;  %vm1843_vm0 = vmmov (!%p138_p2), 0   ;;  %v1761_v5 = vld [vmem:[%s2215_s1 + $0x50] sm:$0xff] (!%p138_p2)   ;;  %p160_p3 = scmp.lt.s32.totalorder (!%p138_p2), %s1262_s13, 1 }
   0x6   : > { %141 = sbr.rel (%p138_p2) target bundleno = 388 (0x184), region = 32  ;;  %1567 = vmatprep.subr.bf16.mxu0 (!%p138_p2), %v1842_v1  ;;  %1587 = vmatprep.subr.bf16.mxu1 (!%p138_p2), %v1842_v1  ;;  %v1758_v2 = vld [vmem:[%s2215_s1] sm:$0xff] (!%p138_p2)   ;;  %v1760_v4 = vld [vmem:[%s2215_s1 + $0x8] sm:$0xff] (!%p138_p2)   ;;  %v1762_v6 = vld [vmem:[%s2215_s1 + $0x10] sm:$0xff] (!%p138_p2)  }
   0x7   : > { %1568 = vmatpush3.bf16.msra.mxu0 (!%p138_p2), %v1757_v0  ;;  %1583 = vmatprep.mubr.msk.bf16.mxu0 (!%p138_p2), %vm1843_vm0, %v1842_v1  ;;  %v1763_v7 = vld [vmem:[%s2215_s1 + $0x58] sm:$0xff] (!%p138_p2)   ;;  %v1765_v9 = vld [vmem:[%s2215_s1 + $0x60] sm:$0xff] (!%p138_p2)   ;;  %v1767_v11 = vld [vmem:[%s2215_s1 + $0x68] sm:$0xff] (!%p138_p2)  }
   0x8   : > { %1588 = vmatpush3.bf16.msra.mxu1 (!%p138_p2), %v1758_v2  ;;  %1569 = vmatprep.subr.bf16.mxu0 (!%p138_p2), %v1842_v1  ;;  %v1764_v8 = vld [vmem:[%s2215_s1 + $0x18] sm:$0xff] (!%p138_p2)   ;;  %v1766_v10 = vld [vmem:[%s2215_s1 + $0x20] sm:$0xff] (!%p138_p2)   ;;  %v1768_v12 = vld [vmem:[%s2215_s1 + $0x28] sm:$0xff] (!%p138_p2)  }
   0x9   : > { %1589 = vmatprep.subr.bf16.mxu1 (!%p138_p2), %v1842_v1  ;;  %1603 = vmatprep.mubr.msk.bf16.mxu1 (!%p138_p2), %vm1843_vm0, %v1842_v1  ;;  %v1769_v13 = vld [vmem:[%s2215_s1 + $0x70] sm:$0xff] (!%p138_p2)   ;;  %v1771_v15 = vld [vmem:[%s2215_s1 + $0x78] sm:$0xff] (!%p138_p2)   ;;  %v1773_v19 = vld [vmem:[%s2215_s1 + $0x80] sm:$0xff] (!%p138_p2)  }
   0xa   : > { %v1770_v14 = vld [vmem:[%s2215_s1 + $0x30] sm:$0xff] (!%p138_p2)   ;;  %v1772_v16 = vld [vmem:[%s2215_s1 + $0x38] sm:$0xff] (!%p138_p2)   ;;  %v1774_v20 = vld [vmem:[%s2215_s1 + $0xc0] sm:$0xff] (!%p138_p2)  }
   0xb   : > { %1570 = vmatpush3.bf16.msra.mxu0 (!%p138_p2), %v1759_v3  ;;  %v1775_v21 = vld [vmem:[%s2215_s1 + $0x88] sm:$0xff] (!%p138_p2)   ;;  %v1777_v23 = vld [vmem:[%s2215_s1 + $0x90] sm:$0xff] (!%p138_p2)   ;;  %v1779_v25 = vld [vmem:[%s2215_s1 + $0x98] sm:$0xff] (!%p138_p2)  }
   0xc   : > { %1590 = vmatpush3.bf16.msra.mxu1 (!%p138_p2), %v1760_v4  ;;  %1571 = vmatprep.subr.bf16.mxu0 (!%p138_p2), %v1842_v1  ;;  %v1776_v22 = vld [vmem:[%s2215_s1 + $0xc8] sm:$0xff] (!%p138_p2)   ;;  %v1778_v24 = vld [vmem:[%s2215_s1 + $0xd0] sm:$0xff] (!%p138_p2)   ;;  %v1780_v26 = vld [vmem:[%s2215_s1 + $0xd8] sm:$0xff] (!%p138_p2)  }
   0xd   : > { %1591 = vmatprep.subr.bf16.mxu1 %v1842_v1  ;;  %s2219_s13 = smov (!%p160_p3, %s1262_s13), 1  ;;  %v1781_v27 = vld [vmem:[%s2215_s1 + $0xa0] sm:$0xff]   ;;  %v1783_v30 = vld [vmem:[%s2215_s1 + $0xa8] sm:$0xff]   ;;  %v1785_v33 = vld [vmem:[%s2215_s1 + $0xb0] sm:$0xff]  }
   0xe   : > { %s1485_s15 = sshll.u32 %s2219_s13, 5  ;;  %v1782_v28 = vld [vmem:[%s2215_s1 + $0xe0] sm:$0xff]   ;;  %v1784_v31 = vld [vmem:[%s2215_s1 + $0xe8] sm:$0xff]   ;;  %v1786_v34 = vld [vmem:[%s2215_s1 + $0xf0] sm:$0xff]   ;;  %s1269_s17 = sshll.u32 %s2219_s13, 2 }
   0xf   : > { %1572 = vmatpush3.bf16.msra.mxu0 %v1761_v5  ;;  %s1942_s20 = scalar_lea.vmem %s2214_s0, %s1485_s15  ;;  %v1787_v37 = vld [vmem:[%s2215_s1 + $0xb8] sm:$0xff]   ;;  %v1790_v40 = vld [vmem:[%s2215_s1 + $0x100] sm:$0xff]   ;;  %v1792_v43 = vld [vmem:[%s2215_s1 + $0x108] sm:$0xff]   ;;  %s168_s21 = scalar_lea.vmem %s2217_s3, %s1269_s17 }
  0x10   : > { %1592 = vmatpush3.bf16.msra.mxu1 %v1762_v6  ;;  %1573 = vmatprep.subr.bf16.mxu0 %v1842_v1  ;;  %v1270_v17 = vld [vmem:[%s1942_s20 + $0x8] sm:$0xf]  ;;  %v170_v18 = vld [vmem:[%s1942_s20] sm:$0xf]  ;;  %v1788_v38 = vld [vmem:[%s2215_s1 + $0xf8] sm:$0xff]  }
  0x11   : > { %1593 = vmatprep.subr.bf16.mxu1 %v1842_v1  ;;  %v1789_v29 = vld [vmem:[%s1942_s20] sm:$0x1f]   ;;  %v1328_v41 = vld [vmem:[%s1942_s20 + $0x10] sm:$0xf]  ;;  %v1793_v44 = vld [vmem:[%s2215_s1 + $0x148] sm:$0xff]  }
  0x12   : > { %v409_v32 = vshll.u32 %v1789_v29, 16  ;;  %v407_v35 = vshrl.u32 %v1789_v29, 16  ;;  %v1791_v42 = vld [vmem:[%s2215_s1 + $0x140] sm:$0xff]   ;;  %v1794_v45 = vld [vmem:[%s2215_s1 + $0x110] sm:$0xff]   ;;  %v1796_v47 = vld [vmem:[%s2215_s1 + $0x118] sm:$0xff]  }
  0x13   : > { %1574 = vmatpush3.bf16.msra.mxu0 %v1763_v7  ;;  %v1795_v46 = vld [vmem:[%s2215_s1 + $0x150] sm:$0xff]   ;;  %v1797_v48 = vld [vmem:[%s2215_s1 + $0x158] sm:$0xff]   ;;  %v1798_v49 = vld [vmem:[%s2215_s1 + $0x120] sm:$0xff]  }
  0x14   : > { %1594 = vmatpush3.bf16.msra.mxu1 %v1764_v8  ;;  %1575 = vmatprep.subr.bf16.mxu0 %v1842_v1  ;;  %v411_v36 = vrot.slane %v409_v32, 1  ;;  %v1799_v50 = vld [vmem:[%s2215_s1 + $0x160] sm:$0xff]   ;;  %v1800_v51 = vld [vmem:[%s2215_s1 + $0x128] sm:$0xff]   ;;  %v1807_v52 = vld [vmem:[%s1942_s20 + $0x10] sm:$0x1f]  }
  0x15   : > { %1595 = vmatprep.subr.bf16.mxu1 %v1842_v1  ;;  %v1801_v53 = vld [vmem:[%s2215_s1 + $0x168] sm:$0xff]   ;;  %v1802_v54 = vld [vmem:[%s2215_s1 + $0x130] sm:$0xff]   ;;  %v746_v55 = vshll.u32 %v1807_v52, 16  ;;  %v1804_v57 = vld [vmem:[%s2215_s1 + $0x138] sm:$0xff]   ;;  %v744_v58 = vshrl.u32 %v1807_v52, 16 }
  0x16   : > { %v412_v39 = vor.u32 %v411_v36, %v407_v35  ;;  %v1803_v56 = vld [vmem:[%s2215_s1 + $0x170] sm:$0xff]   ;;  %v1805_v60 = vld [vmem:[%s2215_s1 + $0x178] sm:$0xff]   ;;  %v1806_v62 = vld [vmem:[%s2215_s1 + $0x180] sm:$0xff]  }
  0x17   : > { %1576 = vmatpush3.bf16.msra.mxu0 %v1765_v9  ;;  %v748_v59 = vrot.slane %v746_v55, 1  ;;  %v1353_v61 = vld [vmem:[%s1942_s20 + $0x18] sm:$0xf]  ;;  %v1808_v0 = vld [vmem:[%s2215_s1 + $0x1c0] sm:$0xff]   ;;  %v1809_v2 = vld [vmem:[%s2215_s1 + $0x188] sm:$0xff]  }
  0x18   : > { %1596 = vmatpush3.bf16.msra.mxu1 %v1766_v10  ;;  %1577 = vmatprep.subr.bf16.mxu0 %v1842_v1  ;;  %v1810_v3 = vld [vmem:[%s2215_s1 + $0x1c8] sm:$0xff]   ;;  %v1811_v4 = vld [vmem:[%s2215_s1 + $0x190] sm:$0xff]   ;;  %v1813_v6 = vld [vmem:[%s2215_s1 + $0x198] sm:$0xff]  }
  0x19   : > { %1597 = vmatprep.subr.bf16.mxu1 %v1842_v1  ;;  %v749_v63 = vor.u32 %v748_v59, %v744_v58  ;;  %v1812_v5 = vld [vmem:[%s2215_s1 + $0x1d0] sm:$0xff]   ;;  %v1814_v7 = vld [vmem:[%s2215_s1 + $0x1d8] sm:$0xff]   ;;  %v1815_v8 = vld [vmem:[%s2215_s1 + $0x1a0] sm:$0xff]  }
  0x1a   : > { %v840_v9 = vld [vmem:[%s1942_s20] sm:$0xe]  ;;  %v2135_v10 = vld [vmem:[%s1942_s20 + $0x4] sm:$0x3]  ;;  %v1827_v32 = vld [vmem:[%s2215_s1 + $0x210] sm:$0xff]  }
  0x1b   : > { %1578 = vmatpush3.bf16.msra.mxu0 %v1767_v11  ;;  %v1816_v11 = vld [vmem:[%s2215_s1 + $0x1e0] sm:$0xff]   ;;  %v1830_v35 = vld [vmem:[%s2215_s1 + $0x228] sm:$0xff]   ;;  %v1831_v36 = vld [vmem:[%s2215_s1 + $0x230] sm:$0xff]  }
  0x1c   : > { %1598 = vmatpush3.bf16.msra.mxu1 %v1768_v12  ;;  %1579 = vmatprep.subr.bf16.mxu0 %v1842_v1  ;;  %v1421_v12 = vcombine.low %v840_v9, %v2135_v10  ;;  %v1824_v29 = vld [vmem:[%s2215_s1 + $0x200] sm:$0xff]  }
  0x1d   : > { %1599 = vmatprep.subr.bf16.mxu1 %v1842_v1 }
  0x1f   : > { %1580 = vmatpush3.bf16.msra.mxu0 %v1769_v13  ;;  %v1817_v13 = vld [vmem:[%s2215_s1 + $0x1a8] sm:$0xff]  }
  0x20   : > { %1600 = vmatpush3.bf16.msra.mxu1 %v1770_v14  ;;  %1581 = vmatprep.subr.bf16.mxu0 %v1842_v1  ;;  %v1825_v14 = vld [vmem:[%s1942_s20 + $0x8] sm:$0x3e]  }
  0x21   : > { %1601 = vmatprep.subr.bf16.mxu1 %v1842_v1 }
  0x23   : > { %1582 = vmatpush3.bf16.msra.mxu0 %v1771_v15  ;;  %v1818_v15 = vld [vmem:[%s2215_s1 + $0x1e8] sm:$0xff]  }
  0x24   : > { %1602 = vmatpush3.bf16.msra.mxu1 %v1772_v16  ;;  %1607 = vmatprep.subr.bf16.mxu0 %v1842_v1  ;;  %v865_v16 = vshrl.u32 %v1421_v12, 16 }
  0x25   : > { %1627 = vmatprep.subr.bf16.mxu1 %v1842_v1 }
  0x26   : > { %1584 = vmatmul.mubr.bf16.vlgmr.msra.gmra.mrb[0].mxu0 %v1270_v17  ;;  %v868_v17 = vshll.u32 %v1421_v12, 16 }
  0x27   : > { %1604 = vmatmul.mubr.bf16.vlgmr.msra.gmra.mrb[0].mxu1 %v170_v18  ;;  %1608 = vmatpush3.bf16.msra.mxu0 %v1773_v19  ;;  %v1819_v18 = vld [vmem:[%s2215_s1 + $0x1b0] sm:$0xff]   ;;  %v987_v19 = vshrl.u32 %v1825_v14, 16 }
  0x28   : > { %1628 = vmatpush3.bf16.msra.mxu1 %v1774_v20  ;;  %1609 = vmatprep.subr.bf16.mxu0 %v1842_v1  ;;  %v990_v20 = vshll.u32 %v1825_v14, 16 }
  0x29   : > { %1629 = vmatprep.subr.bf16.mxu1 %v1842_v1  ;;  %1623 = vmatprep.mubr.msk.bf16.mxu0 %vm1843_vm0, %v1842_v1 }
  0x2a   : > { %1643 = vmatprep.mubr.msk.bf16.mxu1 %vm1843_vm0, %v1842_v1 }
  0x2b   : > { %1610 = vmatpush3.bf16.msra.mxu0 %v1775_v21  ;;  %v1820_v21 = vld [vmem:[%s2215_s1 + $0x1f0] sm:$0xff]  }
  0x2c   : > { %1630 = vmatpush3.bf16.msra.mxu1 %v1776_v22  ;;  %1611 = vmatprep.subr.bf16.mxu0 %v1842_v1  ;;  %v867_v22 = vrot.slane %v865_v16, 1 }
  0x2d   : > { %1631 = vmatprep.subr.bf16.mxu1 %v1842_v1 }
  0x2f   : > { %1612 = vmatpush3.bf16.msra.mxu0 %v1777_v23  ;;  %v870_v23 = vrot.slane %v868_v17, 2  ;;  %v1482_v17 = vld [vmem:[%s2216_s2] ss:$0 sm:$0xff] }
  0x30   : > { %1632 = vmatpush3.bf16.msra.mxu1 %v1778_v24  ;;  %1613 = vmatprep.subr.bf16.mxu0 %v1842_v1  ;;  %v1821_v24 = vld [vmem:[%s2215_s1 + $0x1b8] sm:$0xff]  }
  0x31   : > { %1633 = vmatprep.subr.bf16.mxu1 %v1842_v1 }
  0x33   : > { %1614 = vmatpush3.bf16.msra.mxu0 %v1779_v25  ;;  %v989_v25 = vrot.slane %v987_v19, 1 }
  0x34   : > { %1634 = vmatpush3.bf16.msra.mxu1 %v1780_v26  ;;  %1615 = vmatprep.subr.bf16.mxu0 %v1842_v1  ;;  %v992_v26 = vrot.slane %v990_v20, 2 }
  0x35   : > { %1635 = vmatprep.subr.bf16.mxu1 %v1842_v1 }
  0x37   : > { %1616 = vmatpush3.bf16.msra.mxu0 %v1781_v27  ;;  %v1822_v27 = vld [vmem:[%s2215_s1 + $0x1f8] sm:$0xff]  }
  0x38   : > { %1636 = vmatpush3.bf16.msra.mxu1 %v1782_v28  ;;  %1617 = vmatprep.subr.bf16.mxu0 %v1842_v1  ;;  %v871_v28 = vor.u32 %v870_v23, %v867_v22 }
  0x39   : > { %1637 = vmatprep.subr.bf16.mxu1 %v1842_v1 }
  0x3b   : > { %1618 = vmatpush3.bf16.msra.mxu0 %v1783_v30  ;;  %v993_v30 = vor.u32 %v992_v26, %v989_v25 }
  0x3c   : > { %1638 = vmatpush3.bf16.msra.mxu1 %v1784_v31  ;;  %1619 = vmatprep.subr.bf16.mxu0 %v1842_v1  ;;  %v1826_v31 = vld [vmem:[%s2215_s1 + $0x208] sm:$0xff]  }
  0x3d   : > { %1639 = vmatprep.subr.bf16.mxu1 %v1842_v1 }
  0x3f   : > { %1620 = vmatpush3.bf16.msra.mxu0 %v1785_v33  ;;  %v1828_v33 = vld [vmem:[%s2215_s1 + $0x218] sm:$0xff]  }
  0x40   : > { %1640 = vmatpush3.bf16.msra.mxu1 %v1786_v34  ;;  %1621 = vmatprep.subr.bf16.mxu0 %v1842_v1  ;;  %v1829_v34 = vld [vmem:[%s2215_s1 + $0x220] sm:$0xff]  }
  0x41   : > { %1641 = vmatprep.subr.bf16.mxu1 %v1842_v1 }
  0x43   : > { %1622 = vmatpush3.bf16.msra.mxu0 %v1787_v37  ;;  %v1084_v37 = vld [vmem:[%s1942_s20] sm:$0xc] }
  0x44   : > { %1642 = vmatpush3.bf16.msra.mxu1 %v1788_v38  ;;  %1647 = vmatprep.subr.bf16.mxu0 %v1842_v1  ;;  %v1473_v38 = vcombine.low %v1084_v37, %v2135_v10 }
  0x45   : > { %1667 = vmatprep.subr.bf16.mxu1 %v1842_v1 }
  0x46   : > { %1624 = vmatmul.mubr.bf16.vlgmr.msra.gmra.mrb[4].mxu0 %v412_v39  ;;  %v1832_v39 = vld [vmem:[%s2215_s1 + $0x238] sm:$0xff]  }
  0x47   : > { %1648 = vmatpush3.bf16.msra.mxu0 %v1790_v40  ;;  %1644 = vmatmul.mubr.bf16.vlgmr.msra.gmra.mrb[4].mxu1 %v1328_v41  ;;  %v1105_v40 = vrot.slane %v1473_v38, 2 }
  0x48   : > { %1668 = vmatpush3.bf16.msra.mxu1 %v1791_v42  ;;  %1649 = vmatprep.subr.bf16.mxu0 %v1842_v1 }
  0x49   : > { %1669 = vmatprep.subr.bf16.mxu1 %v1842_v1  ;;  %1663 = vmatprep.mubr.msk.bf16.mxu0 %vm1843_vm0, %v1842_v1 }
  0x4a   : > { %1683 = vmatprep.mubr.msk.bf16.mxu1 %vm1843_vm0, %v1842_v1 }
  0x4b   : > { %1650 = vmatpush3.bf16.msra.mxu0 %v1792_v43 }
  0x4c   : > { %1670 = vmatpush3.bf16.msra.mxu1 %v1793_v44  ;;  %1651 = vmatprep.subr.bf16.mxu0 %v1842_v1 }
  0x4d   : > { %1671 = vmatprep.subr.bf16.mxu1 %v1842_v1 }
  0x4f   : > { %1652 = vmatpush3.bf16.msra.mxu0 %v1794_v45 }
  0x50   : > { %1672 = vmatpush3.bf16.msra.mxu1 %v1795_v46  ;;  %1653 = vmatprep.subr.bf16.mxu0 %v1842_v1 }
  0x51   : > { %1673 = vmatprep.subr.bf16.mxu1 %v1842_v1 }
  0x53   : > { %1654 = vmatpush3.bf16.msra.mxu0 %v1796_v47 }
  0x54   : > { %1674 = vmatpush3.bf16.msra.mxu1 %v1797_v48  ;;  %1655 = vmatprep.subr.bf16.mxu0 %v1842_v1 }
  0x55   : > { %1675 = vmatprep.subr.bf16.mxu1 %v1842_v1 }
  0x57   : > { %1656 = vmatpush3.bf16.msra.mxu0 %v1798_v49 }
  0x58   : > { %1676 = vmatpush3.bf16.msra.mxu1 %v1799_v50  ;;  %1657 = vmatprep.subr.bf16.mxu0 %v1842_v1 }
  0x59   : > { %1677 = vmatprep.subr.bf16.mxu1 %v1842_v1 }
  0x5b   : > { %1658 = vmatpush3.bf16.msra.mxu0 %v1800_v51 }
  0x5c   : > { %1678 = vmatpush3.bf16.msra.mxu1 %v1801_v53  ;;  %1659 = vmatprep.subr.bf16.mxu0 %v1842_v1 }
  0x5d   : > { %1679 = vmatprep.subr.bf16.mxu1 %v1842_v1 }
  0x5f   : > { %1660 = vmatpush3.bf16.msra.mxu0 %v1802_v54 }
  0x60   : > { %1680 = vmatpush3.bf16.msra.mxu1 %v1803_v56  ;;  %1661 = vmatprep.subr.bf16.mxu0 %v1842_v1 }
  0x61   : > { %1681 = vmatprep.subr.bf16.mxu1 %v1842_v1 }
  0x63   : > { %1662 = vmatpush3.bf16.msra.mxu0 %v1804_v57 }
  0x64   : > { %1682 = vmatpush3.bf16.msra.mxu1 %v1805_v60  ;;  %1687 = vmatprep.subr.bf16.mxu0 %v1842_v1 }
  0x65   : > { %1707 = vmatprep.subr.bf16.mxu1 %v1842_v1 }
  0x66   : > { %1664 = vmatmul.mubr.bf16.vlgmr.msra.gmra.mrb[8].mxu0 %v1353_v61 }
  0x67   : > { %1688 = vmatpush3.bf16.msra.mxu0 %v1806_v62  ;;  %1684 = vmatmul.mubr.bf16.vlgmr.msra.gmra.mrb[8].mxu1 %v749_v63 }
  0x68   : > { %1708 = vmatpush3.bf16.msra.mxu1 %v1808_v0  ;;  %1689 = vmatprep.subr.bf16.mxu0 %v1842_v1 }
  0x69   : > { %1709 = vmatprep.subr.bf16.mxu1 %v1842_v1  ;;  %1703 = vmatprep.mubr.msk.bf16.mxu0 %vm1843_vm0, %v1842_v1 }
  0x6a   : > { %1723 = vmatprep.mubr.msk.bf16.mxu1 %vm1843_vm0, %v1842_v1 }
  0x6b   : > { %1690 = vmatpush3.bf16.msra.mxu0 %v1809_v2 }
  0x6c   : > { %1710 = vmatpush3.bf16.msra.mxu1 %v1810_v3  ;;  %1691 = vmatprep.subr.bf16.mxu0 %v1842_v1 }
  0x6d   : > { %1711 = vmatprep.subr.bf16.mxu1 %v1842_v1 }
  0x6f   : > { %1692 = vmatpush3.bf16.msra.mxu0 %v1811_v4 }
  0x70   : > { %1712 = vmatpush3.bf16.msra.mxu1 %v1812_v5  ;;  %1693 = vmatprep.subr.bf16.mxu0 %v1842_v1 }
  0x71   : > { %1713 = vmatprep.subr.bf16.mxu1 %v1842_v1 }
  0x73   : > { %1694 = vmatpush3.bf16.msra.mxu0 %v1813_v6 }
  0x74   : > { %1714 = vmatpush3.bf16.msra.mxu1 %v1814_v7  ;;  %1695 = vmatprep.subr.bf16.mxu0 %v1842_v1 }
  0x75   : > { %1715 = vmatprep.subr.bf16.mxu1 %v1842_v1 }
  0x77   : > { %1696 = vmatpush3.bf16.msra.mxu0 %v1815_v8 }
  0x78   : > { %1716 = vmatpush3.bf16.msra.mxu1 %v1816_v11  ;;  %1697 = vmatprep.subr.bf16.mxu0 %v1842_v1 }
  0x79   : > { %1717 = vmatprep.subr.bf16.mxu1 %v1842_v1 }
  0x7b   : > { %1698 = vmatpush3.bf16.msra.mxu0 %v1817_v13 }
  0x7c   : > { %1718 = vmatpush3.bf16.msra.mxu1 %v1818_v15  ;;  %1699 = vmatprep.subr.bf16.mxu0 %v1842_v1 }
  0x7d   : > { %1719 = vmatprep.subr.bf16.mxu1 %v1842_v1 }
  0x7f   : > { %1700 = vmatpush3.bf16.msra.mxu0 %v1819_v18 }
  0x80   : > { %1720 = vmatpush3.bf16.msra.mxu1 %v1820_v21  ;;  %1701 = vmatprep.subr.bf16.mxu0 %v1842_v1 }
  0x81   : > { %1721 = vmatprep.subr.bf16.mxu1 %v1842_v1 }
  0x83   : > { %1702 = vmatpush3.bf16.msra.mxu0 %v1821_v24 }
  0x84   : > { %1722 = vmatpush3.bf16.msra.mxu1 %v1822_v27  ;;  %1727 = vmatprep.subr.bf16.mxu0 %v1842_v1 }
  0x86   : > { %1704 = vmatmul.mubr.bf16.vlgmr.msra.gmra.mrb[12].mxu0 %v871_v28 }
  0x87   : > { %1728 = vmatpush3.bf16.msra.mxu0 %v1824_v29  ;;  %1724 = vmatmul.mubr.bf16.vlgmr.msra.gmra.mrb[12].mxu1 %v993_v30 }
  0x88   : > { %1729 = vmatprep.subr.bf16.mxu0 %v1842_v1  ;;  %1743 = vmatprep.mubr.msk.bf16.mxu0 %vm1843_vm0, %v1842_v1 }
  0x8b   : > { %1730 = vmatpush3.bf16.msra.mxu0 %v1826_v31 }
  0x8c   : > { %1731 = vmatprep.subr.bf16.mxu0 %v1842_v1 }
  0x8f   : > { %1732 = vmatpush3.bf16.msra.mxu0 %v1827_v32 }
  0x90   : > { %1733 = vmatprep.subr.bf16.mxu0 %v1842_v1 }
  0x93   : > { %1734 = vmatpush3.bf16.msra.mxu0 %v1828_v33 }
  0x94   : > { %1735 = vmatprep.subr.bf16.mxu0 %v1842_v1 }
  0x97   : > { %1736 = vmatpush3.bf16.msra.mxu0 %v1829_v34 }
  0x98   : > { %1737 = vmatprep.subr.bf16.mxu0 %v1842_v1 }
  0x9b   : > { %1738 = vmatpush3.bf16.msra.mxu0 %v1830_v35 }
  0x9c   : > { %1739 = vmatprep.subr.bf16.mxu0 %v1842_v1 }
  0x9f   : > { %1740 = vmatpush3.bf16.msra.mxu0 %v1831_v36 }
  0xa0   : > { %1741 = vmatprep.subr.bf16.mxu0 %v1842_v1 }
  0xa3   : > { %1742 = vmatpush3.bf16.msra.mxu0 %v1832_v39 }
  0xa6   : > { %1744 = vmatmul.mubr.bf16.vlgmr.msra.gmra.mrb[16].mxu0 %v1105_v40 }
  0xf9   : > { %v288_v41 = vpop.f32.mrb[0].mxu0 }
  0xfa   : > { %v1585_v42 = vpop.f32.mrb[1].mxu0  ;;  %v376_v43 = vpop.f32.mrb[0].mxu1 }
  0xfb   : > { %v377_v44 = vadd.f32 %v376_v43, %v288_v41  ;;  %v291_v45 = vpop.f32.mrb[2].mxu0  ;;  %v1605_v46 = vpop.f32.mrb[1].mxu1 }
  0xfc   : > { %v1586_v47 = vpop.f32.mrb[3].mxu0  ;;  %v379_v48 = vpop.f32.mrb[2].mxu1 }
  0xfd   : > { %v1606_v49 = vpop.f32.mrb[3].mxu1 }
 0x119   : > { %v496_v50 = vpop.f32.mrb[4].mxu0 }
 0x11a   : > { %v502_v51 = vadd.f32 %v496_v50, %v377_v44  ;;  %v1625_v52 = vpop.f32.mrb[5].mxu0  ;;  %v604_v53 = vpop.f32.mrb[4].mxu1 }
 0x11b   : > { %v499_v54 = vpop.f32.mrb[6].mxu0  ;;  %v1645_v55 = vpop.f32.mrb[5].mxu1 }
 0x11c   : > { %v610_v56 = vadd.f32 %v604_v53, %v502_v51  ;;  %v1626_v1 = vpop.f32.mrb[7].mxu0  ;;  %v607_v57 = vpop.f32.mrb[6].mxu1 }
 0x11d   : > { %v1646_v58 = vpop.f32.mrb[7].mxu1 }
 0x139   : > { %v712_v59 = vpop.f32.mrb[8].mxu0 }
 0x13a   : > { %v718_v60 = vadd.f32 %v712_v59, %v610_v56  ;;  %v1665_v61 = vpop.f32.mrb[9].mxu0  ;;  %v833_v62 = vpop.f32.mrb[8].mxu1 }
 0x13b   : > { %v715_v63 = vpop.f32.mrb[10].mxu0  ;;  %v1685_v0 = vpop.f32.mrb[9].mxu1 }
 0x13c   : > { %v839_v2 = vadd.f32 %v833_v62, %v718_v60  ;;  %v1666_v3 = vpop.f32.mrb[11].mxu0  ;;  %v836_v4 = vpop.f32.mrb[10].mxu1 }
 0x13d   : > { %v1686_v5 = vpop.f32.mrb[11].mxu1 }
 0x159   : > { %v955_v6 = vpop.f32.mrb[12].mxu0 }
 0x15a   : > { %v961_v7 = vadd.f32 %v955_v6, %v839_v2  ;;  %v1705_v8 = vpop.f32.mrb[13].mxu0  ;;  %v1077_v9 = vpop.f32.mrb[12].mxu1 }
 0x15b   : > { %v958_v10 = vpop.f32.mrb[14].mxu0  ;;  %v1725_v11 = vpop.f32.mrb[13].mxu1 }
 0x15c   : > { %v1083_v12 = vadd.f32 %v1077_v9, %v961_v7  ;;  %v1706_v13 = vpop.f32.mrb[15].mxu0  ;;  %v1080_v14 = vpop.f32.mrb[14].mxu1 }
 0x15d   : > { %v1726_v15 = vpop.f32.mrb[15].mxu1 }
 0x179   : > { %v1189_v16 = vpop.f32.mrb[16].mxu0 }
 0x17a   : > { %v1195_v18 = vadd.f32 %v1189_v16, %v1083_v12  ;;  %v1745_v19 = vpop.f32.mrb[17].mxu0 }
 0x17b   : > { %v1192_v20 = vpop.f32.mrb[18].mxu0 }
 0x17c   : > { %v1203_v21 = vadd.f32 %v1482_v17, %v1195_v18  ;;  %v1746_v22 = vpop.f32.mrb[19].mxu0 }
 0x17e   : > { %vm1204_vm1 = vcmp.gt.f32.partialorder %v1203_v21, 0.0  ;;  %v1205_v23 = vmul.f32 0.01, %v1203_v21 }
 0x180   : > { %v1206_v24 = vsel %vm1204_vm1, %v1203_v21, %v1205_v23 }
 0x181   : > { %v1207_v25 = vpack.c.bf16 %v1206_v24, %v1206_v24 }
 0x183   : > { %1208 = vst [vmem:[%s168_s21] sm:$0xf] %v1207_v25 }
 0x184 PF: > { %s13_s12 = sadd.s32 1, %s1840_s12  }
 0x185   : > { %p10_p4 = scmp.ge.s32.totalorder %s13_s12, 4  }
 0x187   :  { %12 = sbr.rel (!%p10_p4) target bundleno = 1 (0x1), region = 73 }

// kernel: forward.20
= control target key start
LH: loop header
LB: loop body
LE: loop exit
PB: predicated region body
PF: predicated region fallthrough
CT: control target
= control target key end

     0   :  { %s1921_s15 = smov 0   ;;  %s2271_s0 = inlined_call_operand.vmem [shape: bf16[2,1,24,128], index: 0, kind: input, shape index: {}]   ;;  %s2272_s1 = inlined_call_operand.vmem [shape: bf16[9,128,128], index: 1, kind: input, shape index: {}]   ;;  %s2273_s2 = inlined_call_operand.vmem [shape: f32[1,128], index: 2, kind: input, shape index: {}]   ;;  %s2274_s3 = inlined_call_operand.vmem [shape: bf16[2,8,128], index: 3, kind: input, shape index: {}]   ;;  %s2275_s4 = inlined_call_operand.vmem [shape: bf16[2,8,128], index: 4, kind: output, shape index: {}]  }
   0x1 LB: > { %s1317_s16 = sadd.s32 4294967295, %s1892_s15   ;;  %p1321_p0 = scmp.ge.s32.totalorder %s1892_s15, 1  ;;  %s1892_s15 = sphi %s1921_s15, %s14_s15  }
   0x2   : > { %p171_p1 = scmp.lt.s32.totalorder %s1892_s15, 3 }
   0x4   : > { %p172_p2 = pnand %p1321_p0, %p171_p1 }
   0x5   : > { %v1807_v0 = vld [vmem:[%s2272_s1 + $0x40] sm:$0xff] (!%p172_p2)   ;;  %v1894_v1 = vmov (!%p172_p2), 0.0   ;;  %v1809_v3 = vld [vmem:[%s2272_s1 + $0x48] sm:$0xff] (!%p172_p2)   ;;  %vm1895_vm0 = vmmov (!%p172_p2), 0   ;;  %p200_p3 = scmp.lt.s32.totalorder (!%p172_p2), %s1317_s16, 1  ;;  %v1811_v5 = vld [vmem:[%s2272_s1 + $0x50] sm:$0xff] (!%p172_p2)  }
   0x6   : > { %175 = sbr.rel (%p172_p2) target bundleno = 390 (0x186), region = 36  ;;  %1616 = vmatprep.subr.bf16.mxu0 (!%p172_p2), %v1894_v1  ;;  %1636 = vmatprep.subr.bf16.mxu1 (!%p172_p2), %v1894_v1  ;;  %v1808_v2 = vld [vmem:[%s2272_s1] sm:$0xff] (!%p172_p2)   ;;  %v1810_v4 = vld [vmem:[%s2272_s1 + $0x8] sm:$0xff] (!%p172_p2)   ;;  %v1812_v6 = vld [vmem:[%s2272_s1 + $0x10] sm:$0xff] (!%p172_p2)  }
   0x7   : > { %1617 = vmatpush3.bf16.msra.mxu0 (!%p172_p2), %v1807_v0  ;;  %1632 = vmatprep.mubr.msk.bf16.mxu0 (!%p172_p2), %vm1895_vm0, %v1894_v1  ;;  %v1813_v7 = vld [vmem:[%s2272_s1 + $0x58] sm:$0xff] (!%p172_p2)   ;;  %v1815_v9 = vld [vmem:[%s2272_s1 + $0x60] sm:$0xff] (!%p172_p2)   ;;  %v1817_v14 = vld [vmem:[%s2272_s1 + $0x68] sm:$0xff] (!%p172_p2)  }
   0x8   : > { %1637 = vmatpush3.bf16.msra.mxu1 (!%p172_p2), %v1808_v2  ;;  %1618 = vmatprep.subr.bf16.mxu0 (!%p172_p2), %v1894_v1  ;;  %v1814_v8 = vld [vmem:[%s2272_s1 + $0x18] sm:$0xff] (!%p172_p2)   ;;  %v1816_v10 = vld [vmem:[%s2272_s1 + $0x20] sm:$0xff] (!%p172_p2)   ;;  %v1818_v15 = vld [vmem:[%s2272_s1 + $0x28] sm:$0xff] (!%p172_p2)  }
   0x9   : > { %1638 = vmatprep.subr.bf16.mxu1 (!%p172_p2), %v1894_v1  ;;  %1652 = vmatprep.mubr.msk.bf16.mxu1 (!%p172_p2), %vm1895_vm0, %v1894_v1  ;;  %v1819_v17 = vld [vmem:[%s2272_s1 + $0x70] sm:$0xff] (!%p172_p2)   ;;  %v1821_v21 = vld [vmem:[%s2272_s1 + $0x78] sm:$0xff] (!%p172_p2)   ;;  %v1824_v24 = vld [vmem:[%s2272_s1 + $0x80] sm:$0xff] (!%p172_p2)  }
   0xa   : > { %v1820_v18 = vld [vmem:[%s2272_s1 + $0x30] sm:$0xff] (!%p172_p2)   ;;  %v1822_v22 = vld [vmem:[%s2272_s1 + $0x38] sm:$0xff] (!%p172_p2)   ;;  %v1825_v25 = vld [vmem:[%s2272_s1 + $0xc0] sm:$0xff] (!%p172_p2)  }
   0xb   : > { %1619 = vmatpush3.bf16.msra.mxu0 (!%p172_p2), %v1809_v3  ;;  %v1826_v26 = vld [vmem:[%s2272_s1 + $0x88] sm:$0xff] (!%p172_p2)   ;;  %v1828_v28 = vld [vmem:[%s2272_s1 + $0x90] sm:$0xff] (!%p172_p2)   ;;  %v1830_v30 = vld [vmem:[%s2272_s1 + $0x98] sm:$0xff] (!%p172_p2)  }
   0xc   : > { %1639 = vmatpush3.bf16.msra.mxu1 (!%p172_p2), %v1810_v4  ;;  %1620 = vmatprep.subr.bf16.mxu0 (!%p172_p2), %v1894_v1  ;;  %v1827_v27 = vld [vmem:[%s2272_s1 + $0xc8] sm:$0xff] (!%p172_p2)   ;;  %v1829_v29 = vld [vmem:[%s2272_s1 + $0xd0] sm:$0xff] (!%p172_p2)   ;;  %v1831_v31 = vld [vmem:[%s2272_s1 + $0xd8] sm:$0xff] (!%p172_p2)  }
   0xd   : > { %s2277_s16 = smov (!%p200_p3, %s1317_s16), 1  ;;  %1640 = vmatprep.subr.bf16.mxu1 %v1894_v1  ;;  %v1832_v32 = vld [vmem:[%s2272_s1 + $0xa0] sm:$0xff]   ;;  %v1834_v34 = vld [vmem:[%s2272_s1 + $0xa8] sm:$0xff]   ;;  %v1836_v36 = vld [vmem:[%s2272_s1 + $0xb0] sm:$0xff]  }
   0xe   : > { %s1796_s29 = smul.u32 12, %s2277_s16  ;;  %v1833_v33 = vld [vmem:[%s2272_s1 + $0xe0] sm:$0xff]   ;;  %v1835_v35 = vld [vmem:[%s2272_s1 + $0xe8] sm:$0xff]   ;;  %v1837_v37 = vld [vmem:[%s2272_s1 + $0xf0] sm:$0xff]  }
   0xf   : > { %1621 = vmatpush3.bf16.msra.mxu0 %v1811_v5  ;;  %v1838_v42 = vld [vmem:[%s2272_s1 + $0xb8] sm:$0xff]   ;;  %v1841_v46 = vld [vmem:[%s2272_s1 + $0x100] sm:$0xff]   ;;  %v1845_v49 = vld [vmem:[%s2272_s1 + $0x108] sm:$0xff]  }
  0x10   : > { %1641 = vmatpush3.bf16.msra.mxu1 %v1812_v6  ;;  %1622 = vmatprep.subr.bf16.mxu0 %v1894_v1  ;;  %s1971_s10 = scalar_lea.vmem %s2271_s0, %s1796_s29  ;;  %v1839_v44 = vld [vmem:[%s2272_s1 + $0xf8] sm:$0xff]   ;;  %v1844_v48 = vld [vmem:[%s2272_s1 + $0x140] sm:$0xff]   ;;  %v1846_v50 = vld [vmem:[%s2272_s1 + $0x148] sm:$0xff]  }
  0x11   : > { %1642 = vmatprep.subr.bf16.mxu1 %v1894_v1  ;;  %v214_v11 = vld [vmem:[%s1971_s10] sm:$0xf]  ;;  %v1983_v12 = vld [vmem:[%s1971_s10 + $0x4] sm:$0x1]  ;;  %v1847_v51 = vld [vmem:[%s2272_s1 + $0x110] sm:$0xff]  }
  0x12   : > { %v1341_v13 = vcombine.low %v214_v11, %v1983_v12  ;;  %v438_v38 = vld [vmem:[%s1971_s10] sm:$0xe]  ;;  %v551_v40 = vld [vmem:[%s1971_s10 + $0x4] sm:$0x3]  ;;  %v1848_v52 = vld [vmem:[%s2272_s1 + $0x150] sm:$0xff]  }
  0x13   : > { %1623 = vmatpush3.bf16.msra.mxu0 %v1813_v7  ;;  %v550_v39 = vld [vmem:[%s1971_s10] sm:$0xc]  ;;  %v1374_v41 = vcombine.low %v438_v38, %v1983_v12  ;;  %v1849_v53 = vld [vmem:[%s2272_s1 + $0x118] sm:$0xff]   ;;  %v665_v55 = vld [vmem:[%s1971_s10 + $0x4] sm:$0x7] }
  0x14   : > { %1643 = vmatpush3.bf16.msra.mxu1 %v1814_v8  ;;  %1624 = vmatprep.subr.bf16.mxu0 %v1894_v1  ;;  %v257_v16 = vshll.u32 %v1341_v13, 16  ;;  %v255_v19 = vshrl.u32 %v1341_v13, 16  ;;  %v1399_v43 = vcombine.low %v550_v39, %v551_v40  ;;  %v1850_v54 = vld [vmem:[%s2272_s1 + $0x158] sm:$0xff]   ;;  %v1851_v56 = vld [vmem:[%s2272_s1 + $0x120] sm:$0xff]   ;;  %v1424_v58 = vcombine.low %v550_v39, %v665_v55  ;;  %v1853_v59 = vld [vmem:[%s2272_s1 + $0x128] sm:$0xff]  }
  0x15   : > { %1644 = vmatprep.subr.bf16.mxu1 %v1894_v1  ;;  %v459_v45 = vrot.slane %v1374_v41, 1  ;;  %v1852_v57 = vld [vmem:[%s2272_s1 + $0x160] sm:$0xff]   ;;  %v1854_v60 = vld [vmem:[%s2272_s1 + $0x168] sm:$0xff]   ;;  %v1855_v63 = vld [vmem:[%s2272_s1 + $0x130] sm:$0xff]  }
  0x16   : > { %v259_v20 = vrot.slane %v257_v16, 1  ;;  %v574_v47 = vrot.slane %v1399_v43, 2  ;;  %v687_v61 = vshrl.u32 %v1424_v58, 16  ;;  %v690_v62 = vshll.u32 %v1424_v58, 16  ;;  %v1856_v0 = vld [vmem:[%s2272_s1 + $0x170] sm:$0xff]   ;;  %v1857_v5 = vld [vmem:[%s2272_s1 + $0x138] sm:$0xff]  }
  0x17   : > { %1625 = vmatpush3.bf16.msra.mxu0 %v1815_v9  ;;  %v784_v2 = vld [vmem:[%s1971_s10] sm:$0x8]  ;;  %v1858_v7 = vld [vmem:[%s2272_s1 + $0x178] sm:$0xff]   ;;  %v1862_v12 = vld [vmem:[%s2272_s1 + $0x188] sm:$0xff]  }
  0x18   : > { %1645 = vmatpush3.bf16.msra.mxu1 %v1816_v10  ;;  %1626 = vmatprep.subr.bf16.mxu0 %v1894_v1  ;;  %v260_v23 = vor.u32 %v259_v20, %v255_v19  ;;  %v689_v3 = vrot.slane %v687_v61, 2  ;;  %v692_v4 = vrot.slane %v690_v62, 3  ;;  %v1449_v6 = vcombine.low %v784_v2, %v665_v55  ;;  %v1859_v9 = vld [vmem:[%s2272_s1 + $0x180] sm:$0xff]   ;;  %v1863_v13 = vld [vmem:[%s2272_s1 + $0x1c8] sm:$0xff]   ;;  %v1866_v16 = vld [vmem:[%s2272_s1 + $0x198] sm:$0xff]  }
  0x19   : > { %1646 = vmatprep.subr.bf16.mxu1 %v1894_v1  ;;  %v1869_v19 = vld [vmem:[%s2272_s1 + $0x1e0] sm:$0xff]   ;;  %v1882_v39 = vld [vmem:[%s2272_s1 + $0x228] sm:$0xff]   ;;  %v1883_v40 = vld [vmem:[%s2272_s1 + $0x230] sm:$0xff]  }
  0x1a   : > { %v693_v8 = vor.u32 %v692_v4, %v689_v3  ;;  %v805_v10 = vrot.slane %v1449_v6, 3  ;;  %v1003_v20 = vld [vmem:[%s1971_s10 + $0x4] sm:$0xf]  ;;  %v1884_v43 = vld [vmem:[%s2272_s1 + $0x238] sm:$0xff]  }
  0x1b   : > { %1627 = vmatpush3.bf16.msra.mxu0 %v1817_v14  ;;  %v1864_v14 = vld [vmem:[%s2272_s1 + $0x190] sm:$0xff]   ;;  %v1881_v38 = vld [vmem:[%s2272_s1 + $0x220] sm:$0xff]  }
  0x1c   : > { %1647 = vmatpush3.bf16.msra.mxu1 %v1818_v15  ;;  %1628 = vmatprep.subr.bf16.mxu0 %v1894_v1  ;;  %v1865_v15 = vld [vmem:[%s2272_s1 + $0x1d0] sm:$0xff]   ;;  %v1124_v41 = vld [vmem:[%s1971_s10 + $0x4] sm:$0xe] }
  0x1d   : > { %1648 = vmatprep.subr.bf16.mxu1 %v1894_v1 }
  0x1f   : > { %1629 = vmatpush3.bf16.msra.mxu0 %v1819_v17  ;;  %v1867_v17 = vld [vmem:[%s2272_s1 + $0x1d8] sm:$0xff]  }
  0x20   : > { %1649 = vmatpush3.bf16.msra.mxu1 %v1820_v18  ;;  %1630 = vmatprep.subr.bf16.mxu0 %v1894_v1  ;;  %v1868_v18 = vld [vmem:[%s2272_s1 + $0x1a0] sm:$0xff]  }
  0x21   : > { %1650 = vmatprep.subr.bf16.mxu1 %v1894_v1 }
  0x23   : > { %1631 = vmatpush3.bf16.msra.mxu0 %v1821_v21  ;;  %v1004_v21 = vld [vmem:[%s1971_s10 + $0x8] sm:$0x1] }
  0x24   : > { %1651 = vmatpush3.bf16.msra.mxu1 %v1822_v22  ;;  %1656 = vmatprep.subr.bf16.mxu0 %v1894_v1  ;;  %v1870_v22 = vld [vmem:[%s2272_s1 + $0x1a8] sm:$0xff]  }
  0x25   : > { %1676 = vmatprep.subr.bf16.mxu1 %v1894_v1 }
  0x26   : > { %1633 = vmatmul.mubr.bf16.vlgmr.msra.gmra.mrb[0].mxu0 %v260_v23  ;;  %v1498_v23 = vcombine.low %v1003_v20, %v1004_v21 }
  0x27   : > { %1653 = vmatmul.mubr.bf16.vlgmr.msra.gmra.mrb[0].mxu1 %v214_v11  ;;  %1657 = vmatpush3.bf16.msra.mxu0 %v1824_v24  ;;  %v1861_v11 = vld [vmem:[%s2272_s1 + $0x1c0] sm:$0xff]   ;;  %v1871_v24 = vld [vmem:[%s2272_s1 + $0x1e8] sm:$0xff]  }
  0x28   : > { %1677 = vmatpush3.bf16.msra.mxu1 %v1825_v25  ;;  %1658 = vmatprep.subr.bf16.mxu0 %v1894_v1  ;;  %v1872_v25 = vld [vmem:[%s2272_s1 + $0x1b0] sm:$0xff]  }
  0x29   : > { %1678 = vmatprep.subr.bf16.mxu1 %v1894_v1  ;;  %1672 = vmatprep.mubr.msk.bf16.mxu0 %vm1895_vm0, %v1894_v1 }
  0x2a   : > { %1692 = vmatprep.mubr.msk.bf16.mxu1 %vm1895_vm0, %v1894_v1 }
  0x2b   : > { %1659 = vmatpush3.bf16.msra.mxu0 %v1826_v26  ;;  %v1030_v26 = vshll.u32 %v1498_v23, 16 }
  0x2c   : > { %1679 = vmatpush3.bf16.msra.mxu1 %v1827_v27  ;;  %1660 = vmatprep.subr.bf16.mxu0 %v1894_v1  ;;  %v1873_v27 = vld [vmem:[%s2272_s1 + $0x1f0] sm:$0xff]  }
  0x2d   : > { %1680 = vmatprep.subr.bf16.mxu1 %v1894_v1 }
  0x2f   : > { %1661 = vmatpush3.bf16.msra.mxu0 %v1828_v28  ;;  %v1874_v28 = vld [vmem:[%s2272_s1 + $0x1b8] sm:$0xff]  }
  0x30   : > { %1681 = vmatpush3.bf16.msra.mxu1 %v1829_v29  ;;  %1662 = vmatprep.subr.bf16.mxu0 %v1894_v1  ;;  %v1028_v29 = vshrl.u32 %v1498_v23, 16 }
  0x31   : > { %1682 = vmatprep.subr.bf16.mxu1 %v1894_v1 }
  0x33   : > { %1663 = vmatpush3.bf16.msra.mxu0 %v1830_v30  ;;  %v1032_v30 = vrot.slane %v1030_v26, 1 }
  0x34   : > { %1683 = vmatpush3.bf16.msra.mxu1 %v1831_v31  ;;  %1664 = vmatprep.subr.bf16.mxu0 %v1894_v1  ;;  %v1875_v31 = vld [vmem:[%s2272_s1 + $0x1f8] sm:$0xff]  }
  0x35   : > { %1684 = vmatprep.subr.bf16.mxu1 %v1894_v1 }
  0x37   : > { %1665 = vmatpush3.bf16.msra.mxu0 %v1832_v32  ;;  %v896_v32 = vld [vmem:[%s1971_s10 + $0x4] sm:$0xf]  ;;  %s1323_s10 = sshll.u32 %s2277_s16, 2 }
  0x38   : > { %1685 = vmatpush3.bf16.msra.mxu1 %v1833_v33  ;;  %1666 = vmatprep.subr.bf16.mxu0 %v1894_v1  ;;  %v1876_v33 = vld [vmem:[%s2272_s1 + $0x200] sm:$0xff]   ;;  %s208_s28 = scalar_lea.vmem %s2274_s3, %s1323_s10  ;;  %s212_s6 = scalar_lea.vmem %s2275_s4, %s1323_s10 }
  0x39   : > { %1686 = vmatprep.subr.bf16.mxu1 %v1894_v1  ;;  %v1244_v20 = vld [vmem:[%s208_s28] sm:$0xf] }
  0x3b   : > { %1667 = vmatpush3.bf16.msra.mxu0 %v1834_v34  ;;  %v1033_v34 = vor.u32 %v1032_v30, %v1028_v29 }
  0x3c   : > { %1687 = vmatpush3.bf16.msra.mxu1 %v1835_v35  ;;  %1668 = vmatprep.subr.bf16.mxu0 %v1894_v1  ;;  %v1878_v35 = vld [vmem:[%s2272_s1 + $0x208] sm:$0xff]  }
  0x3d   : > { %1688 = vmatprep.subr.bf16.mxu1 %v1894_v1 }
  0x3f   : > { %1669 = vmatpush3.bf16.msra.mxu0 %v1836_v36  ;;  %v1879_v36 = vld [vmem:[%s2272_s1 + $0x210] sm:$0xff]  }
  0x40   : > { %1689 = vmatpush3.bf16.msra.mxu1 %v1837_v37  ;;  %1670 = vmatprep.subr.bf16.mxu0 %v1894_v1  ;;  %v1880_v37 = vld [vmem:[%s2272_s1 + $0x218] sm:$0xff]  }
  0x41   : > { %1690 = vmatprep.subr.bf16.mxu1 %v1894_v1 }
  0x43   : > { %1671 = vmatpush3.bf16.msra.mxu0 %v1838_v42  ;;  %v1523_v42 = vcombine.low %v1124_v41, %v1004_v21 }
  0x44   : > { %1691 = vmatpush3.bf16.msra.mxu1 %v1839_v44  ;;  %1696 = vmatprep.subr.bf16.mxu0 %v1894_v1 }
  0x45   : > { %1716 = vmatprep.subr.bf16.mxu1 %v1894_v1  ;;  %v1145_v44 = vrot.slane %v1523_v42, 1 }
  0x46   : > { %1673 = vmatmul.mubr.bf16.vlgmr.msra.gmra.mrb[4].mxu0 %v459_v45 }
  0x47   : > { %1697 = vmatpush3.bf16.msra.mxu0 %v1841_v46  ;;  %1693 = vmatmul.mubr.bf16.vlgmr.msra.gmra.mrb[4].mxu1 %v574_v47 }
  0x48   : > { %1717 = vmatpush3.bf16.msra.mxu1 %v1844_v48  ;;  %1698 = vmatprep.subr.bf16.mxu0 %v1894_v1 }
  0x49   : > { %1718 = vmatprep.subr.bf16.mxu1 %v1894_v1  ;;  %1712 = vmatprep.mubr.msk.bf16.mxu0 %vm1895_vm0, %v1894_v1 }
  0x4a   : > { %1732 = vmatprep.mubr.msk.bf16.mxu1 %vm1895_vm0, %v1894_v1 }
  0x4b   : > { %1699 = vmatpush3.bf16.msra.mxu0 %v1845_v49 }
  0x4c   : > { %1719 = vmatpush3.bf16.msra.mxu1 %v1846_v50  ;;  %1700 = vmatprep.subr.bf16.mxu0 %v1894_v1 }
  0x4d   : > { %1720 = vmatprep.subr.bf16.mxu1 %v1894_v1 }
  0x4f   : > { %1701 = vmatpush3.bf16.msra.mxu0 %v1847_v51 }
  0x50   : > { %1721 = vmatpush3.bf16.msra.mxu1 %v1848_v52  ;;  %1702 = vmatprep.subr.bf16.mxu0 %v1894_v1 }
  0x51   : > { %1722 = vmatprep.subr.bf16.mxu1 %v1894_v1 }
  0x53   : > { %1703 = vmatpush3.bf16.msra.mxu0 %v1849_v53 }
  0x54   : > { %1723 = vmatpush3.bf16.msra.mxu1 %v1850_v54  ;;  %1704 = vmatprep.subr.bf16.mxu0 %v1894_v1 }
  0x55   : > { %1724 = vmatprep.subr.bf16.mxu1 %v1894_v1 }
  0x57   : > { %1705 = vmatpush3.bf16.msra.mxu0 %v1851_v56 }
  0x58   : > { %1725 = vmatpush3.bf16.msra.mxu1 %v1852_v57  ;;  %1706 = vmatprep.subr.bf16.mxu0 %v1894_v1 }
  0x59   : > { %1726 = vmatprep.subr.bf16.mxu1 %v1894_v1 }
  0x5b   : > { %1707 = vmatpush3.bf16.msra.mxu0 %v1853_v59 }
  0x5c   : > { %1727 = vmatpush3.bf16.msra.mxu1 %v1854_v60  ;;  %1708 = vmatprep.subr.bf16.mxu0 %v1894_v1 }
  0x5d   : > { %1728 = vmatprep.subr.bf16.mxu1 %v1894_v1 }
  0x5f   : > { %1709 = vmatpush3.bf16.msra.mxu0 %v1855_v63 }
  0x60   : > { %1729 = vmatpush3.bf16.msra.mxu1 %v1856_v0  ;;  %1710 = vmatprep.subr.bf16.mxu0 %v1894_v1 }
  0x61   : > { %1730 = vmatprep.subr.bf16.mxu1 %v1894_v1 }
  0x63   : > { %1711 = vmatpush3.bf16.msra.mxu0 %v1857_v5 }
  0x64   : > { %1731 = vmatpush3.bf16.msra.mxu1 %v1858_v7  ;;  %1736 = vmatprep.subr.bf16.mxu0 %v1894_v1 }
  0x65   : > { %1756 = vmatprep.subr.bf16.mxu1 %v1894_v1 }
  0x66   : > { %1713 = vmatmul.mubr.bf16.vlgmr.msra.gmra.mrb[8].mxu0 %v693_v8 }
  0x67   : > { %1737 = vmatpush3.bf16.msra.mxu0 %v1859_v9  ;;  %1733 = vmatmul.mubr.bf16.vlgmr.msra.gmra.mrb[8].mxu1 %v805_v10 }
  0x68   : > { %1757 = vmatpush3.bf16.msra.mxu1 %v1861_v11  ;;  %1738 = vmatprep.subr.bf16.mxu0 %v1894_v1 }
  0x69   : > { %1758 = vmatprep.subr.bf16.mxu1 %v1894_v1  ;;  %1752 = vmatprep.mubr.msk.bf16.mxu0 %vm1895_vm0, %v1894_v1 }
  0x6a   : > { %1772 = vmatprep.mubr.msk.bf16.mxu1 %vm1895_vm0, %v1894_v1 }
  0x6b   : > { %1739 = vmatpush3.bf16.msra.mxu0 %v1862_v12 }
  0x6c   : > { %1759 = vmatpush3.bf16.msra.mxu1 %v1863_v13  ;;  %1740 = vmatprep.subr.bf16.mxu0 %v1894_v1 }
  0x6d   : > { %1760 = vmatprep.subr.bf16.mxu1 %v1894_v1 }
  0x6f   : > { %1741 = vmatpush3.bf16.msra.mxu0 %v1864_v14 }
  0x70   : > { %1761 = vmatpush3.bf16.msra.mxu1 %v1865_v15  ;;  %1742 = vmatprep.subr.bf16.mxu0 %v1894_v1 }
  0x71   : > { %1762 = vmatprep.subr.bf16.mxu1 %v1894_v1 }
  0x73   : > { %1743 = vmatpush3.bf16.msra.mxu0 %v1866_v16 }
  0x74   : > { %1763 = vmatpush3.bf16.msra.mxu1 %v1867_v17  ;;  %1744 = vmatprep.subr.bf16.mxu0 %v1894_v1 }
  0x75   : > { %1764 = vmatprep.subr.bf16.mxu1 %v1894_v1 }
  0x77   : > { %1745 = vmatpush3.bf16.msra.mxu0 %v1868_v18 }
  0x78   : > { %1765 = vmatpush3.bf16.msra.mxu1 %v1869_v19  ;;  %1746 = vmatprep.subr.bf16.mxu0 %v1894_v1 }
  0x79   : > { %1766 = vmatprep.subr.bf16.mxu1 %v1894_v1 }
  0x7b   : > { %1747 = vmatpush3.bf16.msra.mxu0 %v1870_v22  ;;  %v1532_v22 = vld [vmem:[%s2273_s2] ss:$0 sm:$0xff] }
  0x7c   : > { %1767 = vmatpush3.bf16.msra.mxu1 %v1871_v24  ;;  %1748 = vmatprep.subr.bf16.mxu0 %v1894_v1  ;;  %v1245_v24 = vunpack.c.l.bf16 %v1244_v20 }
  0x7d   : > { %1768 = vmatprep.subr.bf16.mxu1 %v1894_v1 }
  0x7f   : > { %1749 = vmatpush3.bf16.msra.mxu0 %v1872_v25 }
  0x80   : > { %1769 = vmatpush3.bf16.msra.mxu1 %v1873_v27  ;;  %1750 = vmatprep.subr.bf16.mxu0 %v1894_v1 }
  0x81   : > { %1770 = vmatprep.subr.bf16.mxu1 %v1894_v1 }
  0x83   : > { %1751 = vmatpush3.bf16.msra.mxu0 %v1874_v28 }
  0x84   : > { %1771 = vmatpush3.bf16.msra.mxu1 %v1875_v31  ;;  %1776 = vmatprep.subr.bf16.mxu0 %v1894_v1 }
  0x86   : > { %1753 = vmatmul.mubr.bf16.vlgmr.msra.gmra.mrb[12].mxu0 %v896_v32 }
  0x87   : > { %1777 = vmatpush3.bf16.msra.mxu0 %v1876_v33  ;;  %1773 = vmatmul.mubr.bf16.vlgmr.msra.gmra.mrb[12].mxu1 %v1033_v34 }
  0x88   : > { %1778 = vmatprep.subr.bf16.mxu0 %v1894_v1  ;;  %1792 = vmatprep.mubr.msk.bf16.mxu0 %vm1895_vm0, %v1894_v1 }
  0x8b   : > { %1779 = vmatpush3.bf16.msra.mxu0 %v1878_v35 }
  0x8c   : > { %1780 = vmatprep.subr.bf16.mxu0 %v1894_v1 }
  0x8f   : > { %1781 = vmatpush3.bf16.msra.mxu0 %v1879_v36 }
  0x90   : > { %1782 = vmatprep.subr.bf16.mxu0 %v1894_v1 }
  0x93   : > { %1783 = vmatpush3.bf16.msra.mxu0 %v1880_v37 }
  0x94   : > { %1784 = vmatprep.subr.bf16.mxu0 %v1894_v1 }
  0x97   : > { %1785 = vmatpush3.bf16.msra.mxu0 %v1881_v38 }
  0x98   : > { %1786 = vmatprep.subr.bf16.mxu0 %v1894_v1 }
  0x9b   : > { %1787 = vmatpush3.bf16.msra.mxu0 %v1882_v39 }
  0x9c   : > { %1788 = vmatprep.subr.bf16.mxu0 %v1894_v1 }
  0x9f   : > { %1789 = vmatpush3.bf16.msra.mxu0 %v1883_v40 }
  0xa0   : > { %1790 = vmatprep.subr.bf16.mxu0 %v1894_v1 }
  0xa3   : > { %1791 = vmatpush3.bf16.msra.mxu0 %v1884_v43 }
  0xa6   : > { %1793 = vmatmul.mubr.bf16.vlgmr.msra.gmra.mrb[16].mxu0 %v1145_v44 }
  0xf9   : > { %v344_v45 = vpop.f32.mrb[0].mxu0 }
  0xfa   : > { %v1634_v46 = vpop.f32.mrb[1].mxu0  ;;  %v432_v47 = vpop.f32.mrb[0].mxu1 }
  0xfb   : > { %v433_v48 = vadd.f32 %v432_v47, %v344_v45  ;;  %v347_v49 = vpop.f32.mrb[2].mxu0  ;;  %v1654_v50 = vpop.f32.mrb[1].mxu1 }
  0xfc   : > { %v1635_v51 = vpop.f32.mrb[3].mxu0  ;;  %v435_v52 = vpop.f32.mrb[2].mxu1 }
  0xfd   : > { %v1655_v53 = vpop.f32.mrb[3].mxu1 }
 0x119   : > { %v543_v54 = vpop.f32.mrb[4].mxu0 }
 0x11a   : > { %v549_v55 = vadd.f32 %v543_v54, %v433_v48  ;;  %v1674_v56 = vpop.f32.mrb[5].mxu0  ;;  %v658_v57 = vpop.f32.mrb[4].mxu1 }
 0x11b   : > { %v546_v58 = vpop.f32.mrb[6].mxu0  ;;  %v1694_v59 = vpop.f32.mrb[5].mxu1 }
 0x11c   : > { %v664_v60 = vadd.f32 %v658_v57, %v549_v55  ;;  %v1675_v1 = vpop.f32.mrb[7].mxu0  ;;  %v661_v61 = vpop.f32.mrb[6].mxu1 }
 0x11d   : > { %v1695_v62 = vpop.f32.mrb[7].mxu1 }
 0x139   : > { %v777_v63 = vpop.f32.mrb[8].mxu0 }
 0x13a   : > { %v783_v0 = vadd.f32 %v777_v63, %v664_v60  ;;  %v1714_v2 = vpop.f32.mrb[9].mxu0  ;;  %v889_v3 = vpop.f32.mrb[8].mxu1 }
 0x13b   : > { %v780_v4 = vpop.f32.mrb[10].mxu0  ;;  %v1734_v5 = vpop.f32.mrb[9].mxu1 }
 0x13c   : > { %v895_v6 = vadd.f32 %v889_v3, %v783_v0  ;;  %v1715_v7 = vpop.f32.mrb[11].mxu0  ;;  %v892_v8 = vpop.f32.mrb[10].mxu1 }
 0x13d   : > { %v1735_v9 = vpop.f32.mrb[11].mxu1 }
 0x159   : > { %v996_v10 = vpop.f32.mrb[12].mxu0 }
 0x15a   : > { %v1002_v11 = vadd.f32 %v996_v10, %v895_v6  ;;  %v1754_v12 = vpop.f32.mrb[13].mxu0  ;;  %v1117_v13 = vpop.f32.mrb[12].mxu1 }
 0x15b   : > { %v999_v14 = vpop.f32.mrb[14].mxu0  ;;  %v1774_v15 = vpop.f32.mrb[13].mxu1 }
 0x15c   : > { %v1123_v16 = vadd.f32 %v1117_v13, %v1002_v11  ;;  %v1755_v17 = vpop.f32.mrb[15].mxu0  ;;  %v1120_v18 = vpop.f32.mrb[14].mxu1 }
 0x15d   : > { %v1775_v19 = vpop.f32.mrb[15].mxu1 }
 0x179   : > { %v1229_v21 = vpop.f32.mrb[16].mxu0 }
 0x17a   : > { %v1235_v23 = vadd.f32 %v1229_v21, %v1123_v16  ;;  %v1794_v25 = vpop.f32.mrb[17].mxu0 }
 0x17b   : > { %v1232_v26 = vpop.f32.mrb[18].mxu0 }
 0x17c   : > { %v1243_v27 = vadd.f32 %v1532_v22, %v1235_v23  ;;  %v1795_v28 = vpop.f32.mrb[19].mxu0 }
 0x17e   : > { %v1246_v29 = vadd.f32 %v1245_v24, %v1243_v27 }
 0x180   : > { %vm1247_vm1 = vcmp.gt.f32.partialorder %v1246_v29, 0.0  ;;  %v1248_v30 = vmul.f32 0.01, %v1246_v29 }
 0x182   : > { %v1249_v31 = vsel %vm1247_vm1, %v1246_v29, %v1248_v30 }
 0x183   : > { %v1250_v32 = vpack.c.bf16 %v1249_v31, %v1249_v31 }
 0x185   : > { %1251 = vst [vmem:[%s212_s6] sm:$0xf] %v1250_v32 }
 0x186 PF: > { %s14_s15 = sadd.s32 1, %s1892_s15  }
 0x187   : > { %p11_p4 = scmp.ge.s32.totalorder %s14_s15, 4  }
 0x189   :  { %13 = sbr.rel (!%p11_p4) target bundleno = 1 (0x1), region = 77 }

// kernel: forward.21
= control target key start
LH: loop header
LB: loop body
LE: loop exit
PB: predicated region body
PF: predicated region fallthrough
CT: control target
= control target key end

     0   :  { %s1856_s12 = smov 0   ;;  %s2203_s0 = inlined_call_operand.vmem [shape: bf16[2,1,24,128], index: 0, kind: input, shape index: {}]   ;;  %s2204_s1 = inlined_call_operand.vmem [shape: bf16[9,128,128], index: 1, kind: input, shape index: {}]   ;;  %s2205_s2 = inlined_call_operand.vmem [shape: f32[1,128], index: 2, kind: input, shape index: {}]   ;;  %s2206_s3 = inlined_call_operand.vmem [shape: bf16[2,8,128], index: 3, kind: output, shape index: {}]  }
   0x1 LB: > { %s1258_s13 = sadd.s32 4294967295, %s1832_s12   ;;  %p1262_p0 = scmp.ge.s32.totalorder %s1832_s12, 1  ;;  %s1832_s12 = sphi %s1856_s12, %s13_s12  }
   0x2   : > { %p137_p1 = scmp.lt.s32.totalorder %s1832_s12, 3 }
   0x4   : > { %p138_p2 = pnand %p1262_p0, %p137_p1 }
   0x5   : > { %v1747_v0 = vld [vmem:[%s2204_s1 + $0x40] sm:$0xff] (!%p138_p2)   ;;  %v1834_v1 = vmov (!%p138_p2), 0.0   ;;  %v1749_v3 = vld [vmem:[%s2204_s1 + $0x48] sm:$0xff] (!%p138_p2)   ;;  %vm1835_vm0 = vmmov (!%p138_p2), 0   ;;  %p160_p3 = scmp.lt.s32.totalorder (!%p138_p2), %s1258_s13, 1  ;;  %v1751_v5 = vld [vmem:[%s2204_s1 + $0x50] sm:$0xff] (!%p138_p2)  }
   0x6   : > { %141 = sbr.rel (%p138_p2) target bundleno = 388 (0x184), region = 32  ;;  %1556 = vmatprep.subr.bf16.mxu0 (!%p138_p2), %v1834_v1  ;;  %1576 = vmatprep.subr.bf16.mxu1 (!%p138_p2), %v1834_v1  ;;  %v1748_v2 = vld [vmem:[%s2204_s1] sm:$0xff] (!%p138_p2)   ;;  %v1750_v4 = vld [vmem:[%s2204_s1 + $0x8] sm:$0xff] (!%p138_p2)   ;;  %v1752_v6 = vld [vmem:[%s2204_s1 + $0x10] sm:$0xff] (!%p138_p2)  }
   0x7   : > { %1557 = vmatpush3.bf16.msra.mxu0 (!%p138_p2), %v1747_v0  ;;  %1572 = vmatprep.mubr.msk.bf16.mxu0 (!%p138_p2), %vm1835_vm0, %v1834_v1  ;;  %v1753_v7 = vld [vmem:[%s2204_s1 + $0x58] sm:$0xff] (!%p138_p2)   ;;  %v1755_v9 = vld [vmem:[%s2204_s1 + $0x60] sm:$0xff] (!%p138_p2)   ;;  %v1757_v14 = vld [vmem:[%s2204_s1 + $0x68] sm:$0xff] (!%p138_p2)  }
   0x8   : > { %1577 = vmatpush3.bf16.msra.mxu1 (!%p138_p2), %v1748_v2  ;;  %1558 = vmatprep.subr.bf16.mxu0 (!%p138_p2), %v1834_v1  ;;  %v1754_v8 = vld [vmem:[%s2204_s1 + $0x18] sm:$0xff] (!%p138_p2)   ;;  %v1756_v10 = vld [vmem:[%s2204_s1 + $0x20] sm:$0xff] (!%p138_p2)   ;;  %v1758_v15 = vld [vmem:[%s2204_s1 + $0x28] sm:$0xff] (!%p138_p2)  }
   0x9   : > { %1578 = vmatprep.subr.bf16.mxu1 (!%p138_p2), %v1834_v1  ;;  %1592 = vmatprep.mubr.msk.bf16.mxu1 (!%p138_p2), %vm1835_vm0, %v1834_v1  ;;  %v1759_v17 = vld [vmem:[%s2204_s1 + $0x70] sm:$0xff] (!%p138_p2)   ;;  %v1761_v21 = vld [vmem:[%s2204_s1 + $0x78] sm:$0xff] (!%p138_p2)   ;;  %v1764_v24 = vld [vmem:[%s2204_s1 + $0x80] sm:$0xff] (!%p138_p2)  }
   0xa   : > { %v1760_v18 = vld [vmem:[%s2204_s1 + $0x30] sm:$0xff] (!%p138_p2)   ;;  %v1762_v22 = vld [vmem:[%s2204_s1 + $0x38] sm:$0xff] (!%p138_p2)   ;;  %v1765_v25 = vld [vmem:[%s2204_s1 + $0xc0] sm:$0xff] (!%p138_p2)  }
   0xb   : > { %1559 = vmatpush3.bf16.msra.mxu0 (!%p138_p2), %v1749_v3  ;;  %v1766_v26 = vld [vmem:[%s2204_s1 + $0x88] sm:$0xff] (!%p138_p2)   ;;  %v1768_v28 = vld [vmem:[%s2204_s1 + $0x90] sm:$0xff] (!%p138_p2)   ;;  %v1770_v30 = vld [vmem:[%s2204_s1 + $0x98] sm:$0xff] (!%p138_p2)  }
   0xc   : > { %1579 = vmatpush3.bf16.msra.mxu1 (!%p138_p2), %v1750_v4  ;;  %1560 = vmatprep.subr.bf16.mxu0 (!%p138_p2), %v1834_v1  ;;  %v1767_v27 = vld [vmem:[%s2204_s1 + $0xc8] sm:$0xff] (!%p138_p2)   ;;  %v1769_v29 = vld [vmem:[%s2204_s1 + $0xd0] sm:$0xff] (!%p138_p2)   ;;  %v1771_v31 = vld [vmem:[%s2204_s1 + $0xd8] sm:$0xff] (!%p138_p2)  }
   0xd   : > { %s2208_s13 = smov (!%p160_p3, %s1258_s13), 1  ;;  %1580 = vmatprep.subr.bf16.mxu1 %v1834_v1  ;;  %v1772_v32 = vld [vmem:[%s2204_s1 + $0xa0] sm:$0xff]   ;;  %v1774_v34 = vld [vmem:[%s2204_s1 + $0xa8] sm:$0xff]   ;;  %v1776_v36 = vld [vmem:[%s2204_s1 + $0xb0] sm:$0xff]  }
   0xe   : > { %s1736_s26 = smul.u32 12, %s2208_s13  ;;  %v1773_v33 = vld [vmem:[%s2204_s1 + $0xe0] sm:$0xff]   ;;  %v1775_v35 = vld [vmem:[%s2204_s1 + $0xe8] sm:$0xff]   ;;  %v1777_v37 = vld [vmem:[%s2204_s1 + $0xf0] sm:$0xff]   ;;  %s1264_s18 = sshll.u32 %s2208_s13, 2 }
   0xf   : > { %1561 = vmatpush3.bf16.msra.mxu0 %v1751_v5  ;;  %v1778_v42 = vld [vmem:[%s2204_s1 + $0xb8] sm:$0xff]   ;;  %v1781_v46 = vld [vmem:[%s2204_s1 + $0x100] sm:$0xff]   ;;  %v1785_v49 = vld [vmem:[%s2204_s1 + $0x108] sm:$0xff]   ;;  %s168_s21 = scalar_lea.vmem %s2206_s3, %s1264_s18 }
  0x10   : > { %1581 = vmatpush3.bf16.msra.mxu1 %v1752_v6  ;;  %1562 = vmatprep.subr.bf16.mxu0 %v1834_v1  ;;  %s1906_s6 = scalar_lea.vmem %s2203_s0, %s1736_s26  ;;  %v1779_v44 = vld [vmem:[%s2204_s1 + $0xf8] sm:$0xff]   ;;  %v1784_v48 = vld [vmem:[%s2204_s1 + $0x140] sm:$0xff]   ;;  %v1786_v50 = vld [vmem:[%s2204_s1 + $0x148] sm:$0xff]  }
  0x11   : > { %1582 = vmatprep.subr.bf16.mxu1 %v1834_v1  ;;  %v170_v11 = vld [vmem:[%s1906_s6] sm:$0xf]  ;;  %v1918_v12 = vld [vmem:[%s1906_s6 + $0x4] sm:$0x1]  ;;  %v1787_v51 = vld [vmem:[%s2204_s1 + $0x110] sm:$0xff]  }
  0x12   : > { %v1281_v13 = vcombine.low %v170_v11, %v1918_v12  ;;  %v394_v38 = vld [vmem:[%s1906_s6] sm:$0xe]  ;;  %v507_v40 = vld [vmem:[%s1906_s6 + $0x4] sm:$0x3]  ;;  %v1788_v52 = vld [vmem:[%s2204_s1 + $0x150] sm:$0xff]  }
  0x13   : > { %1563 = vmatpush3.bf16.msra.mxu0 %v1753_v7  ;;  %v506_v39 = vld [vmem:[%s1906_s6] sm:$0xc]  ;;  %v1314_v41 = vcombine.low %v394_v38, %v1918_v12  ;;  %v1789_v53 = vld [vmem:[%s2204_s1 + $0x118] sm:$0xff]   ;;  %v621_v55 = vld [vmem:[%s1906_s6 + $0x4] sm:$0x7] }
  0x14   : > { %1583 = vmatpush3.bf16.msra.mxu1 %v1754_v8  ;;  %1564 = vmatprep.subr.bf16.mxu0 %v1834_v1  ;;  %v213_v16 = vshll.u32 %v1281_v13, 16  ;;  %v211_v19 = vshrl.u32 %v1281_v13, 16  ;;  %v1339_v43 = vcombine.low %v506_v39, %v507_v40  ;;  %v1790_v54 = vld [vmem:[%s2204_s1 + $0x158] sm:$0xff]   ;;  %v1791_v56 = vld [vmem:[%s2204_s1 + $0x120] sm:$0xff]   ;;  %v1364_v58 = vcombine.low %v506_v39, %v621_v55  ;;  %v1793_v59 = vld [vmem:[%s2204_s1 + $0x128] sm:$0xff]  }
  0x15   : > { %1584 = vmatprep.subr.bf16.mxu1 %v1834_v1  ;;  %v415_v45 = vrot.slane %v1314_v41, 1  ;;  %v1792_v57 = vld [vmem:[%s2204_s1 + $0x160] sm:$0xff]   ;;  %v1794_v60 = vld [vmem:[%s2204_s1 + $0x168] sm:$0xff]   ;;  %v1795_v63 = vld [vmem:[%s2204_s1 + $0x130] sm:$0xff]  }
  0x16   : > { %v215_v20 = vrot.slane %v213_v16, 1  ;;  %v530_v47 = vrot.slane %v1339_v43, 2  ;;  %v643_v61 = vshrl.u32 %v1364_v58, 16  ;;  %v646_v62 = vshll.u32 %v1364_v58, 16  ;;  %v1796_v0 = vld [vmem:[%s2204_s1 + $0x170] sm:$0xff]   ;;  %v1797_v5 = vld [vmem:[%s2204_s1 + $0x138] sm:$0xff]  }
  0x17   : > { %1565 = vmatpush3.bf16.msra.mxu0 %v1755_v9  ;;  %v740_v2 = vld [vmem:[%s1906_s6] sm:$0x8]  ;;  %v1798_v7 = vld [vmem:[%s2204_s1 + $0x178] sm:$0xff]   ;;  %v1802_v12 = vld [vmem:[%s2204_s1 + $0x188] sm:$0xff]  }
  0x18   : > { %1585 = vmatpush3.bf16.msra.mxu1 %v1756_v10  ;;  %1566 = vmatprep.subr.bf16.mxu0 %v1834_v1  ;;  %v216_v23 = vor.u32 %v215_v20, %v211_v19  ;;  %v645_v3 = vrot.slane %v643_v61, 2  ;;  %v648_v4 = vrot.slane %v646_v62, 3  ;;  %v1389_v6 = vcombine.low %v740_v2, %v621_v55  ;;  %v1799_v9 = vld [vmem:[%s2204_s1 + $0x180] sm:$0xff]   ;;  %v1803_v13 = vld [vmem:[%s2204_s1 + $0x1c8] sm:$0xff]   ;;  %v1806_v16 = vld [vmem:[%s2204_s1 + $0x198] sm:$0xff]  }
  0x19   : > { %1586 = vmatprep.subr.bf16.mxu1 %v1834_v1  ;;  %v1809_v19 = vld [vmem:[%s2204_s1 + $0x1e0] sm:$0xff]   ;;  %v1822_v39 = vld [vmem:[%s2204_s1 + $0x228] sm:$0xff]   ;;  %v1823_v40 = vld [vmem:[%s2204_s1 + $0x230] sm:$0xff]  }
  0x1a   : > { %v649_v8 = vor.u32 %v648_v4, %v645_v3  ;;  %v761_v10 = vrot.slane %v1389_v6, 3  ;;  %v959_v20 = vld [vmem:[%s1906_s6 + $0x4] sm:$0xf]  ;;  %v1824_v43 = vld [vmem:[%s2204_s1 + $0x238] sm:$0xff]  }
  0x1b   : > { %1567 = vmatpush3.bf16.msra.mxu0 %v1757_v14  ;;  %v1804_v14 = vld [vmem:[%s2204_s1 + $0x190] sm:$0xff]   ;;  %v1821_v38 = vld [vmem:[%s2204_s1 + $0x220] sm:$0xff]  }
  0x1c   : > { %1587 = vmatpush3.bf16.msra.mxu1 %v1758_v15  ;;  %1568 = vmatprep.subr.bf16.mxu0 %v1834_v1  ;;  %v1805_v15 = vld [vmem:[%s2204_s1 + $0x1d0] sm:$0xff]   ;;  %v1080_v41 = vld [vmem:[%s1906_s6 + $0x4] sm:$0xe] }
  0x1d   : > { %1588 = vmatprep.subr.bf16.mxu1 %v1834_v1 }
  0x1f   : > { %1569 = vmatpush3.bf16.msra.mxu0 %v1759_v17  ;;  %v1807_v17 = vld [vmem:[%s2204_s1 + $0x1d8] sm:$0xff]  }
  0x20   : > { %1589 = vmatpush3.bf16.msra.mxu1 %v1760_v18  ;;  %1570 = vmatprep.subr.bf16.mxu0 %v1834_v1  ;;  %v1808_v18 = vld [vmem:[%s2204_s1 + $0x1a0] sm:$0xff]  }
  0x21   : > { %1590 = vmatprep.subr.bf16.mxu1 %v1834_v1 }
  0x23   : > { %1571 = vmatpush3.bf16.msra.mxu0 %v1761_v21  ;;  %v960_v21 = vld [vmem:[%s1906_s6 + $0x8] sm:$0x1] }
  0x24   : > { %1591 = vmatpush3.bf16.msra.mxu1 %v1762_v22  ;;  %1596 = vmatprep.subr.bf16.mxu0 %v1834_v1  ;;  %v1810_v22 = vld [vmem:[%s2204_s1 + $0x1a8] sm:$0xff]  }
  0x25   : > { %1616 = vmatprep.subr.bf16.mxu1 %v1834_v1 }
  0x26   : > { %1573 = vmatmul.mubr.bf16.vlgmr.msra.gmra.mrb[0].mxu0 %v216_v23  ;;  %v1438_v23 = vcombine.low %v959_v20, %v960_v21 }
  0x27   : > { %1593 = vmatmul.mubr.bf16.vlgmr.msra.gmra.mrb[0].mxu1 %v170_v11  ;;  %1597 = vmatpush3.bf16.msra.mxu0 %v1764_v24  ;;  %v1801_v11 = vld [vmem:[%s2204_s1 + $0x1c0] sm:$0xff]   ;;  %v1811_v24 = vld [vmem:[%s2204_s1 + $0x1e8] sm:$0xff]  }
  0x28   : > { %1617 = vmatpush3.bf16.msra.mxu1 %v1765_v25  ;;  %1598 = vmatprep.subr.bf16.mxu0 %v1834_v1  ;;  %v1812_v25 = vld [vmem:[%s2204_s1 + $0x1b0] sm:$0xff]  }
  0x29   : > { %1618 = vmatprep.subr.bf16.mxu1 %v1834_v1  ;;  %1612 = vmatprep.mubr.msk.bf16.mxu0 %vm1835_vm0, %v1834_v1 }
  0x2a   : > { %1632 = vmatprep.mubr.msk.bf16.mxu1 %vm1835_vm0, %v1834_v1 }
  0x2b   : > { %1599 = vmatpush3.bf16.msra.mxu0 %v1766_v26  ;;  %v986_v26 = vshll.u32 %v1438_v23, 16 }
  0x2c   : > { %1619 = vmatpush3.bf16.msra.mxu1 %v1767_v27  ;;  %1600 = vmatprep.subr.bf16.mxu0 %v1834_v1  ;;  %v1813_v27 = vld [vmem:[%s2204_s1 + $0x1f0] sm:$0xff]  }
  0x2d   : > { %1620 = vmatprep.subr.bf16.mxu1 %v1834_v1 }
  0x2f   : > { %1601 = vmatpush3.bf16.msra.mxu0 %v1768_v28  ;;  %v1814_v28 = vld [vmem:[%s2204_s1 + $0x1b8] sm:$0xff]  }
  0x30   : > { %1621 = vmatpush3.bf16.msra.mxu1 %v1769_v29  ;;  %1602 = vmatprep.subr.bf16.mxu0 %v1834_v1  ;;  %v984_v29 = vshrl.u32 %v1438_v23, 16 }
  0x31   : > { %1622 = vmatprep.subr.bf16.mxu1 %v1834_v1 }
  0x33   : > { %1603 = vmatpush3.bf16.msra.mxu0 %v1770_v30  ;;  %v988_v30 = vrot.slane %v986_v26, 1 }
  0x34   : > { %1623 = vmatpush3.bf16.msra.mxu1 %v1771_v31  ;;  %1604 = vmatprep.subr.bf16.mxu0 %v1834_v1  ;;  %v1815_v31 = vld [vmem:[%s2204_s1 + $0x1f8] sm:$0xff]  }
  0x35   : > { %1624 = vmatprep.subr.bf16.mxu1 %v1834_v1 }
  0x37   : > { %1605 = vmatpush3.bf16.msra.mxu0 %v1772_v32  ;;  %v852_v32 = vld [vmem:[%s1906_s6 + $0x4] sm:$0xf] }
  0x38   : > { %1625 = vmatpush3.bf16.msra.mxu1 %v1773_v33  ;;  %1606 = vmatprep.subr.bf16.mxu0 %v1834_v1  ;;  %v1816_v33 = vld [vmem:[%s2204_s1 + $0x200] sm:$0xff]  }
  0x39   : > { %1626 = vmatprep.subr.bf16.mxu1 %v1834_v1 }
  0x3b   : > { %1607 = vmatpush3.bf16.msra.mxu0 %v1774_v34  ;;  %v989_v34 = vor.u32 %v988_v30, %v984_v29 }
  0x3c   : > { %1627 = vmatpush3.bf16.msra.mxu1 %v1775_v35  ;;  %1608 = vmatprep.subr.bf16.mxu0 %v1834_v1  ;;  %v1818_v35 = vld [vmem:[%s2204_s1 + $0x208] sm:$0xff]  }
  0x3d   : > { %1628 = vmatprep.subr.bf16.mxu1 %v1834_v1 }
  0x3f   : > { %1609 = vmatpush3.bf16.msra.mxu0 %v1776_v36  ;;  %v1819_v36 = vld [vmem:[%s2204_s1 + $0x210] sm:$0xff]  }
  0x40   : > { %1629 = vmatpush3.bf16.msra.mxu1 %v1777_v37  ;;  %1610 = vmatprep.subr.bf16.mxu0 %v1834_v1  ;;  %v1820_v37 = vld [vmem:[%s2204_s1 + $0x218] sm:$0xff]  }
  0x41   : > { %1630 = vmatprep.subr.bf16.mxu1 %v1834_v1 }
  0x43   : > { %1611 = vmatpush3.bf16.msra.mxu0 %v1778_v42  ;;  %v1463_v42 = vcombine.low %v1080_v41, %v960_v21  ;;  %v1472_v21 = vld [vmem:[%s2205_s2] ss:$0 sm:$0xff] }
  0x44   : > { %1631 = vmatpush3.bf16.msra.mxu1 %v1779_v44  ;;  %1636 = vmatprep.subr.bf16.mxu0 %v1834_v1 }
  0x45   : > { %1656 = vmatprep.subr.bf16.mxu1 %v1834_v1  ;;  %v1101_v44 = vrot.slane %v1463_v42, 1 }
  0x46   : > { %1613 = vmatmul.mubr.bf16.vlgmr.msra.gmra.mrb[4].mxu0 %v415_v45 }
  0x47   : > { %1637 = vmatpush3.bf16.msra.mxu0 %v1781_v46  ;;  %1633 = vmatmul.mubr.bf16.vlgmr.msra.gmra.mrb[4].mxu1 %v530_v47 }
  0x48   : > { %1657 = vmatpush3.bf16.msra.mxu1 %v1784_v48  ;;  %1638 = vmatprep.subr.bf16.mxu0 %v1834_v1 }
  0x49   : > { %1658 = vmatprep.subr.bf16.mxu1 %v1834_v1  ;;  %1652 = vmatprep.mubr.msk.bf16.mxu0 %vm1835_vm0, %v1834_v1 }
  0x4a   : > { %1672 = vmatprep.mubr.msk.bf16.mxu1 %vm1835_vm0, %v1834_v1 }
  0x4b   : > { %1639 = vmatpush3.bf16.msra.mxu0 %v1785_v49 }
  0x4c   : > { %1659 = vmatpush3.bf16.msra.mxu1 %v1786_v50  ;;  %1640 = vmatprep.subr.bf16.mxu0 %v1834_v1 }
  0x4d   : > { %1660 = vmatprep.subr.bf16.mxu1 %v1834_v1 }
  0x4f   : > { %1641 = vmatpush3.bf16.msra.mxu0 %v1787_v51 }
  0x50   : > { %1661 = vmatpush3.bf16.msra.mxu1 %v1788_v52  ;;  %1642 = vmatprep.subr.bf16.mxu0 %v1834_v1 }
  0x51   : > { %1662 = vmatprep.subr.bf16.mxu1 %v1834_v1 }
  0x53   : > { %1643 = vmatpush3.bf16.msra.mxu0 %v1789_v53 }
  0x54   : > { %1663 = vmatpush3.bf16.msra.mxu1 %v1790_v54  ;;  %1644 = vmatprep.subr.bf16.mxu0 %v1834_v1 }
  0x55   : > { %1664 = vmatprep.subr.bf16.mxu1 %v1834_v1 }
  0x57   : > { %1645 = vmatpush3.bf16.msra.mxu0 %v1791_v56 }
  0x58   : > { %1665 = vmatpush3.bf16.msra.mxu1 %v1792_v57  ;;  %1646 = vmatprep.subr.bf16.mxu0 %v1834_v1 }
  0x59   : > { %1666 = vmatprep.subr.bf16.mxu1 %v1834_v1 }
  0x5b   : > { %1647 = vmatpush3.bf16.msra.mxu0 %v1793_v59 }
  0x5c   : > { %1667 = vmatpush3.bf16.msra.mxu1 %v1794_v60  ;;  %1648 = vmatprep.subr.bf16.mxu0 %v1834_v1 }
  0x5d   : > { %1668 = vmatprep.subr.bf16.mxu1 %v1834_v1 }
  0x5f   : > { %1649 = vmatpush3.bf16.msra.mxu0 %v1795_v63 }
  0x60   : > { %1669 = vmatpush3.bf16.msra.mxu1 %v1796_v0  ;;  %1650 = vmatprep.subr.bf16.mxu0 %v1834_v1 }
  0x61   : > { %1670 = vmatprep.subr.bf16.mxu1 %v1834_v1 }
  0x63   : > { %1651 = vmatpush3.bf16.msra.mxu0 %v1797_v5 }
  0x64   : > { %1671 = vmatpush3.bf16.msra.mxu1 %v1798_v7  ;;  %1676 = vmatprep.subr.bf16.mxu0 %v1834_v1 }
  0x65   : > { %1696 = vmatprep.subr.bf16.mxu1 %v1834_v1 }
  0x66   : > { %1653 = vmatmul.mubr.bf16.vlgmr.msra.gmra.mrb[8].mxu0 %v649_v8 }
  0x67   : > { %1677 = vmatpush3.bf16.msra.mxu0 %v1799_v9  ;;  %1673 = vmatmul.mubr.bf16.vlgmr.msra.gmra.mrb[8].mxu1 %v761_v10 }
  0x68   : > { %1697 = vmatpush3.bf16.msra.mxu1 %v1801_v11  ;;  %1678 = vmatprep.subr.bf16.mxu0 %v1834_v1 }
  0x69   : > { %1698 = vmatprep.subr.bf16.mxu1 %v1834_v1  ;;  %1692 = vmatprep.mubr.msk.bf16.mxu0 %vm1835_vm0, %v1834_v1 }
  0x6a   : > { %1712 = vmatprep.mubr.msk.bf16.mxu1 %vm1835_vm0, %v1834_v1 }
  0x6b   : > { %1679 = vmatpush3.bf16.msra.mxu0 %v1802_v12 }
  0x6c   : > { %1699 = vmatpush3.bf16.msra.mxu1 %v1803_v13  ;;  %1680 = vmatprep.subr.bf16.mxu0 %v1834_v1 }
  0x6d   : > { %1700 = vmatprep.subr.bf16.mxu1 %v1834_v1 }
  0x6f   : > { %1681 = vmatpush3.bf16.msra.mxu0 %v1804_v14 }
  0x70   : > { %1701 = vmatpush3.bf16.msra.mxu1 %v1805_v15  ;;  %1682 = vmatprep.subr.bf16.mxu0 %v1834_v1 }
  0x71   : > { %1702 = vmatprep.subr.bf16.mxu1 %v1834_v1 }
  0x73   : > { %1683 = vmatpush3.bf16.msra.mxu0 %v1806_v16 }
  0x74   : > { %1703 = vmatpush3.bf16.msra.mxu1 %v1807_v17  ;;  %1684 = vmatprep.subr.bf16.mxu0 %v1834_v1 }
  0x75   : > { %1704 = vmatprep.subr.bf16.mxu1 %v1834_v1 }
  0x77   : > { %1685 = vmatpush3.bf16.msra.mxu0 %v1808_v18 }
  0x78   : > { %1705 = vmatpush3.bf16.msra.mxu1 %v1809_v19  ;;  %1686 = vmatprep.subr.bf16.mxu0 %v1834_v1 }
  0x79   : > { %1706 = vmatprep.subr.bf16.mxu1 %v1834_v1 }
  0x7b   : > { %1687 = vmatpush3.bf16.msra.mxu0 %v1810_v22 }
  0x7c   : > { %1707 = vmatpush3.bf16.msra.mxu1 %v1811_v24  ;;  %1688 = vmatprep.subr.bf16.mxu0 %v1834_v1 }
  0x7d   : > { %1708 = vmatprep.subr.bf16.mxu1 %v1834_v1 }
  0x7f   : > { %1689 = vmatpush3.bf16.msra.mxu0 %v1812_v25 }
  0x80   : > { %1709 = vmatpush3.bf16.msra.mxu1 %v1813_v27  ;;  %1690 = vmatprep.subr.bf16.mxu0 %v1834_v1 }
  0x81   : > { %1710 = vmatprep.subr.bf16.mxu1 %v1834_v1 }
  0x83   : > { %1691 = vmatpush3.bf16.msra.mxu0 %v1814_v28 }
  0x84   : > { %1711 = vmatpush3.bf16.msra.mxu1 %v1815_v31  ;;  %1716 = vmatprep.subr.bf16.mxu0 %v1834_v1 }
  0x86   : > { %1693 = vmatmul.mubr.bf16.vlgmr.msra.gmra.mrb[12].mxu0 %v852_v32 }
  0x87   : > { %1717 = vmatpush3.bf16.msra.mxu0 %v1816_v33  ;;  %1713 = vmatmul.mubr.bf16.vlgmr.msra.gmra.mrb[12].mxu1 %v989_v34 }
  0x88   : > { %1718 = vmatprep.subr.bf16.mxu0 %v1834_v1  ;;  %1732 = vmatprep.mubr.msk.bf16.mxu0 %vm1835_vm0, %v1834_v1 }
  0x8b   : > { %1719 = vmatpush3.bf16.msra.mxu0 %v1818_v35 }
  0x8c   : > { %1720 = vmatprep.subr.bf16.mxu0 %v1834_v1 }
  0x8f   : > { %1721 = vmatpush3.bf16.msra.mxu0 %v1819_v36 }
  0x90   : > { %1722 = vmatprep.subr.bf16.mxu0 %v1834_v1 }
  0x93   : > { %1723 = vmatpush3.bf16.msra.mxu0 %v1820_v37 }
  0x94   : > { %1724 = vmatprep.subr.bf16.mxu0 %v1834_v1 }
  0x97   : > { %1725 = vmatpush3.bf16.msra.mxu0 %v1821_v38 }
  0x98   : > { %1726 = vmatprep.subr.bf16.mxu0 %v1834_v1 }
  0x9b   : > { %1727 = vmatpush3.bf16.msra.mxu0 %v1822_v39 }
  0x9c   : > { %1728 = vmatprep.subr.bf16.mxu0 %v1834_v1 }
  0x9f   : > { %1729 = vmatpush3.bf16.msra.mxu0 %v1823_v40 }
  0xa0   : > { %1730 = vmatprep.subr.bf16.mxu0 %v1834_v1 }
  0xa3   : > { %1731 = vmatpush3.bf16.msra.mxu0 %v1824_v43 }
  0xa6   : > { %1733 = vmatmul.mubr.bf16.vlgmr.msra.gmra.mrb[16].mxu0 %v1101_v44 }
  0xf9   : > { %v300_v45 = vpop.f32.mrb[0].mxu0 }
  0xfa   : > { %v1574_v46 = vpop.f32.mrb[1].mxu0  ;;  %v388_v47 = vpop.f32.mrb[0].mxu1 }
  0xfb   : > { %v389_v48 = vadd.f32 %v388_v47, %v300_v45  ;;  %v303_v49 = vpop.f32.mrb[2].mxu0  ;;  %v1594_v50 = vpop.f32.mrb[1].mxu1 }
  0xfc   : > { %v1575_v51 = vpop.f32.mrb[3].mxu0  ;;  %v391_v52 = vpop.f32.mrb[2].mxu1 }
  0xfd   : > { %v1595_v53 = vpop.f32.mrb[3].mxu1 }
 0x119   : > { %v499_v54 = vpop.f32.mrb[4].mxu0 }
 0x11a   : > { %v505_v55 = vadd.f32 %v499_v54, %v389_v48  ;;  %v1614_v56 = vpop.f32.mrb[5].mxu0  ;;  %v614_v57 = vpop.f32.mrb[4].mxu1 }
 0x11b   : > { %v502_v58 = vpop.f32.mrb[6].mxu0  ;;  %v1634_v59 = vpop.f32.mrb[5].mxu1 }
 0x11c   : > { %v620_v60 = vadd.f32 %v614_v57, %v505_v55  ;;  %v1615_v1 = vpop.f32.mrb[7].mxu0  ;;  %v617_v61 = vpop.f32.mrb[6].mxu1 }
 0x11d   : > { %v1635_v62 = vpop.f32.mrb[7].mxu1 }
 0x139   : > { %v733_v63 = vpop.f32.mrb[8].mxu0 }
 0x13a   : > { %v739_v0 = vadd.f32 %v733_v63, %v620_v60  ;;  %v1654_v2 = vpop.f32.mrb[9].mxu0  ;;  %v845_v3 = vpop.f32.mrb[8].mxu1 }
 0x13b   : > { %v736_v4 = vpop.f32.mrb[10].mxu0  ;;  %v1674_v5 = vpop.f32.mrb[9].mxu1 }
 0x13c   : > { %v851_v6 = vadd.f32 %v845_v3, %v739_v0  ;;  %v1655_v7 = vpop.f32.mrb[11].mxu0  ;;  %v848_v8 = vpop.f32.mrb[10].mxu1 }
 0x13d   : > { %v1675_v9 = vpop.f32.mrb[11].mxu1 }
 0x159   : > { %v952_v10 = vpop.f32.mrb[12].mxu0 }
 0x15a   : > { %v958_v11 = vadd.f32 %v952_v10, %v851_v6  ;;  %v1694_v12 = vpop.f32.mrb[13].mxu0  ;;  %v1073_v13 = vpop.f32.mrb[12].mxu1 }
 0x15b   : > { %v955_v14 = vpop.f32.mrb[14].mxu0  ;;  %v1714_v15 = vpop.f32.mrb[13].mxu1 }
 0x15c   : > { %v1079_v16 = vadd.f32 %v1073_v13, %v958_v11  ;;  %v1695_v17 = vpop.f32.mrb[15].mxu0  ;;  %v1076_v18 = vpop.f32.mrb[14].mxu1 }
 0x15d   : > { %v1715_v19 = vpop.f32.mrb[15].mxu1 }
 0x179   : > { %v1185_v20 = vpop.f32.mrb[16].mxu0 }
 0x17a   : > { %v1191_v22 = vadd.f32 %v1185_v20, %v1079_v16  ;;  %v1734_v23 = vpop.f32.mrb[17].mxu0 }
 0x17b   : > { %v1188_v24 = vpop.f32.mrb[18].mxu0 }
 0x17c   : > { %v1199_v25 = vadd.f32 %v1472_v21, %v1191_v22  ;;  %v1735_v26 = vpop.f32.mrb[19].mxu0 }
 0x17e   : > { %vm1200_vm1 = vcmp.gt.f32.partialorder %v1199_v25, 0.0  ;;  %v1201_v27 = vmul.f32 0.01, %v1199_v25 }
 0x180   : > { %v1202_v28 = vsel %vm1200_vm1, %v1199_v25, %v1201_v27 }
 0x181   : > { %v1203_v29 = vpack.c.bf16 %v1202_v28, %v1202_v28 }
 0x183   : > { %1204 = vst [vmem:[%s168_s21] sm:$0xf] %v1203_v29 }
 0x184 PF: > { %s13_s12 = sadd.s32 1, %s1832_s12  }
 0x185   : > { %p10_p4 = scmp.ge.s32.totalorder %s13_s12, 4  }
 0x187   :  { %12 = sbr.rel (!%p10_p4) target bundleno = 1 (0x1), region = 70 }

// kernel: forward.23
= control target key start
LH: loop header
LB: loop body
LE: loop exit
PB: predicated region body
PF: predicated region fallthrough
CT: control target
= control target key end

     0   :  { %v254_v3 = vmov 0.0|0.0   ;;  %vm255_vm0 = vmmov 0   ;;  %v256_v6 = vmov 0.0   ;;  %vm19_vm1 = vcmask 1043456   ;;  %s347_s0 = inlined_call_operand.vmem [shape: bf16[2,4,128], index: 0, kind: input, shape index: {}]   ;;  %s348_s1 = inlined_call_operand.vmem [shape: f32[128,128], index: 1, kind: input, shape index: {}]   ;;  %s349_s2 = inlined_call_operand.vmem [shape: f32[1,128], index: 2, kind: input, shape index: {}]   ;;  %s350_s3 = inlined_call_operand.hbm [shape: f32[2,128], index: 3, kind: output, shape index: {}]  }
   0x1   :  { %v36_v0 = vld [vmem:[%s348_s1] sm:$0xff]  ;;  %v37_v1 = vld [vmem:[%s348_s1 + $0x8] sm:$0xff]  ;;  %v38_v2 = vld [vmem:[%s348_s1 + $0x10] sm:$0xff]  ;;  %202 = vmatprep.subr.bf16.mxu0 %v254_v3  ;;  %199 = vmatprep.mubr.msk.f32.mxu0 %vm255_vm0, %v256_v6 }
   0x2   :  { %v203_v4 = vpack.c.bf16 %v37_v1, %v36_v0  ;;  %v39_v5 = vld [vmem:[%s348_s1 + $0x18] sm:$0xff]  ;;  %v40_v8 = vld [vmem:[%s348_s1 + $0x20] sm:$0xff]  ;;  %v41_v9 = vld [vmem:[%s348_s1 + $0x28] sm:$0xff] }
   0x3   :  { %v206_v7 = vpack.c.bf16 %v39_v5, %v38_v2  ;;  %v15_v10 = vld [vmem:[%s347_s0] sm:$0x3]  ;;  %v16_v11 = vld [vmem:[%s347_s0 + $0x2] sm:$0x3] }
   0x4   :  { %204 = vmatpush3.bf16.msra.mxu0 %v203_v4  ;;  %v17_v12 = vunpack.c.l.bf16 %v15_v10  ;;  %v18_v13 = vunpack.c.l.bf16 %v16_v11 }
   0x5   :  { %205 = vmatprep.subr.bf16.mxu0 %v254_v3 }
   0x6   :  { %8 = vsyncpa [#allocation3], 0  ;;  %v209_v14 = vpack.c.bf16 %v41_v9, %v40_v8  ;;  %v42_v15 = vld [vmem:[%s348_s1 + $0x30] sm:$0xff]  ;;  %v43_v16 = vld [vmem:[%s348_s1 + $0x38] sm:$0xff]  ;;  %v20_v17 = vsel %vm19_vm1, %v17_v12, 0.0  ;;  %v27_v18 = vsel %vm19_vm1, %v18_v13, 0.0 }
   0x7   :  { %v21_v19 = vrot.slane %v20_v17, 4  ;;  %v28_v20 = vrot.slane %v27_v18, 4  ;;  %v212_v21 = vpack.c.bf16 %v43_v16, %v42_v15  ;;  %v44_v24 = vld [vmem:[%s348_s1 + $0x40] sm:$0xff]  ;;  %v45_v25 = vld [vmem:[%s348_s1 + $0x48] sm:$0xff]  ;;  %v46_v31 = vld [vmem:[%s348_s1 + $0x50] sm:$0xff]  ;;  %vm61_vm2 = vcmask 1041409  }
   0x8   :  { %207 = vmatpush3.bf16.msra.mxu0 %v206_v7  ;;  %v215_v28 = vpack.c.bf16 %v45_v25, %v44_v24  ;;  %v47_v32 = vld [vmem:[%s348_s1 + $0x58] sm:$0xff]  ;;  %v48_v36 = vld [vmem:[%s348_s1 + $0x60] sm:$0xff]  ;;  %v49_v37 = vld [vmem:[%s348_s1 + $0x68] sm:$0xff]  ;;  %s257_s22 = smov [#allocation2]  }
   0x9   :  { %208 = vmatprep.subr.bf16.mxu0 %v254_v3  ;;  %v22_v22 = vadd.f32 %v21_v19, %v20_v17  ;;  %v29_v23 = vadd.f32 %v28_v20, %v27_v18  ;;  %v218_v33 = vpack.c.bf16 %v47_v32, %v46_v31  ;;  %v221_v38 = vpack.c.bf16 %v49_v37, %v48_v36  ;;  %v50_v41 = vld [vmem:[%s348_s1 + $0x70] sm:$0xff]  ;;  %v51_v42 = vld [vmem:[%s348_s1 + $0x78] sm:$0xff]  ;;  %v149_v47 = vld [vmem:[%s349_s2] ss:$0 sm:$0xff]  ;;  %s141_s23 = sshll.u32 %s257_s22, 4  ;;  %s142_s23 = int_to_ptr.vmem [resolvable:$true] %s141_s23 }
   0xa   :  { %v224_v43 = vpack.c.bf16 %v51_v42, %v50_v41  ;;  %s230_s1 = scalar_lea.vmem %s142_s23, 32  ;;  %p235_p1 = scmp.lt.s32.totalorder %s142_s23, %s142_s23 }
   0xb   :  { %v23_v26 = vrot.slane %v22_v22, 2  ;;  %v30_v27 = vrot.slane %v29_v23, 2  ;;  %p231_p0 = scmp.ne.s32.totalorder %s142_s23, %s230_s1  ;;  %p236_p2 = scmp.lt.s32.totalorder %s230_s1, %s230_s1 }
   0xc   :  { %210 = vmatpush3.bf16.msra.mxu0 %v209_v14 }
   0xd   :  { %211 = vmatprep.subr.bf16.mxu0 %v254_v3  ;;  %v24_v29 = vadd.f32 %v23_v26, %v22_v22  ;;  %v31_v30 = vadd.f32 %v30_v27, %v29_v23  ;;  %p237_p3 = por %p236_p2, %p235_p1 }
   0xf   :  { %v25_v34 = vrot.slane %v24_v29, 1  ;;  %v32_v35 = vrot.slane %v31_v30, 1  ;;  %p238_p4 = pnand %p237_p3, %p231_p0 }
  0x10   :  { %213 = vmatpush3.bf16.msra.mxu0 %v212_v21 }
  0x11   :  { %214 = vmatprep.subr.bf16.mxu0 %v254_v3  ;;  %v26_v39 = vadd.f32 %v25_v34, %v24_v29  ;;  %v33_v40 = vadd.f32 %v32_v35, %v31_v30 }
  0x13   :  { %v34_v44 = vmul.f32 0.25, %v26_v39  ;;  %v35_v45 = vmul.f32 0.25, %v33_v40 }
  0x14   :  { %216 = vmatpush3.bf16.msra.mxu0 %v215_v28 }
  0x15   :  { %217 = vmatprep.subr.bf16.mxu0 %v254_v3  ;;  %v62_v46 = vsel %vm61_vm2, %v35_v45, %v34_v44 }
  0x18   :  { %219 = vmatpush3.bf16.msra.mxu0 %v218_v33 }
  0x19   :  { %220 = vmatprep.subr.bf16.mxu0 %v254_v3 }
  0x1c   :  { %222 = vmatpush3.bf16.msra.mxu0 %v221_v38 }
  0x1d   :  { %223 = vmatprep.subr.bf16.mxu0 %v254_v3 }
  0x20   :  { %225 = vmatpush3.bf16.msra.mxu0 %v224_v43 }
  0x23   :  { %200 = vmatmul.mubr.f32.vlgmr.msra.gmra.mrb[0].mxu0 %v62_v46 }
  0xf6   :  { %v130_v48 = vpop.f32.mrb[0].mxu0 }
  0xf7   :  { %v131_v49 = vadd.f32 %v149_v47, %v130_v48  ;;  %v201_v50 = vpop.f32.mrb[1].mxu0 }
  0xf9   :  { %134 = vst [vmem:[#allocation2] sm:$0x3] %v131_v49 }
  0xfa   :  { %241 = shalt.err (!%p238_p4)
}
  0xfb   :  { %s242_s26 = scalar_lea.hbm %s350_s3, 32 }
  0xfc   :  { %p243_p5 = scmp.ne.s32.totalorder %s350_s3, %s242_s26  ;;  %p246_p6 = scmp.lt.u32.totalorder %s242_s26, %s350_s3 }
  0xfe   :  { %p248_p7 = pnand %p246_p6, %p243_p5 }
 0x100   :  { %251 = shalt.err (!%p248_p7)
}
 0x101   :  { %144 = dma.vmem_to_hbm [thread:$0]  %s142_s23, 32, %s350_s3, [#allocation3]  }
 0x102   :  { %252 = dma.done.wait [#allocation3], 32  }
 0x103   :  { %253 = vsyncadd [#allocation3], 4294967264 }
 0x104   :  { %148 = vsyncpa [#allocation3], 1 }

// kernel: forward.12
= control target key start
LH: loop header
LB: loop body
LE: loop exit
PB: predicated region body
PF: predicated region fallthrough
CT: control target
= control target key end

     0   :  { %s15133_s12 = smov 0   ;;  %s18236_s0 = inlined_call_operand.vmem [shape: bf16[2,4,128,128], index: 0, kind: input, shape index: {}]   ;;  %s18237_s1 = inlined_call_operand.vmem [shape: bf16[49,128,128], index: 1, kind: input, shape index: {}]   ;;  %s18238_s2 = inlined_call_operand.vmem [shape: f32[1,128], index: 2, kind: input, shape index: {}]   ;;  %s18239_s3 = inlined_call_operand.vmem [shape: bf16[2,88,128], index: 3, kind: output, shape index: {}]  }
   0x1 LB: > { %s10462_s13 = sadd.s32 4294967295, %s15111_s12   ;;  %p10466_p0 = scmp.ge.s32.totalorder %s15111_s12, 1  ;;  %s15111_s12 = sphi %s15133_s12, %s13_s12  }
   0x2   : > { %p137_p1 = scmp.lt.s32.totalorder %s15111_s12, 3 }
   0x4   : > { %p138_p2 = pnand %p10466_p0, %p137_p1 }
   0x6   : > { %141 = sbr.rel (%p138_p2) target bundleno = 1073 (0x431), region = 32 }
   0xd   : > { %v14502_v0 = vld [vmem:[%s18237_s1 + $0x40] sm:$0xff]   ;;  %v14504_v2 = vld [vmem:[%s18237_s1 + $0x48] sm:$0xff]   ;;  %v14506_v4 = vld [vmem:[%s18237_s1 + $0x50] sm:$0xff]   ;;  %p161_p3 = scmp.lt.s32.totalorder %s10462_s13, 1  ;;  %vm3604_vm0 = vcmask 1045504   ;;  %vm1076_vm3 = vcmask 1046528  }
   0xe   : > { %v14503_v1 = vld [vmem:[%s18237_s1 + $0x600] sm:$0xff]   ;;  %12721 = vmatprep.subr.bf16.mxu1 %v14502_v0  ;;  %v14505_v3 = vld [vmem:[%s18237_s1 + $0x608] sm:$0xff]   ;;  %v14507_v5 = vld [vmem:[%s18237_s1 + $0x610] sm:$0xff]   ;;  %vm3959_vm1 = vsmask.f32 5376  ;;  %vm4358_vm4 = vcmask 1044480  }
   0xf   : > { %13393 = vmatprep.subr.bf16.mxu0 %v14503_v1  ;;  %12722 = vmatpush3.bf16.msra.mxu1 %v14502_v0  ;;  %v14508_v6 = vld [vmem:[%s18237_s1 + $0x58] sm:$0xff]   ;;  %s18455_s13 = smov (!%p161_p3, %s10462_s13), 1  ;;  %v14510_v8 = vld [vmem:[%s18237_s1 + $0x60] sm:$0xff]   ;;  %v14512_v10 = vld [vmem:[%s18237_s1 + $0x68] sm:$0xff]   ;;  %vm611_vm2 = vsmask.f32 7424 }
  0x10   : > { %13394 = vmatpush3.bf16.msra.mxu0 %v14503_v1  ;;  %12723 = vmatprep.subr.bf16.mxu1 %v14504_v2  ;;  %v14509_v7 = vld [vmem:[%s18237_s1 + $0x618] sm:$0xff]   ;;  %s11994_s5 = sshll.u32 %s18455_s13, 8  ;;  %v14511_v9 = vld [vmem:[%s18237_s1 + $0x620] sm:$0xff]   ;;  %v14513_v12 = vld [vmem:[%s18237_s1 + $0x628] sm:$0xff]   ;;  %vm1431_vm5 = vsmask.f32 6400 }
  0x11   : > { %13395 = vmatprep.subr.bf16.mxu0 %v14505_v3  ;;  %s15180_s14 = scalar_lea.vmem %s18236_s0, %s11994_s5  ;;  %v14514_v16 = vld [vmem:[%s18237_s1 + $0x70] sm:$0xff]   ;;  %v14516_v21 = vld [vmem:[%s18237_s1 + $0x78] sm:$0xff]   ;;  %v14519_v25 = vld [vmem:[%s18237_s1] sm:$0xff]   ;;  %vm6409_vm6 = vsmask.f32 4352  ;;  %s14493_s7 = smul.u32 44, %s18455_s13 }
  0x12   : > { %v14518_v11 = vld [vmem:[%s15180_s14 + $0x40] sm:$0xff]   ;;  %v11159_v13 = vld [vmem:[%s15180_s14 + $0xc8] sm:$0xf]  ;;  %v15188_v14 = vld [vmem:[%s15180_s14 + $0xcc] sm:$0xff]  }
  0x13   : > { %12724 = vmatpush3.bf16.msra.mxu1 %v14504_v2  ;;  %12737 = vmatprep.mubr.bf16.mxu1 %v14518_v11  ;;  %v11226_v15 = vld [vmem:[%s15180_s14 + $0xc4] sm:$0xc]  ;;  %v14515_v18 = vld [vmem:[%s18237_s1 + $0x630] sm:$0xff]   ;;  %v5228_v19 = vrot.slane %v15188_v14, 2  ;;  %v14517_v24 = vld [vmem:[%s18237_s1 + $0x638] sm:$0xff]   ;;  %s18183_s9 = scalar_lea.vmem %s18239_s3, %s14493_s7 }
  0x14   : > { %13396 = vmatpush3.bf16.msra.mxu0 %v14505_v3  ;;  %12725 = vmatprep.subr.bf16.mxu1 %v14506_v4  ;;  %v15194_v17 = vcombine.low %v11226_v15, %v11159_v13  ;;  %v15206_v23 = vld [vmem:[%s15180_s14 + $0xd4] sm:$0xff]   ;;  %v14522_v26 = vld [vmem:[%s18237_s1 + $0x640] sm:$0xff]   ;;  %v14523_v28 = vld [vmem:[%s15180_s14 + $0x48] sm:$0xff]  }
  0x15   : > { %13397 = vmatprep.subr.bf16.mxu0 %v14507_v5  ;;  %v5230_v27 = vrot.slane %v15206_v23, 2  ;;  %v14525_v29 = vld [vmem:[%s18237_s1 + $0x8] sm:$0xff]   ;;  %v15227_v32 = vld [vmem:[%s15180_s14 + $0xdc] sm:$0xff]   ;;  %v14531_v33 = vld [vmem:[%s15180_s14 + $0x50] sm:$0xff]  }
  0x16   : > { %v5227_v20 = vrot.slane %v15194_v17, 2  ;;  %v14526_v30 = vld [vmem:[%s18237_s1 + $0x648] sm:$0xff]   ;;  %v5232_v34 = vrot.slane %v15227_v32, 2  ;;  %v14527_v36 = vld [vmem:[%s18237_s1 + $0x10] sm:$0xff]   ;;  %v14532_v40 = vld [vmem:[%s15180_s14 + $0x58] sm:$0xff]  }
  0x17   : > { %12726 = vmatpush3.bf16.msra.mxu1 %v14506_v4  ;;  %v5231_v31 = vsel %vm3604_vm0, %v5228_v19, %v5230_v27  ;;  %v15232_v35 = vld [vmem:[%s15180_s14 + $0xe4] sm:$0xff]   ;;  %v14528_v39 = vld [vmem:[%s18237_s1 + $0x650] sm:$0xff]   ;;  %v14529_v41 = vld [vmem:[%s18237_s1 + $0x18] sm:$0xff]  }
  0x18   : > { %13398 = vmatpush3.bf16.msra.mxu0 %v14507_v5  ;;  %12727 = vmatprep.subr.bf16.mxu1 %v14508_v6  ;;  %v5229_v22 = vsel %vm3604_vm0, %v5227_v20, %v5228_v19  ;;  %v5233_v37 = vsel %vm3604_vm0, %v5230_v27, %v5232_v34  ;;  %v5234_v38 = vrot.slane %v15232_v35, 2  ;;  %v15247_v42 = vld [vmem:[%s15180_s14 + $0xec] sm:$0xf]  ;;  %v11169_v43 = vld [vmem:[%s15180_s14 + $0xf0] sm:$0x3]  ;;  %v14530_v44 = vld [vmem:[%s18237_s1 + $0x658] sm:$0xff]  }
  0x19   : > { %13399 = vmatprep.subr.bf16.mxu0 %v14509_v7  ;;  %13409 = vmatprep.mubr.bf16.mxu0 %v5229_v22  ;;  %v15255_v46 = vcombine.low %v15247_v42, %v11169_v43  ;;  %v14539_v47 = vld [vmem:[%s15180_s14 + $0x60] sm:$0xff]   ;;  %v14537_v52 = vld [vmem:[%s18237_s1 + $0x28] sm:$0xff]   ;;  %v14541_v62 = vld [vmem:[%s18237_s1 + $0x30] sm:$0xff]   ;;  %v5607_v27 = vshll.u32 %v15194_v17, 16 }
  0x1a   : > { %v5235_v45 = vsel %vm3604_vm0, %v5232_v34, %v5234_v38  ;;  %v14533_v49 = vld [vmem:[%s18237_s1 + $0x20] sm:$0xff]   ;;  %v14540_v53 = vld [vmem:[%s15180_s14 + $0x68] ss:$0 sps:$4 sm:$0xff]   ;;  %v15277_v56 = vld [vmem:[%s15180_s14 + $0x8c] sm:$0xff]  }
  0x1b   : > { %12728 = vmatpush3.bf16.msra.mxu1 %v14508_v6  ;;  %v5236_v48 = vrot.slane %v15255_v46, 2  ;;  %v14535_v51 = vld [vmem:[%s18237_s1 + $0x660] sm:$0xff]   ;;  %v15271_v54 = vld [vmem:[%s15180_s14 + $0x88] sm:$0xf]  ;;  %v18255_v60 = vshrl.u32 %v15277_v56, 16  ;;  %v18254_v61 = vshll.u32 %v15277_v56, 16 }
  0x1c   : > { %13400 = vmatpush3.bf16.msra.mxu0 %v14509_v7  ;;  %12729 = vmatprep.subr.bf16.mxu1 %v14510_v8  ;;  %v14538_v55 = vld [vmem:[%s18237_s1 + $0x668] sm:$0xff]   ;;  %v11200_v57 = vld [vmem:[%s15180_s14 + $0x84] sm:$0xc]  ;;  %v15292_v1 = vld [vmem:[%s15180_s14 + $0x94] sm:$0xff]  }
  0x1d   : > { %13401 = vmatprep.subr.bf16.mxu0 %v14511_v9  ;;  %v5237_v50 = vsel %vm3604_vm0, %v5234_v38, %v5236_v48  ;;  %v14546_v58 = vld [vmem:[%s15180_s14] sm:$0xff]   ;;  %v15282_v59 = vcombine.low %v11200_v57, %v15271_v54  ;;  %v14543_v2 = vld [vmem:[%s18237_s1 + $0x670] sm:$0xff]   ;;  %v5412_v3 = vrot.slane %v18255_v60, 2  ;;  %v5413_v4 = vrot.slane %v18254_v61, 3 }
  0x1e   : > { %v18253_v7 = vshrl.u32 %v15292_v1, 16  ;;  %v14548_v19 = vld [vmem:[%s18237_s1 + $0x80] sm:$0xff]  }
  0x1f   : > { %12730 = vmatpush3.bf16.msra.mxu1 %v14510_v8  ;;  %v5405_v63 = vshrl.u32 %v15282_v59, 16  ;;  %v5408_v0 = vshll.u32 %v15282_v59, 16  ;;  %v18252_v8 = vshll.u32 %v15292_v1, 16  ;;  %v14551_v22 = vld [vmem:[%s18237_s1 + $0x680] sm:$0xff]  }
  0x20   : > { %13402 = vmatpush3.bf16.msra.mxu0 %v14511_v9  ;;  %12731 = vmatprep.subr.bf16.mxu1 %v14512_v10  ;;  %v5414_v9 = vor.u32 %v5413_v4, %v5412_v3  ;;  %v5416_v13 = vrot.slane %v18253_v7, 2  ;;  %v15819_v7 = vld [vmem:[%s15180_s14 + $0x54] sm:$0xf]  ;;  %v15873_v61 = vld [vmem:[%s15180_s14 + $0x60] sm:$0xf] }
  0x21   : > { %13403 = vmatprep.subr.bf16.mxu0 %v14513_v12  ;;  %v5407_v5 = vrot.slane %v5405_v63, 2  ;;  %v5410_v6 = vrot.slane %v5408_v0, 3  ;;  %v5417_v15 = vrot.slane %v18252_v8, 3  ;;  %v18243_v0 = vshrl.u32 %v15206_v23, 16 }
  0x23   : > { %12732 = vmatpush3.bf16.msra.mxu1 %v14512_v10  ;;  %v14544_v10 = vld [vmem:[%s18237_s1 + $0x38] sm:$0xff]   ;;  %v5411_v11 = vor.u32 %v5410_v6, %v5407_v5  ;;  %v5418_v20 = vor.u32 %v5417_v15, %v5416_v13  ;;  %v15382_v5 = vld [vmem:[%s15180_s14 + $0x8] sm:$0xff]   ;;  %v552_v6 = vld [vmem:[%s15180_s14] sm:$0xf] }
  0x24   : > { %13404 = vmatpush3.bf16.msra.mxu0 %v14513_v12  ;;  %12733 = vmatprep.subr.bf16.mxu1 %v14514_v16  ;;  %v620_v15 = vshll.u32 %v15382_v5, 16 }
  0x25   : > { %13405 = vmatprep.subr.bf16.mxu0 %v14515_v18  ;;  %v5415_v12 = vsel %vm3959_vm1, %v5411_v11, %v5414_v9 }
  0x27   : > { %12734 = vmatpush3.bf16.msra.mxu1 %v14514_v16  ;;  %v14545_v16 = vld [vmem:[%s18237_s1 + $0x678] sm:$0xff]  }
  0x28   : > { %13406 = vmatpush3.bf16.msra.mxu0 %v14515_v18  ;;  %12735 = vmatprep.subr.bf16.mxu1 %v14516_v21  ;;  %v14547_v18 = vld [vmem:[%s15180_s14 + $0x8] sm:$0xff]  }
  0x29   : > { %13407 = vmatprep.subr.bf16.mxu0 %v14517_v24 }
  0x2b   : > { %12736 = vmatpush3.bf16.msra.mxu1 %v14516_v21  ;;  %v18245_v21 = vshrl.u32 %v15188_v14, 16 }
  0x2c   : > { %13408 = vmatpush3.bf16.msra.mxu0 %v14517_v24  ;;  %12749 = vmatprep.subr.bf16.mxu1 %v14519_v25  ;;  %v5604_v24 = vshrl.u32 %v15194_v17, 16 }
  0x2d   : > { %13421 = vmatprep.subr.bf16.mxu0 %v14522_v26 }
  0x2e   : > { %12738 = vmatmul.mubr.bf16.vlgmr.msra.gmra.mrb[0].mxu1 %v14523_v28  ;;  %v14554_v28 = vld [vmem:[%s18237_s1 + $0x688] sm:$0xff]   ;;  %v15341_v17 = vrot.slane %v5604_v24, 2 }
  0x2f   : > { %12750 = vmatpush3.bf16.msra.mxu1 %v14519_v25  ;;  %13410 = vmatmul.mubr.bf16.vlgmr.msra.gmra.mrb[0].mxu0 %v5231_v31  ;;  %v14553_v25 = vld [vmem:[%s18237_s1 + $0x88] sm:$0xff]   ;;  %v5419_v31 = vsel %vm3959_vm1, %v5414_v9, %v5418_v20  ;;  %v15386_v9 = vld [vmem:[%s15180_s14 + $0x4] sm:$0xf] }
  0x30   : > { %13422 = vmatpush3.bf16.msra.mxu0 %v14522_v26  ;;  %12751 = vmatprep.subr.bf16.mxu1 %v14525_v29  ;;  %v15327_v26 = vld [vmem:[%s15180_s14 + $0x9c] sm:$0xff]   ;;  %v10541_v13 = vcombine.low %v552_v6, %v15386_v9  ;;  %v562_v6 = vld [vmem:[%s15180_s14 + $0x28] sm:$0xf] }
  0x31   : > { %13423 = vmatprep.subr.bf16.mxu0 %v14526_v30  ;;  %12741 = vmatprep.mubr.bf16.mxu1 %v14531_v33  ;;  %v18251_v33 = vshrl.u32 %v15327_v26, 16  ;;  %v18250_v34 = vshll.u32 %v15327_v26, 16 }
  0x32   : > { %13413 = vmatprep.mubr.bf16.mxu0 %v5233_v37  ;;  %v14557_v37 = vld [vmem:[%s18237_s1 + $0x90] sm:$0xff]   ;;  %v615_v24 = vshll.u32 %v10541_v13, 16 }
  0x33   : > { %12752 = vmatpush3.bf16.msra.mxu1 %v14525_v29  ;;  %v14555_v29 = vld [vmem:[%s15180_s14 + $0x10] sm:$0xff]   ;;  %v5420_v38 = vrot.slane %v18251_v33, 2  ;;  %v14586_v33 = vld [vmem:[%s18237_s1 + $0x6d8] sm:$0xff]  }
  0x34   : > { %13424 = vmatpush3.bf16.msra.mxu0 %v14526_v30  ;;  %12753 = vmatprep.subr.bf16.mxu1 %v14527_v36  ;;  %v18244_v30 = vshll.u32 %v15188_v14, 16 }
  0x35   : > { %13425 = vmatprep.subr.bf16.mxu0 %v14528_v39 }
  0x36   : > { %12742 = vmatmul.mubr.bf16.gmra.mrb[4].mxu1 %v14532_v40  ;;  %v15350_v40 = vrot.slane %v5607_v27, 3  ;;  %v14565_v27 = vld [vmem:[%s18237_s1 + $0x6a0] sm:$0xff]  }
  0x37   : > { %12754 = vmatpush3.bf16.msra.mxu1 %v14527_v36  ;;  %13414 = vmatmul.mubr.bf16.gmra.mrb[4].mxu0 %v5235_v45  ;;  %v15339_v36 = vld [vmem:[%s15180_s14 + $0xa4] sm:$0xff]   ;;  %v14558_v45 = vld [vmem:[%s18237_s1 + $0x690] sm:$0xff]  }
  0x38   : > { %13426 = vmatpush3.bf16.msra.mxu0 %v14528_v39  ;;  %12755 = vmatprep.subr.bf16.mxu1 %v14529_v41  ;;  %v5421_v39 = vrot.slane %v18250_v34, 3  ;;  %v18248_v43 = vshll.u32 %v15339_v36, 16  ;;  %v11304_v34 = vld [vmem:[%s15180_s14 + $0x84] sm:$0x8] }
  0x39   : > { %13427 = vmatprep.subr.bf16.mxu0 %v14530_v44  ;;  %12745 = vmatprep.mubr.bf16.mxu1 %v14539_v47 }
  0x3a   : > { %13417 = vmatprep.mubr.bf16.mxu0 %v5237_v50  ;;  %v5422_v47 = vor.u32 %v5421_v39, %v5420_v38  ;;  %v5610_v38 = vor.u32 %v15350_v40, %v15341_v17  ;;  %v5615_v17 = vrot.slane %v18243_v0, 2  ;;  %v14569_v40 = vld [vmem:[%s18237_s1 + $0xb0] sm:$0xff]   ;;  %v15498_v0 = vld [vmem:[%s15180_s14 + $0x44] sm:$0xf] }
  0x3b   : > { %12756 = vmatpush3.bf16.msra.mxu1 %v14529_v41  ;;  %v18249_v41 = vshrl.u32 %v15339_v36, 16 }
  0x3c   : > { %13428 = vmatpush3.bf16.msra.mxu0 %v14530_v44  ;;  %12757 = vmatprep.subr.bf16.mxu1 %v14533_v49  ;;  %v14556_v44 = vld [vmem:[%s15180_s14 + $0x18] sm:$0xff]  }
  0x3d   : > { %13429 = vmatprep.subr.bf16.mxu0 %v14535_v51  ;;  %v5424_v50 = vrot.slane %v18249_v41, 2 }
  0x3e   : > { %12746 = vmatmul.mubr.bf16.gmra.mrb[8].mxu1 %v14540_v53  ;;  %v14559_v53 = vld [vmem:[%s18237_s1 + $0x98] sm:$0xff]  }
  0x3f   : > { %12758 = vmatpush3.bf16.msra.mxu1 %v14533_v49  ;;  %13418 = vmatmul.mubr.bf16.gmra.mrb[8].mxu0 %v5236_v48  ;;  %v11126_v48 = vld [vmem:[%s15180_s14 + $0xac] sm:$0xf]  ;;  %v5611_v49 = vrot.slane %v18245_v21, 2 }
  0x40   : > { %13430 = vmatpush3.bf16.msra.mxu0 %v14535_v51  ;;  %12759 = vmatprep.subr.bf16.mxu1 %v14537_v52  ;;  %v5425_v51 = vrot.slane %v18248_v43, 3 }
  0x41   : > { %13431 = vmatprep.subr.bf16.mxu0 %v14538_v55  ;;  %12765 = vmatprep.mubr.bf16.mxu1 %v14546_v58  ;;  %v5612_v58 = vrot.slane %v18244_v30, 3 }
  0x42   : > { %13437 = vmatprep.mubr.bf16.mxu0 %v5415_v12  ;;  %v5426_v63 = vor.u32 %v5425_v51, %v5424_v50  ;;  %v15416_v50 = vld [vmem:[%s15180_s14 + $0x10] sm:$0xff]  }
  0x43   : > { %12760 = vmatpush3.bf16.msra.mxu1 %v14537_v52  ;;  %v11252_v52 = vld [vmem:[%s15180_s14 + $0xb0] sm:$0x7]  ;;  %v15406_v39 = vor.u32 %v5612_v58, %v5611_v49  ;;  %v18246_v58 = vshrl.u32 %v15232_v35, 16 }
  0x44   : > { %13432 = vmatpush3.bf16.msra.mxu0 %v14538_v55  ;;  %12761 = vmatprep.subr.bf16.mxu1 %v14541_v62  ;;  %v5423_v55 = vsel %vm3959_vm1, %v5418_v20, %v5422_v47  ;;  %v15370_v57 = vcombine.low %v11126_v48, %v11252_v52 }
  0x45   : > { %13433 = vmatprep.subr.bf16.mxu0 %v14543_v2  ;;  %v5614_v49 = vsel %vm3959_vm1, %v5610_v38, %v15406_v39 }
  0x46   : > { %v5429_v3 = vshrl.u32 %v15370_v57, 16  ;;  %v5432_v4 = vshll.u32 %v15370_v57, 16 }
  0x47   : > { %12762 = vmatpush3.bf16.msra.mxu1 %v14541_v62  ;;  %v14561_v62 = vld [vmem:[%s15180_s14 + $0x20] sm:$0xff]  }
  0x48   : > { %13434 = vmatpush3.bf16.msra.mxu0 %v14543_v2  ;;  %12763 = vmatprep.subr.bf16.mxu1 %v14544_v10  ;;  %v14560_v2 = vld [vmem:[%s18237_s1 + $0x698] sm:$0xff]   ;;  %v5431_v11 = vrot.slane %v5429_v3, 2  ;;  %v5434_v12 = vrot.slane %v5432_v4, 3  ;;  %v628_v3 = vshll.u32 %v15416_v50, 16 }
  0x49   : > { %13435 = vmatprep.subr.bf16.mxu0 %v14545_v16  ;;  %v14573_v4 = vld [vmem:[%s18237_s1 + $0x6b8] sm:$0xff]  }
  0x4a   : > { %v5435_v20 = vor.u32 %v5434_v12, %v5431_v11  ;;  %v15449_v11 = vld [vmem:[%s15180_s14 + $0x20] sm:$0xff]   ;;  %v1078_v12 = vrot.slane %v15382_v5, 1 }
  0x4b   : > { %12764 = vmatpush3.bf16.msra.mxu1 %v14544_v10  ;;  %v5427_v10 = vsel %vm3959_vm1, %v5422_v47, %v5426_v63  ;;  %v14568_v47 = vld [vmem:[%s18237_s1 + $0x6a8] sm:$0xff]  }
  0x4c   : > { %13436 = vmatpush3.bf16.msra.mxu0 %v14545_v16  ;;  %12777 = vmatprep.subr.bf16.mxu1 %v14548_v19  ;;  %v18242_v16 = vshll.u32 %v15206_v23, 16 }
  0x4d   : > { %13449 = vmatprep.subr.bf16.mxu0 %v14551_v22 }
  0x4e   : > { %12766 = vmatmul.mubr.bf16.vlgmr.msra.gmra.mrb[0].mxu1 %v14547_v18  ;;  %v14562_v18 = vld [vmem:[%s15180_s14 + $0x28] ss:$0 sps:$4 sm:$0xff]   ;;  %v5616_v51 = vrot.slane %v18242_v16, 3  ;;  %v10555_v16 = vld [vmem:[%s15180_s14 + $0x40] sm:$0xf] }
  0x4f   : > { %12778 = vmatpush3.bf16.msra.mxu1 %v14548_v19  ;;  %13438 = vmatmul.mubr.bf16.vlgmr.msra.gmra.mrb[0].mxu0 %v5419_v31  ;;  %v14563_v19 = vld [vmem:[%s18237_s1 + $0xa0] sm:$0xff]   ;;  %v617_v31 = vrot.slane %v615_v24, 1  ;;  %v18247_v24 = vshll.u32 %v15232_v35, 16 }
  0x50   : > { %13450 = vmatpush3.bf16.msra.mxu0 %v14551_v22  ;;  %12779 = vmatprep.subr.bf16.mxu1 %v14553_v25  ;;  %v613_v22 = vshrl.u32 %v10541_v13, 16  ;;  %v5617_v38 = vor.u32 %v5616_v51, %v5615_v17  ;;  %v14579_v17 = vld [vmem:[%s18237_s1 + $0xc8] sm:$0xff]  }
  0x51   : > { %13451 = vmatprep.subr.bf16.mxu0 %v14554_v28  ;;  %12769 = vmatprep.mubr.bf16.mxu1 %v14555_v29  ;;  %v5436_v29 = vsel %vm3959_vm1, %v5426_v63, %v5435_v20  ;;  %v14572_v63 = vld [vmem:[%s18237_s1 + $0xb8] sm:$0xff]  }
  0x52   : > { %13441 = vmatprep.mubr.bf16.mxu0 %v5423_v55  ;;  %v14571_v55 = vld [vmem:[%s18237_s1 + $0x6b0] sm:$0xff]  }
  0x53   : > { %12780 = vmatpush3.bf16.msra.mxu1 %v14553_v25  ;;  %v18241_v25 = vshrl.u32 %v15227_v32, 16 }
  0x54   : > { %13452 = vmatpush3.bf16.msra.mxu0 %v14554_v28  ;;  %12781 = vmatprep.subr.bf16.mxu1 %v14557_v37  ;;  %v18240_v28 = vshll.u32 %v15227_v32, 16 }
  0x55   : > { %13453 = vmatprep.subr.bf16.mxu0 %v14558_v45  ;;  %v5619_v52 = vrot.slane %v18241_v25, 2 }
  0x56   : > { %12770 = vmatmul.mubr.bf16.gmra.mrb[4].mxu1 %v14556_v44  ;;  %v14567_v44 = vld [vmem:[%s18237_s1 + $0xa8] sm:$0xff]  }
  0x57   : > { %12782 = vmatpush3.bf16.msra.mxu1 %v14557_v37  ;;  %12773 = vmatprep.mubr.bf16.mxu1 %v14561_v62  ;;  %v622_v37 = vrot.slane %v620_v15, 1  ;;  %v15436_v62 = vld [vmem:[%s15180_s14 + $0x18] sm:$0xff]  }
  0x58   : > { %13454 = vmatpush3.bf16.msra.mxu0 %v14558_v45  ;;  %12783 = vmatprep.subr.bf16.mxu1 %v14559_v53  ;;  %v618_v45 = vor.u32 %v617_v31, %v613_v22  ;;  %v18258_v13 = vshll.u32 %v15436_v62, 16  ;;  %v632_v22 = vshrl.u32 %v15416_v50, 16 }
  0x59   : > { %13455 = vmatprep.subr.bf16.mxu0 %v14560_v2  ;;  %13442 = vmatmul.mubr.bf16.gmra.mrb[4].mxu0 %v5427_v10  ;;  %v563_v10 = vld [vmem:[%s15180_s14 + $0x2c] sm:$0x1] }
  0x5a   : > { %13445 = vmatprep.mubr.bf16.mxu0 %v5436_v29  ;;  %v623_v48 = vsel %vm611_vm2, %v618_v45, %v622_v37  ;;  %v14578_v29 = vld [vmem:[%s18237_s1 + $0x6c0] sm:$0xff]   ;;  %v18256_v45 = vshll.u32 %v15449_v11, 16 }
  0x5b   : > { %12784 = vmatpush3.bf16.msra.mxu1 %v14559_v53  ;;  %v5620_v53 = vrot.slane %v18240_v28, 3 }
  0x5c   : > { %13456 = vmatpush3.bf16.msra.mxu0 %v14560_v2  ;;  %12785 = vmatprep.subr.bf16.mxu1 %v14563_v19  ;;  %v624_v2 = vshrl.u32 %v15382_v5, 16  ;;  %v14603_v5 = vld [vmem:[%s18237_s1 + $0x108] sm:$0xff]  }
  0x5d   : > { %13457 = vmatprep.subr.bf16.mxu0 %v14565_v27 }
  0x5e   : > { %12774 = vmatmul.mubr.bf16.gmra.mrb[12].mxu1 %v14562_v18  ;;  %v1080_v18 = vrot.slane %v15416_v50, 1  ;;  %v14600_v50 = vld [vmem:[%s18237_s1 + $0x100] sm:$0xff]  }
  0x5f   : > { %12786 = vmatpush3.bf16.msra.mxu1 %v14563_v19  ;;  %12793 = vmatprep.mubr.bf16.mxu1 %v623_v48  ;;  %v630_v19 = vrot.slane %v628_v3, 1  ;;  %v11278_v48 = vld [vmem:[%s15180_s14 + $0xf0] sm:$0x7] }
  0x60   : > { %13458 = vmatpush3.bf16.msra.mxu0 %v14565_v27  ;;  %12787 = vmatprep.subr.bf16.mxu1 %v14567_v44  ;;  %v626_v27 = vor.u32 %v624_v2, %v622_v37  ;;  %v15469_v31 = vsel %vm1076_vm3, %v1078_v12, %v1080_v18  ;;  %v638_v37 = vrot.slane %v18258_v13, 1 }
  0x61   : > { %13459 = vmatprep.subr.bf16.mxu0 %v14568_v47  ;;  %13446 = vmatmul.mubr.bf16.gmra.mrb[12].mxu0 %v5435_v20  ;;  %v14577_v20 = vld [vmem:[%s18237_s1 + $0xc0] sm:$0xff]   ;;  %v634_v51 = vor.u32 %v632_v22, %v630_v19 }
  0x62   : > { %13465 = vmatprep.mubr.bf16.mxu0 %v5614_v49  ;;  %v11295_v49 = vcombine.low %v15247_v42, %v11278_v48  ;;  %v5618_v48 = vsel %vm3959_vm1, %v15406_v39, %v5617_v38  ;;  %v5623_v39 = vrot.slane %v18246_v58, 2  ;;  %v15525_v58 = vld [vmem:[%s15180_s14 + $0x48] sm:$0xff]  }
  0x63   : > { %12788 = vmatpush3.bf16.msra.mxu1 %v14567_v44  ;;  %v18259_v44 = vshrl.u32 %v15436_v62, 16 }
  0x64   : > { %13460 = vmatpush3.bf16.msra.mxu0 %v14568_v47  ;;  %12789 = vmatprep.subr.bf16.mxu1 %v14569_v40  ;;  %v15473_v47 = vcombine.low %v562_v6, %v563_v10  ;;  %v18257_v6 = vshrl.u32 %v15449_v11, 16  ;;  %v1084_v10 = vrot.slane %v15449_v11, 1  ;;  %v5631_v28 = vshll.u32 %v11295_v49, 16 }
  0x65   : > { %13461 = vmatprep.subr.bf16.mxu0 %v14571_v55 }
  0x66   : > { %v652_v25 = vshll.u32 %v15473_v47, 16 }
  0x67   : > { %12790 = vmatpush3.bf16.msra.mxu1 %v14569_v40  ;;  %v15478_v40 = vor.u32 %v5620_v53, %v5619_v52  ;;  %v631_v52 = vsel %vm611_vm2, %v626_v27, %v630_v19  ;;  %v5628_v53 = vshrl.u32 %v11295_v49, 16  ;;  %v10583_v19 = vcombine.low %v10555_v16, %v15498_v0 }
  0x68   : > { %13462 = vmatpush3.bf16.msra.mxu0 %v14571_v55  ;;  %12791 = vmatprep.subr.bf16.mxu1 %v14572_v63  ;;  %v1082_v55 = vrot.slane %v15436_v62, 1  ;;  %v639_v27 = vsel %vm611_vm2, %v634_v51, %v638_v37  ;;  %v646_v49 = vrot.slane %v18256_v45, 1  ;;  %v14650_v45 = vld [vmem:[%s18237_s1 + $0x788] sm:$0xff]  }
  0x69   : > { %13463 = vmatprep.subr.bf16.mxu0 %v14573_v4  ;;  %v5630_v16 = vrot.slane %v5628_v53, 2  ;;  %v866_v51 = vshll.u32 %v10583_v19, 16  ;;  %v864_v53 = vshrl.u32 %v10583_v19, 16  ;;  %v14588_v19 = vld [vmem:[%s18237_s1 + $0xe0] sm:$0xff]  }
  0x6a   : > { %v15491_v42 = vsel %vm1076_vm3, %v1080_v18, %v1082_v55  ;;  %v15501_v30 = vsel %vm1076_vm3, %v1082_v55, %v1084_v10  ;;  %v5622_v18 = vsel %vm3959_vm1, %v5617_v38, %v15478_v40  ;;  %v5624_v55 = vrot.slane %v18247_v24, 3  ;;  %v14583_v24 = vld [vmem:[%s18237_s1 + $0xd0] sm:$0xff]  }
  0x6b   : > { %12792 = vmatpush3.bf16.msra.mxu1 %v14572_v63  ;;  %v1086_v63 = vrot.slane %v15473_v47, 1  ;;  %v642_v38 = vor.u32 %v18259_v44, %v638_v37  ;;  %v868_v41 = vrot.slane %v866_v51, 1 }
  0x6c   : > { %13464 = vmatpush3.bf16.msra.mxu0 %v14573_v4  ;;  %12805 = vmatprep.subr.bf16.mxu1 %v14577_v20  ;;  %v14580_v4 = vld [vmem:[%s18237_s1 + $0x6c8] sm:$0xff]   ;;  %v5625_v37 = vor.u32 %v5624_v55, %v5623_v39 }
  0x6d   : > { %13477 = vmatprep.subr.bf16.mxu0 %v14578_v29  ;;  %v15520_v21 = vsel %vm1076_vm3, %v1084_v10, %v1086_v63  ;;  %v650_v10 = vor.u32 %v18257_v6, %v646_v49 }
  0x6e   : > { %12794 = vmatmul.mubr.bf16.vlgmr.msra.gmra.mrb[0].mxu1 %v631_v52  ;;  %v5633_v52 = vrot.slane %v5631_v28, 3  ;;  %v14584_v28 = vld [vmem:[%s18237_s1 + $0x6d0] sm:$0xff]  }
  0x6f   : > { %12806 = vmatpush3.bf16.msra.mxu1 %v14577_v20  ;;  %13466 = vmatmul.mubr.bf16.vlgmr.msra.gmra.mrb[0].mxu0 %v5618_v48  ;;  %v654_v20 = vrot.slane %v652_v25, 1  ;;  %v647_v48 = vsel %vm611_vm2, %v642_v38, %v646_v49  ;;  %v871_v25 = vshll.u32 %v15525_v58, 16  ;;  %v869_v49 = vor.u32 %v868_v41, %v864_v53  ;;  %v14590_v41 = vld [vmem:[%s18237_s1 + $0xe8] sm:$0xff]  }
  0x70   : > { %13478 = vmatpush3.bf16.msra.mxu0 %v14578_v29  ;;  %12807 = vmatprep.subr.bf16.mxu1 %v14579_v17  ;;  %v14585_v29 = vld [vmem:[%s18237_s1 + $0xd8] sm:$0xff]   ;;  %v5634_v43 = vor.u32 %v5633_v52, %v5630_v16  ;;  %v14591_v52 = vld [vmem:[%s18237_s1 + $0x6e8] sm:$0xff]  }
  0x71   : > { %13479 = vmatprep.subr.bf16.mxu0 %v14580_v4  ;;  %12797 = vmatprep.mubr.bf16.mxu1 %v639_v27  ;;  %v655_v27 = vsel %vm611_vm2, %v650_v10, %v654_v20  ;;  %v873_v55 = vrot.slane %v871_v25, 1  ;;  %v15589_v53 = vld [vmem:[%s15180_s14 + $0x68] sm:$0x1f]  }
  0x72   : > { %13469 = vmatprep.mubr.bf16.mxu0 %v5622_v18  ;;  %v656_v18 = vshrl.u32 %v15473_v47, 16  ;;  %v5635_v39 = vsel %vm3959_vm1, %v5625_v37, %v5634_v43 }
  0x73   : > { %12808 = vmatpush3.bf16.msra.mxu1 %v14579_v17  ;;  %v5626_v17 = vsel %vm3959_vm1, %v15478_v40, %v5625_v37  ;;  %v5803_v40 = vrot.slane %v15277_v56, 3  ;;  %v874_v51 = vsel %vm611_vm2, %v869_v49, %v873_v55  ;;  %v1055_v49 = vld [vmem:[%s15180_s14] sm:$0xe] }
  0x74   : > { %13480 = vmatpush3.bf16.msra.mxu0 %v14580_v4  ;;  %12809 = vmatprep.subr.bf16.mxu1 %v14583_v24  ;;  %v11321_v4 = vcombine.low %v11304_v34, %v15271_v54  ;;  %v658_v38 = vor.u32 %v656_v18, %v654_v20  ;;  %v15558_v54 = vld [vmem:[%s15180_s14 + $0x50] sm:$0xff]   ;;  %v1255_v34 = vrot.slane %v15525_v58, 1  ;;  %v1444_v20 = vrot.slane %v632_v22, 1 }
  0x75   : > { %13481 = vmatprep.subr.bf16.mxu0 %v14584_v28  ;;  %v1257_v10 = vrot.slane %v15558_v54, 1  ;;  %v1440_v18 = vrot.slane %v624_v2, 1  ;;  %v14595_v2 = vld [vmem:[%s18237_s1 + $0xf8] sm:$0xff]  }
  0x76   : > { %12798 = vmatmul.mubr.bf16.gmra.mrb[4].mxu1 %v647_v48  ;;  %v5802_v16 = vrot.slane %v11321_v4, 3  ;;  %v14594_v48 = vld [vmem:[%s18237_s1 + $0x6f0] sm:$0xff]   ;;  %v18260_v4 = vrot.slane %v15589_v53, 1 }
  0x77   : > { %12810 = vmatpush3.bf16.msra.mxu1 %v14583_v24  ;;  %12801 = vmatprep.mubr.bf16.mxu1 %v655_v27  ;;  %v14589_v24 = vld [vmem:[%s18237_s1 + $0x6e0] sm:$0xff]   ;;  %v15583_v37 = vsel %vm1076_vm3, %v1255_v34, %v1257_v10 }
  0x78   : > { %13482 = vmatpush3.bf16.msra.mxu0 %v14584_v28  ;;  %12811 = vmatprep.subr.bf16.mxu1 %v14585_v29  ;;  %v15572_v28 = vld [vmem:[%s15180_s14 + $0x58] sm:$0xff]   ;;  %v5804_v22 = vsel %vm4358_vm4, %v5802_v16, %v5803_v40  ;;  %v1445_v16 = vrot.slane %v628_v3, 2  ;;  %v5805_v3 = vrot.slane %v15292_v1, 3 }
  0x79   : > { %13483 = vmatprep.subr.bf16.mxu0 %v14586_v33  ;;  %13470 = vmatmul.mubr.bf16.gmra.mrb[4].mxu0 %v5626_v17  ;;  %v1259_v25 = vrot.slane %v15572_v28, 1  ;;  %v875_v17 = vshrl.u32 %v15525_v58, 16  ;;  %v14617_v58 = vld [vmem:[%s18237_s1 + $0x730] sm:$0xff]  }
  0x7a   : > { %13473 = vmatprep.mubr.bf16.mxu0 %v5635_v39 }
  0x7b   : > { %12812 = vmatpush3.bf16.msra.mxu1 %v14585_v29  ;;  %v15575_v29 = vld [vmem:[%s15180_s14 + $0x60] sm:$0xff]   ;;  %v15600_v39 = vsel %vm1076_vm3, %v1257_v10, %v1259_v25 }
  0x7c   : > { %13484 = vmatpush3.bf16.msra.mxu0 %v14586_v33  ;;  %12813 = vmatprep.subr.bf16.mxu1 %v14588_v19  ;;  %v14592_v33 = vld [vmem:[%s18237_s1 + $0xf0] sm:$0xff]   ;;  %v1261_v27 = vrot.slane %v15575_v29, 1 }
  0x7d   : > { %13485 = vmatprep.subr.bf16.mxu0 %v14589_v24 }
  0x7e   : > { %12802 = vmatmul.mubr.bf16.gmra.mrb[16].mxu1 %v658_v38  ;;  %v15614_v38 = vcombine.low %v1055_v49, %v15386_v9  ;;  %v887_v9 = vshll.u32 %v15572_v28, 16  ;;  %v899_v49 = vshrl.u32 %v15575_v29, 16 }
  0x7f   : > { %12814 = vmatpush3.bf16.msra.mxu1 %v14588_v19  ;;  %12821 = vmatprep.mubr.bf16.mxu1 %v874_v51  ;;  %v879_v19 = vshll.u32 %v15558_v54, 16  ;;  %v883_v51 = vshrl.u32 %v15558_v54, 16 }
  0x80   : > { %13486 = vmatpush3.bf16.msra.mxu0 %v14589_v24  ;;  %12815 = vmatprep.subr.bf16.mxu1 %v14590_v41  ;;  %v15606_v24 = vsel %vm1076_vm3, %v1259_v25, %v1261_v27  ;;  %v1077_v10 = vrot.slane %v15614_v38, 1  ;;  %v877_v25 = vor.u32 %v875_v17, %v873_v55  ;;  %v5807_v55 = vrot.slane %v15327_v26, 3 }
  0x81   : > { %13487 = vmatprep.subr.bf16.mxu0 %v14591_v52  ;;  %13474 = vmatmul.mubr.bf16.gmra.mrb[16].mxu0 %v5634_v43  ;;  %v1441_v43 = vrot.slane %v620_v15, 2  ;;  %v14596_v15 = vld [vmem:[%s18237_s1 + $0x6f8] sm:$0xff]  }
  0x82   : > { %13493 = vmatprep.mubr.bf16.mxu0 %v5804_v22  ;;  %v15631_v22 = vor.u32 %v1445_v16, %v1444_v20  ;;  %v15640_v54 = vsel %vm1076_vm3, %v1077_v10, %v1078_v12  ;;  %v14602_v20 = vld [vmem:[%s18237_s1 + $0x700] sm:$0xff]   ;;  %v891_v12 = vshrl.u32 %v15572_v28, 16  ;;  %v14608_v10 = vld [vmem:[%s18237_s1 + $0x710] sm:$0xff]  }
  0x83   : > { %12816 = vmatpush3.bf16.msra.mxu1 %v14590_v41  ;;  %v15619_v41 = vsel %vm1076_vm3, %v1261_v27, %v18260_v4  ;;  %v881_v27 = vrot.slane %v879_v19, 1  ;;  %v5806_v19 = vsel %vm4358_vm4, %v5803_v40, %v5805_v3  ;;  %v14607_v40 = vld [vmem:[%s18237_s1 + $0x110] sm:$0xff]  }
  0x84   : > { %13488 = vmatpush3.bf16.msra.mxu0 %v14591_v52  ;;  %12817 = vmatprep.subr.bf16.mxu1 %v14592_v33  ;;  %v15626_v52 = vor.u32 %v1441_v43, %v1440_v18  ;;  %v895_v18 = vshll.u32 %v15575_v29, 16  ;;  %v903_v43 = vshll.u32 %v15589_v53, 16 }
  0x85   : > { %13489 = vmatprep.subr.bf16.mxu0 %v14594_v48  ;;  %v882_v17 = vsel %vm611_vm2, %v877_v25, %v881_v27  ;;  %v5809_v25 = vrot.slane %v15339_v36, 3 }
  0x87   : > { %12818 = vmatpush3.bf16.msra.mxu1 %v14592_v33  ;;  %v885_v33 = vor.u32 %v883_v51, %v881_v27  ;;  %v897_v51 = vrot.slane %v895_v18, 1  ;;  %v14609_v27 = vld [vmem:[%s18237_s1 + $0x118] sm:$0xff]   ;;  %v15680_v18 = vld [vmem:[%s15180_s14 + $0x10] sm:$0xf] }
  0x88   : > { %13490 = vmatpush3.bf16.msra.mxu0 %v14594_v48  ;;  %12819 = vmatprep.subr.bf16.mxu1 %v14595_v2  ;;  %v889_v48 = vrot.slane %v887_v9, 1  ;;  %v905_v9 = vrot.slane %v903_v43, 1 }
  0x89   : > { %13491 = vmatprep.subr.bf16.mxu0 %v14596_v15  ;;  %v901_v29 = vor.u32 %v899_v49, %v897_v51 }
  0x8a   : > { %v890_v16 = vsel %vm611_vm2, %v885_v33, %v889_v48  ;;  %v893_v28 = vor.u32 %v891_v12, %v889_v48  ;;  %v15677_v48 = vld [vmem:[%s15180_s14 + $0xc] sm:$0xf]  ;;  %v5810_v12 = vsel %vm4358_vm4, %v5807_v55, %v5809_v25 }
  0x8b   : > { %12820 = vmatpush3.bf16.msra.mxu1 %v14595_v2  ;;  %v14604_v2 = vld [vmem:[%s18237_s1 + $0x708] sm:$0xff]   ;;  %v906_v33 = vsel %vm611_vm2, %v901_v29, %v905_v9 }
  0x8c   : > { %13492 = vmatpush3.bf16.msra.mxu0 %v14596_v15  ;;  %12833 = vmatprep.subr.bf16.mxu1 %v14600_v50  ;;  %v5808_v15 = vsel %vm4358_vm4, %v5805_v3, %v5807_v55  ;;  %v898_v3 = vsel %vm611_vm2, %v893_v28, %v897_v51  ;;  %v14613_v55 = vld [vmem:[%s18237_s1 + $0x720] sm:$0xff]  }
  0x8d   : > { %13505 = vmatprep.subr.bf16.mxu0 %v14602_v20 }
  0x8e   : > { %12822 = vmatmul.mubr.bf16.vlgmr.msra.gmra.mrb[0].mxu1 %v882_v17  ;;  %v15683_v17 = vld [vmem:[%s15180_s14 + $0x14] sm:$0xf] }
  0x8f   : > { %12834 = vmatpush3.bf16.msra.mxu1 %v14600_v50  ;;  %13494 = vmatmul.mubr.bf16.vlgmr.msra.gmra.mrb[0].mxu0 %v5806_v19  ;;  %v5811_v50 = vrot.slane %v15370_v57, 3  ;;  %v14610_v57 = vld [vmem:[%s18237_s1 + $0x718] sm:$0xff]   ;;  %v14612_v19 = vld [vmem:[%s18237_s1 + $0x120] sm:$0xff]  }
  0x90   : > { %13506 = vmatpush3.bf16.msra.mxu0 %v14602_v20  ;;  %12835 = vmatprep.subr.bf16.mxu1 %v14603_v5  ;;  %v5958_v20 = vld [vmem:[%s15180_s14 + $0x8] sm:$0x8] }
  0x91   : > { %13507 = vmatprep.subr.bf16.mxu0 %v14604_v2  ;;  %12825 = vmatprep.mubr.bf16.mxu1 %v890_v16  ;;  %v5812_v49 = vsel %vm4358_vm4, %v5809_v25, %v5811_v50  ;;  %v15695_v43 = vcombine.low %v5958_v20, %v15677_v48  ;;  %v10622_v16 = vld [vmem:[%s15180_s14 + $0x40] sm:$0xe]  ;;  %v14615_v25 = vld [vmem:[%s18237_s1 + $0x728] sm:$0xff]   ;;  %v15728_v20 = vld [vmem:[%s15180_s14 + $0x1c] sm:$0xf] }
  0x92   : > { %13497 = vmatprep.mubr.bf16.mxu0 %v5808_v15  ;;  %v10639_v51 = vcombine.low %v10622_v16, %v15498_v0  ;;  %v15715_v0 = vld [vmem:[%s15180_s14 + $0x18] sm:$0xf] }
  0x93   : > { %12836 = vmatpush3.bf16.msra.mxu1 %v14603_v5  ;;  %v907_v5 = vshrl.u32 %v15589_v53, 16  ;;  %v6017_v15 = vrot.slane %v15695_v43, 3 }
  0x94   : > { %13508 = vmatpush3.bf16.msra.mxu0 %v14604_v2  ;;  %12837 = vmatprep.subr.bf16.mxu1 %v14607_v40  ;;  %v15699_v2 = vcombine.low %v15680_v18, %v15683_v17  ;;  %v1254_v29 = vrot.slane %v10639_v51, 1 }
  0x95   : > { %13509 = vmatprep.subr.bf16.mxu0 %v14608_v10  ;;  %v909_v28 = vor.u32 %v907_v5, %v905_v9  ;;  %v15743_v5 = vld [vmem:[%s15180_s14 + $0x20] sm:$0xf] }
  0x96   : > { %12826 = vmatmul.mubr.bf16.gmra.mrb[4].mxu1 %v898_v3  ;;  %v15720_v9 = vsel %vm1076_vm3, %v1254_v29, %v1255_v34  ;;  %v1433_v34 = vshrl.u32 %v15614_v38, 16  ;;  %v15769_v29 = vld [vmem:[%s15180_s14 + $0x30] sm:$0xf] }
  0x97   : > { %12838 = vmatpush3.bf16.msra.mxu1 %v14607_v40  ;;  %12829 = vmatprep.mubr.bf16.mxu1 %v906_v33  ;;  %v6018_v40 = vrot.slane %v15699_v2, 3  ;;  %v1436_v33 = vshll.u32 %v15614_v38, 16  ;;  %v14619_v38 = vld [vmem:[%s18237_s1 + $0x738] sm:$0xff]  }
  0x98   : > { %13510 = vmatpush3.bf16.msra.mxu0 %v14608_v10  ;;  %12839 = vmatprep.subr.bf16.mxu1 %v14609_v27  ;;  %v14614_v10 = vld [vmem:[%s18237_s1 + $0x128] sm:$0xff]  }
  0x99   : > { %13511 = vmatprep.subr.bf16.mxu0 %v14610_v57  ;;  %13498 = vmatmul.mubr.bf16.gmra.mrb[4].mxu0 %v5810_v12  ;;  %v6019_v3 = vsel %vm4358_vm4, %v6017_v15, %v6018_v40  ;;  %v1435_v12 = vrot.slane %v1433_v34, 1  ;;  %v15766_v15 = vld [vmem:[%s15180_s14 + $0x2c] sm:$0xf] }
  0x9a   : > { %13501 = vmatprep.mubr.bf16.mxu0 %v5812_v49  ;;  %v14621_v49 = vld [vmem:[%s18237_s1 + $0x140] sm:$0xff]   ;;  %v14626_v34 = vld [vmem:[%s18237_s1 + $0x148] sm:$0xff]  }
  0x9b   : > { %12840 = vmatpush3.bf16.msra.mxu1 %v14609_v27  ;;  %v14616_v27 = vld [vmem:[%s18237_s1 + $0x130] sm:$0xff]  }
  0x9c   : > { %13512 = vmatpush3.bf16.msra.mxu0 %v14610_v57  ;;  %12841 = vmatprep.subr.bf16.mxu1 %v14612_v19  ;;  %v14618_v57 = vld [vmem:[%s18237_s1 + $0x138] sm:$0xff]  }
  0x9d   : > { %13513 = vmatprep.subr.bf16.mxu0 %v14613_v55 }
  0x9e   : > { %12830 = vmatmul.mubr.bf16.gmra.mrb[20].mxu1 %v909_v28  ;;  %v15763_v28 = vld [vmem:[%s15180_s14 + $0x28] sm:$0xf] }
  0x9f   : > { %12842 = vmatpush3.bf16.msra.mxu1 %v14612_v19  ;;  %12849 = vmatprep.mubr.bf16.mxu1 %v15640_v54  ;;  %v15737_v54 = vcombine.low %v15715_v0, %v15728_v20  ;;  %v1438_v19 = vrot.slane %v1436_v33, 2 }
  0xa0   : > { %13514 = vmatpush3.bf16.msra.mxu0 %v14613_v55  ;;  %12843 = vmatprep.subr.bf16.mxu1 %v14614_v10  ;;  %v14624_v55 = vld [vmem:[%s18237_s1 + $0x740] sm:$0xff]  }
  0xa1   : > { %13515 = vmatprep.subr.bf16.mxu0 %v14615_v25  ;;  %13502 = vmatmul.mubr.bf16.gmra.mrb[20].mxu0 %v5811_v50  ;;  %v15746_v50 = vld [vmem:[%s15180_s14 + $0x24] sm:$0xf]  ;;  %v6020_v16 = vrot.slane %v15737_v54, 3 }
  0xa2   : > { %13521 = vmatprep.mubr.bf16.mxu0 %v6019_v3  ;;  %v15760_v51 = vcombine.low %v15743_v5, %v15746_v50 }
  0xa3   : > { %12844 = vmatpush3.bf16.msra.mxu1 %v14614_v10  ;;  %v5969_v10 = vld [vmem:[%s15180_s14 + $0x34] sm:$0x7]  ;;  %v6021_v3 = vsel %vm4358_vm4, %v6018_v40, %v6020_v16  ;;  %v15792_v40 = vsel %vm1431_vm5, %v15626_v52, %v15631_v22 }
  0xa4   : > { %13516 = vmatpush3.bf16.msra.mxu0 %v14615_v25  ;;  %12845 = vmatprep.subr.bf16.mxu1 %v14616_v27  ;;  %v1439_v25 = vor.u32 %v1438_v19, %v1435_v12  ;;  %v11351_v33 = vcombine.low %v15769_v29, %v5969_v10  ;;  %v15910_v19 = vld [vmem:[%s15180_s14 + $0x70] sm:$0xf]  ;;  %v11371_v12 = vld [vmem:[%s15180_s14 + $0x74] sm:$0x7] }
  0xa5   : > { %13517 = vmatprep.subr.bf16.mxu0 %v14617_v58  ;;  %v11393_v13 = vcombine.low %v15910_v19, %v11371_v12  ;;  %v6419_v12 = vshrl.u32 %v15699_v2, 16 }
  0xa6   : > { %v6026_v8 = vrot.slane %v11351_v33, 3 }
  0xa7   : > { %12846 = vmatpush3.bf16.msra.mxu1 %v14616_v27  ;;  %v6022_v27 = vrot.slane %v15760_v51, 3 }
  0xa8   : > { %13518 = vmatpush3.bf16.msra.mxu0 %v14617_v58  ;;  %12847 = vmatprep.subr.bf16.mxu1 %v14618_v57  ;;  %v15779_v58 = vcombine.low %v15763_v28, %v15766_v15 }
  0xa9   : > { %13519 = vmatprep.subr.bf16.mxu0 %v14619_v38  ;;  %v6023_v10 = vsel %vm4358_vm4, %v6020_v16, %v6022_v27  ;;  %v11360_v16 = vld [vmem:[%s15180_s14 + $0x48] sm:$0x8] }
  0xab   : > { %12848 = vmatpush3.bf16.msra.mxu1 %v14618_v57  ;;  %v14627_v57 = vld [vmem:[%s18237_s1 + $0x748] sm:$0xff]  }
  0xac   : > { %13520 = vmatpush3.bf16.msra.mxu0 %v14619_v38  ;;  %12861 = vmatprep.subr.bf16.mxu1 %v14621_v49  ;;  %v15787_v38 = vsel %vm1431_vm5, %v1439_v25, %v15626_v52  ;;  %v14628_v52 = vld [vmem:[%s18237_s1 + $0x150] sm:$0xff]   ;;  %v6024_v25 = vrot.slane %v15779_v58, 3 }
  0xad   : > { %13533 = vmatprep.subr.bf16.mxu0 %v14624_v55 }
  0xae   : > { %12850 = vmatmul.mubr.bf16.vlgmr.msra.gmra.mrb[0].mxu1 %v15469_v31  ;;  %v14629_v31 = vld [vmem:[%s18237_s1 + $0x750] sm:$0xff]   ;;  %v6025_v33 = vsel %vm4358_vm4, %v6022_v27, %v6024_v25 }
  0xaf   : > { %12862 = vmatpush3.bf16.msra.mxu1 %v14621_v49  ;;  %13522 = vmatmul.mubr.bf16.vlgmr.msra.gmra.mrb[0].mxu0 %v6021_v3  ;;  %v14630_v49 = vld [vmem:[%s18237_s1 + $0x158] sm:$0xff]   ;;  %v15816_v3 = vld [vmem:[%s15180_s14 + $0x50] sm:$0xf] }
  0xb0   : > { %13534 = vmatpush3.bf16.msra.mxu0 %v14624_v55  ;;  %12863 = vmatprep.subr.bf16.mxu1 %v14626_v34  ;;  %v15813_v55 = vld [vmem:[%s15180_s14 + $0x4c] sm:$0xf] }
  0xb1   : > { %13535 = vmatprep.subr.bf16.mxu0 %v14627_v57  ;;  %12853 = vmatprep.mubr.bf16.mxu1 %v15491_v42  ;;  %v14631_v42 = vld [vmem:[%s18237_s1 + $0x758] sm:$0xff]  }
  0xb2   : > { %13525 = vmatprep.mubr.bf16.mxu0 %v6023_v10  ;;  %v15833_v10 = vcombine.low %v15816_v3, %v15819_v7 }
  0xb3   : > { %12864 = vmatpush3.bf16.msra.mxu1 %v14626_v34  ;;  %v6027_v34 = vsel %vm4358_vm4, %v6024_v25, %v6026_v8  ;;  %v14637_v25 = vld [vmem:[%s18237_s1 + $0x768] sm:$0xff]  }
  0xb4   : > { %13536 = vmatpush3.bf16.msra.mxu0 %v14627_v57  ;;  %12865 = vmatprep.subr.bf16.mxu1 %v14628_v52  ;;  %v15829_v57 = vcombine.low %v11360_v16, %v15813_v55  ;;  %v14649_v16 = vld [vmem:[%s18237_s1 + $0x188] sm:$0xff]  }
  0xb5   : > { %13537 = vmatprep.subr.bf16.mxu0 %v14629_v31 }
  0xb6   : > { %12854 = vmatmul.mubr.bf16.gmra.mrb[4].mxu1 %v15501_v30  ;;  %v14632_v30 = vld [vmem:[%s18237_s1 + $0x160] sm:$0xff]   ;;  %v6232_v27 = vrot.slane %v15829_v57, 3 }
  0xb7   : > { %12866 = vmatpush3.bf16.msra.mxu1 %v14628_v52  ;;  %12857 = vmatprep.mubr.bf16.mxu1 %v15520_v21  ;;  %v14634_v21 = vld [vmem:[%s18237_s1 + $0x760] sm:$0xff]   ;;  %v6233_v52 = vrot.slane %v15833_v10, 3 }
  0xb8   : > { %13538 = vmatpush3.bf16.msra.mxu0 %v14629_v31  ;;  %12867 = vmatprep.subr.bf16.mxu1 %v14630_v49  ;;  %v14636_v31 = vld [vmem:[%s18237_s1 + $0x168] sm:$0xff]  }
  0xb9   : > { %13539 = vmatprep.subr.bf16.mxu0 %v14631_v42  ;;  %13526 = vmatmul.mubr.bf16.gmra.mrb[4].mxu0 %v6025_v33  ;;  %v14640_v33 = vld [vmem:[%s18237_s1 + $0x770] sm:$0xff]   ;;  %v6234_v47 = vsel %vm4358_vm4, %v6232_v27, %v6233_v52  ;;  %v14642_v27 = vld [vmem:[%s18237_s1 + $0x778] sm:$0xff]  }
  0xba   : > { %13529 = vmatprep.mubr.bf16.mxu0 %v6027_v34  ;;  %v15867_v34 = vld [vmem:[%s15180_s14 + $0x5c] sm:$0xf] }
  0xbb   : > { %12868 = vmatpush3.bf16.msra.mxu1 %v14630_v49 }
  0xbc   : > { %13540 = vmatpush3.bf16.msra.mxu0 %v14631_v42  ;;  %12869 = vmatprep.subr.bf16.mxu1 %v14632_v30  ;;  %v14638_v42 = vld [vmem:[%s18237_s1 + $0x170] sm:$0xff]  }
  0xbd   : > { %13541 = vmatprep.subr.bf16.mxu0 %v14634_v21 }
  0xbe   : > { %12858 = vmatmul.mubr.bf16.gmra.mrb[24].mxu1 %v1086_v63  ;;  %v15864_v63 = vld [vmem:[%s15180_s14 + $0x58] sm:$0xf] }
  0xbf   : > { %12870 = vmatpush3.bf16.msra.mxu1 %v14632_v30  ;;  %12877 = vmatprep.mubr.bf16.mxu1 %v15720_v9  ;;  %v14641_v30 = vld [vmem:[%s18237_s1 + $0x178] sm:$0xff]   ;;  %v15877_v9 = vcombine.low %v15864_v63, %v15867_v34 }
  0xc0   : > { %13542 = vmatpush3.bf16.msra.mxu0 %v14634_v21  ;;  %12871 = vmatprep.subr.bf16.mxu1 %v14636_v31  ;;  %v15902_v21 = vld [vmem:[%s15180_s14 + $0x6c] sm:$0xf] }
  0xc1   : > { %13543 = vmatprep.subr.bf16.mxu0 %v14637_v25  ;;  %13530 = vmatmul.mubr.bf16.gmra.mrb[24].mxu0 %v6026_v8  ;;  %v15880_v8 = vld [vmem:[%s15180_s14 + $0x64] sm:$0xf]  ;;  %v6235_v60 = vrot.slane %v15877_v9, 3 }
  0xc2   : > { %13549 = vmatprep.mubr.bf16.mxu0 %v6234_v47  ;;  %v14647_v47 = vld [vmem:[%s18237_s1 + $0x780] sm:$0xff]  }
  0xc3   : > { %12872 = vmatpush3.bf16.msra.mxu1 %v14636_v31  ;;  %v14644_v31 = vld [vmem:[%s18237_s1 + $0x180] sm:$0xff]  }
  0xc4   : > { %13544 = vmatpush3.bf16.msra.mxu0 %v14637_v25  ;;  %12873 = vmatprep.subr.bf16.mxu1 %v14638_v42  ;;  %v15892_v25 = vcombine.low %v15873_v61, %v15880_v8 }
  0xc5   : > { %13545 = vmatprep.subr.bf16.mxu0 %v14640_v33 }
  0xc6   : > { %v6237_v49 = vrot.slane %v15892_v25, 3 }
  0xc7   : > { %12874 = vmatpush3.bf16.msra.mxu1 %v14638_v42  ;;  %v15899_v42 = vld [vmem:[%s15180_s14 + $0x68] sm:$0xf] }
  0xc8   : > { %13546 = vmatpush3.bf16.msra.mxu0 %v14640_v33  ;;  %12875 = vmatprep.subr.bf16.mxu1 %v14641_v30  ;;  %v6236_v33 = vsel %vm4358_vm4, %v6233_v52, %v6235_v60  ;;  %v15921_v6 = vcombine.low %v15899_v42, %v15902_v21  ;;  %v6422_v52 = vshll.u32 %v15699_v2, 16 }
  0xc9   : > { %13547 = vmatprep.subr.bf16.mxu0 %v14642_v27 }
  0xca   : > { %v6424_v4 = vrot.slane %v6422_v52, 4  ;;  %v14660_v52 = vld [vmem:[%s18237_s1 + $0x7a8] sm:$0xff]  }
  0xcb   : > { %12876 = vmatpush3.bf16.msra.mxu1 %v14641_v30  ;;  %v14651_v30 = vld [vmem:[%s18237_s1 + $0x190] sm:$0xff]  }
  0xcc   : > { %13548 = vmatpush3.bf16.msra.mxu0 %v14642_v27  ;;  %12889 = vmatprep.subr.bf16.mxu1 %v14644_v31  ;;  %v6238_v27 = vsel %vm4358_vm4, %v6235_v60, %v6237_v49  ;;  %v6239_v60 = vrot.slane %v15921_v6, 3 }
  0xcd   : > { %13561 = vmatprep.subr.bf16.mxu0 %v14647_v47 }
  0xce   : > { %12878 = vmatmul.mubr.bf16.vlgmr.msra.gmra.mrb[0].mxu1 %v15583_v37  ;;  %v6411_v37 = vshrl.u32 %v15695_v43, 16  ;;  %v6240_v44 = vsel %vm4358_vm4, %v6237_v49, %v6239_v60 }
  0xcf   : > { %12890 = vmatpush3.bf16.msra.mxu1 %v14644_v31  ;;  %13550 = vmatmul.mubr.bf16.vlgmr.msra.gmra.mrb[0].mxu0 %v6236_v33  ;;  %v14652_v31 = vld [vmem:[%s18237_s1 + $0x790] sm:$0xff]   ;;  %v6414_v33 = vshll.u32 %v15695_v43, 16  ;;  %v14654_v43 = vld [vmem:[%s18237_s1 + $0x798] sm:$0xff]  }
  0xd0   : > { %13562 = vmatpush3.bf16.msra.mxu0 %v14647_v47  ;;  %12891 = vmatprep.subr.bf16.mxu1 %v14649_v16  ;;  %v6241_v47 = vrot.slane %v11393_v13, 3  ;;  %v14655_v13 = vld [vmem:[%s18237_s1 + $0x1a0] sm:$0xff]  }
  0xd1   : > { %13563 = vmatprep.subr.bf16.mxu0 %v14650_v45  ;;  %12881 = vmatprep.mubr.bf16.mxu1 %v15600_v39  ;;  %v14653_v39 = vld [vmem:[%s18237_s1 + $0x198] sm:$0xff]   ;;  %v6416_v2 = vrot.slane %v6414_v33, 4  ;;  %v18306_v33 = vshrl.u32 %v15449_v11, 16 }
  0xd2   : > { %13553 = vmatprep.mubr.bf16.mxu0 %v6238_v27  ;;  %v6413_v27 = vrot.slane %v6411_v37, 3  ;;  %v18303_v37 = vrot.slane %v15589_v53, 1  ;;  %v14663_v53 = vld [vmem:[%s18237_s1 + $0x7b0] sm:$0xff]  }
  0xd3   : > { %12892 = vmatpush3.bf16.msra.mxu1 %v14649_v16  ;;  %v6421_v16 = vrot.slane %v6419_v12, 3 }
  0xd4   : > { %13564 = vmatpush3.bf16.msra.mxu0 %v14650_v45  ;;  %12893 = vmatprep.subr.bf16.mxu1 %v14651_v30  ;;  %v6242_v45 = vsel %vm4358_vm4, %v6239_v60, %v6241_v47  ;;  %v6417_v49 = vor.u32 %v6416_v2, %v6413_v27  ;;  %v14661_v60 = vld [vmem:[%s18237_s1 + $0x1b0] sm:$0xff]   ;;  %v6437_v27 = vshrl.u32 %v15760_v51, 16 }
  0xd5   : > { %13565 = vmatprep.subr.bf16.mxu0 %v14652_v31 }
  0xd6   : > { %12882 = vmatmul.mubr.bf16.gmra.mrb[4].mxu1 %v15606_v24  ;;  %v14657_v24 = vld [vmem:[%s18237_s1 + $0x7a0] sm:$0xff]  }
  0xd7   : > { %12894 = vmatpush3.bf16.msra.mxu1 %v14651_v30  ;;  %12885 = vmatprep.mubr.bf16.mxu1 %v15619_v41  ;;  %v14659_v41 = vld [vmem:[%s18237_s1 + $0x1a8] sm:$0xff]   ;;  %v15958_v30 = vor.u32 %v6424_v4, %v6421_v16  ;;  %v6431_v4 = vshll.u32 %v15737_v54, 16  ;;  %v15988_v16 = vld [vmem:[%s15180_s14 + $0x34] sm:$0xf] }
  0xd8   : > { %13566 = vmatpush3.bf16.msra.mxu0 %v14652_v31  ;;  %12895 = vmatprep.subr.bf16.mxu1 %v14653_v39  ;;  %v6428_v31 = vshrl.u32 %v15737_v54, 16  ;;  %v1410_v54 = vld [vmem:[%s15180_s14 + $0x2c] sm:$0x3] }
  0xd9   : > { %13567 = vmatprep.subr.bf16.mxu0 %v14654_v43  ;;  %13554 = vmatmul.mubr.bf16.gmra.mrb[4].mxu0 %v6240_v44  ;;  %v6426_v12 = vsel %vm6409_vm6, %v6417_v49, %v15958_v30 }
  0xda   : > { %13557 = vmatprep.mubr.bf16.mxu0 %v6242_v45  ;;  %v15063_v45 = vld [vmem:[%s15180_s14 + $0x28] sm:$0xf] }
  0xdb   : > { %12896 = vmatpush3.bf16.msra.mxu1 %v14653_v39  ;;  %v14664_v39 = vld [vmem:[%s18237_s1 + $0x1b8] sm:$0xff]   ;;  %v10664_v2 = vcombine.low %v15063_v45, %v1410_v54 }
  0xdc   : > { %13568 = vmatpush3.bf16.msra.mxu0 %v14654_v43  ;;  %12897 = vmatprep.subr.bf16.mxu1 %v14655_v13  ;;  %v6433_v43 = vrot.slane %v6431_v4, 4 }
  0xdd   : > { %13569 = vmatprep.subr.bf16.mxu0 %v14657_v24  ;;  %v1457_v45 = vshrl.u32 %v10664_v2, 16 }
  0xde   : > { %12886 = vmatmul.mubr.bf16.gmra.mrb[28].mxu1 %v18303_v37 }
  0xdf   : > { %12898 = vmatpush3.bf16.msra.mxu1 %v14655_v13  ;;  %12905 = vmatprep.mubr.bf16.mxu1 %v15787_v38  ;;  %v6430_v38 = vrot.slane %v6428_v31, 3  ;;  %v6440_v13 = vshll.u32 %v15760_v51, 16  ;;  %v14666_v51 = vld [vmem:[%s18237_s1 + $0x1c0] sm:$0xff]   ;;  %v6439_v31 = vrot.slane %v6437_v27, 3  ;;  %v6449_v27 = vshll.u32 %v15779_v58, 16 }
  0xe0   : > { %13570 = vmatpush3.bf16.msra.mxu0 %v14657_v24  ;;  %12899 = vmatprep.subr.bf16.mxu1 %v14659_v41  ;;  %v14665_v24 = vld [vmem:[%s18237_s1 + $0x7b8] sm:$0xff]  }
  0xe1   : > { %13571 = vmatprep.subr.bf16.mxu0 %v14660_v52  ;;  %13558 = vmatmul.mubr.bf16.gmra.mrb[28].mxu0 %v6241_v47  ;;  %v6442_v4 = vrot.slane %v6440_v13, 4  ;;  %v6434_v54 = vor.u32 %v6433_v43, %v6430_v38  ;;  %v1460_v47 = vshll.u32 %v10664_v2, 16  ;;  %v18307_v38 = vshll.u32 %v15449_v11, 16 }
  0xe2   : > { %13577 = vmatprep.mubr.bf16.mxu0 %v6426_v12  ;;  %v11418_v12 = vcombine.low %v15769_v29, %v15988_v16 }
  0xe3   : > { %12900 = vmatpush3.bf16.msra.mxu1 %v14659_v41  ;;  %v18304_v41 = vshrl.u32 %v15436_v62, 16  ;;  %v1453_v43 = vrot.slane %v18307_v38, 2  ;;  %v6443_v13 = vor.u32 %v6442_v4, %v6439_v31  ;;  %v6451_v31 = vrot.slane %v6449_v27, 4  ;;  %v14672_v27 = vld [vmem:[%s18237_s1 + $0x1d8] sm:$0xff]  }
  0xe4   : > { %13572 = vmatpush3.bf16.msra.mxu0 %v14660_v52  ;;  %12901 = vmatprep.subr.bf16.mxu1 %v14661_v60  ;;  %v18305_v52 = vshll.u32 %v15436_v62, 16  ;;  %v1452_v62 = vrot.slane %v18306_v33, 1  ;;  %v6455_v2 = vshrl.u32 %v11418_v12, 16  ;;  %v6458_v44 = vshll.u32 %v11418_v12, 16 }
  0xe5   : > { %13573 = vmatprep.subr.bf16.mxu0 %v14663_v53  ;;  %v1448_v49 = vrot.slane %v18304_v41, 1  ;;  %v14667_v41 = vld [vmem:[%s18237_s1 + $0x7c0] sm:$0xff]   ;;  %v6435_v33 = vsel %vm6409_vm6, %v15958_v30, %v6434_v54  ;;  %v6444_v4 = vsel %vm6409_vm6, %v6434_v54, %v6443_v13 }
  0xe6   : > { %v1449_v37 = vrot.slane %v18305_v52, 2  ;;  %v6457_v30 = vrot.slane %v6455_v2, 3  ;;  %v6460_v12 = vrot.slane %v6458_v44, 4 }
  0xe7   : > { %12902 = vmatpush3.bf16.msra.mxu1 %v14661_v60  ;;  %v6446_v60 = vshrl.u32 %v15779_v58, 16  ;;  %v14669_v58 = vld [vmem:[%s18237_s1 + $0x7c8] sm:$0xff]  }
  0xe8   : > { %13574 = vmatpush3.bf16.msra.mxu0 %v14663_v53  ;;  %12903 = vmatprep.subr.bf16.mxu1 %v14664_v39  ;;  %v1450_v52 = vor.u32 %v1449_v37, %v1448_v49  ;;  %v14668_v53 = vld [vmem:[%s18237_s1 + $0x1c8] sm:$0xff]   ;;  %v1459_v49 = vrot.slane %v1457_v45, 1  ;;  %v1462_v37 = vrot.slane %v1460_v47, 2  ;;  %v14670_v47 = vld [vmem:[%s18237_s1 + $0x1d0] sm:$0xff]   ;;  %v6633_v45 = vshll.u32 %v15829_v57, 16 }
  0xe9   : > { %13575 = vmatprep.subr.bf16.mxu0 %v14665_v24 }
  0xea   : > { %v1451_v11 = vsel %vm1431_vm5, %v15631_v22, %v1450_v52  ;;  %v1463_v22 = vor.u32 %v1462_v37, %v1459_v49  ;;  %v14675_v49 = vld [vmem:[%s18237_s1 + $0x1e0] sm:$0xff]  }
  0xeb   : > { %12904 = vmatpush3.bf16.msra.mxu1 %v14664_v39  ;;  %v6448_v39 = vrot.slane %v6446_v60, 3  ;;  %v6641_v60 = vshll.u32 %v15833_v10, 16  ;;  %v14684_v37 = vld [vmem:[%s15180_s14 + $0x80] sm:$0xff]  }
  0xec   : > { %13576 = vmatpush3.bf16.msra.mxu0 %v14665_v24  ;;  %12917 = vmatprep.subr.bf16.mxu1 %v14666_v51  ;;  %v1454_v24 = vor.u32 %v1453_v43, %v1452_v62  ;;  %v6638_v62 = vshrl.u32 %v15833_v10, 16  ;;  %v6635_v43 = vrot.slane %v6633_v45, 4 }
  0xed   : > { %13589 = vmatprep.subr.bf16.mxu0 %v14667_v41  ;;  %v6452_v54 = vor.u32 %v6451_v31, %v6448_v39  ;;  %v14677_v39 = vld [vmem:[%s18237_s1 + $0x1e8] sm:$0xff]  }
  0xee   : > { %12906 = vmatmul.mubr.bf16.vlgmr.msra.gmra.mrb[0].mxu1 %v15792_v40  ;;  %v14671_v40 = vld [vmem:[%s18237_s1 + $0x7d0] sm:$0xff]   ;;  %v1455_v44 = vsel %vm1431_vm5, %v1450_v52, %v1454_v24  ;;  %v1464_v38 = vsel %vm1431_vm5, %v1454_v24, %v1463_v22  ;;  %v6640_v2 = vrot.slane %v6638_v62, 3  ;;  %v14678_v31 = vld [vmem:[%s18237_s1 + $0x7e8] sm:$0xff]  }
  0xef   : > { %12918 = vmatpush3.bf16.msra.mxu1 %v14666_v51  ;;  %13578 = vmatmul.mubr.bf16.vlgmr.msra.gmra.mrb[0].mxu0 %v6435_v33  ;;  %v6630_v51 = vshrl.u32 %v15829_v57, 16  ;;  %v14673_v57 = vld [vmem:[%s18237_s1 + $0x7d8] sm:$0xff]   ;;  %v6453_v52 = vsel %vm6409_vm6, %v6443_v13, %v6452_v54  ;;  %v6643_v33 = vrot.slane %v6641_v60, 4  ;;  %v14676_v13 = vld [vmem:[%s18237_s1 + $0x7e0] sm:$0xff]   ;;  %v14679_v24 = vld [vmem:[%s18237_s1 + $0x1f0] sm:$0xff]  }
  0xf0   : > { %13590 = vmatpush3.bf16.msra.mxu0 %v14667_v41  ;;  %12919 = vmatprep.subr.bf16.mxu1 %v14668_v53  ;;  %v6461_v41 = vor.u32 %v6460_v12, %v6457_v30  ;;  %v6647_v30 = vshrl.u32 %v15877_v9, 16  ;;  %v6650_v12 = vshll.u32 %v15877_v9, 16 }
  0xf1   : > { %13591 = vmatprep.subr.bf16.mxu0 %v14669_v58  ;;  %12909 = vmatprep.mubr.bf16.mxu1 %v1451_v11  ;;  %v6644_v11 = vor.u32 %v6643_v33, %v6640_v2 }
  0xf2   : > { %13581 = vmatprep.mubr.bf16.mxu0 %v6444_v4  ;;  %v6462_v10 = vsel %vm6409_vm6, %v6452_v54, %v6461_v41  ;;  %v6649_v9 = vrot.slane %v6647_v30, 3  ;;  %v6652_v45 = vrot.slane %v6650_v12, 4  ;;  %v16073_v54 = vld [vmem:[%s15180_s14 + $0x74] sm:$0xf]  ;;  %v14691_v12 = vld [vmem:[%s15180_s14 + $0x98] sm:$0xff]  }
  0xf3   : > { %12920 = vmatpush3.bf16.msra.mxu1 %v14668_v53  ;;  %v6632_v53 = vrot.slane %v6630_v51, 3  ;;  %v6659_v51 = vshll.u32 %v15892_v25, 16  ;;  %v11444_v60 = vcombine.low %v15910_v19, %v16073_v54 }
  0xf4   : > { %13592 = vmatpush3.bf16.msra.mxu0 %v14669_v58  ;;  %12921 = vmatprep.subr.bf16.mxu1 %v14670_v47 }
  0xf5   : > { %13593 = vmatprep.subr.bf16.mxu0 %v14671_v40  ;;  %v6636_v58 = vor.u32 %v6635_v43, %v6632_v53  ;;  %v6661_v62 = vrot.slane %v6659_v51, 4  ;;  %v6668_v53 = vshll.u32 %v15921_v6, 16  ;;  %v14688_v43 = vld [vmem:[%s18237_s1 + $0x208] sm:$0xff]   ;;  %v6674_v33 = vshrl.u32 %v11444_v60, 16 }
  0xf6   : > { %12910 = vmatmul.mubr.bf16.gmra.mrb[4].mxu1 %v1455_v44  ;;  %v14683_v44 = vld [vmem:[%s18237_s1 + $0x7f8] sm:$0xff]  }
  0xf7   : > { %12922 = vmatpush3.bf16.msra.mxu1 %v14670_v47  ;;  %12913 = vmatprep.mubr.bf16.mxu1 %v1464_v38  ;;  %v6645_v4 = vsel %vm6409_vm6, %v6636_v58, %v6644_v11  ;;  %v14681_v47 = vld [vmem:[%s18237_s1 + $0x7f0] sm:$0xff]   ;;  %v14685_v38 = vld [vmem:[%s15180_s14 + $0x88] sm:$0xff]   ;;  %v6670_v58 = vrot.slane %v6668_v53, 4 }
  0xf8   : > { %13594 = vmatpush3.bf16.msra.mxu0 %v14671_v40  ;;  %12923 = vmatprep.subr.bf16.mxu1 %v14672_v27  ;;  %v14682_v40 = vld [vmem:[%s18237_s1 + $0x1f8] sm:$0xff]   ;;  %v14697_v53 = vld [vmem:[%s15180_s14 + $0xa8] ss:$0 sps:$4 sm:$0xff]  }
  0xf9   : > { %13595 = vmatprep.subr.bf16.mxu0 %v14673_v57  ;;  %13582 = vmatmul.mubr.bf16.gmra.mrb[4].mxu0 %v6453_v52  ;;  %v6665_v52 = vshrl.u32 %v15921_v6, 16 }
  0xfa   : > { %13585 = vmatprep.mubr.bf16.mxu0 %v6462_v10  ;;  %v14689_v10 = vld [vmem:[%s18237_s1 + $0x808] sm:$0xff]  }
  0xfb   : > { %12924 = vmatpush3.bf16.msra.mxu1 %v14672_v27  ;;  %v6653_v27 = vor.u32 %v6652_v45, %v6649_v9  ;;  %v6667_v6 = vrot.slane %v6665_v52, 3  ;;  %v14694_v9 = vld [vmem:[%s18237_s1 + $0x218] sm:$0xff]   ;;  %v14696_v45 = vld [vmem:[%s15180_s14 + $0xa0] sm:$0xff]  }
  0xfc   : > { %13596 = vmatpush3.bf16.msra.mxu0 %v14673_v57  ;;  %12925 = vmatprep.subr.bf16.mxu1 %v14675_v49  ;;  %v14687_v57 = vld [vmem:[%s18237_s1 + $0x800] sm:$0xff]  }
  0xfd   : > { %13597 = vmatprep.subr.bf16.mxu0 %v14676_v13 }
  0xfe   : > { %12914 = vmatmul.mubr.bf16.gmra.mrb[32].mxu1 %v1463_v22  ;;  %v6656_v22 = vshrl.u32 %v15892_v25, 16  ;;  %v14686_v25 = vld [vmem:[%s18237_s1 + $0x200] sm:$0xff]  }
  0xff   : > { %12926 = vmatpush3.bf16.msra.mxu1 %v14675_v49  ;;  %12933 = vmatprep.mubr.bf16.mxu1 %v14684_v37  ;;  %v6677_v49 = vshll.u32 %v11444_v60, 16  ;;  %v14690_v37 = vld [vmem:[%s15180_s14 + $0x90] sm:$0xff]  }
 0x100   : > { %13598 = vmatpush3.bf16.msra.mxu0 %v14676_v13  ;;  %12927 = vmatprep.subr.bf16.mxu1 %v14677_v39  ;;  %v6654_v13 = vsel %vm6409_vm6, %v6644_v11, %v6653_v27  ;;  %v14693_v11 = vld [vmem:[%s18237_s1 + $0x810] sm:$0xff]  }
 0x101   : > { %13599 = vmatprep.subr.bf16.mxu0 %v14678_v31  ;;  %13586 = vmatmul.mubr.bf16.gmra.mrb[32].mxu0 %v6461_v41  ;;  %v6658_v41 = vrot.slane %v6656_v22, 3 }
 0x102   : > { %13605 = vmatprep.mubr.bf16.mxu0 %v6645_v4  ;;  %v14692_v4 = vld [vmem:[%s18237_s1 + $0x210] sm:$0xff]  }
 0x103   : > { %12928 = vmatpush3.bf16.msra.mxu1 %v14677_v39  ;;  %v6662_v2 = vor.u32 %v6661_v62, %v6658_v41 }
 0x104   : > { %13600 = vmatpush3.bf16.msra.mxu0 %v14678_v31  ;;  %12929 = vmatprep.subr.bf16.mxu1 %v14679_v24  ;;  %v6676_v31 = vrot.slane %v6674_v33, 3  ;;  %v14707_v33 = vld [vmem:[%s15180_s14 + $0xc0] sm:$0xff]  }
 0x105   : > { %13601 = vmatprep.subr.bf16.mxu0 %v14681_v47  ;;  %v6663_v39 = vsel %vm6409_vm6, %v6653_v27, %v6662_v2 }
 0x107   : > { %12930 = vmatpush3.bf16.msra.mxu1 %v14679_v24  ;;  %v6679_v24 = vrot.slane %v6677_v49, 4  ;;  %v16141_v49 = vld [vmem:[%s15180_s14 + $0x90] sm:$0xff]  }
 0x108   : > { %13602 = vmatpush3.bf16.msra.mxu0 %v14681_v47  ;;  %12931 = vmatprep.subr.bf16.mxu1 %v14682_v40 }
 0x109   : > { %13603 = vmatprep.subr.bf16.mxu0 %v14683_v44 }
 0x10b   : > { %12932 = vmatpush3.bf16.msra.mxu1 %v14682_v40  ;;  %v6671_v40 = vor.u32 %v6670_v58, %v6667_v6  ;;  %v14702_v6 = vld [vmem:[%s18237_s1 + $0x230] sm:$0xff]   ;;  %v16151_v58 = vld [vmem:[%s15180_s14 + $0x98] sm:$0xff]  }
 0x10c   : > { %13604 = vmatpush3.bf16.msra.mxu0 %v14683_v44  ;;  %12945 = vmatprep.subr.bf16.mxu1 %v14686_v25  ;;  %v6680_v44 = vor.u32 %v6679_v24, %v6676_v31  ;;  %v14704_v31 = vld [vmem:[%s18237_s1 + $0x830] sm:$0xff]   ;;  %v16158_v24 = vld [vmem:[%s15180_s14 + $0xa0] sm:$0xff]  }
 0x10d   : > { %13617 = vmatprep.subr.bf16.mxu0 %v14687_v57 }
 0x10e   : > { %12934 = vmatmul.mubr.bf16.vlgmr.msra.gmra.mrb[0].mxu1 %v14685_v38  ;;  %v6672_v38 = vsel %vm6409_vm6, %v6662_v2, %v6671_v40  ;;  %v6681_v52 = vsel %vm6409_vm6, %v6671_v40, %v6680_v44  ;;  %v14700_v2 = vld [vmem:[%s18237_s1 + $0x228] sm:$0xff]   ;;  %v10839_v40 = vld [vmem:[%s15180_s14 + $0x80] sm:$0xe] }
 0x10f   : > { %12946 = vmatpush3.bf16.msra.mxu1 %v14686_v25  ;;  %13606 = vmatmul.mubr.bf16.vlgmr.msra.gmra.mrb[0].mxu0 %v6654_v13  ;;  %v14695_v25 = vld [vmem:[%s18237_s1 + $0x818] sm:$0xff]  }
 0x110   : > { %13618 = vmatpush3.bf16.msra.mxu0 %v14687_v57  ;;  %12947 = vmatprep.subr.bf16.mxu1 %v14688_v43  ;;  %v14698_v57 = vld [vmem:[%s18237_s1 + $0x220] sm:$0xff]  }
 0x111   : > { %13619 = vmatprep.subr.bf16.mxu0 %v14689_v10  ;;  %12937 = vmatprep.mubr.bf16.mxu1 %v14690_v37  ;;  %v16104_v30 = vpop.f32.mrb[8].mxu1  ;;  %v14701_v37 = vld [vmem:[%s18237_s1 + $0x828] sm:$0xff]  }
 0x112   : > { %v16107_v47 = vpop.f32.mrb[9].mxu1  ;;  %13609 = vmatprep.mubr.bf16.mxu0 %v6663_v39  ;;  %v16109_v22 = vpop.f32.mrb[8].mxu0  ;;  %v2540_v39 = vrot.slane %v16141_v49, 1 }
 0x113   : > { %18308 = vst [vmem:[#allocation2_spill] sm:$0xff] %v16109_v22  ;;  %12948 = vmatpush3.bf16.msra.mxu1 %v14688_v43  ;;  %v12748_v51 = vpop.f32.mrb[10].mxu1  ;;  %v16115_v41 = vpop.f32.mrb[9].mxu0  ;;  %v14699_v43 = vld [vmem:[%s18237_s1 + $0x820] sm:$0xff]  }
 0x114   : > { %18309 = vst [vmem:[#allocation3_spill] sm:$0xff] %v16115_v41  ;;  %13620 = vmatpush3.bf16.msra.mxu0 %v14689_v10  ;;  %12949 = vmatprep.subr.bf16.mxu1 %v14692_v4  ;;  %v16117_v62 = vpop.f32.mrb[11].mxu1  ;;  %v13420_v60 = vpop.f32.mrb[10].mxu0  ;;  %v16134_v10 = vld [vmem:[%s15180_s14 + $0x88] sm:$0xff]   ;;  %v18311_v51 = vcombine.low %v15677_v48, %v15680_v18  ;;  %v14705_v48 = vld [vmem:[%s18237_s1 + $0x238] sm:$0xff]  }
 0x115   : > { %13621 = vmatprep.subr.bf16.mxu0 %v14693_v11  ;;  %v16122_v27 = vpop.f32.mrb[11].mxu0  ;;  %v2538_v13 = vrot.slane %v16134_v10, 1  ;;  %v2544_v60 = vrot.slane %v16158_v24, 1 }
 0x116   : > { %18310 = vst [vmem:[#allocation4_spill] sm:$0xff] %v16122_v27  ;;  %12938 = vmatmul.mubr.bf16.gmra.mrb[4].mxu1 %v14691_v12  ;;  %v10756_v12 = vld [vmem:[%s15180_s14 + $0x84] sm:$0xf] }
 0x117   : > { %12950 = vmatpush3.bf16.msra.mxu1 %v14692_v4  ;;  %12941 = vmatprep.mubr.bf16.mxu1 %v14696_v45  ;;  %v16161_v4 = vsel %vm1076_vm3, %v2538_v13, %v2540_v39 }
 0x118   : > { %13622 = vmatpush3.bf16.msra.mxu0 %v14693_v11  ;;  %12951 = vmatprep.subr.bf16.mxu1 %v14694_v9  ;;  %v2542_v11 = vrot.slane %v16151_v58, 1 }
 0x119   : > { %13623 = vmatprep.subr.bf16.mxu0 %v14695_v25  ;;  %13610 = vmatmul.mubr.bf16.gmra.mrb[4].mxu0 %v6672_v38  ;;  %v10766_v38 = vld [vmem:[%s15180_s14 + $0xac] sm:$0x1] }
 0x11a   : > { %13613 = vmatprep.mubr.bf16.mxu0 %v6681_v52  ;;  %v16172_v45 = vsel %vm1076_vm3, %v2540_v39, %v2542_v11  ;;  %v14709_v52 = vld [vmem:[%s18237_s1 + $0x240] sm:$0xff]   ;;  %v16201_v39 = vld [vmem:[%s15180_s14 + $0xc8] sm:$0xff]  }
 0x11b   : > { %12952 = vmatpush3.bf16.msra.mxu1 %v14694_v9  ;;  %v16169_v9 = vcombine.low %v10839_v40, %v10756_v12  ;;  %v16205_v40 = vld [vmem:[%s15180_s14 + $0xd0] sm:$0xff]  }
 0x11c   : > { %13624 = vmatpush3.bf16.msra.mxu0 %v14695_v25  ;;  %12953 = vmatprep.subr.bf16.mxu1 %v14698_v57  ;;  %v10765_v25 = vld [vmem:[%s15180_s14 + $0xa8] sm:$0xf] }
 0x11d   : > { %13625 = vmatprep.subr.bf16.mxu0 %v14699_v43  ;;  %v2537_v18 = vrot.slane %v16169_v9, 1 }
 0x11e   : > { %12942 = vmatmul.mubr.bf16.gmra.mrb[36].mxu1 %v14697_v53 }
 0x11f   : > { %12954 = vmatpush3.bf16.msra.mxu1 %v14698_v57  ;;  %12961 = vmatprep.mubr.bf16.mxu1 %v14707_v33  ;;  %v14706_v57 = vld [vmem:[%s18237_s1 + $0x838] sm:$0xff]   ;;  %v16191_v53 = vsel %vm1076_vm3, %v2537_v18, %v2538_v13  ;;  %v14708_v33 = vld [vmem:[%s15180_s14 + $0xc8] sm:$0xff]  }
 0x120   : > { %13626 = vmatpush3.bf16.msra.mxu0 %v14699_v43  ;;  %12955 = vmatprep.subr.bf16.mxu1 %v14700_v2  ;;  %v14711_v43 = vld [vmem:[%s18237_s1 + $0x840] sm:$0xff]  }
 0x121   : > { %13627 = vmatprep.subr.bf16.mxu0 %v14701_v37  ;;  %13614 = vmatmul.mubr.bf16.gmra.mrb[36].mxu0 %v6680_v44  ;;  %v16182_v44 = vsel %vm1076_vm3, %v2542_v11, %v2544_v60 }
 0x122   : > { %13633 = vmatprep.mubr.bf16.mxu0 %v18311_v51  ;;  %v14713_v51 = vld [vmem:[%s18237_s1 + $0x248] sm:$0xff]  }
 0x123   : > { %12956 = vmatpush3.bf16.msra.mxu1 %v14700_v2  ;;  %v16196_v2 = vcombine.low %v10765_v25, %v10766_v38  ;;  %v14714_v25 = vld [vmem:[%s18237_s1 + $0x848] sm:$0xff]   ;;  %v18262_v38 = vrot.slane %v16205_v40, 1 }
 0x124   : > { %13628 = vmatpush3.bf16.msra.mxu0 %v14701_v37  ;;  %12957 = vmatprep.subr.bf16.mxu1 %v14702_v6  ;;  %v10755_v37 = vld [vmem:[%s15180_s14 + $0x80] sm:$0xf] }
 0x125   : > { %13629 = vmatprep.subr.bf16.mxu0 %v14704_v31  ;;  %v18261_v11 = vrot.slane %v16196_v2, 1  ;;  %v10783_v13 = vcombine.low %v10755_v37, %v10756_v12  ;;  %v14715_v12 = vld [vmem:[%s15180_s14 + $0xd0] sm:$0xff]  }
 0x126   : > { %v14718_v37 = vld [vmem:[%s18237_s1 + $0x850] sm:$0xff]  }
 0x127   : > { %12958 = vmatpush3.bf16.msra.mxu1 %v14702_v6  ;;  %v16210_v6 = vsel %vm1076_vm3, %v2544_v60, %v18261_v11  ;;  %v2076_v18 = vshll.u32 %v10783_v13, 16 }
 0x128   : > { %13630 = vmatpush3.bf16.msra.mxu0 %v14704_v31  ;;  %12959 = vmatprep.subr.bf16.mxu1 %v14705_v48  ;;  %v18263_v31 = vrot.slane %v16201_v39, 1 }
 0x129   : > { %13631 = vmatprep.subr.bf16.mxu0 %v14706_v57 }
 0x12a   : > { %v16226_v60 = vsel %vm1076_vm3, %v18263_v31, %v18262_v38  ;;  %v18266_v38 = vshll.u32 %v16134_v10, 16 }
 0x12b   : > { %12960 = vmatpush3.bf16.msra.mxu1 %v14705_v48  ;;  %v18312_v48 = vcombine.low %v15683_v17, %v15715_v0  ;;  %v14716_v17 = vld [vmem:[%s15180_s14 + $0xd8] sm:$0xff]  }
 0x12c   : > { %13632 = vmatpush3.bf16.msra.mxu0 %v14706_v57  ;;  %12973 = vmatprep.subr.bf16.mxu1 %v14709_v52  ;;  %v14717_v57 = vld [vmem:[%s18237_s1 + $0x250] sm:$0xff]   ;;  %v14719_v0 = vld [vmem:[%s18237_s1 + $0x258] sm:$0xff]  }
 0x12d   : > { %13645 = vmatprep.subr.bf16.mxu0 %v14711_v43 }
 0x12e   : > { %12962 = vmatmul.mubr.bf16.vlgmr.msra.gmra.mrb[0].mxu1 %v14708_v33 }
 0x12f   : > { %12974 = vmatpush3.bf16.msra.mxu1 %v14709_v52  ;;  %13634 = vmatmul.mubr.bf16.vlgmr.msra.gmra.mrb[0].mxu0 %v18312_v48  ;;  %v18313_v48 = vcombine.low %v15728_v20, %v15743_v5  ;;  %v14720_v20 = vld [vmem:[%s18237_s1 + $0x858] sm:$0xff]  }
 0x130   : > { %13646 = vmatpush3.bf16.msra.mxu0 %v14711_v43  ;;  %12975 = vmatprep.subr.bf16.mxu1 %v14713_v51  ;;  %v14721_v43 = vld [vmem:[%s15180_s14 + $0xe0] sm:$0xff]  }
 0x131   : > { %v12775_v33 = vpop.f32.mrb[12].mxu1  ;;  %13647 = vmatprep.subr.bf16.mxu0 %v14714_v25  ;;  %12965 = vmatprep.mubr.bf16.mxu1 %v14715_v12  ;;  %v2074_v12 = vshrl.u32 %v10783_v13, 16  ;;  %v10865_v13 = vld [vmem:[%s15180_s14 + $0xc0] sm:$0xe] }
 0x132   : > { %v16238_v52 = vadd.f32 %v12775_v33, %v16104_v30  ;;  %v538_v11 = vpop.f32.mrb[13].mxu1  ;;  %13637 = vmatprep.mubr.bf16.mxu0 %v18313_v48  ;;  %v2078_v33 = vrot.slane %v2076_v18, 1  ;;  %v2083_v18 = vrot.slane %v18266_v38, 1  ;;  %v18318_v48 = vcombine.low %v15766_v15, %v15769_v29  ;;  %v14728_v29 = vld [vmem:[%s18237_s1 + $0x868] sm:$0xff]  }
 0x133   : > { %v16250_v31 = vadd.f32 %v538_v11, %v16107_v47  ;;  %v12776_v30 = vpop.f32.mrb[14].mxu1  ;;  %12976 = vmatpush3.bf16.msra.mxu1 %v14713_v51  ;;  %v16263_v47 = vld [vmem:[%s15180_s14 + $0xc4] sm:$0xf]  ;;  %v18272_v38 = vshrl.u32 %v16151_v58, 16 }
 0x134   : > { %13648 = vmatpush3.bf16.msra.mxu0 %v14714_v25  ;;  %v541_v27 = vpop.f32.mrb[15].mxu1  ;;  %12977 = vmatprep.subr.bf16.mxu1 %v14717_v57  ;;  %v16252_v41 = vpop.f32.mrb[12].mxu0  ;;  %v2079_v25 = vor.u32 %v2078_v33, %v2074_v12  ;;  %v16285_v30 = vld [vmem:[%s15180_s14 + $0xd8] sm:$0xff]   ;;  %v16288_v12 = vld [vmem:[%s15180_s14 + $0xe0] sm:$0xff]   ;;  %v16291_v33 = vld [vmem:[%s15180_s14 + $0xe8] sm:$0x1f]  }
 0x135   : > { %18314 = vst [vmem:[#allocation5_spill] sm:$0xff] %v16252_v41  ;;  %v16255_v22 = vadd.f32 %v541_v27, %v16117_v62  ;;  %13649 = vmatprep.subr.bf16.mxu0 %v14718_v37  ;;  %v16260_v5 = vpop.f32.mrb[13].mxu0  ;;  %v10882_v62 = vcombine.low %v10865_v13, %v16263_v47  ;;  %v14723_v27 = vld [vmem:[%s18237_s1 + $0x260] sm:$0xff]   ;;  %v2719_v15 = vrot.slane %v16285_v30, 1 }
 0x136   : > { %18315 = vst [vmem:[#allocation6_spill] sm:$0xff] %v16260_v5  ;;  %12966 = vmatmul.mubr.bf16.gmra.mrb[4].mxu1 %v14716_v17  ;;  %v13448_v11 = vpop.f32.mrb[14].mxu0  ;;  %v14722_v17 = vld [vmem:[%s15180_s14 + $0xe8] ss:$0 sps:$4 sm:$0xff]  }
 0x137   : > { %12978 = vmatpush3.bf16.msra.mxu1 %v14717_v57  ;;  %12969 = vmatprep.mubr.bf16.mxu1 %v14721_v43  ;;  %v16266_v51 = vpop.f32.mrb[15].mxu0  ;;  %v14725_v57 = vld [vmem:[%s18237_s1 + $0x860] sm:$0xff]   ;;  %v18317_v43 = vcombine.low %v15746_v50, %v15763_v28  ;;  %v18319_v11 = vrot.slane %v16201_v39, 1  ;;  %v14727_v50 = vld [vmem:[%s18237_s1 + $0x268] sm:$0xff]   ;;  %v2084_v28 = vsel %vm611_vm2, %v2079_v25, %v2083_v18  ;;  %v18264_v25 = vrot.slane %v16291_v33, 1 }
 0x138   : > { %18316 = vst [vmem:[#allocation7_spill] sm:$0xff] %v16266_v51  ;;  %13650 = vmatpush3.bf16.msra.mxu0 %v14718_v37  ;;  %12979 = vmatprep.subr.bf16.mxu1 %v14719_v0  ;;  %v2714_v37 = vrot.slane %v10882_v62, 1  ;;  %v2721_v62 = vrot.slane %v16288_v12, 1 }
 0x139   : > { %13651 = vmatprep.subr.bf16.mxu0 %v14720_v20  ;;  %13638 = vmatmul.mubr.bf16.gmra.mrb[4].mxu0 %v18317_v43 }
 0x13a   : > { %13641 = vmatprep.mubr.bf16.mxu0 %v18318_v48  ;;  %v16296_v13 = vsel %vm1076_vm3, %v2714_v37, %v18319_v11  ;;  %v16316_v37 = vsel %vm1076_vm3, %v2719_v15, %v2721_v62  ;;  %v18267_v48 = vshrl.u32 %v16134_v10, 16  ;;  %v18265_v11 = vshll.u32 %v16141_v49, 16 }
 0x13b   : > { %12980 = vmatpush3.bf16.msra.mxu1 %v14719_v0  ;;  %v11474_v0 = vcombine.low %v15988_v16, %v15988_v16  ;;  %v14729_v16 = vld [vmem:[%s18237_s1 + $0x270] sm:$0xff]  }
 0x13c   : > { %13652 = vmatpush3.bf16.msra.mxu0 %v14720_v20  ;;  %12981 = vmatprep.subr.bf16.mxu1 %v14723_v27  ;;  %v18320_v20 = vrot.slane %v16205_v40, 1 }
 0x13d   : > { %13653 = vmatprep.subr.bf16.mxu0 %v14725_v57 }
 0x13e   : > { %12970 = vmatmul.mubr.bf16.gmra.mrb[40].mxu1 %v14722_v17  ;;  %v16312_v43 = vsel %vm1076_vm3, %v18320_v20, %v2719_v15  ;;  %v16324_v17 = vsel %vm1076_vm3, %v2721_v62, %v18264_v25  ;;  %v14734_v15 = vld [vmem:[%s18237_s1 + $0x878] sm:$0xff]   ;;  %v14738_v62 = vld [vmem:[%s18237_s1 + $0x280] sm:$0xff]  }
 0x13f   : > { %12982 = vmatpush3.bf16.msra.mxu1 %v14723_v27  ;;  %12989 = vmatprep.mubr.bf16.mxu1 %v2084_v28  ;;  %v14731_v27 = vld [vmem:[%s18237_s1 + $0x870] sm:$0xff]   ;;  %v14733_v28 = vld [vmem:[%s18237_s1 + $0x278] sm:$0xff]   ;;  %v14740_v20 = vld [vmem:[%s18237_s1 + $0x880] sm:$0xff]  }
 0x140   : > { %13654 = vmatpush3.bf16.msra.mxu0 %v14725_v57  ;;  %12983 = vmatprep.subr.bf16.mxu1 %v14727_v50  ;;  %v18321_v57 = vcombine.low %v15813_v55, %v15816_v3  ;;  %v18268_v55 = vshll.u32 %v16151_v58, 16  ;;  %v2087_v3 = vor.u32 %v18267_v48, %v2083_v18  ;;  %v18271_v48 = vshrl.u32 %v16158_v24, 16 }
 0x141   : > { %13655 = vmatprep.subr.bf16.mxu0 %v14728_v29  ;;  %13642 = vmatmul.mubr.bf16.gmra.mrb[40].mxu0 %v11474_v0  ;;  %v18269_v0 = vshrl.u32 %v16141_v49, 16 }
 0x142   : > { %13661 = vmatprep.mubr.bf16.mxu0 %v18321_v57  ;;  %v2099_v18 = vrot.slane %v18268_v55, 1  ;;  %v18270_v57 = vshll.u32 %v16158_v24, 16  ;;  %v2113_v55 = vshll.u32 %v16196_v2, 16 }
 0x143   : > { %12984 = vmatpush3.bf16.msra.mxu1 %v14727_v50  ;;  %v2091_v50 = vrot.slane %v18265_v11, 1  ;;  %v14742_v11 = vld [vmem:[%s18237_s1 + $0x288] sm:$0xff]  }
 0x144   : > { %13656 = vmatpush3.bf16.msra.mxu0 %v14728_v29  ;;  %12985 = vmatprep.subr.bf16.mxu1 %v14729_v16  ;;  %v10797_v29 = vld [vmem:[%s15180_s14 + $0xc0] sm:$0xf] }
 0x145   : > { %13657 = vmatprep.subr.bf16.mxu0 %v14731_v27  ;;  %v2092_v25 = vsel %vm611_vm2, %v2087_v3, %v2091_v50  ;;  %v2107_v3 = vrot.slane %v18270_v57, 1  ;;  %v2115_v57 = vrot.slane %v2113_v55, 1  ;;  %v18323_v55 = vcombine.low %v15867_v34, %v15873_v61 }
 0x147   : > { %12986 = vmatpush3.bf16.msra.mxu1 %v14729_v16  ;;  %v2095_v16 = vor.u32 %v18269_v0, %v2091_v50  ;;  %v14767_v0 = vld [vmem:[%s15180_s14 + $0xc] sm:$0xff]  }
 0x148   : > { %13658 = vmatpush3.bf16.msra.mxu0 %v14731_v27  ;;  %12987 = vmatprep.subr.bf16.mxu1 %v14733_v28  ;;  %v16359_v27 = vcombine.low %v10797_v29, %v16263_v47  ;;  %v14743_v47 = vld [vmem:[%s18237_s1 + $0x888] sm:$0xff]   ;;  %v2103_v29 = vor.u32 %v18272_v38, %v2099_v18  ;;  %v16401_v38 = vld [vmem:[%s15180_s14 + $0x14] sm:$0xff]  }
 0x149   : > { %13659 = vmatprep.subr.bf16.mxu0 %v14734_v15 }
 0x14a   : > { %v2327_v50 = vshll.u32 %v16359_v27, 16 }
 0x14b   : > { %12988 = vmatpush3.bf16.msra.mxu1 %v14733_v28  ;;  %v2100_v28 = vsel %vm611_vm2, %v2095_v16, %v2099_v18  ;;  %v2111_v16 = vor.u32 %v18271_v48, %v2107_v3 }
 0x14c   : > { %13660 = vmatpush3.bf16.msra.mxu0 %v14734_v15  ;;  %13001 = vmatprep.subr.bf16.mxu1 %v14738_v62  ;;  %v18322_v15 = vcombine.low %v15819_v7, %v15864_v63  ;;  %v14747_v7 = vld [vmem:[%s18237_s1 + $0x890] sm:$0xff]   ;;  %v2325_v63 = vshrl.u32 %v16359_v27, 16  ;;  %v2329_v48 = vrot.slane %v2327_v50, 1 }
 0x14d   : > { %13673 = vmatprep.subr.bf16.mxu0 %v14740_v20  ;;  %v2116_v41 = vsel %vm611_vm2, %v2111_v16, %v2115_v57  ;;  %v7230_v16 = vshll.u32 %v16401_v38, 16 }
 0x14e   : > { %12990 = vmatmul.mubr.bf16.vlgmr.msra.gmra.mrb[0].mxu1 %v2092_v25  ;;  %v14746_v25 = vld [vmem:[%s18237_s1 + $0x290] sm:$0xff]  }
 0x14f   : > { %13002 = vmatpush3.bf16.msra.mxu1 %v14738_v62  ;;  %13662 = vmatmul.mubr.bf16.vlgmr.msra.gmra.mrb[0].mxu0 %v18322_v15  ;;  %v14748_v15 = vld [vmem:[%s18237_s1 + $0x298] sm:$0xff]  }
 0x150   : > { %13674 = vmatpush3.bf16.msra.mxu0 %v14740_v20  ;;  %13003 = vmatprep.subr.bf16.mxu1 %v14742_v11 }
 0x151   : > { %v12803_v62 = vpop.f32.mrb[16].mxu1  ;;  %13675 = vmatprep.subr.bf16.mxu0 %v14743_v47  ;;  %12993 = vmatprep.mubr.bf16.mxu1 %v2100_v28  ;;  %v2332_v28 = vshll.u32 %v16201_v39, 16 }
 0x152   : > { %v16391_v20 = vadd.f32 %v12803_v62, %v16238_v52  ;;  %v779_v18 = vpop.f32.mrb[17].mxu1  ;;  %13665 = vmatprep.mubr.bf16.mxu0 %v18323_v55  ;;  %v2108_v52 = vsel %vm611_vm2, %v2103_v29, %v2107_v3  ;;  %v7225_v62 = vshll.u32 %v14767_v0, 16  ;;  %v7223_v3 = vshrl.u32 %v14767_v0, 16 }
 0x153   : > { %v16404_v51 = vadd.f32 %v779_v18, %v16250_v31  ;;  %v12804_v27 = vpop.f32.mrb[18].mxu1  ;;  %13004 = vmatpush3.bf16.msra.mxu1 %v14742_v11  ;;  %v14749_v31 = vld [vmem:[%s18237_s1 + $0x898] sm:$0xff]   ;;  %v2117_v11 = vshrl.u32 %v16196_v2, 16  ;;  %v2334_v55 = vrot.slane %v2332_v28, 1  ;;  %v2336_v28 = vshrl.u32 %v16201_v39, 16 }
 0x154   : > { %13676 = vmatpush3.bf16.msra.mxu0 %v14743_v47  ;;  %v782_v5 = vpop.f32.mrb[19].mxu1  ;;  %13005 = vmatprep.subr.bf16.mxu1 %v14746_v25  ;;  %v16408_v61 = vpop.f32.mrb[16].mxu0  ;;  %v7227_v29 = vrot.slane %v7225_v62, 1  ;;  %v16454_v62 = vld [vmem:[%s15180_s14 + $0x24] sm:$0xff]   ;;  %v2344_v39 = vshrl.u32 %v16205_v40, 16 }
 0x155   : > { %v16411_v34 = vadd.f32 %v782_v5, %v16255_v22  ;;  %13677 = vmatprep.subr.bf16.mxu0 %v14747_v7  ;;  %v16416_v50 = vpop.f32.mrb[17].mxu0  ;;  %v14751_v22 = vld [vmem:[%s18237_s1 + $0x2a0] sm:$0xff]   ;;  %v2330_v5 = vor.u32 %v2329_v48, %v2325_v63  ;;  %v2119_v0 = vor.u32 %v2117_v11, %v2115_v57  ;;  %v14755_v48 = vld [vmem:[%s18237_s1 + $0x2a8] sm:$0xff]   ;;  %v7234_v11 = vshrl.u32 %v16401_v38, 16 }
 0x156   : > { %12994 = vmatmul.mubr.bf16.gmra.mrb[4].mxu1 %v2108_v52  ;;  %v13476_v47 = vpop.f32.mrb[18].mxu0  ;;  %v7228_v27 = vor.u32 %v7227_v29, %v7223_v3  ;;  %v7232_v52 = vrot.slane %v7230_v16, 1  ;;  %v14770_v57 = vld [vmem:[%s15180_s14 + $0x1c] sm:$0xff]   ;;  %v2348_v16 = vshll.u32 %v16285_v30, 16 }
 0x157   : > { %13006 = vmatpush3.bf16.msra.mxu1 %v14746_v25  ;;  %12997 = vmatprep.mubr.bf16.mxu1 %v2116_v41  ;;  %v16420_v18 = vpop.f32.mrb[19].mxu0  ;;  %v14753_v25 = vld [vmem:[%s18237_s1 + $0x8a0] sm:$0xff]   ;;  %v18324_v41 = vcombine.low %v15880_v8, %v15899_v42  ;;  %v2335_v63 = vsel %vm611_vm2, %v2330_v5, %v2334_v55  ;;  %v14756_v8 = vld [vmem:[%s18237_s1 + $0x8a8] sm:$0xff]   ;;  %v14757_v42 = vld [vmem:[%s18237_s1 + $0x2b0] sm:$0xff]   ;;  %v7238_v47 = vshll.u32 %v14770_v57, 16  ;;  %v7242_v5 = vshrl.u32 %v14770_v57, 16 }
 0x158   : > { %13678 = vmatpush3.bf16.msra.mxu0 %v14747_v7  ;;  %13007 = vmatprep.subr.bf16.mxu1 %v14748_v15  ;;  %v18325_v7 = vcombine.low %v15902_v21, %v15910_v19  ;;  %v11504_v19 = vcombine.low %v16073_v54, %v16073_v54  ;;  %v7233_v21 = vsel %vm611_vm2, %v7228_v27, %v7232_v52  ;;  %v2340_v54 = vshll.u32 %v16205_v40, 16  ;;  %v14762_v3 = vld [vmem:[%s18237_s1 + $0x8b8] sm:$0xff]   ;;  %v14766_v38 = vld [vmem:[%s18237_s1 + $0x2c0] sm:$0xff]  }
 0x159   : > { %13679 = vmatprep.subr.bf16.mxu0 %v14749_v31  ;;  %13666 = vmatmul.mubr.bf16.gmra.mrb[4].mxu0 %v18324_v41  ;;  %v7236_v41 = vor.u32 %v7234_v11, %v7232_v52  ;;  %v14769_v40 = vld [vmem:[%s18237_s1 + $0x8c0] sm:$0xff]   ;;  %v2352_v52 = vshrl.u32 %v16285_v30, 16 }
 0x15a   : > { %13669 = vmatprep.mubr.bf16.mxu0 %v18325_v7  ;;  %v2342_v29 = vrot.slane %v2340_v54, 1  ;;  %v14783_v7 = vld [vmem:[%s15180_s14 + $0x2c] sm:$0xff]   ;;  %v2364_v54 = vshll.u32 %v16291_v33, 16 }
 0x15b   : > { %13008 = vmatpush3.bf16.msra.mxu1 %v14748_v15  ;;  %v14759_v15 = vld [vmem:[%s18237_s1 + $0x8b0] sm:$0xff]  }
 0x15c   : > { %13680 = vmatpush3.bf16.msra.mxu0 %v14749_v31  ;;  %13009 = vmatprep.subr.bf16.mxu1 %v14751_v22  ;;  %v14761_v31 = vld [vmem:[%s18237_s1 + $0x2b8] sm:$0xff]   ;;  %v2346_v27 = vor.u32 %v2344_v39, %v2342_v29 }
 0x15d   : > { %13681 = vmatprep.subr.bf16.mxu0 %v14753_v25 }
 0x15e   : > { %12998 = vmatmul.mubr.bf16.gmra.mrb[44].mxu1 %v2119_v0  ;;  %v7240_v0 = vrot.slane %v7238_v47, 1  ;;  %v7250_v47 = vshrl.u32 %v16454_v62, 16 }
 0x15f   : > { %13010 = vmatpush3.bf16.msra.mxu1 %v14751_v22  ;;  %13017 = vmatprep.mubr.bf16.mxu1 %v2335_v63  ;;  %v2338_v22 = vor.u32 %v2336_v28, %v2334_v55  ;;  %v14771_v55 = vld [vmem:[%s18237_s1 + $0x2c8] sm:$0xff]   ;;  %v2356_v63 = vshll.u32 %v16288_v12, 16 }
 0x160   : > { %13682 = vmatpush3.bf16.msra.mxu0 %v14753_v25  ;;  %13011 = vmatprep.subr.bf16.mxu1 %v14755_v48  ;;  %v7246_v25 = vshll.u32 %v16454_v62, 16  ;;  %v7241_v57 = vsel %vm611_vm2, %v7236_v41, %v7240_v0  ;;  %v14772_v28 = vld [vmem:[%s18237_s1 + $0x8c8] sm:$0xff]   ;;  %v14776_v62 = vld [vmem:[%s18237_s1 + $0x8d0] sm:$0xff]  }
 0x161   : > { %13683 = vmatprep.subr.bf16.mxu0 %v14756_v8  ;;  %13670 = vmatmul.mubr.bf16.gmra.mrb[44].mxu0 %v11504_v19  ;;  %v7244_v19 = vor.u32 %v7242_v5, %v7240_v0  ;;  %v2358_v11 = vrot.slane %v2356_v63, 1  ;;  %v2366_v5 = vrot.slane %v2364_v54, 1  ;;  %v11545_v54 = vld [vmem:[%s15180_s14 + $0x90] sm:$0xf] }
 0x162   : > { %13689 = vmatprep.mubr.bf16.mxu0 %v7233_v21  ;;  %v7248_v21 = vrot.slane %v7246_v25, 1 }
 0x163   : > { %13012 = vmatpush3.bf16.msra.mxu1 %v14755_v48  ;;  %v2350_v48 = vrot.slane %v2348_v16, 1  ;;  %v14775_v16 = vld [vmem:[%s18237_s1 + $0x2d0] sm:$0xff]  }
 0x164   : > { %13684 = vmatpush3.bf16.msra.mxu0 %v14756_v8  ;;  %13013 = vmatprep.subr.bf16.mxu1 %v14757_v42  ;;  %v2343_v8 = vsel %vm611_vm2, %v2338_v22, %v2342_v29  ;;  %v7249_v29 = vsel %vm611_vm2, %v7244_v19, %v7248_v21 }
 0x165   : > { %13685 = vmatprep.subr.bf16.mxu0 %v14759_v15  ;;  %v2351_v30 = vsel %vm611_vm2, %v2346_v27, %v2350_v48  ;;  %v11543_v27 = vld [vmem:[%s15180_s14 + $0x88] sm:$0x8] }
 0x167   : > { %13014 = vmatpush3.bf16.msra.mxu1 %v14757_v42  ;;  %v16480_v42 = vld [vmem:[%s15180_s14 + $0x34] sm:$0x1f]  }
 0x168   : > { %13686 = vmatpush3.bf16.msra.mxu0 %v14759_v15  ;;  %13015 = vmatprep.subr.bf16.mxu1 %v14761_v31  ;;  %v2360_v15 = vshrl.u32 %v16288_v12, 16  ;;  %v7258_v12 = vshrl.u32 %v14783_v7, 16  ;;  %v7262_v39 = vshll.u32 %v16480_v42, 16 }
 0x169   : > { %13687 = vmatprep.subr.bf16.mxu0 %v14762_v3 }
 0x16a   : > { %v2362_v22 = vor.u32 %v2360_v15, %v2358_v11  ;;  %v7264_v19 = vrot.slane %v7262_v39, 1  ;;  %v14780_v39 = vld [vmem:[%s18237_s1 + $0x2e0] sm:$0xff]  }
 0x16b   : > { %13016 = vmatpush3.bf16.msra.mxu1 %v14761_v31  ;;  %v7254_v31 = vshll.u32 %v14783_v7, 16  ;;  %v7252_v7 = vor.u32 %v7250_v47, %v7248_v21 }
 0x16c   : > { %13688 = vmatpush3.bf16.msra.mxu0 %v14762_v3  ;;  %13029 = vmatprep.subr.bf16.mxu1 %v14766_v38  ;;  %v2354_v3 = vor.u32 %v2352_v52, %v2350_v48  ;;  %v11544_v48 = vld [vmem:[%s15180_s14 + $0x8c] sm:$0xf]  ;;  %v2367_v15 = vsel %vm611_vm2, %v2362_v22, %v2366_v5  ;;  %v7266_v22 = vshrl.u32 %v16480_v42, 16 }
 0x16d   : > { %13701 = vmatprep.subr.bf16.mxu0 %v14769_v40  ;;  %v14785_v42 = vld [vmem:[%s18237_s1 + $0x8e8] sm:$0xff]  }
 0x16e   : > { %13018 = vmatmul.mubr.bf16.vlgmr.msra.gmra.mrb[0].mxu1 %v2343_v8  ;;  %v2359_v52 = vsel %vm611_vm2, %v2354_v3, %v2358_v11 }
 0x16f   : > { %13030 = vmatpush3.bf16.msra.mxu1 %v14766_v38  ;;  %13690 = vmatmul.mubr.bf16.vlgmr.msra.gmra.mrb[0].mxu0 %v7241_v57  ;;  %v7256_v38 = vrot.slane %v7254_v31, 1  ;;  %v11546_v31 = vld [vmem:[%s15180_s14 + $0x94] sm:$0xf] }
 0x170   : > { %13702 = vmatpush3.bf16.msra.mxu0 %v14769_v40  ;;  %13031 = vmatprep.subr.bf16.mxu1 %v14771_v55  ;;  %v14777_v40 = vld [vmem:[%s18237_s1 + $0x2d8] sm:$0xff]  }
 0x171   : > { %v12831_v25 = vpop.f32.mrb[20].mxu1  ;;  %13703 = vmatprep.subr.bf16.mxu0 %v14772_v28  ;;  %13021 = vmatprep.mubr.bf16.mxu1 %v2351_v30  ;;  %v7257_v11 = vsel %vm611_vm2, %v7252_v7, %v7256_v38  ;;  %v14788_v7 = vld [vmem:[%s18237_s1 + $0x8f0] sm:$0xff]  }
 0x172   : > { %v16499_v41 = vadd.f32 %v12831_v25, %v16391_v20  ;;  %v1030_v0 = vpop.f32.mrb[21].mxu1  ;;  %13693 = vmatprep.mubr.bf16.mxu0 %v7249_v29  ;;  %v7260_v20 = vor.u32 %v7258_v12, %v7256_v38  ;;  %v16526_v29 = vcombine.low %v11543_v27, %v11544_v48  ;;  %v14784_v38 = vld [vmem:[%s18237_s1 + $0x2e8] sm:$0xff]   ;;  %v11547_v48 = vld [vmem:[%s15180_s14 + $0x98] sm:$0xf] }
 0x173   : > { %v16507_v63 = vadd.f32 %v1030_v0, %v16404_v51  ;;  %v12832_v8 = vpop.f32.mrb[22].mxu1  ;;  %13032 = vmatpush3.bf16.msra.mxu1 %v14771_v55  ;;  %v14778_v51 = vld [vmem:[%s18237_s1 + $0x8d8] sm:$0xff]  }
 0x174   : > { %13704 = vmatpush3.bf16.msra.mxu0 %v14772_v28  ;;  %v1033_v57 = vpop.f32.mrb[23].mxu1  ;;  %13033 = vmatprep.subr.bf16.mxu1 %v14775_v16  ;;  %v16513_v30 = vpop.f32.mrb[20].mxu0  ;;  %v2368_v28 = vshrl.u32 %v16291_v33, 16  ;;  %v7265_v3 = vsel %vm611_vm2, %v7260_v20, %v7264_v19  ;;  %v11548_v8 = vld [vmem:[%s15180_s14 + $0x9c] sm:$0xf] }
 0x175   : > { %v16516_v21 = vadd.f32 %v1033_v57, %v16411_v34  ;;  %13705 = vmatprep.subr.bf16.mxu0 %v14776_v62  ;;  %v16521_v55 = vpop.f32.mrb[21].mxu0  ;;  %v16528_v34 = vcombine.low %v11545_v54, %v11546_v31  ;;  %v11550_v20 = vld [vmem:[%s15180_s14 + $0xa4] sm:$0xf]  ;;  %v14790_v57 = vld [vmem:[%s18237_s1 + $0x8f8] sm:$0xff]  }
 0x176   : > { %13022 = vmatmul.mubr.bf16.gmra.mrb[4].mxu1 %v2359_v52  ;;  %v13504_v47 = vpop.f32.mrb[22].mxu0  ;;  %v2370_v25 = vor.u32 %v2368_v28, %v2366_v5  ;;  %v7268_v5 = vor.u32 %v7266_v22, %v7264_v19  ;;  %v11549_v52 = vld [vmem:[%s15180_s14 + $0xa0] sm:$0xf]  ;;  %v16562_v19 = vcombine.low %v11547_v48, %v11548_v8 }
 0x177   : > { %13034 = vmatpush3.bf16.msra.mxu1 %v14775_v16  ;;  %13025 = vmatprep.mubr.bf16.mxu1 %v2367_v15  ;;  %v16530_v12 = vpop.f32.mrb[23].mxu0  ;;  %v14782_v16 = vld [vmem:[%s18237_s1 + $0x8e0] sm:$0xff]   ;;  %v7474_v0 = vrot.slane %v16528_v34, 3  ;;  %v16567_v15 = vcombine.low %v11549_v52, %v11550_v20  ;;  %v11552_v47 = vld [vmem:[%s15180_s14 + $0xac] sm:$0xf] }
 0x178   : > { %13706 = vmatpush3.bf16.msra.mxu0 %v14776_v62  ;;  %13035 = vmatprep.subr.bf16.mxu1 %v14777_v40  ;;  %v7473_v62 = vrot.slane %v16526_v29, 3  ;;  %v14792_v54 = vld [vmem:[%s18237_s1 + $0x300] sm:$0xff]   ;;  %v7476_v31 = vrot.slane %v16562_v19, 3  ;;  %v11588_v20 = vld [vmem:[%s15180_s14 + $0xd4] sm:$0xf] }
 0x179   : > { %13707 = vmatprep.subr.bf16.mxu0 %v14778_v51  ;;  %13694 = vmatmul.mubr.bf16.gmra.mrb[4].mxu0 %v7257_v11  ;;  %v7478_v28 = vrot.slane %v16567_v15, 3  ;;  %v11551_v11 = vld [vmem:[%s15180_s14 + $0xa8] sm:$0xf] }
 0x17a   : > { %13697 = vmatprep.mubr.bf16.mxu0 %v7265_v3  ;;  %v7475_v27 = vsel %vm4358_vm4, %v7473_v62, %v7474_v0  ;;  %v14797_v3 = vld [vmem:[%s18237_s1 + $0x308] sm:$0xff]   ;;  %v7477_v22 = vsel %vm4358_vm4, %v7474_v0, %v7476_v31  ;;  %v14799_v62 = vld [vmem:[%s18237_s1 + $0x310] sm:$0xff]  }
 0x17b   : > { %13036 = vmatpush3.bf16.msra.mxu1 %v14777_v40  ;;  %v14786_v40 = vld [vmem:[%s18237_s1 + $0x2f0] sm:$0xff]   ;;  %v7479_v0 = vsel %vm4358_vm4, %v7476_v31, %v7478_v28  ;;  %v14801_v31 = vld [vmem:[%s18237_s1 + $0x318] sm:$0xff]  }
 0x17c   : > { %13708 = vmatpush3.bf16.msra.mxu0 %v14778_v51  ;;  %13037 = vmatprep.subr.bf16.mxu1 %v14780_v39  ;;  %v14795_v51 = vld [vmem:[%s18237_s1 + $0x900] sm:$0xff]  }
 0x17d   : > { %13709 = vmatprep.subr.bf16.mxu0 %v14782_v16 }
 0x17e   : > { %13026 = vmatmul.mubr.bf16.gmra.mrb[48].mxu1 %v2370_v25  ;;  %v14798_v25 = vld [vmem:[%s18237_s1 + $0x908] sm:$0xff]  }
 0x17f   : > { %13038 = vmatpush3.bf16.msra.mxu1 %v14780_v39  ;;  %13045 = vmatprep.mubr.bf16.mxu1 %v16191_v53  ;;  %v14789_v53 = vld [vmem:[%s18237_s1 + $0x2f8] sm:$0xff]   ;;  %v16583_v39 = vld [vmem:[%s15180_s14 + $0xb0] sm:$0xf] }
 0x180   : > { %13710 = vmatpush3.bf16.msra.mxu0 %v14782_v16  ;;  %13039 = vmatprep.subr.bf16.mxu1 %v14784_v38  ;;  %v11554_v16 = vld [vmem:[%s15180_s14 + $0xb4] sm:$0x7] }
 0x181   : > { %13711 = vmatprep.subr.bf16.mxu0 %v14785_v42  ;;  %13698 = vmatmul.mubr.bf16.gmra.mrb[48].mxu0 %v7268_v5  ;;  %v11585_v5 = vld [vmem:[%s15180_s14 + $0xc8] sm:$0x8] }
 0x182   : > { %13717 = vmatprep.mubr.bf16.mxu0 %v7475_v27  ;;  %v11587_v27 = vld [vmem:[%s15180_s14 + $0xd0] sm:$0xf] }
 0x183   : > { %13040 = vmatpush3.bf16.msra.mxu1 %v14784_v38  ;;  %v16591_v38 = vcombine.low %v11551_v11, %v11552_v47  ;;  %v16626_v47 = vcombine.low %v11587_v27, %v11588_v20  ;;  %v11590_v27 = vld [vmem:[%s15180_s14 + $0xdc] sm:$0xf]  ;;  %v11592_v20 = vld [vmem:[%s15180_s14 + $0xe4] sm:$0xf] }
 0x184   : > { %13712 = vmatpush3.bf16.msra.mxu0 %v14785_v42  ;;  %13041 = vmatprep.subr.bf16.mxu1 %v14786_v40  ;;  %v11576_v42 = vcombine.low %v16583_v39, %v11554_v16 }
 0x185   : > { %13713 = vmatprep.subr.bf16.mxu0 %v14788_v7  ;;  %v7480_v52 = vrot.slane %v16591_v38, 3 }
 0x187   : > { %13042 = vmatpush3.bf16.msra.mxu1 %v14786_v40  ;;  %v7481_v16 = vsel %vm4358_vm4, %v7478_v28, %v7480_v52 }
 0x188   : > { %13714 = vmatpush3.bf16.msra.mxu0 %v14788_v7  ;;  %13043 = vmatprep.subr.bf16.mxu1 %v14789_v53  ;;  %v11586_v7 = vld [vmem:[%s15180_s14 + $0xcc] sm:$0xf] }
 0x189   : > { %13715 = vmatprep.subr.bf16.mxu0 %v14790_v57  ;;  %v16624_v11 = vcombine.low %v11585_v5, %v11586_v7  ;;  %v18327_v5 = vrot.slane %v16196_v2, 1  ;;  %v11589_v2 = vld [vmem:[%s15180_s14 + $0xd8] sm:$0xf] }
 0x18b   : > { %13044 = vmatpush3.bf16.msra.mxu1 %v14789_v53  ;;  %v7688_v28 = vrot.slane %v16624_v11, 3 }
 0x18c   : > { %13716 = vmatpush3.bf16.msra.mxu0 %v14790_v57  ;;  %13057 = vmatprep.subr.bf16.mxu1 %v14792_v54 }
 0x18d   : > { %13729 = vmatprep.subr.bf16.mxu0 %v14795_v51 }
 0x18e   : > { %13046 = vmatmul.mubr.bf16.vlgmr.msra.gmra.mrb[0].mxu1 %v16161_v4  ;;  %v14800_v4 = vld [vmem:[%s18237_s1 + $0x910] sm:$0xff]  }
 0x18f   : > { %13058 = vmatpush3.bf16.msra.mxu1 %v14792_v54  ;;  %13718 = vmatmul.mubr.bf16.vlgmr.msra.gmra.mrb[0].mxu0 %v7477_v22 }
 0x190   : > { %13730 = vmatpush3.bf16.msra.mxu0 %v14795_v51  ;;  %13059 = vmatprep.subr.bf16.mxu1 %v14797_v3 }
 0x191   : > { %v12859_v40 = vpop.f32.mrb[24].mxu1  ;;  %13731 = vmatprep.subr.bf16.mxu0 %v14798_v25  ;;  %13049 = vmatprep.mubr.bf16.mxu1 %v16172_v45  ;;  %v7482_v45 = vrot.slane %v11576_v42, 3  ;;  %v14808_v42 = vld [vmem:[%s18237_s1 + $0x928] sm:$0xff]  }
 0x192   : > { %v16606_v48 = vadd.f32 %v12859_v40, %v16499_v41  ;;  %v1208_v8 = vpop.f32.mrb[25].mxu1  ;;  %13721 = vmatprep.mubr.bf16.mxu0 %v7479_v0  ;;  %v14803_v0 = vld [vmem:[%s18237_s1 + $0x320] sm:$0xff]   ;;  %v14809_v40 = vld [vmem:[%s18237_s1 + $0x330] sm:$0xff]  }
 0x193   : > { %v16611_v53 = vadd.f32 %v1208_v8, %v16507_v63  ;;  %v12860_v57 = vpop.f32.mrb[26].mxu1  ;;  %13060 = vmatpush3.bf16.msra.mxu1 %v14797_v3  ;;  %v14802_v63 = vld [vmem:[%s18237_s1 + $0x918] sm:$0xff]  }
 0x194   : > { %13732 = vmatpush3.bf16.msra.mxu0 %v14798_v25  ;;  %v1211_v54 = vpop.f32.mrb[27].mxu1  ;;  %13061 = vmatprep.subr.bf16.mxu1 %v14799_v62  ;;  %v16616_v41 = vpop.f32.mrb[24].mxu0  ;;  %v14812_v8 = vld [vmem:[%s18237_s1 + $0x338] sm:$0xff]   ;;  %v11593_v57 = vld [vmem:[%s15180_s14 + $0xe8] sm:$0xf] }
 0x195   : > { %v16619_v51 = vadd.f32 %v1211_v54, %v16516_v21  ;;  %13733 = vmatprep.subr.bf16.mxu0 %v14800_v4  ;;  %v16628_v3 = vpop.f32.mrb[25].mxu0  ;;  %v7483_v21 = vsel %vm4358_vm4, %v7480_v52, %v7482_v45  ;;  %v11591_v52 = vld [vmem:[%s15180_s14 + $0xe0] sm:$0xf]  ;;  %v11594_v54 = vld [vmem:[%s15180_s14 + $0xec] sm:$0xf] }
 0x196   : > { %13050 = vmatmul.mubr.bf16.gmra.mrb[4].mxu1 %v16182_v44  ;;  %v13532_v22 = vpop.f32.mrb[26].mxu0  ;;  %v14805_v44 = vld [vmem:[%s18237_s1 + $0x920] sm:$0xff]  }
 0x197   : > { %13062 = vmatpush3.bf16.msra.mxu1 %v14799_v62  ;;  %13053 = vmatprep.mubr.bf16.mxu1 %v16210_v6  ;;  %v16634_v25 = vpop.f32.mrb[27].mxu0  ;;  %v7689_v6 = vrot.slane %v16626_v47, 3  ;;  %v14807_v62 = vld [vmem:[%s18237_s1 + $0x328] sm:$0xff]   ;;  %v18328_v22 = vshrl.u32 %v16141_v49, 16 }
 0x198   : > { %18326 = vst [vmem:[#allocation8_spill] sm:$0xff] %v16634_v25  ;;  %13734 = vmatpush3.bf16.msra.mxu0 %v14800_v4  ;;  %13063 = vmatprep.subr.bf16.mxu1 %v14801_v31  ;;  %v14811_v4 = vld [vmem:[%s18237_s1 + $0x930] sm:$0xff]  }
 0x199   : > { %13735 = vmatprep.subr.bf16.mxu0 %v14802_v63  ;;  %13722 = vmatmul.mubr.bf16.gmra.mrb[4].mxu0 %v7481_v16  ;;  %v7690_v7 = vsel %vm4358_vm4, %v7688_v28, %v7689_v6  ;;  %v16678_v16 = vcombine.low %v11591_v52, %v11592_v20  ;;  %v2895_v52 = vshll.u32 %v16169_v9, 16 }
 0x19a   : > { %13725 = vmatprep.mubr.bf16.mxu0 %v7483_v21  ;;  %v16682_v21 = vrot.slane %v18328_v22, 1 }
 0x19b   : > { %13064 = vmatpush3.bf16.msra.mxu1 %v14801_v31  ;;  %v16672_v31 = vcombine.low %v11589_v2, %v11590_v27 }
 0x19c   : > { %13736 = vmatpush3.bf16.msra.mxu0 %v14802_v63  ;;  %13065 = vmatprep.subr.bf16.mxu1 %v14803_v0  ;;  %v16675_v63 = vld [vmem:[%s15180_s14 + $0xf0] sm:$0xf] }
 0x19d   : > { %13737 = vmatprep.subr.bf16.mxu0 %v14805_v44  ;;  %v7691_v28 = vrot.slane %v16672_v31, 3 }
 0x19e   : > { %13054 = vmatmul.mubr.bf16.gmra.mrb[52].mxu1 %v18327_v5 }
 0x19f   : > { %13066 = vmatpush3.bf16.msra.mxu1 %v14803_v0  ;;  %13073 = vmatprep.mubr.bf16.mxu1 %v16296_v13  ;;  %v14813_v13 = vld [vmem:[%s18237_s1 + $0x938] sm:$0xff]   ;;  %v14815_v0 = vld [vmem:[%s18237_s1 + $0x340] sm:$0xff]   ;;  %v7692_v2 = vsel %vm4358_vm4, %v7689_v6, %v7691_v28  ;;  %v14822_v6 = vld [vmem:[%s18237_s1 + $0x350] sm:$0xff]  }
 0x1a0   : > { %13738 = vmatpush3.bf16.msra.mxu0 %v14805_v44  ;;  %13067 = vmatprep.subr.bf16.mxu1 %v14807_v62  ;;  %v14818_v44 = vld [vmem:[%s18237_s1 + $0x940] sm:$0xff]  }
 0x1a1   : > { %13739 = vmatprep.subr.bf16.mxu0 %v14808_v42  ;;  %13726 = vmatmul.mubr.bf16.gmra.mrb[52].mxu0 %v7482_v45  ;;  %v11596_v45 = vld [vmem:[%s15180_s14 + $0xf4] sm:$0x7] }
 0x1a2   : > { %13745 = vmatprep.mubr.bf16.mxu0 %v7690_v7  ;;  %v11618_v5 = vcombine.low %v16675_v63, %v11596_v45  ;;  %v7693_v7 = vrot.slane %v16678_v16, 3  ;;  %v18330_v45 = vshll.u32 %v16134_v10, 16 }
 0x1a3   : > { %13068 = vmatpush3.bf16.msra.mxu1 %v14807_v62  ;;  %v16691_v62 = vcombine.low %v11593_v57, %v11594_v54 }
 0x1a4   : > { %13740 = vmatpush3.bf16.msra.mxu0 %v14808_v42  ;;  %13069 = vmatprep.subr.bf16.mxu1 %v14809_v40  ;;  %v2892_v42 = vshrl.u32 %v16169_v9, 16  ;;  %v16705_v20 = vrot.slane %v11618_v5, 3  ;;  %v2900_v22 = vrot.slane %v18330_v45, 2  ;;  %v14823_v9 = vld [vmem:[%s18237_s1 + $0x950] sm:$0xff]   ;;  %v7869_v5 = vshll.u32 %v16526_v29, 16 }
 0x1a5   : > { %13741 = vmatprep.subr.bf16.mxu0 %v14811_v4  ;;  %v7695_v27 = vrot.slane %v16691_v62, 3  ;;  %v7883_v45 = vshrl.u32 %v16562_v19, 16 }
 0x1a6   : > { %v16707_v57 = vrot.slane %v2892_v42, 1  ;;  %v7871_v25 = vrot.slane %v7869_v5, 4 }
 0x1a7   : > { %13070 = vmatpush3.bf16.msra.mxu1 %v14809_v40  ;;  %v14820_v40 = vld [vmem:[%s18237_s1 + $0x348] sm:$0xff]  }
 0x1a8   : > { %13742 = vmatpush3.bf16.msra.mxu0 %v14811_v4  ;;  %13071 = vmatprep.subr.bf16.mxu1 %v14812_v8  ;;  %v14821_v4 = vld [vmem:[%s18237_s1 + $0x948] sm:$0xff]  }
 0x1a9   : > { %13743 = vmatprep.subr.bf16.mxu0 %v14813_v13 }
 0x1ab   : > { %13072 = vmatpush3.bf16.msra.mxu1 %v14812_v8  ;;  %v18329_v8 = vshrl.u32 %v16134_v10, 16  ;;  %v2897_v10 = vrot.slane %v2895_v52, 2 }
 0x1ac   : > { %13744 = vmatpush3.bf16.msra.mxu0 %v14813_v13  ;;  %13085 = vmatprep.subr.bf16.mxu1 %v14815_v0  ;;  %v7694_v13 = vsel %vm4358_vm4, %v7691_v28, %v7693_v7 }
 0x1ad   : > { %13757 = vmatprep.subr.bf16.mxu0 %v14818_v44  ;;  %v2899_v54 = vrot.slane %v18329_v8, 1  ;;  %v14824_v8 = vld [vmem:[%s18237_s1 + $0x358] sm:$0xff]  }
 0x1ae   : > { %13074 = vmatmul.mubr.bf16.vlgmr.msra.gmra.mrb[0].mxu1 %v16226_v60  ;;  %v7866_v60 = vshrl.u32 %v16526_v29, 16  ;;  %v14825_v29 = vld [vmem:[%s18237_s1 + $0x958] sm:$0xff]  }
 0x1af   : > { %13086 = vmatpush3.bf16.msra.mxu1 %v14815_v0  ;;  %13746 = vmatmul.mubr.bf16.vlgmr.msra.gmra.mrb[0].mxu0 %v7692_v2 }
 0x1b0   : > { %13758 = vmatpush3.bf16.msra.mxu0 %v14818_v44  ;;  %13087 = vmatprep.subr.bf16.mxu1 %v14820_v40  ;;  %v7874_v44 = vshrl.u32 %v16528_v34, 16 }
 0x1b1   : > { %v12887_v42 = vpop.f32.mrb[28].mxu1  ;;  %13759 = vmatprep.subr.bf16.mxu0 %v14821_v4  ;;  %13077 = vmatprep.mubr.bf16.mxu1 %v16312_v43 }
 0x1b2   : > { %v16725_v0 = vadd.f32 %v12887_v42, %v16606_v48  ;;  %v1385_v2 = vpop.f32.mrb[29].mxu1  ;;  %13749 = vmatprep.mubr.bf16.mxu0 %v7694_v13  ;;  %v7877_v48 = vshll.u32 %v16528_v34, 16  ;;  %v7886_v13 = vshll.u32 %v16562_v19, 16  ;;  %v14826_v19 = vld [vmem:[%s18237_s1 + $0x360] sm:$0xff]  }
 0x1b3   : > { %v16732_v28 = vadd.f32 %v1385_v2, %v16611_v53  ;;  %v12888_v43 = vpop.f32.mrb[30].mxu1  ;;  %13088 = vmatpush3.bf16.msra.mxu1 %v14820_v40  ;;  %v18331_v40 = vshll.u32 %v16141_v49, 16  ;;  %v14828_v49 = vld [vmem:[%s18237_s1 + $0x960] sm:$0xff]  }
 0x1b4   : > { %13760 = vmatpush3.bf16.msra.mxu0 %v14821_v4  ;;  %v1388_v52 = vpop.f32.mrb[31].mxu1  ;;  %13089 = vmatprep.subr.bf16.mxu1 %v14822_v6  ;;  %v16740_v42 = vpop.f32.mrb[28].mxu0  ;;  %v7868_v43 = vrot.slane %v7866_v60, 3  ;;  %v7696_v4 = vsel %vm4358_vm4, %v7693_v7, %v7695_v27  ;;  %v7698_v60 = vsel %vm4358_vm4, %v7695_v27, %v16705_v20  ;;  %v16765_v7 = vor.u32 %v2900_v22, %v2899_v54  ;;  %v14831_v27 = vld [vmem:[%s18237_s1 + $0x968] sm:$0xff]  }
 0x1b5   : > { %v16743_v53 = vadd.f32 %v1388_v52, %v16619_v51  ;;  %13761 = vmatprep.subr.bf16.mxu0 %v14823_v9  ;;  %v16747_v2 = vrot.slane %v18331_v40, 2  ;;  %v16749_v34 = vpop.f32.mrb[29].mxu0  ;;  %v7876_v51 = vrot.slane %v7874_v44, 3  ;;  %v2898_v40 = vor.u32 %v2897_v10, %v16707_v57 }
 0x1b6   : > { %18332 = vst [vmem:[#allocation9_spill] sm:$0xff] %v16749_v34  ;;  %13078 = vmatmul.mubr.bf16.gmra.mrb[4].mxu1 %v16316_v37  ;;  %v13560_v52 = vpop.f32.mrb[30].mxu0  ;;  %v7879_v37 = vrot.slane %v7877_v48, 4  ;;  %v7885_v44 = vrot.slane %v7883_v45, 3  ;;  %v18334_v54 = vshrl.u32 %v16151_v58, 16  ;;  %v18335_v10 = vshll.u32 %v16151_v58, 16 }
 0x1b7   : > { %13090 = vmatpush3.bf16.msra.mxu1 %v14822_v6  ;;  %13081 = vmatprep.mubr.bf16.mxu1 %v16324_v17  ;;  %v16762_v5 = vpop.f32.mrb[31].mxu0  ;;  %v7888_v6 = vrot.slane %v7886_v13, 4  ;;  %v10891_v17 = vld [vmem:[%s15180_s14 + $0xac] sm:$0x3]  ;;  %v2902_v45 = vsel %vm1431_vm5, %v2898_v40, %v16765_v7  ;;  %v15064_v13 = vld [vmem:[%s15180_s14 + $0xa8] sm:$0xf] }
 0x1b8   : > { %18333 = vst [vmem:[#allocation10_spill] sm:$0xff] %v16762_v5  ;;  %13762 = vmatpush3.bf16.msra.mxu0 %v14823_v9  ;;  %13091 = vmatprep.subr.bf16.mxu1 %v14824_v8  ;;  %v14830_v52 = vld [vmem:[%s18237_s1 + $0x368] sm:$0xff]   ;;  %v7872_v9 = vor.u32 %v7871_v25, %v7868_v43  ;;  %v16774_v57 = vor.u32 %v7879_v37, %v7876_v51  ;;  %v2907_v22 = vrot.slane %v18334_v54, 1  ;;  %v2908_v48 = vrot.slane %v18335_v10, 2  ;;  %v14834_v37 = vld [vmem:[%s18237_s1 + $0x970] sm:$0xff]  }
 0x1b9   : > { %13763 = vmatprep.subr.bf16.mxu0 %v14825_v29  ;;  %13750 = vmatmul.mubr.bf16.gmra.mrb[4].mxu0 %v7696_v4  ;;  %v18336_v4 = vshrl.u32 %v16158_v24, 16  ;;  %v7892_v43 = vshrl.u32 %v16567_v15, 16  ;;  %v7895_v51 = vshll.u32 %v16567_v15, 16  ;;  %v7901_v58 = vshrl.u32 %v16591_v38, 16  ;;  %v3069_v54 = vld [vmem:[%s15180_s14 + $0x4] sm:$0xe] }
 0x1ba   : > { %13753 = vmatprep.mubr.bf16.mxu0 %v7698_v60  ;;  %v14832_v60 = vld [vmem:[%s18237_s1 + $0x370] sm:$0xff]   ;;  %v7881_v40 = vsel %vm6409_vm6, %v7872_v9, %v16774_v57  ;;  %v7904_v15 = vshll.u32 %v16591_v38, 16  ;;  %v16812_v10 = vld [vmem:[%s15180_s14 + $0x8] sm:$0xf] }
 0x1bb   : > { %13092 = vmatpush3.bf16.msra.mxu1 %v14824_v8  ;;  %v10908_v8 = vcombine.low %v15064_v13, %v10891_v17  ;;  %v16785_v25 = vrot.slane %v18336_v4, 1  ;;  %v11627_v17 = vld [vmem:[%s15180_s14 + $0xb4] sm:$0xf]  ;;  %v7897_v13 = vrot.slane %v7895_v51, 4 }
 0x1bc   : > { %13764 = vmatpush3.bf16.msra.mxu0 %v14825_v29  ;;  %13093 = vmatprep.subr.bf16.mxu1 %v14826_v19  ;;  %v18337_v29 = vrot.slane %v16291_v33, 1  ;;  %v11644_v9 = vcombine.low %v16583_v39, %v11627_v17  ;;  %v14837_v39 = vld [vmem:[%s18237_s1 + $0x380] sm:$0xff]   ;;  %v14839_v17 = vld [vmem:[%s18237_s1 + $0x388] sm:$0xff]  }
 0x1bd   : > { %13765 = vmatprep.subr.bf16.mxu0 %v14828_v49  ;;  %v2916_v33 = vshrl.u32 %v10908_v8, 16  ;;  %v2919_v38 = vshll.u32 %v10908_v8, 16  ;;  %v7889_v8 = vor.u32 %v7888_v6, %v7885_v44  ;;  %v7906_v6 = vrot.slane %v7904_v15, 4 }
 0x1be   : > { %13082 = vmatmul.mubr.bf16.gmra.mrb[56].mxu1 %v18337_v29  ;;  %v7910_v4 = vshrl.u32 %v11644_v9, 16  ;;  %v7913_v29 = vshll.u32 %v11644_v9, 16  ;;  %v2909_v9 = vor.u32 %v2908_v48, %v2907_v22 }
 0x1bf   : > { %13094 = vmatpush3.bf16.msra.mxu1 %v14826_v19  ;;  %13101 = vmatprep.mubr.bf16.mxu1 %v2902_v45  ;;  %v14835_v19 = vld [vmem:[%s18237_s1 + $0x378] sm:$0xff]   ;;  %v16815_v45 = vld [vmem:[%s15180_s14 + $0xc] sm:$0xff]   ;;  %v2918_v44 = vrot.slane %v2916_v33, 1 }
 0x1c0   : > { %13766 = vmatpush3.bf16.msra.mxu0 %v14828_v49  ;;  %13095 = vmatprep.subr.bf16.mxu1 %v14830_v52  ;;  %v14836_v49 = vld [vmem:[%s18237_s1 + $0x978] sm:$0xff]   ;;  %v7915_v51 = vrot.slane %v7913_v29, 4  ;;  %v18277_v34 = vshll.u32 %v16815_v45, 16  ;;  %v18339_v48 = vshrl.u32 %v16815_v45, 16 }
 0x1c1   : > { %13767 = vmatprep.subr.bf16.mxu0 %v14831_v27  ;;  %13754 = vmatmul.mubr.bf16.gmra.mrb[56].mxu0 %v16705_v20  ;;  %v2905_v20 = vor.u32 %v16747_v2, %v16682_v21  ;;  %v7903_v2 = vrot.slane %v7901_v58, 3  ;;  %v2921_v58 = vrot.slane %v2919_v38, 2 }
 0x1c2   : > { %13773 = vmatprep.mubr.bf16.mxu0 %v7881_v40  ;;  %v18338_v40 = vshll.u32 %v16158_v24, 16  ;;  %v14840_v24 = vld [vmem:[%s18237_s1 + $0x988] sm:$0xff]   ;;  %v3139_v33 = vrot.slane %v18339_v48, 1 }
 0x1c3   : > { %13096 = vmatpush3.bf16.msra.mxu1 %v14830_v52  ;;  %v7894_v52 = vrot.slane %v7892_v43, 3  ;;  %v10933_v43 = vcombine.low %v3069_v54, %v16812_v10  ;;  %v2910_v38 = vsel %vm1431_vm5, %v2905_v20, %v2909_v9 }
 0x1c4   : > { %13768 = vmatpush3.bf16.msra.mxu0 %v14831_v27  ;;  %13097 = vmatprep.subr.bf16.mxu1 %v14832_v60  ;;  %v14838_v27 = vld [vmem:[%s18237_s1 + $0x980] sm:$0xff]   ;;  %v2912_v21 = vrot.slane %v18338_v40, 2  ;;  %v7912_v40 = vrot.slane %v7910_v4, 3  ;;  %v14842_v4 = vld [vmem:[%s18237_s1 + $0x990] sm:$0xff]  }
 0x1c5   : > { %13769 = vmatprep.subr.bf16.mxu0 %v14834_v37  ;;  %v7898_v54 = vor.u32 %v7897_v13, %v7894_v52  ;;  %v3129_v5 = vshrl.u32 %v10933_v43, 16  ;;  %v3132_v22 = vshll.u32 %v10933_v43, 16  ;;  %v8088_v52 = vshll.u32 %v16624_v11, 16 }
 0x1c6   : > { %v2913_v13 = vor.u32 %v2912_v21, %v16785_v25  ;;  %v8093_v25 = vshrl.u32 %v16626_v47, 16  ;;  %v16878_v48 = vor.u32 %v7915_v51, %v7912_v40  ;;  %v8102_v51 = vshrl.u32 %v16672_v31, 16 }
 0x1c7   : > { %13098 = vmatpush3.bf16.msra.mxu1 %v14832_v60  ;;  %v16830_v60 = vld [vmem:[%s15180_s14 + $0x14] sm:$0xff]   ;;  %v7899_v29 = vsel %vm6409_vm6, %v7889_v8, %v7898_v54 }
 0x1c8   : > { %13770 = vmatpush3.bf16.msra.mxu0 %v14834_v37  ;;  %13099 = vmatprep.subr.bf16.mxu1 %v14835_v19  ;;  %v2906_v37 = vsel %vm1431_vm5, %v16765_v7, %v2905_v20  ;;  %v7890_v7 = vsel %vm6409_vm6, %v16774_v57, %v7889_v8  ;;  %v18276_v15 = vshrl.u32 %v16830_v60, 16  ;;  %v8085_v57 = vshrl.u32 %v16624_v11, 16 }
 0x1c9   : > { %13771 = vmatprep.subr.bf16.mxu0 %v14836_v49  ;;  %v16858_v20 = vor.u32 %v2921_v58, %v2918_v44  ;;  %v3142_v11 = vrot.slane %v18277_v34, 2  ;;  %v7907_v8 = vor.u32 %v7906_v6, %v7903_v2  ;;  %v3134_v44 = vrot.slane %v3132_v22, 2 }
 0x1ca   : > { %v8087_v2 = vrot.slane %v8085_v57, 3  ;;  %v8090_v6 = vrot.slane %v8088_v52, 4  ;;  %v8095_v22 = vrot.slane %v8093_v25, 3 }
 0x1cb   : > { %13100 = vmatpush3.bf16.msra.mxu1 %v14835_v19  ;;  %v18275_v19 = vshll.u32 %v16830_v60, 16 }
 0x1cc   : > { %13772 = vmatpush3.bf16.msra.mxu0 %v14836_v49  ;;  %13113 = vmatprep.subr.bf16.mxu1 %v14837_v39  ;;  %v14841_v49 = vld [vmem:[%s18237_s1 + $0x390] sm:$0xff]  }
 0x1cd   : > { %13785 = vmatprep.subr.bf16.mxu0 %v14838_v27 }
 0x1ce   : > { %13102 = vmatmul.mubr.bf16.vlgmr.msra.gmra.mrb[0].mxu1 %v2906_v37  ;;  %v16860_v37 = vrot.slane %v3129_v5, 1 }
 0x1cf   : > { %13114 = vmatpush3.bf16.msra.mxu1 %v14837_v39  ;;  %13774 = vmatmul.mubr.bf16.vlgmr.msra.gmra.mrb[0].mxu0 %v7890_v7  ;;  %v2914_v7 = vsel %vm1431_vm5, %v2909_v9, %v2913_v13 }
 0x1d0   : > { %13786 = vmatpush3.bf16.msra.mxu0 %v14838_v27  ;;  %13115 = vmatprep.subr.bf16.mxu1 %v14839_v17  ;;  %v14843_v27 = vld [vmem:[%s18237_s1 + $0x398] sm:$0xff]   ;;  %v3135_v25 = vor.u32 %v3134_v44, %v16860_v37  ;;  %v8091_v37 = vor.u32 %v8090_v6, %v8087_v2  ;;  %v3080_v2 = vld [vmem:[%s15180_s14 + $0x30] sm:$0x3] }
 0x1d1   : > { %v12915_v43 = vpop.f32.mrb[32].mxu1  ;;  %13787 = vmatprep.subr.bf16.mxu0 %v14840_v24  ;;  %13105 = vmatprep.mubr.bf16.mxu1 %v2910_v38  ;;  %v8096_v38 = vshll.u32 %v16626_v47, 16  ;;  %v8105_v47 = vshll.u32 %v16672_v31, 16  ;;  %v14846_v31 = vld [vmem:[%s18237_s1 + $0x3a0] sm:$0xff]  }
 0x1d2   : > { %v16866_v39 = vadd.f32 %v12915_v43, %v16725_v0  ;;  %v1585_v21 = vpop.f32.mrb[33].mxu1  ;;  %13777 = vmatprep.mubr.bf16.mxu0 %v7899_v29  ;;  %v14844_v0 = vld [vmem:[%s18237_s1 + $0x998] sm:$0xff]  }
 0x1d3   : > { %v16872_v58 = vadd.f32 %v1585_v21, %v16732_v28  ;;  %v12916_v5 = vpop.f32.mrb[34].mxu1  ;;  %13116 = vmatpush3.bf16.msra.mxu1 %v14839_v17  ;;  %v2923_v28 = vsel %vm1431_vm5, %v2913_v13, %v16858_v20  ;;  %v16894_v43 = vld [vmem:[%s15180_s14 + $0x1c] sm:$0xff]   ;;  %v8098_v52 = vrot.slane %v8096_v38, 4  ;;  %v3148_v21 = vrot.slane %v18276_v15, 1 }
 0x1d4   : > { %13788 = vmatpush3.bf16.msra.mxu0 %v14840_v24  ;;  %v1588_v29 = vpop.f32.mrb[35].mxu1  ;;  %13117 = vmatprep.subr.bf16.mxu1 %v14841_v49  ;;  %v16883_v17 = vpop.f32.mrb[32].mxu0  ;;  %v7908_v24 = vsel %vm6409_vm6, %v7898_v54, %v7907_v8  ;;  %v16904_v54 = vor.u32 %v3142_v11, %v3139_v33  ;;  %v3151_v33 = vrot.slane %v18275_v19, 2  ;;  %v8104_v11 = vrot.slane %v8102_v51, 3 }
 0x1d5   : > { %v16886_v9 = vadd.f32 %v1588_v29, %v16743_v53  ;;  %13789 = vmatprep.subr.bf16.mxu0 %v14842_v4  ;;  %v16890_v40 = vpop.f32.mrb[33].mxu0  ;;  %v7917_v53 = vsel %vm6409_vm6, %v7907_v8, %v16878_v48  ;;  %v14849_v8 = vld [vmem:[%s18237_s1 + $0x9a8] sm:$0xff]   ;;  %v16919_v44 = vor.u32 %v8098_v52, %v8095_v22  ;;  %v8107_v5 = vrot.slane %v8105_v47, 4  ;;  %v14852_v22 = vld [vmem:[%s18237_s1 + $0x9b0] sm:$0xff]  }
 0x1d6   : > { %18340 = vst [vmem:[#allocation11_spill] sm:$0xff] %v16890_v40  ;;  %13106 = vmatmul.mubr.bf16.gmra.mrb[4].mxu1 %v2914_v7  ;;  %v13588_v57 = vpop.f32.mrb[34].mxu0  ;;  %v18274_v7 = vshrl.u32 %v16894_v43, 16  ;;  %v18273_v38 = vshll.u32 %v16894_v43, 16  ;;  %v16924_v29 = vld [vmem:[%s15180_s14 + $0x24] sm:$0xff]  }
 0x1d7   : > { %13118 = vmatpush3.bf16.msra.mxu1 %v14841_v49  ;;  %13109 = vmatprep.mubr.bf16.mxu1 %v2923_v28  ;;  %v16898_v13 = vpop.f32.mrb[35].mxu0  ;;  %v14847_v49 = vld [vmem:[%s18237_s1 + $0x9a0] sm:$0xff]   ;;  %v3144_v28 = vsel %vm1431_vm5, %v3135_v25, %v16904_v54  ;;  %v8100_v6 = vsel %vm6409_vm6, %v8091_v37, %v16919_v44  ;;  %v18279_v51 = vshrl.u32 %v16924_v29, 16  ;;  %v14853_v57 = vld [vmem:[%s18237_s1 + $0x3b8] sm:$0xff]  }
 0x1d8   : > { %18341 = vst [vmem:[#allocation12_spill] sm:$0xff] %v16898_v13  ;;  %13790 = vmatpush3.bf16.msra.mxu0 %v14842_v4  ;;  %13119 = vmatprep.subr.bf16.mxu1 %v14843_v27  ;;  %v14848_v4 = vld [vmem:[%s18237_s1 + $0x3a8] sm:$0xff]   ;;  %v3157_v52 = vrot.slane %v18274_v7, 1  ;;  %v14854_v25 = vld [vmem:[%s18237_s1 + $0x9b8] sm:$0xff]   ;;  %v8120_v7 = vshrl.u32 %v16691_v62, 16 }
 0x1d9   : > { %13791 = vmatprep.subr.bf16.mxu0 %v14844_v0  ;;  %13778 = vmatmul.mubr.bf16.gmra.mrb[4].mxu0 %v7908_v24  ;;  %v8114_v24 = vshll.u32 %v16678_v16, 16 }
 0x1da   : > { %13781 = vmatprep.mubr.bf16.mxu0 %v7917_v53  ;;  %v16949_v53 = vld [vmem:[%s15180_s14 + $0xf4] sm:$0xf] }
 0x1db   : > { %13120 = vmatpush3.bf16.msra.mxu1 %v14843_v27  ;;  %v3079_v27 = vld [vmem:[%s15180_s14 + $0x2c] sm:$0xf]  ;;  %v8116_v37 = vrot.slane %v8114_v24, 4 }
 0x1dc   : > { %13792 = vmatpush3.bf16.msra.mxu0 %v14844_v0  ;;  %13121 = vmatprep.subr.bf16.mxu1 %v14846_v31  ;;  %v14850_v0 = vld [vmem:[%s18237_s1 + $0x3b0] sm:$0xff]   ;;  %v16940_v47 = vcombine.low %v3079_v27, %v3080_v2  ;;  %v10947_v27 = vld [vmem:[%s15180_s14 + $0x44] sm:$0xe]  ;;  %v16965_v2 = vld [vmem:[%s15180_s14 + $0x48] sm:$0xf] }
 0x1dd   : > { %13793 = vmatprep.subr.bf16.mxu0 %v14847_v49 }
 0x1de   : > { %13110 = vmatmul.mubr.bf16.gmra.mrb[60].mxu1 %v16858_v20  ;;  %v8111_v20 = vshrl.u32 %v16678_v16, 16  ;;  %v3160_v16 = vrot.slane %v18273_v38, 2  ;;  %v8108_v38 = vor.u32 %v8107_v5, %v8104_v11  ;;  %v3166_v11 = vrot.slane %v18279_v51, 1 }
 0x1df   : > { %13122 = vmatpush3.bf16.msra.mxu1 %v14846_v31  ;;  %13129 = vmatprep.mubr.bf16.mxu1 %v3144_v28  ;;  %v3173_v31 = vshrl.u32 %v16940_v47, 16  ;;  %v3152_v28 = vor.u32 %v3151_v33, %v3148_v21  ;;  %v10975_v5 = vcombine.low %v10947_v27, %v16965_v2 }
 0x1e0   : > { %13794 = vmatpush3.bf16.msra.mxu0 %v14847_v49  ;;  %13123 = vmatprep.subr.bf16.mxu1 %v14848_v4  ;;  %v3176_v49 = vshll.u32 %v16940_v47, 16  ;;  %v3161_v24 = vor.u32 %v3160_v16, %v3157_v52  ;;  %v8109_v52 = vsel %vm6409_vm6, %v16919_v44, %v8108_v38  ;;  %v8122_v16 = vrot.slane %v8120_v7, 3 }
 0x1e1   : > { %13795 = vmatprep.subr.bf16.mxu0 %v14849_v8  ;;  %13782 = vmatmul.mubr.bf16.gmra.mrb[60].mxu0 %v16878_v48  ;;  %v18278_v48 = vshll.u32 %v16924_v29, 16  ;;  %v3153_v19 = vsel %vm1431_vm5, %v16904_v54, %v3152_v28  ;;  %v3175_v15 = vrot.slane %v3173_v31, 1  ;;  %v14864_v31 = vld [vmem:[%s18237_s1 + $0x3d0] sm:$0xff]  }
 0x1e2   : > { %13801 = vmatprep.mubr.bf16.mxu0 %v8100_v6  ;;  %v14858_v6 = vld [vmem:[%s18237_s1 + $0x3c0] sm:$0xff]   ;;  %v3178_v34 = vrot.slane %v3176_v49, 2  ;;  %v3162_v40 = vsel %vm1431_vm5, %v3152_v28, %v3161_v24  ;;  %v3389_v49 = vshll.u32 %v10975_v5, 16 }
 0x1e3   : > { %13124 = vmatpush3.bf16.msra.mxu1 %v14848_v4  ;;  %v8113_v4 = vrot.slane %v8111_v20, 3  ;;  %v8123_v20 = vshll.u32 %v16691_v62, 16  ;;  %v3169_v62 = vrot.slane %v18278_v48, 2 }
 0x1e4   : > { %13796 = vmatpush3.bf16.msra.mxu0 %v14849_v8  ;;  %13125 = vmatprep.subr.bf16.mxu1 %v14850_v0  ;;  %v11670_v8 = vcombine.low %v16675_v63, %v16949_v53  ;;  %v14859_v63 = vld [vmem:[%s18237_s1 + $0x9c0] sm:$0xff]  }
 0x1e5   : > { %13797 = vmatprep.subr.bf16.mxu0 %v14852_v22  ;;  %v8117_v13 = vor.u32 %v8116_v37, %v8113_v4  ;;  %v8125_v48 = vrot.slane %v8123_v20, 4  ;;  %v3170_v44 = vor.u32 %v3169_v62, %v3166_v11  ;;  %v3179_v4 = vor.u32 %v3178_v34, %v3175_v15 }
 0x1e6   : > { %v8129_v21 = vshrl.u32 %v11670_v8, 16  ;;  %v8132_v33 = vshll.u32 %v11670_v8, 16  ;;  %v14861_v8 = vld [vmem:[%s18237_s1 + $0x9c8] sm:$0xff]   ;;  %v3391_v62 = vrot.slane %v3389_v49, 2 }
 0x1e7   : > { %13126 = vmatpush3.bf16.msra.mxu1 %v14850_v0  ;;  %v16976_v0 = vld [vmem:[%s15180_s14 + $0x4c] sm:$0xff]   ;;  %v8118_v7 = vsel %vm6409_vm6, %v8108_v38, %v8117_v13  ;;  %v8126_v38 = vor.u32 %v8125_v48, %v8122_v16  ;;  %v3180_v48 = vsel %vm1431_vm5, %v3170_v44, %v3179_v4 }
 0x1e8   : > { %13798 = vmatpush3.bf16.msra.mxu0 %v14852_v22  ;;  %13127 = vmatprep.subr.bf16.mxu1 %v14853_v57  ;;  %v14860_v22 = vld [vmem:[%s18237_s1 + $0x3c8] sm:$0xff]   ;;  %v8131_v27 = vrot.slane %v8129_v21, 3  ;;  %v18287_v51 = vshrl.u32 %v16976_v0, 16  ;;  %v18286_v54 = vshll.u32 %v16976_v0, 16 }
 0x1e9   : > { %13799 = vmatprep.subr.bf16.mxu0 %v14854_v25 }
 0x1ea   : > { %v3396_v34 = vrot.slane %v18287_v51, 1 }
 0x1eb   : > { %13128 = vmatpush3.bf16.msra.mxu1 %v14853_v57  ;;  %v8134_v57 = vrot.slane %v8132_v33, 4 }
 0x1ec   : > { %13800 = vmatpush3.bf16.msra.mxu0 %v14854_v25  ;;  %13141 = vmatprep.subr.bf16.mxu1 %v14858_v6  ;;  %v3386_v25 = vshrl.u32 %v10975_v5, 16 }
 0x1ed   : > { %13813 = vmatprep.subr.bf16.mxu0 %v14859_v63  ;;  %v8135_v21 = vor.u32 %v8134_v57, %v8131_v27  ;;  %v17031_v27 = vld [vmem:[%s15180_s14 + $0x54] sm:$0xff]   ;;  %v14869_v57 = vld [vmem:[%s18237_s1 + $0x3e0] sm:$0xff]  }
 0x1ee   : > { %13130 = vmatmul.mubr.bf16.vlgmr.msra.gmra.mrb[0].mxu1 %v3153_v19  ;;  %v14865_v19 = vld [vmem:[%s18237_s1 + $0x9d0] sm:$0xff]   ;;  %v3388_v11 = vrot.slane %v3386_v25, 1 }
 0x1ef   : > { %13142 = vmatpush3.bf16.msra.mxu1 %v14858_v6  ;;  %13802 = vmatmul.mubr.bf16.vlgmr.msra.gmra.mrb[0].mxu0 %v8109_v52  ;;  %v14866_v6 = vld [vmem:[%s18237_s1 + $0x3d8] sm:$0xff]   ;;  %v8136_v16 = vsel %vm6409_vm6, %v8126_v38, %v8135_v21 }
 0x1f0   : > { %13814 = vmatpush3.bf16.msra.mxu0 %v14859_v63  ;;  %13143 = vmatprep.subr.bf16.mxu1 %v14860_v22  ;;  %v3171_v63 = vsel %vm1431_vm5, %v3161_v24, %v3170_v44  ;;  %v3392_v25 = vor.u32 %v3391_v62, %v3388_v11  ;;  %v18285_v44 = vshrl.u32 %v17031_v27, 16  ;;  %v10958_v11 = vld [vmem:[%s15180_s14 + $0x70] sm:$0x3] }
 0x1f1   : > { %v12943_v37 = vpop.f32.mrb[36].mxu1  ;;  %13815 = vmatprep.subr.bf16.mxu0 %v14861_v8  ;;  %13133 = vmatprep.mubr.bf16.mxu1 %v3162_v40 }
 0x1f2   : > { %v17004_v28 = vadd.f32 %v12943_v37, %v16866_v39  ;;  %v1787_v20 = vpop.f32.mrb[37].mxu1  ;;  %13805 = vmatprep.mubr.bf16.mxu0 %v8118_v7  ;;  %v3399_v39 = vrot.slane %v18286_v54, 2  ;;  %v17046_v7 = vld [vmem:[%s15180_s14 + $0x5c] sm:$0xff]  }
 0x1f3   : > { %v17012_v15 = vadd.f32 %v1787_v20, %v16872_v58  ;;  %v12944_v40 = vpop.f32.mrb[38].mxu1  ;;  %13144 = vmatpush3.bf16.msra.mxu1 %v14860_v22  ;;  %v14867_v22 = vld [vmem:[%s18237_s1 + $0x9d8] sm:$0xff]   ;;  %v14873_v20 = vld [vmem:[%s18237_s1 + $0x3f0] sm:$0xff]  }
 0x1f4   : > { %13816 = vmatpush3.bf16.msra.mxu0 %v14861_v8  ;;  %v1790_v33 = vpop.f32.mrb[39].mxu1  ;;  %13145 = vmatprep.subr.bf16.mxu1 %v14864_v31  ;;  %v17018_v5 = vpop.f32.mrb[36].mxu0  ;;  %v8127_v8 = vsel %vm6409_vm6, %v8117_v13, %v8126_v38  ;;  %v3400_v49 = vor.u32 %v3399_v39, %v3396_v34  ;;  %v14870_v13 = vld [vmem:[%s18237_s1 + $0x9e0] sm:$0xff]   ;;  %v15065_v38 = vld [vmem:[%s15180_s14 + $0x8c] sm:$0xf]  ;;  %v3405_v39 = vrot.slane %v18285_v44, 1 }
 0x1f5   : > { %v17021_v58 = vadd.f32 %v1790_v33, %v16886_v9  ;;  %13817 = vmatprep.subr.bf16.mxu0 %v14865_v19  ;;  %v17026_v24 = vpop.f32.mrb[37].mxu0  ;;  %v15066_v34 = vld [vmem:[%s15180_s14 + $0x90] sm:$0xf]  ;;  %v18280_v33 = vshll.u32 %v17046_v7, 16 }
 0x1f6   : > { %18342 = vst [vmem:[#allocation13_spill] sm:$0xff] %v17026_v24  ;;  %13134 = vmatmul.mubr.bf16.gmra.mrb[4].mxu1 %v3171_v63  ;;  %v13616_v52 = vpop.f32.mrb[38].mxu0  ;;  %v3401_v37 = vsel %vm1431_vm5, %v3392_v25, %v3400_v49  ;;  %v11695_v40 = vcombine.low %v15065_v38, %v15066_v34  ;;  %v14875_v63 = vld [vmem:[%s18237_s1 + $0x9f0] sm:$0xff]   ;;  %v14885_v34 = vld [vmem:[%s18237_s1 + $0x408] sm:$0xff]  }
 0x1f7   : > { %13146 = vmatpush3.bf16.msra.mxu1 %v14864_v31  ;;  %13137 = vmatprep.mubr.bf16.mxu1 %v3180_v48  ;;  %v17033_v9 = vpop.f32.mrb[39].mxu0  ;;  %v14871_v31 = vld [vmem:[%s18237_s1 + $0x3e8] sm:$0xff]   ;;  %v15085_v44 = vld [vmem:[%s15180_s14 + $0xf0] sm:$0xf] }
 0x1f8   : > { %18343 = vst [vmem:[#allocation14_spill] sm:$0xff] %v17033_v9  ;;  %13818 = vmatpush3.bf16.msra.mxu0 %v14865_v19  ;;  %13147 = vmatprep.subr.bf16.mxu1 %v14866_v6  ;;  %v14872_v19 = vld [vmem:[%s18237_s1 + $0x9e8] sm:$0xff]  }
 0x1f9   : > { %13819 = vmatprep.subr.bf16.mxu0 %v14867_v22  ;;  %13806 = vmatmul.mubr.bf16.gmra.mrb[4].mxu0 %v8127_v8  ;;  %v10957_v48 = vld [vmem:[%s15180_s14 + $0x6c] sm:$0xf]  ;;  %v14876_v8 = vld [vmem:[%s18237_s1 + $0x3f8] sm:$0xff]  }
 0x1fa   : > { %13809 = vmatprep.mubr.bf16.mxu0 %v8136_v16  ;;  %v17075_v52 = vcombine.low %v10957_v48, %v10958_v11  ;;  %v15068_v48 = vld [vmem:[%s15180_s14 + $0x98] sm:$0xf] }
 0x1fb   : > { %13148 = vmatpush3.bf16.msra.mxu1 %v14866_v6  ;;  %v18282_v6 = vshll.u32 %v17031_v27, 16 }
 0x1fc   : > { %13820 = vmatpush3.bf16.msra.mxu0 %v14867_v22  ;;  %13149 = vmatprep.subr.bf16.mxu1 %v14869_v57  ;;  %v17070_v22 = vld [vmem:[%s15180_s14 + $0x64] sm:$0xff]   ;;  %v3433_v38 = vshll.u32 %v17075_v52, 16 }
 0x1fd   : > { %13821 = vmatprep.subr.bf16.mxu0 %v14870_v13  ;;  %v3408_v62 = vrot.slane %v18282_v6, 2 }
 0x1fe   : > { %13138 = vmatmul.mubr.bf16.gmra.mrb[64].mxu1 %v3179_v4  ;;  %v18281_v4 = vshrl.u32 %v17046_v7, 16  ;;  %v3435_v6 = vrot.slane %v3433_v38, 2 }
 0x1ff   : > { %13150 = vmatpush3.bf16.msra.mxu1 %v14869_v57  ;;  %13157 = vmatprep.mubr.bf16.mxu1 %v3401_v37  ;;  %v3417_v57 = vrot.slane %v18280_v33, 2  ;;  %v3409_v25 = vor.u32 %v3408_v62, %v3405_v39  ;;  %v14881_v37 = vld [vmem:[%s18237_s1 + $0x400] sm:$0xff]   ;;  %v15067_v39 = vld [vmem:[%s15180_s14 + $0x94] sm:$0xf] }
 0x200   : > { %13822 = vmatpush3.bf16.msra.mxu0 %v14870_v13  ;;  %13151 = vmatprep.subr.bf16.mxu1 %v14871_v31  ;;  %v3414_v16 = vrot.slane %v18281_v4, 1  ;;  %v18284_v13 = vshrl.u32 %v17070_v22, 16  ;;  %v11696_v11 = vcombine.low %v15067_v39, %v15068_v48  ;;  %v15070_v39 = vld [vmem:[%s15180_s14 + $0xa0] sm:$0xf] }
 0x201   : > { %13823 = vmatprep.subr.bf16.mxu0 %v14872_v19  ;;  %13810 = vmatmul.mubr.bf16.gmra.mrb[64].mxu0 %v8135_v21  ;;  %v14877_v21 = vld [vmem:[%s18237_s1 + $0x9f8] sm:$0xff]  }
 0x202   : > { %13829 = vmatprep.mubr.bf16.mxu0 %v11695_v40  ;;  %v3418_v40 = vor.u32 %v3417_v57, %v3414_v16  ;;  %v3423_v62 = vrot.slane %v18284_v13, 1  ;;  %v14889_v16 = vld [vmem:[%s18237_s1 + $0x410] sm:$0xff]   ;;  %v15069_v57 = vld [vmem:[%s15180_s14 + $0x9c] sm:$0xf] }
 0x203   : > { %13152 = vmatpush3.bf16.msra.mxu1 %v14871_v31  ;;  %v18283_v31 = vshll.u32 %v17070_v22, 16  ;;  %v11697_v48 = vcombine.low %v15069_v57, %v15070_v39  ;;  %v15073_v57 = vld [vmem:[%s15180_s14 + $0xac] sm:$0xf]  ;;  %v15074_v39 = vld [vmem:[%s15180_s14 + $0xb0] sm:$0xf] }
 0x204   : > { %13824 = vmatpush3.bf16.msra.mxu0 %v14872_v19  ;;  %13153 = vmatprep.subr.bf16.mxu1 %v14873_v20  ;;  %v3430_v19 = vshrl.u32 %v17075_v52, 16 }
 0x205   : > { %13825 = vmatprep.subr.bf16.mxu0 %v14875_v63  ;;  %v3426_v33 = vrot.slane %v18283_v31, 2 }
 0x206   : > { %v3432_v4 = vrot.slane %v3430_v19, 1 }
 0x207   : > { %13154 = vmatpush3.bf16.msra.mxu1 %v14873_v20  ;;  %v14883_v20 = vld [vmem:[%s18237_s1 + $0xa00] sm:$0xff]  }
 0x208   : > { %13826 = vmatpush3.bf16.msra.mxu0 %v14875_v63  ;;  %13155 = vmatprep.subr.bf16.mxu1 %v14876_v8  ;;  %v3410_v63 = vsel %vm1431_vm5, %v3400_v49, %v3409_v25  ;;  %v3419_v49 = vsel %vm1431_vm5, %v3409_v25, %v3418_v40  ;;  %v3436_v19 = vor.u32 %v3435_v6, %v3432_v4  ;;  %v14890_v25 = vld [vmem:[%s18237_s1 + $0xa10] sm:$0xff]  }
 0x209   : > { %13827 = vmatprep.subr.bf16.mxu0 %v14877_v21 }
 0x20b   : > { %13156 = vmatpush3.bf16.msra.mxu1 %v14876_v8  ;;  %v14886_v8 = vld [vmem:[%s18237_s1 + $0xa08] sm:$0xff]  }
 0x20c   : > { %13828 = vmatpush3.bf16.msra.mxu0 %v14877_v21  ;;  %13169 = vmatprep.subr.bf16.mxu1 %v14881_v37  ;;  %v3427_v21 = vor.u32 %v3426_v33, %v3423_v62  ;;  %v15072_v62 = vld [vmem:[%s15180_s14 + $0xa8] sm:$0xf] }
 0x20d   : > { %13841 = vmatprep.subr.bf16.mxu0 %v14883_v20 }
 0x20e   : > { %13158 = vmatmul.mubr.bf16.vlgmr.msra.gmra.mrb[0].mxu1 %v3410_v63  ;;  %v3583_v63 = vld [vmem:[%s15180_s14 + $0x4] sm:$0xc]  ;;  %v3428_v6 = vsel %vm1431_vm5, %v3418_v40, %v3427_v21 }
 0x20f   : > { %13170 = vmatpush3.bf16.msra.mxu1 %v14881_v37  ;;  %13830 = vmatmul.mubr.bf16.vlgmr.msra.gmra.mrb[0].mxu0 %v11696_v11  ;;  %v17129_v11 = vcombine.low %v3583_v63, %v16812_v10  ;;  %v15071_v40 = vld [vmem:[%s15180_s14 + $0xa4] sm:$0xf]  ;;  %v11699_v10 = vcombine.low %v15073_v57, %v15074_v39  ;;  %v3606_v63 = vrot.slane %v16815_v45, 2  ;;  %v14905_v57 = vld [vmem:[%s18237_s1 + $0xa38] sm:$0xff]   ;;  %v3608_v39 = vrot.slane %v16830_v60, 2 }
 0x210   : > { %13842 = vmatpush3.bf16.msra.mxu0 %v14883_v20  ;;  %13171 = vmatprep.subr.bf16.mxu1 %v14885_v34  ;;  %v3437_v20 = vsel %vm1431_vm5, %v3427_v21, %v3436_v19 }
 0x211   : > { %v12971_v38 = vpop.f32.mrb[40].mxu1  ;;  %13843 = vmatprep.subr.bf16.mxu0 %v14886_v8  ;;  %13161 = vmatprep.mubr.bf16.mxu1 %v3419_v49 }
 0x212   : > { %v17118_v31 = vadd.f32 %v12971_v38, %v17004_v28  ;;  %v1989_v13 = vpop.f32.mrb[41].mxu1  ;;  %13833 = vmatprep.mubr.bf16.mxu0 %v11697_v48  ;;  %v14891_v28 = vld [vmem:[%s18237_s1 + $0x418] sm:$0xff]   ;;  %v3605_v38 = vrot.slane %v17129_v11, 2 }
 0x213   : > { %v17121_v33 = vadd.f32 %v1989_v13, %v17012_v15  ;;  %v12972_v37 = vpop.f32.mrb[42].mxu1  ;;  %13172 = vmatpush3.bf16.msra.mxu1 %v14885_v34  ;;  %v14892_v34 = vld [vmem:[%s18237_s1 + $0xa18] sm:$0xff]  }
 0x214   : > { %13844 = vmatpush3.bf16.msra.mxu0 %v14886_v8  ;;  %v1992_v4 = vpop.f32.mrb[43].mxu1  ;;  %13173 = vmatprep.subr.bf16.mxu1 %v14889_v16  ;;  %v17131_v15 = vpop.f32.mrb[40].mxu0  ;;  %v11698_v8 = vcombine.low %v15071_v40, %v15072_v62  ;;  %v3607_v37 = vsel %vm3604_vm0, %v3605_v38, %v3606_v63  ;;  %v15076_v40 = vld [vmem:[%s15180_s14 + $0xcc] sm:$0xf]  ;;  %v15077_v62 = vld [vmem:[%s15180_s14 + $0xd0] sm:$0xf]  ;;  %v3609_v38 = vsel %vm3604_vm0, %v3606_v63, %v3608_v39 }
 0x215   : > { %18344 = vst [vmem:[#allocation15_spill] sm:$0xff] %v17131_v15  ;;  %v17134_v13 = vadd.f32 %v1992_v4, %v17021_v58  ;;  %13845 = vmatprep.subr.bf16.mxu0 %v14890_v25  ;;  %v17141_v49 = vpop.f32.mrb[41].mxu0  ;;  %v14894_v58 = vld [vmem:[%s18237_s1 + $0x420] sm:$0xff]   ;;  %v15075_v4 = vld [vmem:[%s15180_s14 + $0xb4] sm:$0xf] }
 0x216   : > { %18345 = vst [vmem:[#allocation16_spill] sm:$0xff] %v17141_v49  ;;  %13162 = vmatmul.mubr.bf16.gmra.mrb[4].mxu1 %v3428_v6  ;;  %v13644_v48 = vpop.f32.mrb[42].mxu0  ;;  %v14899_v6 = vld [vmem:[%s18237_s1 + $0xa28] sm:$0xff]   ;;  %v15080_v63 = vld [vmem:[%s15180_s14 + $0xdc] sm:$0xf] }
 0x217   : > { %13174 = vmatpush3.bf16.msra.mxu1 %v14889_v16  ;;  %13165 = vmatprep.mubr.bf16.mxu1 %v3437_v20  ;;  %v17145_v21 = vpop.f32.mrb[43].mxu0  ;;  %v14896_v16 = vld [vmem:[%s18237_s1 + $0xa20] sm:$0xff]   ;;  %v11700_v20 = vcombine.low %v15075_v4, %v15075_v4  ;;  %v14912_v4 = vld [vmem:[%s18237_s1 + $0xa48] sm:$0xff]   ;;  %v17326_v49 = vld [vmem:[%s15180_s14 + $0x18] sm:$0xff]  }
 0x218   : > { %18346 = vst [vmem:[#allocation17_spill] sm:$0xff] %v17145_v21  ;;  %13846 = vmatpush3.bf16.msra.mxu0 %v14890_v25  ;;  %13175 = vmatprep.subr.bf16.mxu1 %v14891_v28  ;;  %v14898_v25 = vld [vmem:[%s18237_s1 + $0x428] sm:$0xff]   ;;  %v14909_v48 = vld [vmem:[%s18237_s1 + $0xa40] sm:$0xff]  }
 0x219   : > { %13847 = vmatprep.subr.bf16.mxu0 %v14892_v34  ;;  %13834 = vmatmul.mubr.bf16.gmra.mrb[4].mxu0 %v11698_v8  ;;  %v11725_v8 = vcombine.low %v15076_v40, %v15077_v62  ;;  %v15081_v40 = vld [vmem:[%s15180_s14 + $0xe0] sm:$0xf] }
 0x21a   : > { %13837 = vmatprep.mubr.bf16.mxu0 %v11699_v10  ;;  %v14907_v10 = vld [vmem:[%s18237_s1 + $0x440] sm:$0xff]   ;;  %v11727_v62 = vcombine.low %v15080_v63, %v15081_v40 }
 0x21b   : > { %13176 = vmatpush3.bf16.msra.mxu1 %v14891_v28  ;;  %v14900_v28 = vld [vmem:[%s18237_s1 + $0x430] sm:$0xff]  }
 0x21c   : > { %13848 = vmatpush3.bf16.msra.mxu0 %v14892_v34  ;;  %13177 = vmatprep.subr.bf16.mxu1 %v14894_v58  ;;  %v14902_v34 = vld [vmem:[%s18237_s1 + $0xa30] sm:$0xff]  }
 0x21d   : > { %13849 = vmatprep.subr.bf16.mxu0 %v14896_v16 }
 0x21e   : > { %13166 = vmatmul.mubr.bf16.gmra.mrb[68].mxu1 %v3436_v19  ;;  %v14904_v19 = vld [vmem:[%s18237_s1 + $0x438] sm:$0xff]  }
 0x21f   : > { %13178 = vmatpush3.bf16.msra.mxu1 %v14894_v58  ;;  %13185 = vmatprep.mubr.bf16.mxu1 %v3607_v37  ;;  %v3610_v58 = vrot.slane %v16894_v43, 2 }
 0x220   : > { %13850 = vmatpush3.bf16.msra.mxu0 %v14896_v16  ;;  %13179 = vmatprep.subr.bf16.mxu1 %v14898_v25  ;;  %v15078_v16 = vld [vmem:[%s15180_s14 + $0xd4] sm:$0xf] }
 0x221   : > { %13851 = vmatprep.subr.bf16.mxu0 %v14899_v6  ;;  %13838 = vmatmul.mubr.bf16.gmra.mrb[68].mxu0 %v11700_v20  ;;  %v3611_v20 = vsel %vm3604_vm0, %v3608_v39, %v3610_v58  ;;  %v14914_v39 = vld [vmem:[%s18237_s1 + $0xa50] sm:$0xff]  }
 0x222   : > { %13857 = vmatprep.mubr.bf16.mxu0 %v11725_v8  ;;  %v3612_v8 = vrot.slane %v16924_v29, 2 }
 0x223   : > { %13180 = vmatpush3.bf16.msra.mxu1 %v14898_v25  ;;  %v15079_v25 = vld [vmem:[%s15180_s14 + $0xd8] sm:$0xf] }
 0x224   : > { %13852 = vmatpush3.bf16.msra.mxu0 %v14899_v6  ;;  %13181 = vmatprep.subr.bf16.mxu1 %v14900_v28  ;;  %v11726_v37 = vcombine.low %v15078_v16, %v15079_v25  ;;  %v14911_v6 = vld [vmem:[%s18237_s1 + $0x448] sm:$0xff]  }
 0x225   : > { %13853 = vmatprep.subr.bf16.mxu0 %v14902_v34 }
 0x227   : > { %13182 = vmatpush3.bf16.msra.mxu1 %v14900_v28  ;;  %v14931_v28 = vld [vmem:[%s15180_s14 + $0x8c] sm:$0xff]  }
 0x228   : > { %13854 = vmatpush3.bf16.msra.mxu0 %v14902_v34  ;;  %13183 = vmatprep.subr.bf16.mxu1 %v14904_v19  ;;  %v14913_v34 = vld [vmem:[%s18237_s1 + $0x450] sm:$0xff]   ;;  %v8678_v54 = vshrl.u32 %v14931_v28, 16 }
 0x229   : > { %13855 = vmatprep.subr.bf16.mxu0 %v14905_v57 }
 0x22b   : > { %13184 = vmatpush3.bf16.msra.mxu1 %v14904_v19  ;;  %v3614_v19 = vrot.slane %v16940_v47, 2  ;;  %v3613_v47 = vsel %vm3604_vm0, %v3610_v58, %v3612_v8 }
 0x22c   : > { %13856 = vmatpush3.bf16.msra.mxu0 %v14905_v57  ;;  %13197 = vmatprep.subr.bf16.mxu1 %v14907_v10 }
 0x22d   : > { %13869 = vmatprep.subr.bf16.mxu0 %v14909_v48 }
 0x22e   : > { %13186 = vmatmul.mubr.bf16.vlgmr.msra.gmra.mrb[0].mxu1 %v3609_v38 }
 0x22f   : > { %13198 = vmatpush3.bf16.msra.mxu1 %v14907_v10  ;;  %13858 = vmatmul.mubr.bf16.vlgmr.msra.gmra.mrb[0].mxu0 %v11726_v37  ;;  %v11014_v10 = vld [vmem:[%s15180_s14 + $0x44] sm:$0xc]  ;;  %v17215_v37 = vld [vmem:[%s15180_s14 + $0x94] sm:$0xff]  }
 0x230   : > { %13870 = vmatpush3.bf16.msra.mxu0 %v14909_v48  ;;  %13199 = vmatprep.subr.bf16.mxu1 %v14911_v6  ;;  %v17222_v40 = vcombine.low %v11014_v10, %v16965_v2 }
 0x231   : > { %v12999_v57 = vpop.f32.mrb[44].mxu1  ;;  %13871 = vmatprep.subr.bf16.mxu0 %v14912_v4  ;;  %13189 = vmatprep.mubr.bf16.mxu1 %v3611_v20  ;;  %v8680_v20 = vshll.u32 %v14931_v28, 16 }
 0x232   : > { %v17208_v38 = vadd.f32 %v12999_v57, %v17118_v31  ;;  %v2240_v48 = vpop.f32.mrb[45].mxu1  ;;  %13861 = vmatprep.mubr.bf16.mxu0 %v11727_v62  ;;  %v14915_v31 = vld [vmem:[%s18237_s1 + $0x458] sm:$0xff]   ;;  %v15082_v62 = vld [vmem:[%s15180_s14 + $0xe4] sm:$0xf]  ;;  %v15083_v57 = vld [vmem:[%s15180_s14 + $0xe8] sm:$0xf] }
 0x233   : > { %v17211_v16 = vadd.f32 %v2240_v48, %v17121_v33  ;;  %v13000_v25 = vpop.f32.mrb[46].mxu1  ;;  %13200 = vmatpush3.bf16.msra.mxu1 %v14911_v6  ;;  %v3615_v33 = vsel %vm3604_vm0, %v3612_v8, %v3614_v19  ;;  %v11728_v48 = vcombine.low %v15082_v62, %v15083_v57  ;;  %v15084_v8 = vld [vmem:[%s15180_s14 + $0xec] sm:$0xf]  ;;  %v14917_v62 = vld [vmem:[%s18237_s1 + $0x460] sm:$0xff]   ;;  %v3783_v57 = vrot.slane %v16976_v0, 2 }
 0x234   : > { %13872 = vmatpush3.bf16.msra.mxu0 %v14912_v4  ;;  %v2243_v63 = vpop.f32.mrb[47].mxu1  ;;  %13201 = vmatprep.subr.bf16.mxu1 %v14913_v34  ;;  %v17224_v6 = vpop.f32.mrb[44].mxu0  ;;  %v14916_v4 = vld [vmem:[%s18237_s1 + $0xa58] sm:$0xff]   ;;  %v11729_v2 = vcombine.low %v15084_v8, %v15085_v44  ;;  %v14919_v44 = vld [vmem:[%s18237_s1 + $0xa60] sm:$0xff]   ;;  %v14925_v8 = vld [vmem:[%s18237_s1 + $0xa70] sm:$0xff]  }
 0x235   : > { %18347 = vst [vmem:[#allocation18_spill] sm:$0xff] %v17224_v6  ;;  %v17227_v58 = vadd.f32 %v2243_v63, %v17134_v13  ;;  %13873 = vmatprep.subr.bf16.mxu0 %v14914_v39  ;;  %v17234_v25 = vpop.f32.mrb[45].mxu0  ;;  %v8682_v13 = vrot.slane %v8680_v20, 1  ;;  %v8685_v63 = vshll.u32 %v17215_v37, 16 }
 0x236   : > { %18348 = vst [vmem:[#allocation19_spill] sm:$0xff] %v17234_v25  ;;  %13190 = vmatmul.mubr.bf16.gmra.mrb[4].mxu1 %v3613_v47  ;;  %v13672_v10 = vpop.f32.mrb[46].mxu0  ;;  %v3782_v47 = vrot.slane %v17222_v40, 2 }
 0x237   : > { %13202 = vmatpush3.bf16.msra.mxu1 %v14913_v34  ;;  %13193 = vmatprep.mubr.bf16.mxu1 %v3615_v33  ;;  %v17239_v51 = vpop.f32.mrb[47].mxu0  ;;  %v8683_v28 = vor.u32 %v8682_v13, %v8678_v54  ;;  %v8687_v34 = vrot.slane %v8685_v63, 1  ;;  %v14922_v33 = vld [vmem:[%s18237_s1 + $0xa68] sm:$0xff]   ;;  %v14928_v13 = vld [vmem:[%s18237_s1 + $0xa78] sm:$0xff]   ;;  %v3785_v63 = vrot.slane %v17031_v27, 2 }
 0x238   : > { %18349 = vst [vmem:[#allocation20_spill] sm:$0xff] %v17239_v51  ;;  %13874 = vmatpush3.bf16.msra.mxu0 %v14914_v39  ;;  %13203 = vmatprep.subr.bf16.mxu1 %v14915_v31  ;;  %v14921_v39 = vld [vmem:[%s18237_s1 + $0x468] sm:$0xff]   ;;  %v3784_v20 = vsel %vm3604_vm0, %v3782_v47, %v3783_v57 }
 0x239   : > { %13875 = vmatprep.subr.bf16.mxu0 %v14916_v4  ;;  %13862 = vmatmul.mubr.bf16.gmra.mrb[4].mxu0 %v11728_v48  ;;  %v8688_v54 = vsel %vm611_vm2, %v8683_v28, %v8687_v34  ;;  %v14934_v48 = vld [vmem:[%s15180_s14 + $0x9c] sm:$0xff]  }
 0x23a   : > { %13865 = vmatprep.mubr.bf16.mxu0 %v11729_v2  ;;  %v8689_v2 = vshrl.u32 %v17215_v37, 16  ;;  %v8693_v10 = vshll.u32 %v14934_v48, 16 }
 0x23b   : > { %13204 = vmatpush3.bf16.msra.mxu1 %v14915_v31  ;;  %v11730_v31 = vcombine.low %v16949_v53, %v16949_v53  ;;  %v14942_v53 = vld [vmem:[%s15180_s14 + $0xa4] sm:$0xff]  }
 0x23c   : > { %13876 = vmatpush3.bf16.msra.mxu0 %v14916_v4  ;;  %13205 = vmatprep.subr.bf16.mxu1 %v14917_v62  ;;  %v14923_v4 = vld [vmem:[%s18237_s1 + $0x470] sm:$0xff]   ;;  %v8701_v47 = vshll.u32 %v14942_v53, 16  ;;  %v8691_v37 = vor.u32 %v8689_v2, %v8687_v34  ;;  %v8695_v28 = vrot.slane %v8693_v10, 1 }
 0x23d   : > { %13877 = vmatprep.subr.bf16.mxu0 %v14919_v44  ;;  %v8869_v2 = vld [vmem:[%s15180_s14 + $0x10] sm:$0xf]  ;;  %v17293_v10 = vld [vmem:[%s15180_s14 + $0x14] sm:$0xf] }
 0x23e   : > { %13194 = vmatmul.mubr.bf16.gmra.mrb[72].mxu1 %v3614_v19  ;;  %v14927_v19 = vld [vmem:[%s18237_s1 + $0x478] sm:$0xff]   ;;  %v8696_v34 = vsel %vm611_vm2, %v8691_v37, %v8695_v28  ;;  %v8705_v37 = vshrl.u32 %v14942_v53, 16  ;;  %v11797_v25 = vcombine.low %v8869_v2, %v17293_v10  ;;  %v18350_v2 = vrot.slane %v17075_v52, 2 }
 0x23f   : > { %13206 = vmatpush3.bf16.msra.mxu1 %v14917_v62  ;;  %13213 = vmatprep.mubr.bf16.mxu1 %v3784_v20  ;;  %v8697_v62 = vshrl.u32 %v14934_v48, 16  ;;  %v14944_v20 = vld [vmem:[%s15180_s14 + $0xac] sm:$0xff]   ;;  %v17285_v48 = vld [vmem:[%s15180_s14 + $0xb4] sm:$0x1f]  }
 0x240   : > { %13878 = vmatpush3.bf16.msra.mxu0 %v14919_v44  ;;  %13207 = vmatprep.subr.bf16.mxu1 %v14921_v39  ;;  %v14930_v44 = vld [vmem:[%s18237_s1 + $0x480] sm:$0xff]   ;;  %v8713_v51 = vshrl.u32 %v14944_v20, 16  ;;  %v8717_v21 = vshll.u32 %v17285_v48, 16 }
 0x241   : > { %13879 = vmatprep.subr.bf16.mxu0 %v14922_v33  ;;  %13866 = vmatmul.mubr.bf16.gmra.mrb[72].mxu0 %v11730_v31  ;;  %v3786_v31 = vsel %vm3604_vm0, %v3783_v57, %v3785_v63  ;;  %v14936_v57 = vld [vmem:[%s18237_s1 + $0xa88] sm:$0xff]  }
 0x242   : > { %13885 = vmatprep.mubr.bf16.mxu0 %v8688_v54  ;;  %v8699_v54 = vor.u32 %v8697_v62, %v8695_v28 }
 0x243   : > { %13208 = vmatpush3.bf16.msra.mxu1 %v14921_v39  ;;  %v14933_v39 = vld [vmem:[%s18237_s1 + $0xa80] sm:$0xff]  }
 0x244   : > { %13880 = vmatpush3.bf16.msra.mxu0 %v14922_v33  ;;  %13209 = vmatprep.subr.bf16.mxu1 %v14923_v4  ;;  %v3787_v33 = vrot.slane %v17046_v7, 2 }
 0x245   : > { %13881 = vmatprep.subr.bf16.mxu0 %v14925_v8 }
 0x246   : > { %v3788_v62 = vsel %vm3604_vm0, %v3785_v63, %v3787_v33  ;;  %v14937_v63 = vld [vmem:[%s18237_s1 + $0x490] sm:$0xff]  }
 0x247   : > { %13210 = vmatpush3.bf16.msra.mxu1 %v14923_v4  ;;  %v8703_v4 = vrot.slane %v8701_v47, 1  ;;  %v3964_v47 = vshll.u32 %v17129_v11, 16 }
 0x248   : > { %13882 = vmatpush3.bf16.msra.mxu0 %v14925_v8  ;;  %13211 = vmatprep.subr.bf16.mxu1 %v14927_v19  ;;  %v14935_v8 = vld [vmem:[%s18237_s1 + $0x488] sm:$0xff]  }
 0x249   : > { %13883 = vmatprep.subr.bf16.mxu0 %v14928_v13  ;;  %v8704_v28 = vsel %vm611_vm2, %v8699_v54, %v8703_v4 }
 0x24b   : > { %13212 = vmatpush3.bf16.msra.mxu1 %v14927_v19  ;;  %v8709_v19 = vshll.u32 %v14944_v20, 16 }
 0x24c   : > { %13884 = vmatpush3.bf16.msra.mxu0 %v14928_v13  ;;  %13225 = vmatprep.subr.bf16.mxu1 %v14930_v44  ;;  %v3789_v13 = vrot.slane %v17070_v22, 2 }
 0x24d   : > { %13897 = vmatprep.subr.bf16.mxu0 %v14933_v39  ;;  %v8711_v20 = vrot.slane %v8709_v19, 1  ;;  %v14939_v19 = vld [vmem:[%s18237_s1 + $0x498] sm:$0xff]  }
 0x24e   : > { %13214 = vmatmul.mubr.bf16.vlgmr.msra.gmra.mrb[0].mxu1 %v3786_v31  ;;  %v3961_v31 = vshrl.u32 %v17129_v11, 16  ;;  %v3792_v6 = vsel %vm3604_vm0, %v3789_v13, %v18350_v2  ;;  %v8707_v11 = vor.u32 %v8705_v37, %v8703_v4  ;;  %v18351_v4 = vshrl.u32 %v16815_v45, 16 }
 0x24f   : > { %13226 = vmatpush3.bf16.msra.mxu1 %v14930_v44  ;;  %13886 = vmatmul.mubr.bf16.vlgmr.msra.gmra.mrb[0].mxu0 %v8696_v34  ;;  %v14938_v44 = vld [vmem:[%s18237_s1 + $0xa90] sm:$0xff]   ;;  %v3790_v34 = vsel %vm3604_vm0, %v3787_v33, %v3789_v13  ;;  %v8931_v33 = vshll.u32 %v11797_v25, 16  ;;  %v18352_v37 = vshll.u32 %v16815_v45, 16 }
 0x250   : > { %13898 = vmatpush3.bf16.msra.mxu0 %v14933_v39  ;;  %13227 = vmatprep.subr.bf16.mxu1 %v14935_v8  ;;  %v3963_v13 = vrot.slane %v3961_v31, 2  ;;  %v8929_v31 = vshrl.u32 %v11797_v25, 16  ;;  %v8721_v25 = vshrl.u32 %v17285_v48, 16  ;;  %v14946_v48 = vld [vmem:[%s18237_s1 + $0xaa8] sm:$0xff]  }
 0x251   : > { %v13027_v53 = vpop.f32.mrb[48].mxu1  ;;  %13899 = vmatprep.subr.bf16.mxu0 %v14936_v57  ;;  %13217 = vmatprep.mubr.bf16.mxu1 %v3788_v62 }
 0x252   : > { %v17313_v39 = vadd.f32 %v13027_v53, %v17208_v38  ;;  %v2491_v54 = vpop.f32.mrb[49].mxu1  ;;  %13889 = vmatprep.mubr.bf16.mxu0 %v8704_v28  ;;  %v8715_v38 = vor.u32 %v8713_v51, %v8711_v20  ;;  %v8719_v53 = vrot.slane %v8717_v21, 1  ;;  %v3966_v28 = vrot.slane %v3964_v47, 3  ;;  %v14940_v51 = vld [vmem:[%s18237_s1 + $0xa98] sm:$0xff]  }
 0x253   : > { %v17320_v9 = vadd.f32 %v2491_v54, %v17211_v16  ;;  %v13028_v62 = vpop.f32.mrb[50].mxu1  ;;  %13228 = vmatpush3.bf16.msra.mxu1 %v14935_v8  ;;  %v3968_v16 = vrot.slane %v18351_v4, 2  ;;  %v3969_v8 = vrot.slane %v18352_v37, 3  ;;  %v14941_v4 = vld [vmem:[%s18237_s1 + $0x4a0] sm:$0xff]  }
 0x254   : > { %13900 = vmatpush3.bf16.msra.mxu0 %v14936_v57  ;;  %v2494_v15 = vpop.f32.mrb[51].mxu1  ;;  %13229 = vmatprep.subr.bf16.mxu1 %v14937_v63  ;;  %v17332_v54 = vpop.f32.mrb[48].mxu0  ;;  %v8712_v57 = vsel %vm611_vm2, %v8707_v11, %v8711_v20  ;;  %v8720_v45 = vsel %vm611_vm2, %v8715_v38, %v8719_v53  ;;  %v8933_v62 = vrot.slane %v8931_v33, 1  ;;  %v14945_v20 = vld [vmem:[%s18237_s1 + $0x4a8] sm:$0xff]   ;;  %v18356_v38 = vrot.slane %v17075_v52, 2  ;;  %v14949_v52 = vld [vmem:[%s18237_s1 + $0xab0] sm:$0xff]  }
 0x255   : > { %18353 = vst [vmem:[#allocation21_spill] sm:$0xff] %v17332_v54  ;;  %v17335_v2 = vadd.f32 %v2494_v15, %v17227_v58  ;;  %13901 = vmatprep.subr.bf16.mxu0 %v14938_v44  ;;  %v17340_v21 = vpop.f32.mrb[49].mxu0  ;;  %v18289_v15 = vshll.u32 %v17326_v49, 16  ;;  %v17350_v37 = vor.u32 %v3969_v8, %v3968_v16  ;;  %v17374_v16 = vld [vmem:[%s15180_s14 + $0x20] sm:$0xff]  }
 0x256   : > { %18354 = vst [vmem:[#allocation22_spill] sm:$0xff] %v17340_v21  ;;  %13218 = vmatmul.mubr.bf16.gmra.mrb[4].mxu1 %v3790_v34  ;;  %v13700_v47 = vpop.f32.mrb[50].mxu0  ;;  %v3967_v34 = vor.u32 %v3966_v28, %v3963_v13  ;;  %v3938_v13 = vld [vmem:[%s15180_s14 + $0x30] sm:$0x7] }
 0x257   : > { %13230 = vmatpush3.bf16.msra.mxu1 %v14937_v63  ;;  %13221 = vmatprep.mubr.bf16.mxu1 %v3792_v6  ;;  %v17345_v58 = vpop.f32.mrb[51].mxu0  ;;  %v14943_v6 = vld [vmem:[%s18237_s1 + $0xaa0] sm:$0xff]   ;;  %v8934_v63 = vor.u32 %v8933_v62, %v8929_v31  ;;  %v14947_v28 = vld [vmem:[%s18237_s1 + $0x4b0] sm:$0xff]   ;;  %v18358_v47 = vshll.u32 %v16830_v60, 16  ;;  %v17387_v31 = vld [vmem:[%s15180_s14 + $0x28] sm:$0xff]  }
 0x258   : > { %18355 = vst [vmem:[#allocation23_spill] sm:$0xff] %v17345_v58  ;;  %13902 = vmatpush3.bf16.msra.mxu0 %v14938_v44  ;;  %13231 = vmatprep.subr.bf16.mxu1 %v14939_v19  ;;  %v8938_v44 = vrot.slane %v18289_v15, 1  ;;  %v3971_v11 = vsel %vm3959_vm1, %v3967_v34, %v17350_v37  ;;  %v14950_v62 = vld [vmem:[%s18237_s1 + $0x4b8] sm:$0xff]   ;;  %v18288_v34 = vshll.u32 %v17374_v16, 16  ;;  %v18363_v58 = vshll.u32 %v17387_v31, 16 }
 0x259   : > { %13903 = vmatprep.subr.bf16.mxu0 %v14940_v51  ;;  %13890 = vmatmul.mubr.bf16.gmra.mrb[4].mxu0 %v8712_v57 }
 0x25a   : > { %13893 = vmatprep.mubr.bf16.mxu0 %v8720_v45  ;;  %v8939_v33 = vsel %vm611_vm2, %v8934_v63, %v8938_v44  ;;  %v3973_v45 = vrot.slane %v18358_v47, 3  ;;  %v18360_v63 = vshll.u32 %v16894_v43, 16  ;;  %v8954_v21 = vrot.slane %v18363_v58, 1 }
 0x25b   : > { %13232 = vmatpush3.bf16.msra.mxu1 %v14939_v19  ;;  %v8723_v19 = vor.u32 %v8721_v25, %v8719_v53  ;;  %v15086_v53 = vld [vmem:[%s15180_s14 + $0x2c] sm:$0xf] }
 0x25c   : > { %13904 = vmatpush3.bf16.msra.mxu0 %v14940_v51  ;;  %13233 = vmatprep.subr.bf16.mxu1 %v14941_v4  ;;  %v17380_v8 = vcombine.low %v15086_v53, %v3938_v13  ;;  %v18357_v51 = vshrl.u32 %v16830_v60, 16  ;;  %v14951_v60 = vld [vmem:[%s18237_s1 + $0xab8] sm:$0xff]   ;;  %v14952_v13 = vld [vmem:[%s18237_s1 + $0x4c0] sm:$0xff]   ;;  %v8946_v53 = vrot.slane %v18288_v34, 1 }
 0x25d   : > { %13905 = vmatprep.subr.bf16.mxu0 %v14943_v6 }
 0x25e   : > { %13222 = vmatmul.mubr.bf16.gmra.mrb[76].mxu1 %v18356_v38  ;;  %v3972_v57 = vrot.slane %v18357_v51, 2  ;;  %v18291_v38 = vshrl.u32 %v17374_v16, 16  ;;  %v17413_v51 = vld [vmem:[%s15180_s14 + $0x38] sm:$0xf] }
 0x25f   : > { %13234 = vmatpush3.bf16.msra.mxu1 %v14941_v4  ;;  %13241 = vmatprep.mubr.bf16.mxu1 %v3971_v11  ;;  %v18290_v4 = vshrl.u32 %v17326_v49, 16  ;;  %v3985_v11 = vshrl.u32 %v17380_v8, 16 }
 0x260   : > { %13906 = vmatpush3.bf16.msra.mxu0 %v14943_v6  ;;  %13235 = vmatprep.subr.bf16.mxu1 %v14945_v20  ;;  %v18359_v6 = vshrl.u32 %v16894_v43, 16 }
 0x261   : > { %13907 = vmatprep.subr.bf16.mxu0 %v14946_v48  ;;  %13894 = vmatmul.mubr.bf16.gmra.mrb[76].mxu0 %v8723_v19  ;;  %v3974_v19 = vor.u32 %v3973_v45, %v3972_v57  ;;  %v8942_v43 = vor.u32 %v18290_v4, %v8938_v44  ;;  %v14955_v57 = vld [vmem:[%s18237_s1 + $0xac0] sm:$0xff]   ;;  %v17422_v45 = vld [vmem:[%s15180_s14 + $0x30] sm:$0xff]   ;;  %v18362_v44 = vshll.u32 %v16924_v29, 16  ;;  %v3987_v34 = vrot.slane %v3985_v11, 2 }
 0x262   : > { %13913 = vmatprep.mubr.bf16.mxu0 %v8939_v33  ;;  %v3976_v25 = vrot.slane %v18359_v6, 2  ;;  %v8950_v33 = vor.u32 %v18291_v38, %v8946_v53  ;;  %v18292_v58 = vshll.u32 %v17422_v45, 16 }
 0x263   : > { %13236 = vmatpush3.bf16.msra.mxu1 %v14945_v20  ;;  %v3977_v20 = vrot.slane %v18360_v63, 3  ;;  %v3981_v63 = vrot.slane %v18362_v44, 3  ;;  %v3975_v4 = vsel %vm3959_vm1, %v17350_v37, %v3974_v19  ;;  %v14958_v37 = vld [vmem:[%s18237_s1 + $0xac8] sm:$0xff]  }
 0x264   : > { %13908 = vmatpush3.bf16.msra.mxu0 %v14946_v48  ;;  %13237 = vmatprep.subr.bf16.mxu1 %v14947_v28  ;;  %v3988_v48 = vshll.u32 %v17380_v8, 16 }
 0x265   : > { %13909 = vmatprep.subr.bf16.mxu0 %v14949_v52  ;;  %v3978_v6 = vor.u32 %v3977_v20, %v3976_v25  ;;  %v11811_v25 = vld [vmem:[%s15180_s14 + $0x50] sm:$0xf]  ;;  %v17441_v20 = vld [vmem:[%s15180_s14 + $0x54] sm:$0xf] }
 0x266   : > { %v3990_v15 = vrot.slane %v3988_v48, 3  ;;  %v11839_v38 = vcombine.low %v11811_v25, %v17441_v20 }
 0x267   : > { %13238 = vmatpush3.bf16.msra.mxu1 %v14947_v28  ;;  %v8880_v28 = vld [vmem:[%s15180_s14 + $0x3c] sm:$0x1] }
 0x268   : > { %13910 = vmatpush3.bf16.msra.mxu0 %v14949_v52  ;;  %13239 = vmatprep.subr.bf16.mxu1 %v14950_v62  ;;  %v18361_v52 = vshrl.u32 %v16924_v29, 16  ;;  %v8947_v29 = vsel %vm611_vm2, %v8942_v43, %v8946_v53  ;;  %v17448_v48 = vor.u32 %v3990_v15, %v3987_v34  ;;  %v18293_v43 = vshrl.u32 %v17387_v31, 16 }
 0x269   : > { %13911 = vmatprep.subr.bf16.mxu0 %v14951_v60  ;;  %v8955_v53 = vsel %vm611_vm2, %v8950_v33, %v8954_v21  ;;  %v4160_v15 = vshrl.u32 %v17222_v40, 16  ;;  %v4163_v34 = vshll.u32 %v17222_v40, 16  ;;  %v14960_v33 = vld [vmem:[%s18237_s1 + $0xad0] sm:$0xff]  }
 0x26a   : > { %v3980_v47 = vrot.slane %v18361_v52, 2  ;;  %v17433_v52 = vcombine.low %v17413_v51, %v8880_v28  ;;  %v18294_v28 = vshrl.u32 %v17422_v45, 16 }
 0x26b   : > { %13240 = vmatpush3.bf16.msra.mxu1 %v14950_v62  ;;  %v14957_v62 = vld [vmem:[%s18237_s1 + $0x4c8] sm:$0xff]  }
 0x26c   : > { %13912 = vmatpush3.bf16.msra.mxu0 %v14951_v60  ;;  %13253 = vmatprep.subr.bf16.mxu1 %v14952_v13  ;;  %v3979_v60 = vsel %vm3959_vm1, %v3974_v19, %v3978_v6  ;;  %v3982_v11 = vor.u32 %v3981_v63, %v3980_v47  ;;  %v8968_v44 = vshll.u32 %v17433_v52, 16 }
 0x26d   : > { %13925 = vmatprep.subr.bf16.mxu0 %v14955_v57 }
 0x26e   : > { %13242 = vmatmul.mubr.bf16.vlgmr.msra.gmra.mrb[0].mxu1 %v3975_v4  ;;  %v14959_v4 = vld [vmem:[%s18237_s1 + $0x4d0] sm:$0xff]   ;;  %v3983_v63 = vsel %vm3959_vm1, %v3978_v6, %v3982_v11  ;;  %v3992_v40 = vsel %vm3959_vm1, %v3982_v11, %v17448_v48  ;;  %v8970_v6 = vrot.slane %v8968_v44, 1  ;;  %v9182_v11 = vshll.u32 %v11839_v38, 16 }
 0x26f   : > { %13254 = vmatpush3.bf16.msra.mxu1 %v14952_v13  ;;  %13914 = vmatmul.mubr.bf16.vlgmr.msra.gmra.mrb[0].mxu0 %v8947_v29  ;;  %v8962_v13 = vrot.slane %v18292_v58, 1  ;;  %v8958_v29 = vor.u32 %v18293_v43, %v8954_v21  ;;  %v17482_v58 = vld [vmem:[%s15180_s14 + $0x58] sm:$0xff]   ;;  %v4162_v21 = vrot.slane %v4160_v15, 2  ;;  %v4165_v43 = vrot.slane %v4163_v34, 3 }
 0x270   : > { %13926 = vmatpush3.bf16.msra.mxu0 %v14955_v57  ;;  %13255 = vmatprep.subr.bf16.mxu1 %v14957_v62 }
 0x271   : > { %v13055_v19 = vpop.f32.mrb[52].mxu1  ;;  %13927 = vmatprep.subr.bf16.mxu0 %v14958_v37  ;;  %13245 = vmatprep.mubr.bf16.mxu1 %v3979_v60  ;;  %v8963_v15 = vsel %vm611_vm2, %v8958_v29, %v8962_v13  ;;  %v14969_v29 = vld [vmem:[%s18237_s1 + $0xae8] sm:$0xff]  }
 0x272   : > { %v17466_v57 = vadd.f32 %v13055_v19, %v17313_v39  ;;  %v2668_v47 = vpop.f32.mrb[53].mxu1  ;;  %13917 = vmatprep.mubr.bf16.mxu0 %v8955_v53  ;;  %v14961_v39 = vld [vmem:[%s18237_s1 + $0x4d8] sm:$0xff]   ;;  %v8966_v19 = vor.u32 %v18294_v28, %v8962_v13  ;;  %v14964_v28 = vld [vmem:[%s18237_s1 + $0x4e0] sm:$0xff]  }
 0x273   : > { %v17474_v25 = vadd.f32 %v2668_v47, %v17320_v9  ;;  %v13056_v60 = vpop.f32.mrb[54].mxu1  ;;  %13256 = vmatpush3.bf16.msra.mxu1 %v14957_v62  ;;  %v18364_v9 = vshrl.u32 %v16976_v0, 16  ;;  %v18365_v62 = vshll.u32 %v16976_v0, 16 }
 0x274   : > { %13928 = vmatpush3.bf16.msra.mxu0 %v14958_v37  ;;  %v2671_v53 = vpop.f32.mrb[55].mxu1  ;;  %13257 = vmatprep.subr.bf16.mxu1 %v14959_v4  ;;  %v17488_v54 = vpop.f32.mrb[52].mxu0  ;;  %v14962_v37 = vld [vmem:[%s18237_s1 + $0xad8] sm:$0xff]   ;;  %v8971_v0 = vsel %vm611_vm2, %v8966_v19, %v8970_v6 }
 0x275   : > { %v4167_v47 = vrot.slane %v18364_v9, 2  ;;  %v4168_v60 = vrot.slane %v18365_v62, 3  ;;  %v17491_v24 = vadd.f32 %v2671_v53, %v17335_v2  ;;  %13929 = vmatprep.subr.bf16.mxu0 %v14960_v33  ;;  %v17496_v44 = vpop.f32.mrb[53].mxu0  ;;  %v9180_v9 = vshrl.u32 %v11839_v38, 16 }
 0x276   : > { %18366 = vst [vmem:[#allocation24_spill] sm:$0xff] %v17496_v44  ;;  %13246 = vmatmul.mubr.bf16.gmra.mrb[4].mxu1 %v3983_v63  ;;  %v13728_v34 = vpop.f32.mrb[54].mxu0  ;;  %v9184_v62 = vrot.slane %v9182_v11, 1  ;;  %v18296_v2 = vshll.u32 %v17482_v58, 16  ;;  %v4166_v63 = vor.u32 %v4165_v43, %v4162_v21  ;;  %v8972_v38 = vshrl.u32 %v17433_v52, 16  ;;  %v14968_v43 = vld [vmem:[%s18237_s1 + $0x4e8] sm:$0xff]  }
 0x277   : > { %13258 = vmatpush3.bf16.msra.mxu1 %v14959_v4  ;;  %13249 = vmatprep.mubr.bf16.mxu1 %v3992_v40  ;;  %v17501_v53 = vpop.f32.mrb[55].mxu0  ;;  %v4169_v44 = vor.u32 %v4168_v60, %v4167_v47  ;;  %v14966_v4 = vld [vmem:[%s18237_s1 + $0xae0] sm:$0xff]   ;;  %v14970_v21 = vld [vmem:[%s18237_s1 + $0x4f0] sm:$0xff]   ;;  %v18369_v60 = vshll.u32 %v17031_v27, 16  ;;  %v17537_v34 = vld [vmem:[%s15180_s14 + $0x68] sm:$0xff]  }
 0x278   : > { %18367 = vst [vmem:[#allocation25_spill] sm:$0xff] %v17501_v53  ;;  %13930 = vmatpush3.bf16.msra.mxu0 %v14960_v33  ;;  %13259 = vmatprep.subr.bf16.mxu1 %v14961_v39  ;;  %v9185_v13 = vor.u32 %v9184_v62, %v9180_v9  ;;  %v9189_v33 = vrot.slane %v18296_v2, 1  ;;  %v8974_v19 = vor.u32 %v8972_v38, %v8970_v6  ;;  %v17522_v11 = vld [vmem:[%s15180_s14 + $0x60] sm:$0xff]   ;;  %v14972_v6 = vld [vmem:[%s18237_s1 + $0xaf0] sm:$0xff]   ;;  %v18297_v9 = vshrl.u32 %v17482_v58, 16 }
 0x279   : > { %13931 = vmatprep.subr.bf16.mxu0 %v14962_v37  ;;  %13918 = vmatmul.mubr.bf16.gmra.mrb[4].mxu0 %v8963_v15  ;;  %v4170_v40 = vsel %vm3959_vm1, %v4166_v63, %v4169_v44  ;;  %v18295_v15 = vshll.u32 %v17522_v11, 16  ;;  %v15087_v62 = vld [vmem:[%s15180_s14 + $0x6c] sm:$0xf]  ;;  %v18370_v38 = vshrl.u32 %v17046_v7, 16 }
 0x27a   : > { %13921 = vmatprep.mubr.bf16.mxu0 %v8971_v0  ;;  %v14973_v0 = vld [vmem:[%s18237_s1 + $0x4f8] sm:$0xff]  }
 0x27b   : > { %13260 = vmatpush3.bf16.msra.mxu1 %v14961_v39  ;;  %v9190_v39 = vsel %vm611_vm2, %v9185_v13, %v9189_v33  ;;  %v4175_v13 = vrot.slane %v18370_v38, 2 }
 0x27c   : > { %13932 = vmatpush3.bf16.msra.mxu0 %v14962_v37  ;;  %13261 = vmatprep.subr.bf16.mxu1 %v14964_v28  ;;  %v4172_v37 = vrot.slane %v18369_v60, 3  ;;  %v17561_v60 = vld [vmem:[%s15180_s14 + $0x78] sm:$0xf] }
 0x27d   : > { %13933 = vmatprep.subr.bf16.mxu0 %v14966_v4 }
 0x27e   : > { %13250 = vmatmul.mubr.bf16.gmra.mrb[80].mxu1 %v17448_v48  ;;  %v11065_v48 = vld [vmem:[%s15180_s14 + $0x70] sm:$0x7] }
 0x27f   : > { %13262 = vmatpush3.bf16.msra.mxu1 %v14964_v28  ;;  %13269 = vmatprep.mubr.bf16.mxu1 %v4170_v40  ;;  %v18368_v28 = vshrl.u32 %v17031_v27, 16  ;;  %v11082_v63 = vcombine.low %v15087_v62, %v11065_v48  ;;  %v14974_v27 = vld [vmem:[%s18237_s1 + $0xaf8] sm:$0xff]   ;;  %v18299_v48 = vshll.u32 %v17537_v34, 16  ;;  %v17568_v62 = vld [vmem:[%s15180_s14 + $0x70] sm:$0xff]  }
 0x280   : > { %13934 = vmatpush3.bf16.msra.mxu0 %v14966_v4  ;;  %13263 = vmatprep.subr.bf16.mxu1 %v14968_v43 }
 0x281   : > { %13935 = vmatprep.subr.bf16.mxu0 %v14969_v29  ;;  %13922 = vmatmul.mubr.bf16.gmra.mrb[80].mxu0 %v8974_v19  ;;  %v4171_v47 = vrot.slane %v18368_v28, 2  ;;  %v9197_v19 = vrot.slane %v18295_v15, 1  ;;  %v9193_v28 = vor.u32 %v18297_v9, %v9189_v33  ;;  %v18373_v33 = vshll.u32 %v17070_v22, 16 }
 0x282   : > { %13941 = vmatprep.mubr.bf16.mxu0 %v9190_v39  ;;  %v18302_v39 = vshrl.u32 %v17522_v11, 16  ;;  %v9205_v9 = vrot.slane %v18299_v48, 1 }
 0x283   : > { %13264 = vmatpush3.bf16.msra.mxu1 %v14968_v43  ;;  %v4173_v4 = vor.u32 %v4172_v37, %v4171_v47  ;;  %v18371_v43 = vshll.u32 %v17046_v7, 16  ;;  %v4184_v7 = vshrl.u32 %v11082_v63, 16  ;;  %v4187_v47 = vshll.u32 %v11082_v63, 16  ;;  %v14978_v37 = vld [vmem:[%s18237_s1 + $0xb00] sm:$0xff]  }
 0x284   : > { %13936 = vmatpush3.bf16.msra.mxu0 %v14969_v29  ;;  %13265 = vmatprep.subr.bf16.mxu1 %v14970_v21  ;;  %v14975_v29 = vld [vmem:[%s18237_s1 + $0x500] sm:$0xff]   ;;  %v4180_v63 = vrot.slane %v18373_v33, 3  ;;  %v9201_v2 = vor.u32 %v18302_v39, %v9197_v19 }
 0x285   : > { %13937 = vmatprep.subr.bf16.mxu0 %v14972_v6  ;;  %v4176_v40 = vrot.slane %v18371_v43, 3  ;;  %v4174_v38 = vsel %vm3959_vm1, %v4169_v44, %v4173_v4  ;;  %v9198_v44 = vsel %vm611_vm2, %v9193_v28, %v9197_v19 }
 0x286   : > { %v9206_v28 = vsel %vm611_vm2, %v9201_v2, %v9205_v9 }
 0x287   : > { %13266 = vmatpush3.bf16.msra.mxu1 %v14970_v21  ;;  %v11822_v21 = vld [vmem:[%s15180_s14 + $0x7c] sm:$0x1]  ;;  %v4177_v43 = vor.u32 %v4176_v40, %v4175_v13  ;;  %v4186_v13 = vrot.slane %v4184_v7, 2  ;;  %v14981_v40 = vld [vmem:[%s18237_s1 + $0xb08] sm:$0xff]   ;;  %v18300_v7 = vshrl.u32 %v17568_v62, 16 }
 0x288   : > { %13938 = vmatpush3.bf16.msra.mxu0 %v14972_v6  ;;  %13267 = vmatprep.subr.bf16.mxu1 %v14973_v0  ;;  %v18372_v6 = vshrl.u32 %v17070_v22, 16  ;;  %v17580_v53 = vcombine.low %v17561_v60, %v11822_v21  ;;  %v4189_v22 = vrot.slane %v4187_v47, 3 }
 0x289   : > { %13939 = vmatprep.subr.bf16.mxu0 %v14974_v27  ;;  %v4178_v21 = vsel %vm3959_vm1, %v4173_v4, %v4177_v43 }
 0x28a   : > { %v4179_v15 = vrot.slane %v18372_v6, 2  ;;  %v18298_v6 = vshll.u32 %v17568_v62, 16  ;;  %v9219_v47 = vshll.u32 %v17580_v53, 16  ;;  %v4190_v33 = vor.u32 %v4189_v22, %v4186_v13 }
 0x28b   : > { %13268 = vmatpush3.bf16.msra.mxu1 %v14973_v0  ;;  %v14980_v0 = vld [vmem:[%s18237_s1 + $0x508] sm:$0xff]  }
 0x28c   : > { %13940 = vmatpush3.bf16.msra.mxu0 %v14974_v27  ;;  %13281 = vmatprep.subr.bf16.mxu1 %v14975_v29  ;;  %v18301_v27 = vshrl.u32 %v17537_v34, 16  ;;  %v4181_v19 = vor.u32 %v4180_v63, %v4179_v15  ;;  %v14983_v15 = vld [vmem:[%s18237_s1 + $0xb10] sm:$0xff]   ;;  %v9213_v2 = vrot.slane %v18298_v6, 1  ;;  %v9221_v48 = vrot.slane %v9219_v47, 1 }
 0x28d   : > { %13953 = vmatprep.subr.bf16.mxu0 %v14978_v37 }
 0x28e   : > { %13270 = vmatmul.mubr.bf16.vlgmr.msra.gmra.mrb[0].mxu1 %v4174_v38  ;;  %v14982_v38 = vld [vmem:[%s18237_s1 + $0x510] sm:$0xff]   ;;  %v9217_v6 = vor.u32 %v18300_v7, %v9213_v2 }
 0x28f   : > { %13282 = vmatpush3.bf16.msra.mxu1 %v14975_v29  ;;  %13942 = vmatmul.mubr.bf16.vlgmr.msra.gmra.mrb[0].mxu0 %v9198_v44  ;;  %v4337_v29 = vld [vmem:[%s15180_s14 + $0x4] sm:$0x8]  ;;  %v9209_v44 = vor.u32 %v18301_v27, %v9205_v9  ;;  %v4191_v9 = vsel %vm3959_vm1, %v4181_v19, %v4190_v33 }
 0x290   : > { %13954 = vmatpush3.bf16.msra.mxu0 %v14978_v37  ;;  %13283 = vmatprep.subr.bf16.mxu1 %v14980_v0 }
 0x291   : > { %v13083_v4 = vpop.f32.mrb[56].mxu1  ;;  %13955 = vmatprep.subr.bf16.mxu0 %v14981_v40  ;;  %13273 = vmatprep.mubr.bf16.mxu1 %v4178_v21  ;;  %v4182_v21 = vsel %vm3959_vm1, %v4177_v43, %v4181_v19  ;;  %v9214_v47 = vsel %vm611_vm2, %v9209_v44, %v9213_v2  ;;  %v14991_v2 = vld [vmem:[%s18237_s1 + $0x528] sm:$0xff]  }
 0x292   : > { %v17605_v37 = vadd.f32 %v13083_v4, %v17466_v57  ;;  %v2845_v63 = vpop.f32.mrb[57].mxu1  ;;  %13945 = vmatprep.mubr.bf16.mxu0 %v9206_v28  ;;  %v14984_v28 = vld [vmem:[%s18237_s1 + $0x518] sm:$0xff]   ;;  %v15088_v4 = vld [vmem:[%s15180_s14 + $0x8] sm:$0xf] }
 0x293   : > { %v17610_v13 = vadd.f32 %v2845_v63, %v17474_v25  ;;  %v13084_v22 = vpop.f32.mrb[58].mxu1  ;;  %13284 = vmatpush3.bf16.msra.mxu1 %v14980_v0  ;;  %v11107_v25 = vcombine.low %v4337_v29, %v15088_v4  ;;  %v9371_v63 = vld [vmem:[%s15180_s14 + $0x10] sm:$0xe]  ;;  %v14985_v0 = vld [vmem:[%s18237_s1 + $0xb18] sm:$0xff]   ;;  %v9222_v29 = vsel %vm611_vm2, %v9217_v6, %v9221_v48 }
 0x294   : > { %13956 = vmatpush3.bf16.msra.mxu0 %v14981_v40  ;;  %v2848_v57 = vpop.f32.mrb[59].mxu1  ;;  %13285 = vmatprep.subr.bf16.mxu1 %v14982_v38  ;;  %v17621_v22 = vpop.f32.mrb[56].mxu0  ;;  %v17634_v4 = vcombine.low %v9371_v63, %v17293_v10  ;;  %v9223_v10 = vshrl.u32 %v17580_v53, 16  ;;  %v14993_v63 = vld [vmem:[%s18237_s1 + $0x530] sm:$0xff]  }
 0x295   : > { %v17624_v43 = vadd.f32 %v2848_v57, %v17491_v24  ;;  %13957 = vmatprep.subr.bf16.mxu0 %v14983_v15  ;;  %v17629_v40 = vpop.f32.mrb[57].mxu0  ;;  %v14987_v57 = vld [vmem:[%s18237_s1 + $0x520] sm:$0xff]   ;;  %v4359_v7 = vrot.slane %v11107_v25, 3 }
 0x296   : > { %13274 = vmatmul.mubr.bf16.gmra.mrb[4].mxu1 %v4182_v21  ;;  %v13756_v19 = vpop.f32.mrb[58].mxu0  ;;  %v15089_v21 = vld [vmem:[%s15180_s14 + $0xc] sm:$0xff]   ;;  %v9392_v6 = vrot.slane %v17634_v4, 1  ;;  %v9225_v25 = vor.u32 %v9223_v10, %v9221_v48  ;;  %v14996_v48 = vld [vmem:[%s18237_s1 + $0x538] sm:$0xff]  }
 0x297   : > { %13286 = vmatpush3.bf16.msra.mxu1 %v14982_v38  ;;  %13277 = vmatprep.mubr.bf16.mxu1 %v4191_v9  ;;  %v17636_v24 = vpop.f32.mrb[59].mxu0  ;;  %v4360_v27 = vrot.slane %v15089_v21, 3  ;;  %v14989_v38 = vld [vmem:[%s18237_s1 + $0xb20] sm:$0xff]   ;;  %v14992_v9 = vld [vmem:[%s18237_s1 + $0xb28] sm:$0xff]  }
 0x298   : > { %18374 = vst [vmem:[#allocation26_spill] sm:$0xff] %v17636_v24  ;;  %13958 = vmatpush3.bf16.msra.mxu0 %v14983_v15  ;;  %13287 = vmatprep.subr.bf16.mxu1 %v14984_v28  ;;  %v9393_v15 = vrot.slane %v17326_v49, 1  ;;  %v14999_v19 = vld [vmem:[%s18237_s1 + $0x540] sm:$0xff]  }
 0x299   : > { %13959 = vmatprep.subr.bf16.mxu0 %v14985_v0  ;;  %13946 = vmatmul.mubr.bf16.gmra.mrb[4].mxu0 %v9214_v47  ;;  %v4361_v44 = vsel %vm4358_vm4, %v4359_v7, %v4360_v27  ;;  %v14995_v7 = vld [vmem:[%s18237_s1 + $0xb30] sm:$0xff]   ;;  %v15001_v21 = vld [vmem:[%s18237_s1 + $0xb40] sm:$0xff]  }
 0x29a   : > { %13949 = vmatprep.mubr.bf16.mxu0 %v9222_v29  ;;  %v9395_v29 = vrot.slane %v17374_v16, 1 }
 0x29b   : > { %13288 = vmatpush3.bf16.msra.mxu1 %v14984_v28  ;;  %v9394_v28 = vsel %vm1076_vm3, %v9392_v6, %v9393_v15 }
 0x29c   : > { %13960 = vmatpush3.bf16.msra.mxu0 %v14985_v0  ;;  %13289 = vmatprep.subr.bf16.mxu1 %v14987_v57  ;;  %v15090_v0 = vld [vmem:[%s15180_s14 + $0x14] sm:$0xff]  }
 0x29d   : > { %13961 = vmatprep.subr.bf16.mxu0 %v14989_v38  ;;  %v4362_v47 = vrot.slane %v15090_v0, 3 }
 0x29e   : > { %13278 = vmatmul.mubr.bf16.gmra.mrb[84].mxu1 %v4190_v33  ;;  %v14997_v33 = vld [vmem:[%s18237_s1 + $0xb38] sm:$0xff]  }
 0x29f   : > { %13290 = vmatpush3.bf16.msra.mxu1 %v14987_v57  ;;  %13297 = vmatprep.mubr.bf16.mxu1 %v4361_v44  ;;  %v11116_v57 = vld [vmem:[%s15180_s14 + $0x84] sm:$0xe]  ;;  %v4363_v6 = vsel %vm4358_vm4, %v4360_v27, %v4362_v47  ;;  %v15092_v44 = vld [vmem:[%s15180_s14 + $0x88] sm:$0xf] }
 0x2a0   : > { %13962 = vmatpush3.bf16.msra.mxu0 %v14989_v38  ;;  %13291 = vmatprep.subr.bf16.mxu1 %v14991_v2  ;;  %v15091_v38 = vld [vmem:[%s15180_s14 + $0x1c] sm:$0xff]  }
 0x2a1   : > { %13963 = vmatprep.subr.bf16.mxu0 %v14992_v9  ;;  %13950 = vmatmul.mubr.bf16.gmra.mrb[84].mxu0 %v9225_v25  ;;  %v4364_v10 = vrot.slane %v15091_v38, 3  ;;  %v9396_v25 = vsel %vm1076_vm3, %v9393_v15, %v9395_v29  ;;  %v4368_v38 = vrot.slane %v17380_v8, 3 }
 0x2a2   : > { %13969 = vmatprep.mubr.bf16.mxu0 %v9394_v28  ;;  %v15002_v28 = vld [vmem:[%s18237_s1 + $0x548] sm:$0xff]  }
 0x2a3   : > { %13292 = vmatpush3.bf16.msra.mxu1 %v14991_v2  ;;  %v9397_v2 = vrot.slane %v17387_v31, 1  ;;  %v4365_v27 = vsel %vm4358_vm4, %v4362_v47, %v4364_v10  ;;  %v15005_v47 = vld [vmem:[%s18237_s1 + $0xb50] sm:$0xff]  }
 0x2a4   : > { %13964 = vmatpush3.bf16.msra.mxu0 %v14992_v9  ;;  %13293 = vmatprep.subr.bf16.mxu1 %v14993_v63  ;;  %v11144_v9 = vcombine.low %v11116_v57, %v15092_v44  ;;  %v15004_v57 = vld [vmem:[%s18237_s1 + $0x550] sm:$0xff]  }
 0x2a5   : > { %13965 = vmatprep.subr.bf16.mxu0 %v14995_v7 }
 0x2a6   : > { %v4575_v0 = vshrl.u32 %v11144_v9, 16  ;;  %v4578_v15 = vshll.u32 %v11144_v9, 16 }
 0x2a7   : > { %13294 = vmatpush3.bf16.msra.mxu1 %v14993_v63  ;;  %v15003_v63 = vld [vmem:[%s18237_s1 + $0xb48] sm:$0xff]  }
 0x2a8   : > { %13966 = vmatpush3.bf16.msra.mxu0 %v14995_v7  ;;  %13295 = vmatprep.subr.bf16.mxu1 %v14996_v48  ;;  %v15093_v7 = vld [vmem:[%s15180_s14 + $0x24] sm:$0xff]  }
 0x2a9   : > { %13967 = vmatprep.subr.bf16.mxu0 %v14997_v33 }
 0x2ab   : > { %13296 = vmatpush3.bf16.msra.mxu1 %v14996_v48  ;;  %v4366_v48 = vrot.slane %v15093_v7, 3  ;;  %v4580_v7 = vrot.slane %v4578_v15, 2 }
 0x2ac   : > { %13968 = vmatpush3.bf16.msra.mxu0 %v14997_v33  ;;  %13309 = vmatprep.subr.bf16.mxu1 %v14999_v19  ;;  %v9398_v33 = vsel %vm1076_vm3, %v9395_v29, %v9397_v2 }
 0x2ad   : > { %13981 = vmatprep.subr.bf16.mxu0 %v15001_v21 }
 0x2ae   : > { %13298 = vmatmul.mubr.bf16.vlgmr.msra.gmra.mrb[0].mxu1 %v4363_v6  ;;  %v9399_v6 = vrot.slane %v17422_v45, 1 }
 0x2af   : > { %13310 = vmatpush3.bf16.msra.mxu1 %v14999_v19  ;;  %13970 = vmatmul.mubr.bf16.vlgmr.msra.gmra.mrb[0].mxu0 %v9396_v25  ;;  %v15006_v25 = vld [vmem:[%s18237_s1 + $0x558] sm:$0xff]  }
 0x2b0   : > { %13982 = vmatpush3.bf16.msra.mxu0 %v15001_v21  ;;  %13311 = vmatprep.subr.bf16.mxu1 %v15002_v28  ;;  %v4367_v21 = vsel %vm4358_vm4, %v4364_v10, %v4366_v48  ;;  %v4369_v10 = vsel %vm4358_vm4, %v4366_v48, %v4368_v38  ;;  %v9400_v48 = vsel %vm1076_vm3, %v9397_v2, %v9399_v6  ;;  %v15009_v2 = vld [vmem:[%s18237_s1 + $0xb60] sm:$0xff]  }
 0x2b1   : > { %v13111_v44 = vpop.f32.mrb[60].mxu1  ;;  %13983 = vmatprep.subr.bf16.mxu0 %v15003_v63  ;;  %13301 = vmatprep.mubr.bf16.mxu1 %v4365_v27  ;;  %v9401_v27 = vrot.slane %v17433_v52, 1  ;;  %v15007_v52 = vld [vmem:[%s18237_s1 + $0xb58] sm:$0xff]  }
 0x2b2   : > { %v17699_v19 = vadd.f32 %v13111_v44, %v17605_v37  ;;  %v3044_v29 = vpop.f32.mrb[61].mxu1  ;;  %13973 = vmatprep.mubr.bf16.mxu0 %v9398_v33  ;;  %v4577_v37 = vrot.slane %v4575_v0, 1  ;;  %v18375_v33 = vshrl.u32 %v15277_v56, 16 }
 0x2b3   : > { %v17704_v9 = vadd.f32 %v3044_v29, %v17610_v13  ;;  %v13112_v8 = vpop.f32.mrb[62].mxu1  ;;  %13312 = vmatpush3.bf16.msra.mxu1 %v15002_v28  ;;  %v18376_v13 = vshll.u32 %v15277_v56, 16  ;;  %v11878_v28 = vld [vmem:[%s15180_s14 + $0x50] sm:$0xe]  ;;  %v9402_v56 = vsel %vm1076_vm3, %v9399_v6, %v9401_v27  ;;  %v15011_v6 = vld [vmem:[%s18237_s1 + $0xb68] sm:$0xff]  }
 0x2b4   : > { %13984 = vmatpush3.bf16.msra.mxu0 %v15003_v63  ;;  %v3047_v44 = vpop.f32.mrb[63].mxu1  ;;  %13313 = vmatprep.subr.bf16.mxu1 %v15004_v57  ;;  %v4585_v39 = vrot.slane %v18375_v33, 1  ;;  %v17716_v8 = vpop.f32.mrb[60].mxu0  ;;  %v17729_v15 = vcombine.low %v11878_v28, %v17441_v20  ;;  %v4581_v33 = vor.u32 %v4580_v7, %v4577_v37  ;;  %v15012_v37 = vld [vmem:[%s18237_s1 + $0x570] sm:$0xff]  }
 0x2b5   : > { %v4588_v29 = vrot.slane %v18376_v13, 2  ;;  %v17719_v24 = vadd.f32 %v3047_v44, %v17624_v43  ;;  %13985 = vmatprep.subr.bf16.mxu0 %v15005_v47  ;;  %v17724_v63 = vpop.f32.mrb[61].mxu0  ;;  %v15008_v44 = vld [vmem:[%s18237_s1 + $0x560] sm:$0xff]   ;;  %v11127_v7 = vld [vmem:[%s15180_s14 + $0xb0] sm:$0x3] }
 0x2b6   : > { %13302 = vmatmul.mubr.bf16.gmra.mrb[4].mxu1 %v4367_v21  ;;  %v13784_v0 = vpop.f32.mrb[62].mxu0  ;;  %v9569_v20 = vrot.slane %v17729_v15, 1 }
 0x2b7   : > { %13314 = vmatpush3.bf16.msra.mxu1 %v15004_v57  ;;  %13305 = vmatprep.mubr.bf16.mxu1 %v4369_v10  ;;  %v17731_v43 = vpop.f32.mrb[63].mxu0  ;;  %v4589_v21 = vor.u32 %v4588_v29, %v4585_v39  ;;  %v9570_v57 = vrot.slane %v17482_v58, 1  ;;  %v15013_v10 = vld [vmem:[%s18237_s1 + $0xb70] sm:$0xff]   ;;  %v18379_v29 = vshll.u32 %v15292_v1, 16  ;;  %v15014_v0 = vld [vmem:[%s18237_s1 + $0x578] sm:$0xff]  }
 0x2b8   : > { %18377 = vst [vmem:[#allocation27_spill] sm:$0xff] %v17731_v43  ;;  %13986 = vmatpush3.bf16.msra.mxu0 %v15005_v47  ;;  %13315 = vmatprep.subr.bf16.mxu1 %v15006_v25  ;;  %v15010_v47 = vld [vmem:[%s18237_s1 + $0x568] sm:$0xff]  }
 0x2b9   : > { %13987 = vmatprep.subr.bf16.mxu0 %v15007_v52  ;;  %13974 = vmatmul.mubr.bf16.gmra.mrb[4].mxu0 %v9400_v48  ;;  %v4590_v39 = vsel %vm1431_vm5, %v4581_v33, %v4589_v21  ;;  %v4597_v28 = vrot.slane %v18379_v29, 2 }
 0x2ba   : > { %13977 = vmatprep.mubr.bf16.mxu0 %v9402_v56  ;;  %v18380_v56 = vshrl.u32 %v15327_v26, 16 }
 0x2bb   : > { %13316 = vmatpush3.bf16.msra.mxu1 %v15006_v25  ;;  %v9571_v25 = vsel %vm1076_vm3, %v9569_v20, %v9570_v57 }
 0x2bc   : > { %13988 = vmatpush3.bf16.msra.mxu0 %v15007_v52  ;;  %13317 = vmatprep.subr.bf16.mxu1 %v15008_v44  ;;  %v15094_v52 = vld [vmem:[%s15180_s14 + $0xac] sm:$0xf] }
 0x2bd   : > { %13989 = vmatprep.subr.bf16.mxu0 %v15009_v2  ;;  %v17761_v48 = vcombine.low %v15094_v52, %v11127_v7  ;;  %v18382_v7 = vshrl.u32 %v15339_v36, 16 }
 0x2be   : > { %13306 = vmatmul.mubr.bf16.gmra.mrb[88].mxu1 %v4368_v38  ;;  %v18378_v38 = vshrl.u32 %v15292_v1, 16  ;;  %v18381_v1 = vshll.u32 %v15327_v26, 16  ;;  %v15019_v26 = vld [vmem:[%s18237_s1 + $0xb80] sm:$0xff]  }
 0x2bf   : > { %13318 = vmatpush3.bf16.msra.mxu1 %v15008_v44  ;;  %13325 = vmatprep.mubr.bf16.mxu1 %v4590_v39  ;;  %v4603_v44 = vrot.slane %v18380_v56, 1  ;;  %v4619_v20 = vshrl.u32 %v17761_v48, 16  ;;  %v15017_v39 = vld [vmem:[%s18237_s1 + $0x580] sm:$0xff]   ;;  %v9574_v56 = vrot.slane %v17537_v34, 1 }
 0x2c0   : > { %13990 = vmatpush3.bf16.msra.mxu0 %v15009_v2  ;;  %13319 = vmatprep.subr.bf16.mxu1 %v15010_v47  ;;  %v4594_v13 = vrot.slane %v18378_v38, 1  ;;  %v4606_v33 = vrot.slane %v18381_v1, 2  ;;  %v4612_v38 = vrot.slane %v18382_v7, 1 }
 0x2c1   : > { %13991 = vmatprep.subr.bf16.mxu0 %v15011_v6  ;;  %13978 = vmatmul.mubr.bf16.gmra.mrb[88].mxu0 %v9401_v27  ;;  %v15015_v27 = vld [vmem:[%s18237_s1 + $0xb78] sm:$0xff]  }
 0x2c2   : > { %13997 = vmatprep.mubr.bf16.mxu0 %v9571_v25  ;;  %v4598_v2 = vor.u32 %v4597_v28, %v4594_v13  ;;  %v11158_v25 = vld [vmem:[%s15180_s14 + $0xc4] sm:$0xe]  ;;  %v4621_v28 = vrot.slane %v4619_v20, 1  ;;  %v15022_v20 = vld [vmem:[%s18237_s1 + $0x590] sm:$0xff]  }
 0x2c3   : > { %13320 = vmatpush3.bf16.msra.mxu1 %v15010_v47  ;;  %v4622_v47 = vshll.u32 %v17761_v48, 16 }
 0x2c4   : > { %13992 = vmatpush3.bf16.msra.mxu0 %v15011_v6  ;;  %13321 = vmatprep.subr.bf16.mxu1 %v15012_v37  ;;  %v9572_v6 = vrot.slane %v17522_v11, 1  ;;  %v4599_v29 = vsel %vm1431_vm5, %v4589_v21, %v4598_v2 }
 0x2c5   : > { %13993 = vmatprep.subr.bf16.mxu0 %v15013_v10  ;;  %v4624_v52 = vrot.slane %v4622_v47, 2 }
 0x2c6   : > { %v9573_v1 = vsel %vm1076_vm3, %v9570_v57, %v9572_v6  ;;  %v9575_v57 = vsel %vm1076_vm3, %v9572_v6, %v9574_v56 }
 0x2c7   : > { %13322 = vmatpush3.bf16.msra.mxu1 %v15012_v37  ;;  %v4607_v37 = vor.u32 %v4606_v33, %v4603_v44  ;;  %v15020_v44 = vld [vmem:[%s18237_s1 + $0x588] sm:$0xff]  }
 0x2c8   : > { %13994 = vmatpush3.bf16.msra.mxu0 %v15013_v10  ;;  %13323 = vmatprep.subr.bf16.mxu1 %v15014_v0  ;;  %v18383_v10 = vshll.u32 %v15339_v36, 16  ;;  %v15095_v33 = vld [vmem:[%s15180_s14 + $0xc8] sm:$0xf] }
 0x2c9   : > { %13995 = vmatprep.subr.bf16.mxu0 %v15015_v27  ;;  %v11186_v7 = vcombine.low %v11158_v25, %v15095_v33  ;;  %v15021_v36 = vld [vmem:[%s18237_s1 + $0xb88] sm:$0xff]   ;;  %v4608_v21 = vsel %vm1431_vm5, %v4598_v2, %v4607_v37  ;;  %v15023_v2 = vld [vmem:[%s18237_s1 + $0xb90] sm:$0xff]  }
 0x2ca   : > { %v4615_v13 = vrot.slane %v18383_v10, 2 }
 0x2cb   : > { %13324 = vmatpush3.bf16.msra.mxu1 %v15014_v0  ;;  %v4832_v47 = vshrl.u32 %v11186_v7, 16  ;;  %v4835_v25 = vshll.u32 %v11186_v7, 16 }
 0x2cc   : > { %13996 = vmatpush3.bf16.msra.mxu0 %v15015_v27  ;;  %13337 = vmatprep.subr.bf16.mxu1 %v15017_v39  ;;  %v4616_v0 = vor.u32 %v4615_v13, %v4612_v38  ;;  %v17798_v27 = vor.u32 %v4624_v52, %v4621_v28  ;;  %v9578_v13 = vrot.slane %v17580_v53, 1  ;;  %v15024_v52 = vld [vmem:[%s18237_s1 + $0x598] sm:$0xff]  }
 0x2cd   : > { %14009 = vmatprep.subr.bf16.mxu0 %v15019_v26  ;;  %v4834_v53 = vrot.slane %v4832_v47, 1  ;;  %v4837_v7 = vrot.slane %v4835_v25, 2 }
 0x2ce   : > { %13326 = vmatmul.mubr.bf16.vlgmr.msra.gmra.mrb[0].mxu1 %v4599_v29  ;;  %v4617_v6 = vsel %vm1431_vm5, %v4607_v37, %v4616_v0  ;;  %v9750_v37 = vshll.u32 %v17634_v4, 16 }
 0x2cf   : > { %13338 = vmatpush3.bf16.msra.mxu1 %v15017_v39  ;;  %13998 = vmatmul.mubr.bf16.vlgmr.msra.gmra.mrb[0].mxu0 %v9573_v1  ;;  %v9747_v1 = vshrl.u32 %v17634_v4, 16  ;;  %v15025_v4 = vld [vmem:[%s18237_s1 + $0xb98] sm:$0xff]  }
 0x2d0   : > { %14010 = vmatpush3.bf16.msra.mxu0 %v15019_v26  ;;  %13339 = vmatprep.subr.bf16.mxu1 %v15020_v44  ;;  %v9576_v26 = vrot.slane %v17568_v62, 1 }
 0x2d1   : > { %v13139_v10 = vpop.f32.mrb[64].mxu1  ;;  %14011 = vmatprep.subr.bf16.mxu0 %v15021_v36  ;;  %13329 = vmatprep.mubr.bf16.mxu1 %v4608_v21 }
 0x2d2   : > { %v17808_v39 = vadd.f32 %v13139_v10, %v17699_v19  ;;  %v3301_v38 = vpop.f32.mrb[65].mxu1  ;;  %14001 = vmatprep.mubr.bf16.mxu0 %v9575_v57  ;;  %v4626_v19 = vsel %vm1431_vm5, %v4616_v0, %v17798_v27  ;;  %v9577_v0 = vsel %vm1076_vm3, %v9574_v56, %v9576_v26  ;;  %v9579_v47 = vsel %vm1076_vm3, %v9576_v26, %v9578_v13  ;;  %v15027_v56 = vld [vmem:[%s18237_s1 + $0x5a0] sm:$0xff]  }
 0x2d3   : > { %v17814_v29 = vadd.f32 %v3301_v38, %v17704_v9  ;;  %v13140_v28 = vpop.f32.mrb[66].mxu1  ;;  %13340 = vmatpush3.bf16.msra.mxu1 %v15020_v44  ;;  %v18384_v9 = vshrl.u32 %v15188_v14, 16  ;;  %v18385_v44 = vshll.u32 %v15188_v14, 16  ;;  %v9749_v14 = vrot.slane %v9747_v1, 1 }
 0x2d4   : > { %14012 = vmatpush3.bf16.msra.mxu0 %v15021_v36  ;;  %v3304_v33 = vpop.f32.mrb[67].mxu1  ;;  %13341 = vmatprep.subr.bf16.mxu1 %v15022_v20  ;;  %v17827_v10 = vpop.f32.mrb[64].mxu0  ;;  %v9752_v28 = vrot.slane %v9750_v37, 2  ;;  %v15030_v37 = vld [vmem:[%s18237_s1 + $0xba8] sm:$0xff]  }
 0x2d5   : > { %v4842_v21 = vrot.slane %v18384_v9, 1  ;;  %v4845_v57 = vrot.slane %v18385_v44, 2  ;;  %v17830_v38 = vadd.f32 %v3304_v33, %v17719_v24  ;;  %14013 = vmatprep.subr.bf16.mxu0 %v15023_v2  ;;  %v17835_v36 = vpop.f32.mrb[65].mxu0  ;;  %v18386_v24 = vshrl.u32 %v17326_v49, 16 }
 0x2d6   : > { %13330 = vmatmul.mubr.bf16.gmra.mrb[4].mxu1 %v4617_v6  ;;  %v13812_v25 = vpop.f32.mrb[66].mxu0  ;;  %v18387_v9 = vshll.u32 %v17326_v49, 16  ;;  %v4838_v6 = vor.u32 %v4837_v7, %v4834_v53  ;;  %v9753_v49 = vor.u32 %v9752_v28, %v9749_v14  ;;  %v15031_v53 = vld [vmem:[%s18237_s1 + $0x5b0] sm:$0xff]   ;;  %v15033_v14 = vld [vmem:[%s18237_s1 + $0x5b8] sm:$0xff]  }
 0x2d7   : > { %13342 = vmatpush3.bf16.msra.mxu1 %v15022_v20  ;;  %13333 = vmatprep.mubr.bf16.mxu1 %v4626_v19  ;;  %v9754_v33 = vrot.slane %v18386_v24, 1  ;;  %v17843_v43 = vpop.f32.mrb[67].mxu0  ;;  %v4846_v26 = vor.u32 %v4845_v57, %v4842_v21  ;;  %v15028_v20 = vld [vmem:[%s18237_s1 + $0xba0] sm:$0xff]   ;;  %v15032_v7 = vld [vmem:[%s18237_s1 + $0xbb0] sm:$0xff]   ;;  %v18389_v57 = vshll.u32 %v15206_v23, 16  ;;  %v15034_v24 = vld [vmem:[%s18237_s1 + $0xbb8] sm:$0xff]  }
 0x2d8   : > { %v9755_v44 = vrot.slane %v18387_v9, 2  ;;  %14014 = vmatpush3.bf16.msra.mxu0 %v15023_v2  ;;  %13343 = vmatprep.subr.bf16.mxu1 %v15024_v52  ;;  %v15029_v2 = vld [vmem:[%s18237_s1 + $0x5a8] sm:$0xff]   ;;  %v18393_v9 = vshll.u32 %v15227_v32, 16 }
 0x2d9   : > { %14015 = vmatprep.subr.bf16.mxu0 %v15025_v4  ;;  %14002 = vmatmul.mubr.bf16.gmra.mrb[4].mxu0 %v9577_v0  ;;  %v4847_v1 = vsel %vm1431_vm5, %v4838_v6, %v4846_v26  ;;  %v9725_v0 = vld [vmem:[%s15180_s14 + $0x3c] sm:$0x3] }
 0x2da   : > { %14005 = vmatprep.mubr.bf16.mxu0 %v9579_v47  ;;  %v9756_v19 = vor.u32 %v9755_v44, %v9754_v33  ;;  %v18390_v47 = vshrl.u32 %v17374_v16, 16  ;;  %v4863_v44 = vrot.slane %v18393_v9, 2 }
 0x2db   : > { %13344 = vmatpush3.bf16.msra.mxu1 %v15024_v52 }
 0x2dc   : > { %14016 = vmatpush3.bf16.msra.mxu0 %v15025_v4  ;;  %13345 = vmatprep.subr.bf16.mxu1 %v15027_v56  ;;  %v9757_v52 = vsel %vm1431_vm5, %v9753_v49, %v9756_v19  ;;  %v4854_v4 = vrot.slane %v18389_v57, 2  ;;  %v9758_v25 = vrot.slane %v18390_v47, 1  ;;  %v18395_v49 = vshll.u32 %v17387_v31, 16 }
 0x2dd   : > { %14017 = vmatprep.subr.bf16.mxu0 %v15028_v20 }
 0x2de   : > { %13334 = vmatmul.mubr.bf16.gmra.mrb[92].mxu1 %v17798_v27  ;;  %v18388_v27 = vshrl.u32 %v15206_v23, 16  ;;  %v18392_v23 = vshrl.u32 %v15227_v32, 16  ;;  %v4876_v32 = vshrl.u32 %v15255_v46, 16 }
 0x2df   : > { %13346 = vmatpush3.bf16.msra.mxu1 %v15027_v56  ;;  %13353 = vmatprep.mubr.bf16.mxu1 %v4847_v1  ;;  %v17886_v56 = vcombine.low %v17413_v51, %v9725_v0  ;;  %v15036_v1 = vld [vmem:[%s18237_s1 + $0x5c0] sm:$0xff]   ;;  %v4879_v51 = vshll.u32 %v15255_v46, 16 }
 0x2e0   : > { %14018 = vmatpush3.bf16.msra.mxu0 %v15028_v20  ;;  %13347 = vmatprep.subr.bf16.mxu1 %v15029_v2  ;;  %v4851_v21 = vrot.slane %v18388_v27, 1  ;;  %v4860_v33 = vrot.slane %v18392_v23, 1  ;;  %v18394_v20 = vshrl.u32 %v17387_v31, 16  ;;  %v18399_v23 = vshll.u32 %v17422_v45, 16 }
 0x2e1   : > { %14019 = vmatprep.subr.bf16.mxu0 %v15030_v37  ;;  %14006 = vmatmul.mubr.bf16.gmra.mrb[92].mxu0 %v9578_v13  ;;  %v18391_v13 = vshll.u32 %v17374_v16, 16  ;;  %v9771_v31 = vshrl.u32 %v17886_v56, 16 }
 0x2e2   : > { %14025 = vmatprep.mubr.bf16.mxu0 %v9757_v52  ;;  %v4855_v6 = vor.u32 %v4854_v4, %v4851_v21  ;;  %v9762_v16 = vrot.slane %v18394_v20, 1  ;;  %v15037_v52 = vld [vmem:[%s18237_s1 + $0xbc0] sm:$0xff]   ;;  %v18396_v21 = vshrl.u32 %v15232_v35, 16  ;;  %v18397_v4 = vshll.u32 %v15232_v35, 16 }
 0x2e3   : > { %13348 = vmatpush3.bf16.msra.mxu1 %v15029_v2  ;;  %v9759_v28 = vrot.slane %v18391_v13, 2  ;;  %v9763_v2 = vrot.slane %v18395_v49, 2  ;;  %v4878_v13 = vrot.slane %v4876_v32, 1  ;;  %v18398_v35 = vshrl.u32 %v17422_v45, 16  ;;  %v15041_v45 = vld [vmem:[%s18237_s1 + $0xbd0] sm:$0xff]  }
 0x2e4   : > { %14020 = vmatpush3.bf16.msra.mxu0 %v15030_v37  ;;  %13349 = vmatprep.subr.bf16.mxu1 %v15031_v53  ;;  %v4856_v27 = vsel %vm1431_vm5, %v4846_v26, %v4855_v6  ;;  %v4869_v57 = vrot.slane %v18396_v21, 1  ;;  %v4872_v0 = vrot.slane %v18397_v4, 2  ;;  %v15039_v26 = vld [vmem:[%s18237_s1 + $0xbc8] sm:$0xff]  }
 0x2e5   : > { %14021 = vmatprep.subr.bf16.mxu0 %v15032_v7  ;;  %v9760_v37 = vor.u32 %v9759_v28, %v9758_v25  ;;  %v9764_v46 = vor.u32 %v9763_v2, %v9762_v16  ;;  %v15038_v25 = vld [vmem:[%s18237_s1 + $0x5c8] sm:$0xff]   ;;  %v4881_v28 = vrot.slane %v4879_v51, 2 }
 0x2e7   : > { %13350 = vmatpush3.bf16.msra.mxu1 %v15031_v53  ;;  %v4864_v53 = vor.u32 %v4863_v44, %v4860_v33  ;;  %v9761_v47 = vsel %vm1431_vm5, %v9756_v19, %v9760_v37  ;;  %v9767_v19 = vrot.slane %v18399_v23, 2  ;;  %v9773_v33 = vrot.slane %v9771_v31, 1 }
 0x2e8   : > { %14022 = vmatpush3.bf16.msra.mxu0 %v15032_v7  ;;  %13351 = vmatprep.subr.bf16.mxu1 %v15033_v14  ;;  %v9774_v7 = vshll.u32 %v17886_v56, 16  ;;  %v4873_v44 = vor.u32 %v4872_v0, %v4869_v57  ;;  %v9765_v20 = vsel %vm1431_vm5, %v9760_v37, %v9764_v46  ;;  %v4882_v16 = vor.u32 %v4881_v28, %v4878_v13 }
 0x2e9   : > { %14023 = vmatprep.subr.bf16.mxu0 %v15034_v24  ;;  %v5050_v23 = vrot.slane %v15282_v59, 2 }
 0x2ea   : > { %v9776_v9 = vrot.slane %v9774_v7, 2  ;;  %v4874_v31 = vsel %vm1431_vm5, %v4864_v53, %v4873_v44  ;;  %v9946_v7 = vshrl.u32 %v17729_v15, 16  ;;  %v4883_v57 = vsel %vm1431_vm5, %v4873_v44, %v4882_v16 }
 0x2eb   : > { %13352 = vmatpush3.bf16.msra.mxu1 %v15033_v14  ;;  %v4865_v14 = vsel %vm1431_vm5, %v4855_v6, %v4864_v53  ;;  %v15040_v6 = vld [vmem:[%s18237_s1 + $0x5d0] sm:$0xff]   ;;  %v15043_v53 = vld [vmem:[%s18237_s1 + $0xbd8] sm:$0xff]  }
 0x2ec   : > { %14024 = vmatpush3.bf16.msra.mxu0 %v15034_v24  ;;  %13365 = vmatprep.subr.bf16.mxu1 %v15036_v1  ;;  %v9766_v24 = vrot.slane %v18398_v35, 1  ;;  %v9777_v32 = vor.u32 %v9776_v9, %v9773_v33  ;;  %v9948_v13 = vrot.slane %v9946_v7, 1  ;;  %v15045_v9 = vld [vmem:[%s18237_s1 + $0xbe0] sm:$0xff]  }
 0x2ed   : > { %14037 = vmatprep.subr.bf16.mxu0 %v15037_v52 }
 0x2ee   : > { %13354 = vmatmul.mubr.bf16.vlgmr.msra.gmra.mrb[0].mxu1 %v4856_v27  ;;  %v9768_v37 = vor.u32 %v9767_v19, %v9766_v24  ;;  %v9949_v27 = vshll.u32 %v17729_v15, 16  ;;  %v15096_v19 = vld [vmem:[%s15180_s14 + $0x8c] sm:$0xff]  }
 0x2ef   : > { %13366 = vmatpush3.bf16.msra.mxu1 %v15036_v1  ;;  %14026 = vmatmul.mubr.bf16.vlgmr.msra.gmra.mrb[0].mxu0 %v9761_v47  ;;  %v5051_v33 = vrot.slane %v15096_v19, 2 }
 0x2f0   : > { %14038 = vmatpush3.bf16.msra.mxu0 %v15037_v52  ;;  %13367 = vmatprep.subr.bf16.mxu1 %v15038_v25  ;;  %v9769_v0 = vsel %vm1431_vm5, %v9764_v46, %v9768_v37  ;;  %v9778_v47 = vsel %vm1431_vm5, %v9768_v37, %v9777_v32  ;;  %v9951_v28 = vrot.slane %v9949_v27, 2  ;;  %v15044_v46 = vld [vmem:[%s18237_s1 + $0x5e0] sm:$0xff]   ;;  %v15052_v27 = vld [vmem:[%s18237_s1 + $0xbf8] sm:$0xff]  }
 0x2f1   : > { %v13167_v49 = vpop.f32.mrb[68].mxu1  ;;  %14039 = vmatprep.subr.bf16.mxu0 %v15039_v26  ;;  %13357 = vmatprep.mubr.bf16.mxu1 %v4865_v14  ;;  %v18401_v14 = vshll.u32 %v17482_v58, 16  ;;  %v5052_v59 = vsel %vm3604_vm0, %v5050_v23, %v5051_v33  ;;  %v18406_v23 = vshrl.u32 %v17568_v62, 16 }
 0x2f2   : > { %v17927_v2 = vadd.f32 %v13167_v49, %v17808_v39  ;;  %v3558_v1 = vpop.f32.mrb[69].mxu1  ;;  %14029 = vmatprep.mubr.bf16.mxu0 %v9765_v20  ;;  %v15042_v39 = vld [vmem:[%s18237_s1 + $0x5d8] sm:$0xff]   ;;  %v15046_v20 = vld [vmem:[%s18237_s1 + $0x5e8] sm:$0xff]  }
 0x2f3   : > { %v17930_v51 = vadd.f32 %v3558_v1, %v17814_v29  ;;  %v13168_v52 = vpop.f32.mrb[70].mxu1  ;;  %13368 = vmatpush3.bf16.msra.mxu1 %v15038_v25  ;;  %v9954_v35 = vrot.slane %v18401_v14, 2  ;;  %v15050_v1 = vld [vmem:[%s18237_s1 + $0xbf0] sm:$0xff]   ;;  %v9965_v19 = vrot.slane %v18406_v23, 1  ;;  %v15058_v23 = vld [vmem:[%s18237_s1 + $0xc28] sm:$0xff]  }
 0x2f4   : > { %14040 = vmatpush3.bf16.msra.mxu0 %v15039_v26  ;;  %v3561_v21 = vpop.f32.mrb[71].mxu1  ;;  %13369 = vmatprep.subr.bf16.mxu1 %v15040_v6  ;;  %v17939_v4 = vpop.f32.mrb[68].mxu0  ;;  %v15051_v52 = vld [vmem:[%s18237_s1 + $0x5f8] sm:$0xff]  }
 0x2f5   : > { %v17942_v29 = vadd.f32 %v3561_v21, %v17830_v38  ;;  %14041 = vmatprep.subr.bf16.mxu0 %v15041_v45  ;;  %v17947_v15 = vpop.f32.mrb[69].mxu0  ;;  %v18400_v38 = vshrl.u32 %v17482_v58, 16  ;;  %v9952_v58 = vor.u32 %v9951_v28, %v9948_v13  ;;  %v15097_v21 = vld [vmem:[%s15180_s14 + $0x94] sm:$0xff]   ;;  %v15053_v13 = vld [vmem:[%s18237_s1 + $0xc00] sm:$0xff]  }
 0x2f6   : > { %13358 = vmatmul.mubr.bf16.gmra.mrb[4].mxu1 %v4874_v31  ;;  %v13840_v25 = vpop.f32.mrb[70].mxu0  ;;  %v18403_v31 = vshll.u32 %v17522_v11, 16  ;;  %v15098_v28 = vld [vmem:[%s15180_s14 + $0x9c] sm:$0xff]  }
 0x2f7   : > { %13370 = vmatpush3.bf16.msra.mxu1 %v15040_v6  ;;  %13361 = vmatprep.mubr.bf16.mxu1 %v4883_v57  ;;  %v9953_v26 = vrot.slane %v18400_v38, 1  ;;  %v17955_v24 = vpop.f32.mrb[71].mxu0  ;;  %v15047_v6 = vld [vmem:[%s18237_s1 + $0xbe8] sm:$0xff]   ;;  %v18404_v57 = vshrl.u32 %v17537_v34, 16  ;;  %v5055_v38 = vrot.slane %v15098_v28, 2 }
 0x2f8   : > { %14042 = vmatpush3.bf16.msra.mxu0 %v15041_v45  ;;  %13371 = vmatprep.subr.bf16.mxu1 %v15042_v39  ;;  %v15049_v45 = vld [vmem:[%s18237_s1 + $0x5f0] sm:$0xff]   ;;  %v9958_v7 = vrot.slane %v18403_v31, 2 }
 0x2f9   : > { %14043 = vmatprep.subr.bf16.mxu0 %v15043_v53  ;;  %14030 = vmatmul.mubr.bf16.gmra.mrb[4].mxu0 %v9769_v0  ;;  %v9955_v44 = vor.u32 %v9954_v35, %v9953_v26  ;;  %v18405_v0 = vshll.u32 %v17537_v34, 16 }
 0x2fa   : > { %14033 = vmatprep.mubr.bf16.mxu0 %v9778_v47 }
 0x2fb   : > { %13372 = vmatpush3.bf16.msra.mxu1 %v15042_v39  ;;  %v9956_v49 = vsel %vm1431_vm5, %v9952_v58, %v9955_v44  ;;  %v5053_v39 = vrot.slane %v15097_v21, 2  ;;  %v9962_v47 = vrot.slane %v18405_v0, 2  ;;  %v10123_v21 = vld [vmem:[%s15180_s14 + $0x10] sm:$0xc] }
 0x2fc   : > { %14044 = vmatpush3.bf16.msra.mxu0 %v15043_v53  ;;  %13373 = vmatprep.subr.bf16.mxu1 %v15044_v46  ;;  %v9961_v53 = vrot.slane %v18404_v57, 1 }
 0x2fd   : > { %14045 = vmatprep.subr.bf16.mxu0 %v15045_v9  ;;  %v5054_v26 = vsel %vm3604_vm0, %v5051_v33, %v5053_v39  ;;  %v5056_v33 = vsel %vm3604_vm0, %v5053_v39, %v5055_v38 }
 0x2fe   : > { %13362 = vmatmul.mubr.bf16.gmra.mrb[96].mxu1 %v4882_v16  ;;  %v18402_v16 = vshrl.u32 %v17522_v11, 16  ;;  %v9963_v14 = vor.u32 %v9962_v47, %v9961_v53  ;;  %v15100_v47 = vld [vmem:[%s15180_s14 + $0x14] sm:$0xf] }
 0x2ff   : > { %13374 = vmatpush3.bf16.msra.mxu1 %v15044_v46  ;;  %13381 = vmatprep.mubr.bf16.mxu1 %v5052_v59  ;;  %v15054_v46 = vld [vmem:[%s18237_s1 + $0xc08] sm:$0xff]  }
 0x300   : > { %14046 = vmatpush3.bf16.msra.mxu0 %v15045_v9  ;;  %13375 = vmatprep.subr.bf16.mxu1 %v15046_v20  ;;  %v9957_v37 = vrot.slane %v18402_v16, 1  ;;  %v18407_v9 = vshll.u32 %v17568_v62, 16  ;;  %v15055_v62 = vld [vmem:[%s18237_s1 + $0xc10] sm:$0xff]  }
 0x301   : > { %14047 = vmatprep.subr.bf16.mxu0 %v15047_v6  ;;  %14034 = vmatmul.mubr.bf16.gmra.mrb[96].mxu0 %v9777_v32  ;;  %v11929_v32 = vld [vmem:[%s15180_s14 + $0x7c] sm:$0x3] }
 0x302   : > { %14053 = vmatprep.mubr.bf16.mxu0 %v9956_v49  ;;  %v11946_v25 = vcombine.low %v17561_v60, %v11929_v32  ;;  %v9959_v11 = vor.u32 %v9958_v7, %v9957_v37  ;;  %v9966_v58 = vrot.slane %v18407_v9, 2 }
 0x303   : > { %13376 = vmatpush3.bf16.msra.mxu1 %v15046_v20 }
 0x304   : > { %14048 = vmatpush3.bf16.msra.mxu0 %v15047_v6  ;;  %13377 = vmatprep.subr.bf16.mxu1 %v15049_v45  ;;  %v9970_v35 = vshrl.u32 %v11946_v25, 16  ;;  %v9973_v34 = vshll.u32 %v11946_v25, 16  ;;  %v9960_v60 = vsel %vm1431_vm5, %v9955_v44, %v9959_v11  ;;  %v9964_v20 = vsel %vm1431_vm5, %v9959_v11, %v9963_v14  ;;  %v15099_v44 = vld [vmem:[%s15180_s14 + $0xa4] sm:$0xff]  }
 0x305   : > { %14049 = vmatprep.subr.bf16.mxu0 %v15050_v1  ;;  %v5057_v59 = vrot.slane %v15099_v44, 2  ;;  %v11971_v25 = vcombine.low %v10123_v21, %v15100_v47 }
 0x306   : > { %v9972_v6 = vrot.slane %v9970_v35, 1  ;;  %v9975_v49 = vrot.slane %v9973_v34, 2  ;;  %v15102_v35 = vld [vmem:[%s15180_s14 + $0x20] sm:$0xff]  }
 0x307   : > { %13378 = vmatpush3.bf16.msra.mxu1 %v15049_v45  ;;  %v9967_v45 = vor.u32 %v9966_v58, %v9965_v19  ;;  %v5058_v32 = vsel %vm3604_vm0, %v5055_v38, %v5057_v59  ;;  %v10144_v38 = vrot.slane %v11971_v25, 2  ;;  %v10147_v34 = vrot.slane %v15102_v35, 2  ;;  %v15060_v58 = vld [vmem:[%s18237_s1 + $0xc30] sm:$0xff]  }
 0x308   : > { %14050 = vmatpush3.bf16.msra.mxu0 %v15050_v1  ;;  %13379 = vmatprep.subr.bf16.mxu1 %v15051_v52 }
 0x309   : > { %14051 = vmatprep.subr.bf16.mxu0 %v15052_v27  ;;  %v9968_v57 = vsel %vm1431_vm5, %v9963_v14, %v9967_v45 }
 0x30b   : > { %13380 = vmatpush3.bf16.msra.mxu1 %v15051_v52  ;;  %v5059_v52 = vrot.slane %v17761_v48, 2 }
 0x30c   : > { %14052 = vmatpush3.bf16.msra.mxu0 %v15052_v27  ;;  %14093 = vmatprep.subr.bf16.mxu1 %v15053_v13  ;;  %v9976_v27 = vor.u32 %v9975_v49, %v9972_v6 }
 0x30d   : > { %14065 = vmatprep.subr.bf16.mxu0 %v15053_v13  ;;  %v5060_v0 = vsel %vm3604_vm0, %v5057_v59, %v5059_v52  ;;  %v10153_v59 = vrot.slane %v17886_v56, 2 }
 0x30e   : > { %13382 = vmatmul.mubr.bf16.vlgmr.msra.gmra.mrb[0].mxu1 %v5054_v26  ;;  %v15101_v26 = vld [vmem:[%s15180_s14 + $0x18] sm:$0xff]  }
 0x30f   : > { %14054 = vmatmul.mubr.bf16.vlgmr.msra.gmra.mrb[0].mxu0 %v9960_v60  ;;  %14101 = vmatpush3.bf16.msra.mxu1 %v15053_v13  ;;  %v10145_v14 = vrot.slane %v15101_v26, 2  ;;  %v15103_v60 = vld [vmem:[%s15180_s14 + $0x28] sm:$0xff]  }
 0x310   : > { %14066 = vmatpush3.bf16.msra.mxu0 %v15053_v13  ;;  %14094 = vmatprep.subr.bf16.mxu1 %v15054_v46  ;;  %v9977_v13 = vsel %vm1431_vm5, %v9967_v45, %v9976_v27 }
 0x311   : > { %v13195_v1 = vpop.f32.mrb[72].mxu1  ;;  %14067 = vmatprep.subr.bf16.mxu0 %v15054_v46  ;;  %13385 = vmatprep.mubr.bf16.mxu1 %v5056_v33  ;;  %v10146_v19 = vsel %vm3604_vm0, %v10144_v38, %v10145_v14  ;;  %v15061_v33 = vld [vmem:[%s18237_s1 + $0xc38] sm:$0xff]   ;;  %v10148_v49 = vsel %vm3604_vm0, %v10145_v14, %v10147_v34 }
 0x312   : > { %v18016_v16 = vadd.f32 %v13195_v1, %v17927_v2  ;;  %v3736_v37 = vpop.f32.mrb[73].mxu1  ;;  %14057 = vmatprep.mubr.bf16.mxu0 %v9964_v20  ;;  %v15056_v2 = vld [vmem:[%s18237_s1 + $0xc18] sm:$0xff]   ;;  %v15104_v20 = vld [vmem:[%s15180_s14 + $0x30] sm:$0xff]  }
 0x313   : > { %v18020_v31 = vadd.f32 %v3736_v37, %v17930_v51  ;;  %v13196_v7 = vpop.f32.mrb[74].mxu1  ;;  %14102 = vmatpush3.bf16.msra.mxu1 %v15054_v46  ;;  %v10151_v44 = vrot.slane %v15104_v20, 2 }
 0x314   : > { %14068 = vmatpush3.bf16.msra.mxu0 %v15054_v46  ;;  %v3739_v39 = vpop.f32.mrb[75].mxu1  ;;  %14095 = vmatprep.subr.bf16.mxu1 %v15055_v62  ;;  %v18028_v48 = vpop.f32.mrb[72].mxu0  ;;  %v10149_v46 = vrot.slane %v15103_v60, 2 }
 0x315   : > { %v18031_v51 = vadd.f32 %v3739_v39, %v17942_v29  ;;  %14069 = vmatprep.subr.bf16.mxu0 %v15055_v62  ;;  %v18033_v53 = vpop.f32.mrb[73].mxu0  ;;  %v15057_v29 = vld [vmem:[%s18237_s1 + $0xc20] sm:$0xff]   ;;  %v10154_v45 = vsel %vm3604_vm0, %v10151_v44, %v10153_v59 }
 0x316   : > { %13386 = vmatmul.mubr.bf16.gmra.mrb[4].mxu1 %v5058_v32  ;;  %v13868_v11 = vpop.f32.mrb[74].mxu0  ;;  %v10150_v9 = vsel %vm3604_vm0, %v10147_v34, %v10149_v46  ;;  %v10152_v6 = vsel %vm3604_vm0, %v10149_v46, %v10151_v44 }
 0x317   : > { %14058 = vmatmul.mubr.bf16.gmra.mrb[4].mxu0 %v9968_v57  ;;  %14103 = vmatpush3.bf16.msra.mxu1 %v15055_v62  ;;  %v18038_v28 = vpop.f32.mrb[75].mxu0 }
 0x318   : > { %14070 = vmatpush3.bf16.msra.mxu0 %v15055_v62  ;;  %14096 = vmatprep.subr.bf16.mxu1 %v15056_v2 }
 0x319   : > { %14071 = vmatprep.subr.bf16.mxu0 %v15056_v2  ;;  %13389 = vmatprep.mubr.bf16.mxu1 %v5060_v0 }
 0x31a   : > { %14061 = vmatprep.mubr.bf16.mxu0 %v9977_v13 }
 0x31b   : > { %14104 = vmatpush3.bf16.msra.mxu1 %v15056_v2 }
 0x31c   : > { %14072 = vmatpush3.bf16.msra.mxu0 %v15056_v2  ;;  %14097 = vmatprep.subr.bf16.mxu1 %v15057_v29 }
 0x31d   : > { %14073 = vmatprep.subr.bf16.mxu0 %v15057_v29 }
 0x31e   : > { %13390 = vmatmul.mubr.bf16.gmra.mrb[100].mxu1 %v5059_v52 }
 0x31f   : > { %14105 = vmatpush3.bf16.msra.mxu1 %v15057_v29  ;;  %14062 = vmatmul.mubr.bf16.gmra.mrb[100].mxu0 %v9976_v27 }
 0x320   : > { %14074 = vmatpush3.bf16.msra.mxu0 %v15057_v29  ;;  %14098 = vmatprep.subr.bf16.mxu1 %v15058_v23 }
 0x321   : > { %14075 = vmatprep.subr.bf16.mxu0 %v15058_v23  ;;  %14081 = vmatprep.mubr.bf16.mxu0 %v10146_v19 }
 0x322   : > { %14085 = vmatprep.mubr.bf16.mxu1 %v10150_v9 }
 0x323   : > { %14106 = vmatpush3.bf16.msra.mxu1 %v15058_v23 }
 0x324   : > { %14076 = vmatpush3.bf16.msra.mxu0 %v15058_v23  ;;  %14099 = vmatprep.subr.bf16.mxu1 %v15060_v58 }
 0x325   : > { %14077 = vmatprep.subr.bf16.mxu0 %v15060_v58 }
 0x327   : > { %14107 = vmatpush3.bf16.msra.mxu1 %v15060_v58 }
 0x328   : > { %14078 = vmatpush3.bf16.msra.mxu0 %v15060_v58  ;;  %14100 = vmatprep.subr.bf16.mxu1 %v15061_v33 }
 0x329   : > { %14079 = vmatprep.subr.bf16.mxu0 %v15061_v33 }
 0x32b   : > { %14108 = vmatpush3.bf16.msra.mxu1 %v15061_v33 }
 0x32c   : > { %14080 = vmatpush3.bf16.msra.mxu0 %v15061_v33 }
 0x32e   : > { %14086 = vmatmul.mubr.bf16.vlgmr.msra.gmra.mrb[104].mxu1 %v10152_v6 }
 0x32f   : > { %14082 = vmatmul.mubr.bf16.vlgmr.msra.gmra.mrb[0].mxu0 %v10148_v49  ;;  %14089 = vmatprep.mubr.bf16.mxu1 %v10154_v45 }
 0x331   : > { %v13223_v62 = vpop.f32.mrb[76].mxu1 }
 0x332   : > { %v3937_v1 = vadd.f32 %v13223_v62, %v18016_v16  ;;  %v3913_v37 = vpop.f32.mrb[77].mxu1 }
 0x333   : > { %v3935_v52 = vadd.f32 %v3913_v37, %v18020_v31  ;;  %v13224_v7 = vpop.f32.mrb[78].mxu1 }
 0x334   : > { %v3916_v56 = vpop.f32.mrb[79].mxu1  ;;  %v18064_v32 = vpop.f32.mrb[76].mxu0 }
 0x335   : > { %v3936_v27 = vadd.f32 %v3916_v56, %v18031_v51  ;;  %v18067_v21 = vpop.f32.mrb[77].mxu0 }
 0x336   : > { %14090 = vmatmul.mubr.bf16.gmra.mrb[108].mxu1 %v10153_v59  ;;  %v13896_v39 = vpop.f32.mrb[78].mxu0 }
 0x337   : > { %v18069_v57 = vpop.f32.mrb[79].mxu0 }
 0x351   : > { %v13251_v2 = vpop.f32.mrb[80].mxu1 }
 0x352   : > { %v4137_v0 = vadd.f32 %v13251_v2, %v3937_v1  ;;  %v4113_v47 = vpop.f32.mrb[81].mxu1 }
 0x353   : > { %v4135_v25 = vadd.f32 %v4113_v47, %v3935_v52  ;;  %v13252_v16 = vpop.f32.mrb[82].mxu1 }
 0x354   : > { %v4116_v11 = vpop.f32.mrb[83].mxu1  ;;  %v18071_v13 = vpop.f32.mrb[80].mxu0 }
 0x355   : > { %v4136_v31 = vadd.f32 %v4116_v11, %v3936_v27  ;;  %v18073_v29 = vpop.f32.mrb[81].mxu0 }
 0x356   : > { %v13924_v38 = vpop.f32.mrb[82].mxu0 }
 0x357   : > { %v18075_v26 = vpop.f32.mrb[83].mxu0 }
 0x371   : > { %v13279_v51 = vpop.f32.mrb[84].mxu1 }
 0x372   : > { %v4336_v14 = vadd.f32 %v13279_v51, %v4137_v0  ;;  %v4312_v35 = vpop.f32.mrb[85].mxu1 }
 0x373   : > { %v4334_v34 = vadd.f32 %v4312_v35, %v4135_v25  ;;  %v13280_v60 = vpop.f32.mrb[86].mxu1 }
 0x374   : > { %v4315_v46 = vpop.f32.mrb[87].mxu1  ;;  %v18077_v23 = vpop.f32.mrb[84].mxu0 }
 0x375   : > { %v4335_v19 = vadd.f32 %v4315_v46, %v4136_v31  ;;  %v18079_v9 = vpop.f32.mrb[85].mxu0 }
 0x376   : > { %v13952_v58 = vpop.f32.mrb[86].mxu0 }
 0x377   : > { %v18081_v33 = vpop.f32.mrb[87].mxu0 }
 0x378   : > { %18408 = vst [vmem:[#allocation28_spill] sm:$0xff] %v18081_v33 }
 0x391   : > { %v13307_v20 = vpop.f32.mrb[88].mxu1 }
 0x392   : > { %v4514_v44 = vadd.f32 %v13307_v20, %v4336_v14  ;;  %v4490_v59 = vpop.f32.mrb[89].mxu1 }
 0x393   : > { %v4512_v6 = vadd.f32 %v4490_v59, %v4334_v34  ;;  %v13308_v49 = vpop.f32.mrb[90].mxu1 }
 0x394   : > { %v4493_v45 = vpop.f32.mrb[91].mxu1  ;;  %v18083_v62 = vpop.f32.mrb[88].mxu0 }
 0x395   : > { %v4513_v1 = vadd.f32 %v4493_v45, %v4335_v19  ;;  %v18085_v37 = vpop.f32.mrb[89].mxu0 }
 0x396   : > { %18409 = vst [vmem:[#allocation29_spill] sm:$0xff] %v18085_v37  ;;  %v13980_v52 = vpop.f32.mrb[90].mxu0 }
 0x397   : > { %v18087_v7 = vpop.f32.mrb[91].mxu0 }
 0x398   : > { %18410 = vst [vmem:[#allocation30_spill] sm:$0xff] %v18087_v7 }
 0x3b1   : > { %v13335_v56 = vpop.f32.mrb[92].mxu1 }
 0x3b2   : > { %v4771_v27 = vadd.f32 %v13335_v56, %v4514_v44  ;;  %v4747_v39 = vpop.f32.mrb[93].mxu1 }
 0x3b3   : > { %v4769_v2 = vadd.f32 %v4747_v39, %v4512_v6  ;;  %v13336_v0 = vpop.f32.mrb[94].mxu1 }
 0x3b4   : > { %v4750_v47 = vpop.f32.mrb[95].mxu1  ;;  %v18089_v25 = vpop.f32.mrb[92].mxu0 }
 0x3b5   : > { %18411 = vst [vmem:[#allocation31_spill] sm:$0xff] %v18089_v25  ;;  %v4770_v16 = vadd.f32 %v4750_v47, %v4513_v1  ;;  %v18091_v11 = vpop.f32.mrb[93].mxu0 }
 0x3b6   : > { %18412 = vst [vmem:[#allocation32_spill] sm:$0xff] %v18091_v11  ;;  %v14008_v31 = vpop.f32.mrb[94].mxu0  ;;  %v18418_v11 = vld [vmem:[#allocation2_spill] sm:$0xff] }
 0x3b7   : > { %v18093_v38 = vpop.f32.mrb[95].mxu0 }
 0x3b8   : > { %18413 = vst [vmem:[#allocation33_spill] sm:$0xff] %v18093_v38 }
 0x3d1   : > { %v13363_v51 = vpop.f32.mrb[96].mxu1 }
 0x3d2   : > { %v5028_v14 = vadd.f32 %v13363_v51, %v4771_v27  ;;  %v5004_v35 = vpop.f32.mrb[97].mxu1 }
 0x3d3   : > { %v5026_v34 = vadd.f32 %v5004_v35, %v4769_v2  ;;  %v13364_v60 = vpop.f32.mrb[98].mxu1 }
 0x3d4   : > { %v5007_v46 = vpop.f32.mrb[99].mxu1  ;;  %v18095_v19 = vpop.f32.mrb[96].mxu0 }
 0x3d5   : > { %18414 = vst [vmem:[#allocation34_spill] sm:$0xff] %v18095_v19  ;;  %v5027_v58 = vadd.f32 %v5007_v46, %v4770_v16  ;;  %v18097_v20 = vpop.f32.mrb[97].mxu0 }
 0x3d6   : > { %18415 = vst [vmem:[#allocation35_spill] sm:$0xff] %v18097_v20  ;;  %v14036_v44 = vpop.f32.mrb[98].mxu0 }
 0x3d7   : > { %v18099_v59 = vpop.f32.mrb[99].mxu0 }
 0x3d8   : > { %18416 = vst [vmem:[#allocation36_spill] sm:$0xff] %v18099_v59 }
 0x3e1   : > { %v13383_v6 = vpop.f32.mrb[0].mxu1 }
 0x3e2   : > { %v5149_v49 = vpop.f32.mrb[1].mxu1 }
 0x3e3   : > { %v18101_v45 = vpop.f32.mrb[2].mxu1 }
 0x3e4   : > { %v18103_v1 = vpop.f32.mrb[3].mxu1 }
 0x3e9   : > { %v13387_v52 = vpop.f32.mrb[4].mxu1 }
 0x3ea   : > { %v14059_v56 = vpop.f32.mrb[4].mxu0  ;;  %v5165_v27 = vpop.f32.mrb[5].mxu1 }
 0x3eb   : > { %v14113_v39 = vadd.f32 %v14059_v56, %v13387_v52  ;;  %v10082_v2 = vpop.f32.mrb[5].mxu0  ;;  %v13388_v0 = vpop.f32.mrb[6].mxu1 }
 0x3ec   : > { %v14115_v47 = vadd.f32 %v10082_v2, %v5165_v27  ;;  %v14060_v31 = vpop.f32.mrb[6].mxu0  ;;  %v5168_v16 = vpop.f32.mrb[7].mxu1  ;;  %v18419_v27 = vld [vmem:[#allocation3_spill] sm:$0xff] }
 0x3ed   : > { %v14117_v51 = vadd.f32 %v14060_v31, %v13388_v0  ;;  %v10085_v35 = vpop.f32.mrb[7].mxu0  ;;  %v18420_v31 = vld [vmem:[#allocation5_spill] sm:$0xff] }
 0x3ee   : > { %v18105_v60 = vadd.f32 %v10085_v35, %v5168_v16  ;;  %v18421_v35 = vld [vmem:[#allocation6_spill] sm:$0xff] }
 0x3f1   : > { %v13391_v46 = vpop.f32.mrb[100].mxu1 }
 0x3f2   : > { %v5205_v44 = vadd.f32 %v13391_v46, %v5028_v14  ;;  %v5181_v59 = vpop.f32.mrb[101].mxu1  ;;  %v18107_v38 = vpop.f32.mrb[100].mxu0  ;;  %v18422_v46 = vld [vmem:[#allocation4_spill] sm:$0xff] }
 0x3f3   : > { %v5203_v20 = vadd.f32 %v5181_v59, %v5026_v34  ;;  %v13392_v19 = vpop.f32.mrb[102].mxu1  ;;  %v18109_v7 = vpop.f32.mrb[101].mxu0  ;;  %v18423_v59 = vld [vmem:[#allocation7_spill] sm:$0xff] }
 0x3f4   : > { %18417 = vst [vmem:[#allocation37_spill] sm:$0xff] %v18109_v7  ;;  %v5382_v52 = vadd.f32 %v18418_v11, %v5205_v44  ;;  %v5184_v56 = vpop.f32.mrb[103].mxu1  ;;  %v14064_v25 = vpop.f32.mrb[102].mxu0 }
 0x3f5   : > { %v5380_v2 = vadd.f32 %v18419_v27, %v5203_v20  ;;  %v5204_v33 = vadd.f32 %v5184_v56, %v5027_v58  ;;  %v18113_v0 = vpop.f32.mrb[103].mxu0  ;;  %v18424_v56 = vld [vmem:[#allocation9_spill] sm:$0xff]  ;;  %v18425_v27 = vld [vmem:[#allocation8_spill] sm:$0xff] }
 0x3f6   : > { %v5581_v16 = vadd.f32 %v18420_v31, %v5382_v52  ;;  %v18427_v31 = vld [vmem:[#allocation10_spill] sm:$0xff] }
 0x3f7   : > { %v5579_v14 = vadd.f32 %v18421_v35, %v5380_v2  ;;  %v5381_v37 = vadd.f32 %v18422_v46, %v5204_v33  ;;  %v18426_v2 = vld [vmem:[#allocation11_spill] sm:$0xff] }
 0x3f8   : > { %v5780_v34 = vadd.f32 %v16408_v61, %v5581_v16  ;;  %v18428_v16 = vld [vmem:[#allocation13_spill] sm:$0xff] }
 0x3f9   : > { %v5778_v19 = vadd.f32 %v16416_v50, %v5579_v14  ;;  %v5580_v7 = vadd.f32 %v18423_v59, %v5381_v37  ;;  %v18429_v14 = vld [vmem:[#allocation12_spill] sm:$0xff] }
 0x3fa   : > { %v5957_v11 = vadd.f32 %v16513_v30, %v5780_v34 }
 0x3fb   : > { %v5955_v25 = vadd.f32 %v16521_v55, %v5778_v19  ;;  %v5779_v58 = vadd.f32 %v16420_v18, %v5580_v7  ;;  %v18136_v18 = vld [vmem:[%s18238_s2] ss:$0 sm:$0xff] }
 0x3fc   : > { %v6172_v20 = vadd.f32 %v16616_v41, %v5957_v11  ;;  %v18430_v11 = vld [vmem:[#allocation15_spill] sm:$0xff] }
 0x3fd   : > { %v6170_v44 = vadd.f32 %v16628_v3, %v5955_v25  ;;  %v5956_v52 = vadd.f32 %v16530_v12, %v5779_v58 }
 0x3fe   : > { %v6387_v33 = vadd.f32 %v16740_v42, %v6172_v20 }
 0x3ff   : > { %v6385_v61 = vadd.f32 %v18424_v56, %v6170_v44  ;;  %v6171_v50 = vadd.f32 %v18425_v27, %v5956_v52 }
 0x400   : > { %v6607_v37 = vadd.f32 %v16883_v17, %v6387_v33 }
 0x401   : > { %v6605_v30 = vadd.f32 %v18426_v2, %v6385_v61  ;;  %v6386_v55 = vadd.f32 %v18427_v31, %v6171_v50  ;;  %v14087_v41 = vpop.f32.mrb[104].mxu1 }
 0x402   : > { %v6826_v12 = vadd.f32 %v17018_v5, %v6607_v37  ;;  %v14083_v3 = vpop.f32.mrb[0].mxu0  ;;  %v14114_v42 = vadd.f32 %v14113_v39, %v14087_v41  ;;  %v10259_v7 = vpop.f32.mrb[105].mxu1  ;;  %v18431_v5 = vld [vmem:[#allocation16_spill] sm:$0xff]  ;;  %v18432_v39 = vld [vmem:[#allocation14_spill] sm:$0xff] }
 0x403   : > { %v6824_v35 = vadd.f32 %v18428_v16, %v6605_v30  ;;  %v6606_v46 = vadd.f32 %v18429_v14, %v6386_v55  ;;  %v14109_v17 = vadd.f32 %v14083_v3, %v13383_v6  ;;  %v10243_v34 = vpop.f32.mrb[1].mxu0  ;;  %v14116_v19 = vadd.f32 %v14115_v47, %v10259_v7  ;;  %v14088_v59 = vpop.f32.mrb[106].mxu1  ;;  %v18433_v47 = vld [vmem:[#allocation18_spill] sm:$0xff] }
 0x404   : > { %v6994_v25 = vadd.f32 %v18430_v11, %v6826_v12  ;;  %v10313_v58 = vadd.f32 %v14114_v42, %v18136_v18  ;;  %v14110_v20 = vadd.f32 %v10243_v34, %v5149_v49  ;;  %v14084_v44 = vpop.f32.mrb[2].mxu0  ;;  %v14118_v52 = vadd.f32 %v14117_v51, %v14088_v59  ;;  %v10262_v33 = vpop.f32.mrb[107].mxu1  ;;  %v18434_v49 = vld [vmem:[#allocation19_spill] sm:$0xff]  ;;  %v18435_v51 = vld [vmem:[#allocation17_spill] sm:$0xff]  ;;  %v18437_v7 = vld [vmem:[#allocation22_spill] sm:$0xff] }
 0x405   : > { %v6992_v56 = vadd.f32 %v18431_v5, %v6824_v35  ;;  %v6825_v61 = vadd.f32 %v18432_v39, %v6606_v46  ;;  %v10309_v27 = vadd.f32 %v14109_v17, %v18136_v18  ;;  %v18147_v50 = vadd.f32 %v14116_v19, %v18136_v18  ;;  %v10246_v6 = vpop.f32.mrb[3].mxu0  ;;  %v18436_v12 = vld [vmem:[#allocation21_spill] sm:$0xff]  ;;  %v18438_v35 = vld [vmem:[#allocation20_spill] sm:$0xff] }
 0x406   : > { %v7162_v37 = vadd.f32 %v18433_v47, %v6994_v25  ;;  %vm10324_vm7 = vcmp.gt.f32.partialorder %v10313_v58, 0.0  ;;  %v10335_v2 = vmul.f32 0.01, %v10313_v58  ;;  %v10307_v30 = vadd.f32 %v14110_v20, %v18136_v18  ;;  %v18439_v25 = vld [vmem:[#allocation23_spill] sm:$0xff] }
 0x407   : > { %v7160_v31 = vadd.f32 %v18434_v49, %v6992_v56  ;;  %v6993_v55 = vadd.f32 %v18435_v51, %v6825_v61  ;;  %vm10320_vm8 = vcmp.gt.f32.partialorder %v10309_v27, 0.0  ;;  %v10331_v41 = vmul.f32 0.01, %v10309_v27  ;;  %v18442_v51 = vld [vmem:[#allocation26_spill] sm:$0xff] }
 0x408   : > { %v7413_v3 = vadd.f32 %v18436_v12, %v7162_v37  ;;  %v10346_v42 = vsel %vm10324_vm7, %v10313_v58, %v10335_v2  ;;  %vm10318_vm9 = vcmp.gt.f32.partialorder %v10307_v30, 0.0  ;;  %v10329_v46 = vmul.f32 0.01, %v10307_v30  ;;  %v18440_v58 = vld [vmem:[#allocation24_spill] sm:$0xff]  ;;  %v18441_v2 = vld [vmem:[#allocation25_spill] sm:$0xff] }
 0x409   : > { %v7411_v16 = vadd.f32 %v18437_v7, %v7160_v31  ;;  %v7161_v14 = vadd.f32 %v18438_v35, %v6993_v55  ;;  %v18156_v17 = vpop.f32.mrb[108].mxu1  ;;  %v10342_v19 = vsel %vm10320_vm8, %v10309_v27, %v10331_v41  ;;  %vm10322_vm10 = vcmp.gt.f32.partialorder %v18147_v50, 0.0 }
 0x40a   : > { %v7628_v34 = vadd.f32 %v17488_v54, %v7413_v3  ;;  %v14111_v59 = vadd.f32 %v14084_v44, %v18101_v45  ;;  %v18161_v11 = vpop.f32.mrb[109].mxu1  ;;  %v10314_v56 = vadd.f32 %v14118_v52, %v18136_v18  ;;  %v14112_v39 = vadd.f32 %v10246_v6, %v18103_v1 }
 0x40b   : > { %v7412_v20 = vadd.f32 %v18439_v25, %v7161_v14  ;;  %v7626_v5 = vadd.f32 %v18440_v58, %v7411_v16  ;;  %v14092_v61 = vpop.f32.mrb[110].mxu1  ;;  %v10333_v54 = vmul.f32 0.01, %v18147_v50  ;;  %v14120_v45 = vadd.f32 %v18105_v60, %v10262_v33 }
 0x40c   : > { %v7843_v47 = vadd.f32 %v17621_v22, %v7628_v34  ;;  %v10310_v27 = vadd.f32 %v14111_v59, %v18136_v18  ;;  %v18172_v44 = vpop.f32.mrb[111].mxu1  ;;  %vm10325_vm11 = vcmp.gt.f32.partialorder %v10314_v56, 0.0  ;;  %v10336_v31 = vmul.f32 0.01, %v10314_v56 }
 0x40d   : > { %v7841_v37 = vadd.f32 %v17629_v40, %v7626_v5  ;;  %v7627_v49 = vadd.f32 %v18441_v2, %v7412_v20  ;;  %v10308_v22 = vadd.f32 %v14112_v39, %v18136_v18  ;;  %v10312_v60 = vadd.f32 %v14120_v45, %v18136_v18  ;;  %v18444_v39 = vld [vmem:[#allocation29_spill] sm:$0xff]  ;;  %v18448_v45 = vld [vmem:[#allocation30_spill] sm:$0xff]  ;;  %v18450_v2 = vld [vmem:[#allocation35_spill] sm:$0xff] }
 0x40e   : > { %v8062_v52 = vadd.f32 %v17716_v8, %v7843_v47  ;;  %vm10321_vm12 = vcmp.gt.f32.partialorder %v10310_v27, 0.0  ;;  %v10332_v1 = vmul.f32 0.01, %v10310_v27  ;;  %v10347_v40 = vsel %vm10325_vm11, %v10314_v56, %v10336_v31  ;;  %v18452_v31 = vld [vmem:[#allocation37_spill] sm:$0xff] }
 0x40f   : > { %v8060_v6 = vadd.f32 %v17724_v63, %v7841_v37  ;;  %v7842_v55 = vadd.f32 %v18442_v51, %v7627_v49  ;;  %v12024_v41 = vpack.c.bf16 %v10347_v40, %v10346_v42  ;;  %vm10319_vm13 = vcmp.gt.f32.partialorder %v10308_v22, 0.0  ;;  %v18443_v63 = vld [vmem:[#allocation27_spill] sm:$0xff]  ;;  %v18449_v37 = vld [vmem:[#allocation34_spill] sm:$0xff]  ;;  %v18451_v49 = vld [vmem:[#allocation33_spill] sm:$0xff] }
 0x410   : > { %v8281_v8 = vadd.f32 %v17827_v10, %v8062_v52  ;;  %v10343_v33 = vsel %vm10321_vm12, %v10310_v27, %v10332_v1  ;;  %v10330_v16 = vmul.f32 0.01, %v10308_v22  ;;  %vm10323_vm14 = vcmp.gt.f32.partialorder %v10312_v60, 0.0  ;;  %v18447_v27 = vld [vmem:[#allocation32_spill] sm:$0xff] }
 0x411   : > { %v8279_v12 = vadd.f32 %v17835_v36, %v8060_v6  ;;  %v8061_v3 = vadd.f32 %v18443_v63, %v7842_v55  ;;  %v12014_v7 = vpack.c.bf16 %v10343_v33, %v10342_v19  ;;  %12033 = vst [vmem:[%s18183_s9 + $0x18] sm:$0xff] %v12024_v41   ;;  %v10334_v14 = vmul.f32 0.01, %v10312_v60  ;;  %v18453_v52 = vld [vmem:[#allocation36_spill] sm:$0xff] }
 0x412   : > { %v8449_v35 = vadd.f32 %v17939_v4, %v8281_v8  ;;  %v10340_v42 = vsel %vm10318_vm9, %v10307_v30, %v10329_v46  ;;  %v10341_v59 = vsel %vm10319_vm13, %v10308_v22, %v10330_v16  ;;  %v10344_v19 = vsel %vm10322_vm10, %v18147_v50, %v10333_v54 }
 0x413   : > { %v8447_v34 = vadd.f32 %v17947_v15, %v8279_v12  ;;  %v8280_v10 = vadd.f32 %v17843_v43, %v8061_v3  ;;  %12031 = vst [vmem:[%s18183_s9 + $0x8] sm:$0xff] %v12014_v7   ;;  %v12009_v4 = vpack.c.bf16 %v10341_v59, %v10340_v42  ;;  %v10345_v25 = vsel %vm10323_vm14, %v10312_v60, %v10334_v14 }
 0x414   : > { %v8617_v36 = vadd.f32 %v18028_v48, %v8449_v35  ;;  %v12019_v15 = vpack.c.bf16 %v10345_v25, %v10344_v19 }
 0x415   : > { %v8615_v20 = vadd.f32 %v18033_v53, %v8447_v34  ;;  %v8448_v58 = vadd.f32 %v17955_v24, %v8280_v10  ;;  %12010 = vst [vmem:[%s18183_s9] sm:$0xff] %v12009_v4  }
 0x416   : > { %v8868_v5 = vadd.f32 %v18064_v32, %v8617_v36  ;;  %12032 = vst [vmem:[%s18183_s9 + $0x10] sm:$0xff] %v12019_v15  }
 0x417   : > { %v8866_v43 = vadd.f32 %v18067_v21, %v8615_v20  ;;  %v8616_v30 = vadd.f32 %v18038_v28, %v8448_v58  ;;  %v18445_v21 = vld [vmem:[#allocation28_spill] sm:$0xff]  ;;  %v18446_v28 = vld [vmem:[#allocation31_spill] sm:$0xff] }
 0x418   : > { %v9119_v48 = vadd.f32 %v18071_v13, %v8868_v5 }
 0x419   : > { %v9117_v46 = vadd.f32 %v18073_v29, %v8866_v43  ;;  %v8867_v50 = vadd.f32 %v18069_v57, %v8616_v30 }
 0x41a   : > { %v9370_v56 = vadd.f32 %v18077_v23, %v9119_v48 }
 0x41b   : > { %v9368_v53 = vadd.f32 %v18079_v9, %v9117_v46  ;;  %v9118_v24 = vadd.f32 %v18075_v26, %v8867_v50 }
 0x41c   : > { %v9547_v32 = vadd.f32 %v18083_v62, %v9370_v56 }
 0x41d   : > { %v9545_v61 = vadd.f32 %v18444_v39, %v9368_v53  ;;  %v9369_v47 = vadd.f32 %v18445_v21, %v9118_v24 }
 0x41e   : > { %v9724_v54 = vadd.f32 %v18446_v28, %v9547_v32 }
 0x41f   : > { %v9722_v13 = vadd.f32 %v18447_v27, %v9545_v61  ;;  %v9546_v29 = vadd.f32 %v18448_v45, %v9369_v47 }
 0x420   : > { %v9923_v57 = vadd.f32 %v18449_v37, %v9724_v54 }
 0x421   : > { %v9921_v23 = vadd.f32 %v18450_v2, %v9722_v13  ;;  %v9723_v9 = vadd.f32 %v18451_v49, %v9546_v29 }
 0x422   : > { %v10122_v26 = vadd.f32 %v18107_v38, %v9923_v57 }
 0x423   : > { %v10120_v62 = vadd.f32 %v18452_v31, %v9921_v23  ;;  %v9922_v1 = vadd.f32 %v18453_v52, %v9723_v9 }
 0x424   : > { %v10299_v22 = vadd.f32 %v18156_v17, %v10122_v26 }
 0x425   : > { %v10121_v6 = vadd.f32 %v18113_v0, %v9922_v1  ;;  %v10297_v51 = vadd.f32 %v18161_v11, %v10120_v62 }
 0x426   : > { %v10317_v55 = vadd.f32 %v18136_v18, %v10299_v22 }
 0x427   : > { %v10315_v40 = vadd.f32 %v18136_v18, %v10297_v51  ;;  %v10298_v60 = vadd.f32 %v18172_v44, %v10121_v6 }
 0x428   : > { %vm10328_vm15 = vcmp.gt.f32.partialorder %v10317_v55, 0.0  ;;  %v10339_v38 = vmul.f32 0.01, %v10317_v55 }
 0x429   : > { %v10337_v8 = vmul.f32 0.01, %v10315_v40  ;;  %v10316_v33 = vadd.f32 %v18136_v18, %v10298_v60  ;;  %vm10326_vm0 = vcmp.gt.f32.partialorder %v10315_v40, 0.0 }
 0x42a   : > { %v10350_v41 = vsel %vm10328_vm15, %v10317_v55, %v10339_v38 }
 0x42b   : > { %v12005_v12 = vpack.c.bf16 %v10350_v41, %v10350_v41  ;;  %vm10327_vm1 = vcmp.gt.f32.partialorder %v10316_v33, 0.0  ;;  %v10338_v17 = vmul.f32 0.01, %v10316_v33  ;;  %v10348_v0 = vsel %vm10326_vm0, %v10315_v40, %v10337_v8 }
 0x42d   : > { %10406 = vst [vmem:[%s18183_s9 + $0x28] sm:$0xf] %v12005_v12  ;;  %v10349_v11 = vsel %vm10327_vm1, %v10316_v33, %v10338_v17 }
 0x42e   : > { %v12029_v63 = vpack.c.bf16 %v10349_v11, %v10348_v0 }
 0x430   : > { %12034 = vst [vmem:[%s18183_s9 + $0x20] sm:$0xff] %v12029_v63  }
 0x431 PF: > { %s13_s12 = sadd.s32 1, %s15111_s12  }
 0x432   : > { %p10_p4 = scmp.ge.s32.totalorder %s13_s12, 4  }
 0x434   :  { %12 = sbr.rel (!%p10_p4) target bundleno = 1 (0x1), region = 113 }

</bundles_post_ra>
